<compile_context>
chip_gen: v7x
topology: tpu7x:2x2x1
jax: 0.10.0
libtpu: 0.0.40
codegen_flags: <defaults>
</compile_context>

<pallas_src>
import math

import jax
import jax.numpy as jnp
from jax.experimental import pallas as pl
from jax.experimental.pallas import tpu as pltpu

# ---------------- small RoBERTa-like config (synthetic, scaled down) ----------------
HIDDEN = 128          # roberta-base uses 768; scaled down, still lane-aligned (128)
N_HEADS = 4
HEAD_DIM = HIDDEN // N_HEADS
FFN = 256
N_LAYERS = 4          # roberta-base has 12; part1/part2/part3 structure preserved
VOCAB = 64
MAX_POS = 64
PAD_IDX = 1           # RoBERTa padding_idx
LINEAR_CHANNEL = 64
NUM_LABELS = 2
LN_EPS = 1e-5
ATTN_SCALE = 1.0 / math.sqrt(HEAD_DIM)


# ------------------------------- shared math helpers ---------------------------------
def _ln(x, g, b, eps):
    """LayerNorm over the last axis in f32."""
    mu = jnp.mean(x, axis=-1, keepdims=True)
    xc = x - mu
    var = jnp.mean(xc * xc, axis=-1, keepdims=True)
    return xc * jax.lax.rsqrt(var + eps) * g + b


def _gelu(y):
    # TODO(synk): tanh-approx GELU (HF RoBERTa uses exact erf-GELU).
    return 0.5 * y * (1.0 + jnp.tanh(0.7978845608028654 * (y + 0.044715 * y * y * y)))


def _mxu(a_bf16, w_bf16):
    """MXU matmul: bf16 operands, f32 accumulation."""
    return jnp.dot(a_bf16, w_bf16, preferred_element_type=jnp.float32)


# ------------------------------- the single fused kernel -----------------------------
def _forward_kernel(x_ref, bias_ref, wq_ref, wk_ref, wv_ref, wo_ref,
                    wi_ref, wo2_ref, bqkv_ref, bi_ref, lnb_ref,
                    xw_ref, misc_ref, out_ref):
    f32, bf16 = jnp.float32, jnp.bfloat16

    x = x_ref[...].astype(f32)            # (M, H) activation slab, M = B*S
    bias = bias_ref[...]                   # (M, M) additive attention bias
    misc = misc_ref[...]                   # (6, H) f32: emb LN g/b, lin1_b, lin2_b, cls b1/b2

    # part1 prologue: embedding LayerNorm (dropout = identity in eval)
    x = _ln(x, misc[0:1], misc[1:2], LN_EPS)

    for l in range(N_LAYERS):              # static unroll: whole stack in one kernel
        lnb = lnb_ref[l]                   # (6, H): bo, attn_ln g/b, bo2, out_ln g/b

        # ---- self-attention: per-head pre-split weights, batch folded into M ----
        xb = x.astype(bf16)                # one bf16 copy feeds all 12 QKV matmuls
        attn = None
        for h in range(N_HEADS):
            i = l * N_HEADS + h
            bh = bqkv_ref[i]               # (3, D) f32: bq / bk / bv for this head
            q = _mxu(xb, wq_ref[i]) + bh[0:1]            # (M, D)
            k = _mxu(xb, wk_ref[i]) + bh[1:2]            # (M, D)
            v = _mxu(xb, wv_ref[i]) + bh[2:3]            # (M, D)
            s = jax.lax.dot_general(q.astype(bf16), k.astype(bf16),
                                    (((1,), (1,)), ((), ())),
                                    preferred_element_type=f32)   # (M, M)
            s = s * ATTN_SCALE + bias      # padding + cross-batch masking in one add
            s = s - jnp.max(s, axis=-1, keepdims=True)
            p = jnp.exp(s)
            p = p * pl.reciprocal(jnp.sum(p, axis=-1, keepdims=True), approx=True)
            ctx = _mxu(p.astype(bf16), v.astype(bf16))   # (M, D)
            contrib = _mxu(ctx.astype(bf16), wo_ref[i])  # (M, H): ctx_h @ Wo rows of head h
            attn = contrib if attn is None else attn + contrib
        attn = attn + lnb[0:1]                           # attention output dense bias
        x = _ln(attn + x, lnb[1:2], lnb[2:3], LN_EPS)

        if l == 0:
            # "output @ matrix1" between part1 (layer0 attention) and part2 (layer0 FFN)
            x = _mxu(x.astype(bf16), xw_ref[0])

        # ---- FFN: Wi -> GELU -> Wo2 -> add & LN ----
        xb2 = x.astype(bf16)
        inter = _gelu(_mxu(xb2, wi_ref[l]) + bi_ref[l])
        ffn = _mxu(inter.astype(bf16), wo2_ref[l]) + lnb[3:4]
        x = _ln(ffn + x, lnb[4:5], lnb[5:6], LN_EPS)

        if l == N_LAYERS - 2:
            # inserted linear1 -> linear2 between part2 and part3 (eye is None branch);
            # LINEAR_CHANNEL is zero-padded to 128 lanes -> exact and lane-dense.
            xb3 = x.astype(bf16)
            h1 = _mxu(xb3, xw_ref[1]) + misc[2:3]
            x = _mxu(h1.astype(bf16), xw_ref[2]) + misc[3:4]

    # part4: RobertaClassificationHead computed on all rows (logits padded to 128 lanes
    # so the output store is lane-dense); the [CLS] row / label slice happens outside.
    xb4 = x.astype(bf16)
    hc = jnp.tanh(_mxu(xb4, xw_ref[3]) + misc[4:5])
    logits = _mxu(hc.astype(bf16), xw_ref[4]) + misc[5:6]
    out_ref[...] = logits.astype(out_ref.dtype)


# ------------------------------- host-side plumbing ----------------------------------
def embeddings_sum(input_ids, p):
    # Tiny table gathers + RoBERTa position ids in plain JAX; the embedding LayerNorm
    # is fused into the kernel prologue.
    ne = (input_ids != PAD_IDX).astype(jnp.int32)
    pos_ids = jnp.cumsum(ne, axis=1) * ne + PAD_IDX
    return p["word_emb"][input_ids] + p["pos_emb"][pos_ids] + p["type_emb"][0]


def build_attn_bias(attn_mask, S):
    """(M, M) additive bias: (1 - mask) * -1e9 for padded keys, -1e9 for cross-batch keys."""
    B = attn_mask.shape[0]
    M = B * S
    bidx = jnp.arange(M) // S
    same_batch = bidx[:, None] == bidx[None, :]
    key_valid = attn_mask.reshape(M) > 0.5
    ok = jnp.logical_and(same_batch, key_valid[None, :])
    return jnp.where(ok, 0.0, -1000000000.0).astype(jnp.float32)


def robertabase_linear2_forward(params, input_ids, attn_mask):
    B, S = input_ids.shape
    M = B * S
    x = embeddings_sum(input_ids, params).reshape(M, HIDDEN).astype(jnp.float32)
    bias = build_attn_bias(attn_mask, S)

    args = [x, bias,
            params["wq"], params["wk"], params["wv"], params["wo"],
            params["wi"], params["wo2"],
            params["bqkv"], params["bi"], params["lnb"],
            params["xw"], params["misc"]]

    def full(a):  # whole-array block, constant block index (single grid step)
        return pl.BlockSpec(a.shape, lambda i, _nd=a.ndim: (0,) * _nd)

    out = pl.pallas_call(
        _forward_kernel,
        out_shape=jax.ShapeDtypeStruct((M, HIDDEN), jnp.float32),
        grid=(1,),
        in_specs=[full(a) for a in args],
        out_specs=pl.BlockSpec((M, HIDDEN), lambda i: (0, 0)),
        compiler_params=pltpu.CompilerParams(
            dimension_semantics=("arbitrary",)),
    )(*args)

    # [CLS] token row of each batch, first NUM_LABELS lanes of the padded logits.
    return out.reshape(B, S, HIDDEN)[:, 0, :NUM_LABELS]


# ------------------------------- pure-JAX f32 reference ------------------------------
def reference_forward(params, input_ids, attn_mask):
    """Standard per-batch multi-head attention in f32 (independent formulation)."""
    f32 = jnp.float32
    x = embeddings_sum(input_ids, params).astype(f32)          # (B, S, H)
    misc = params["misc"].astype(f32)
    xw = params["xw"].astype(f32)
    x = _ln(x, misc[0], misc[1], LN_EPS)
    add_mask = (1.0 - attn_mask.astype(f32)) * -1000000000.0   # (B, S)

    wq = params["wq"].astype(f32).reshape(N_LAYERS, N_HEADS, HIDDEN, HEAD_DIM)
    wk = params["wk"].astype(f32).reshape(N_LAYERS, N_HEADS, HIDDEN, HEAD_DIM)
    wv = params["wv"].astype(f32).reshape(N_LAYERS, N_HEADS, HIDDEN, HEAD_DIM)
    wo = params["wo"].astype(f32).reshape(N_LAYERS, N_HEADS, HEAD_DIM, HIDDEN)
    bqkv = params["bqkv"].astype(f32).reshape(N_LAYERS, N_HEADS, 3, HEAD_DIM)

    for l in range(N_LAYERS):
        lnb = params["lnb"][l].astype(f32)
        q = jnp.einsum("bsh,nhd->bnsd", x, wq[l]) + bqkv[l, :, 0][None, :, None, :]
        k = jnp.einsum("bsh,nhd->bnsd", x, wk[l]) + bqkv[l, :, 1][None, :, None, :]
        v = jnp.einsum("bsh,nhd->bnsd", x, wv[l]) + bqkv[l, :, 2][None, :, None, :]
        s = jnp.einsum("bnqd,bnkd->bnqk", q, k) * ATTN_SCALE + add_mask[:, None, None, :]
        p = jax.nn.softmax(s, axis=-1)
        ctx = jnp.einsum("bnqk,bnkd->bnqd", p, v)
        attn = jnp.einsum("bnqd,ndh->bqh", ctx, wo[l]) + lnb[0]
        x = _ln(attn + x, lnb[1], lnb[2], LN_EPS)
        if l == 0:
            x = x @ xw[0]                                       # @ matrix1
        inter = _gelu(jnp.einsum("bsh,hf->bsf", x, params["wi"][l].astype(f32))
                      + params["bi"][l].astype(f32))
        ffn = jnp.einsum("bsf,fh->bsh", inter, params["wo2"][l].astype(f32)) + lnb[3]
        x = _ln(ffn + x, lnb[4], lnb[5], LN_EPS)
        if l == N_LAYERS - 2:
            x = x @ xw[1] + misc[2]                             # linear1 (padded)
            x = x @ xw[2] + misc[3]                             # linear2 (padded)
    cls = x[:, 0, :]
    hc = jnp.tanh(cls @ xw[3] + misc[4])
    logits = hc @ xw[4] + misc[5]
    return logits[:, :NUM_LABELS]


# ------------------------------- deterministic params --------------------------------
def init_params(key):
    kit = iter(jax.random.split(key, 128))

    def rnd(shape, scale=0.02):
        return scale * jax.random.normal(next(kit), shape, dtype=jnp.float32)

    p = {
        "word_emb": rnd((VOCAB, HIDDEN)),
        "pos_emb": rnd((MAX_POS, HIDDEN)),
        "type_emb": rnd((1, HIDDEN)),
    }

    wq_l, wk_l, wv_l, wo_l, wi_l, wo2_l = [], [], [], [], [], []
    bqkv_l, bi_l, lnb_l = [], [], []
    for _ in range(N_LAYERS):
        Wq, Wk, Wv, Wo = (rnd((HIDDEN, HIDDEN)) for _ in range(4))
        bq, bk, bv = (rnd((HIDDEN,)) for _ in range(3))
        bo, bo2 = rnd((HIDDEN,)), rnd((HIDDEN,))
        ones, zeros = jnp.ones((HIDDEN,), jnp.float32), jnp.zeros((HIDDEN,), jnp.float32)
        # pre-split per head: Wq_h = Wq[:, h*D:(h+1)*D]   (done once, outside the kernel)
        wq_l.append(Wq.reshape(HIDDEN, N_HEADS, HEAD_DIM).transpose(1, 0, 2))
        wk_l.append(Wk.reshape(HIDDEN, N_HEADS, HEAD_DIM).transpose(1, 0, 2))
        wv_l.append(Wv.reshape(HIDDEN, N_HEADS, HEAD_DIM).transpose(1, 0, 2))
        wo_l.append(Wo.reshape(N_HEADS, HEAD_DIM, HIDDEN))     # Wo_h = Wo[h*D:(h+1)*D, :]
        bqkv_l.append(jnp.stack([bq.reshape(N_HEADS, HEAD_DIM),
                                 bk.reshape(N_HEADS, HEAD_DIM),
                                 bv.reshape(N_HEADS, HEAD_DIM)], axis=1))   # (NH, 3, D)
        wi_l.append(rnd((HIDDEN, FFN)))
        bi_l.append(rnd((1, FFN)))
        wo2_l.append(rnd((FFN, HIDDEN)))
        lnb_l.append(jnp.stack([bo, ones, zeros, bo2, ones, zeros], axis=0))  # (6, H)

    p["wq"] = jnp.stack(wq_l).reshape(N_LAYERS * N_HEADS, HIDDEN, HEAD_DIM).astype(jnp.bfloat16)
    p["wk"] = jnp.stack(wk_l).reshape(N_LAYERS * N_HEADS, HIDDEN, HEAD_DIM).astype(jnp.bfloat16)
    p["wv"] = jnp.stack(wv_l).reshape(N_LAYERS * N_HEADS, HIDDEN, HEAD_DIM).astype(jnp.bfloat16)
    p["wo"] = jnp.stack(wo_l).reshape(N_LAYERS * N_HEADS, HEAD_DIM, HIDDEN).astype(jnp.bfloat16)
    p["wi"] = jnp.stack(wi_l).astype(jnp.bfloat16)              # (L, H, FFN)
    p["wo2"] = jnp.stack(wo2_l).astype(jnp.bfloat16)            # (L, FFN, H)
    p["bqkv"] = jnp.stack(bqkv_l).reshape(N_LAYERS * N_HEADS, 3, HEAD_DIM)   # f32
    p["bi"] = jnp.stack(bi_l)                                   # (L, 1, FFN) f32
    p["lnb"] = jnp.stack(lnb_l)                                 # (L, 6, H)   f32

    # extra weights: matrix1 (identity init), inserted linear1/linear2, classifier head.
    lin1_w, lin1_b = rnd((HIDDEN, LINEAR_CHANNEL)), rnd((LINEAR_CHANNEL,))
    lin2_w, lin2_b = rnd((LINEAR_CHANNEL, HIDDEN)), rnd((HIDDEN,))
    cls_w1, cls_b1 = rnd((HIDDEN, HIDDEN)), rnd((HIDDEN,))
    cls_w2, cls_b2 = rnd((HIDDEN, NUM_LABELS)), rnd((NUM_LABELS,))

    pad_cols = lambda w: jnp.pad(w, ((0, 0), (0, HIDDEN - w.shape[1])))
    pad_rows = lambda w: jnp.pad(w, ((0, HIDDEN - w.shape[0]), (0, 0)))
    pad_vec = lambda v: jnp.pad(v, (0, HIDDEN - v.shape[0]))

    p["xw"] = jnp.stack([
        jnp.eye(HIDDEN, dtype=jnp.float32),   # matrix1 (identity is exact in bf16)
        pad_cols(lin1_w),                     # linear1, zero-padded to 128 lanes (exact)
        pad_rows(lin2_w),                     # linear2, zero-padded rows (exact)
        cls_w1,
        pad_cols(cls_w2),                     # out_proj, logits padded to 128 lanes
    ]).astype(jnp.bfloat16)                   # (5, H, H) bf16

    p["misc"] = jnp.stack([
        jnp.ones((HIDDEN,), jnp.float32),     # embedding LN gamma
        jnp.zeros((HIDDEN,), jnp.float32),    # embedding LN beta
        pad_vec(lin1_b),
        lin2_b,
        cls_b1,
        pad_vec(cls_b2),
    ])                                        # (6, H) f32
    return p


if __name__ == "__main__":
    key = jax.random.PRNGKey(0)
    pkey, ikey = jax.random.split(key)
    params = init_params(pkey)

    B, S = 2, 8
    input_ids = jax.random.randint(ikey, (B, S), 2, VOCAB)
    input_ids = input_ids.at[1, -2:].set(PAD_IDX)              # pad tail of 2nd example
    attn_mask = jnp.ones((B, S), jnp.float32).at[1, -2:].set(0.0)

    fwd = jax.jit(robertabase_linear2_forward)
    logits = fwd(params, input_ids, attn_mask)
    jax.block_until_ready(logits)

    ref = jax.jit(reference_forward)(params, input_ids, attn_mask)
    max_diff = float(jnp.max(jnp.abs(logits - ref)))

    assert logits.shape == (B, NUM_LABELS)
    assert bool(jnp.all(jnp.isfinite(logits)))
    assert max_diff < 5e-2, f"kernel deviates from f32 reference: max|diff|={max_diff}"
    print("KERNEL_OK")
</pallas_src>

<mosaic_0001>
module attributes {stable_mosaic.version = 11 : i64} {
  func.func @_forward_kernel(%arg0: i32, %arg1: memref<16x128xf32, #tpu.memory_space<vmem>>, %arg2: memref<16x16xf32, #tpu.memory_space<vmem>>, %arg3: memref<16x128x32xbf16, #tpu.memory_space<vmem>>, %arg4: memref<16x128x32xbf16, #tpu.memory_space<vmem>>, %arg5: memref<16x128x32xbf16, #tpu.memory_space<vmem>>, %arg6: memref<16x32x128xbf16, #tpu.memory_space<vmem>>, %arg7: memref<4x128x256xbf16, #tpu.memory_space<vmem>>, %arg8: memref<4x256x128xbf16, #tpu.memory_space<vmem>>, %arg9: memref<16x3x32xf32, #tpu.memory_space<vmem>>, %arg10: memref<4x1x256xf32, #tpu.memory_space<vmem>>, %arg11: memref<4x6x128xf32, #tpu.memory_space<vmem>>, %arg12: memref<5x128x128xbf16, #tpu.memory_space<vmem>>, %arg13: memref<6x128xf32, #tpu.memory_space<vmem>>, %arg14: memref<16x128xf32, #tpu.memory_space<vmem>>) attributes {dimension_semantics = [#tpu.dimension_semantics<arbitrary>], iteration_bounds = array<i64: 1>, scalar_prefetch = 0 : i64, scratch_operands = 0 : i64, tpu.core_type = #tpu.core_type<tc>, window_params = [{pipeline_mode = #tpu.pipeline_mode<synchronous>, transform_indices = @transform_0, window_bounds = array<i64: 16, 128>}, {pipeline_mode = #tpu.pipeline_mode<synchronous>, transform_indices = @transform_1, window_bounds = array<i64: 16, 16>}, {pipeline_mode = #tpu.pipeline_mode<synchronous>, transform_indices = @transform_2, window_bounds = array<i64: 16, 128, 32>}, {pipeline_mode = #tpu.pipeline_mode<synchronous>, transform_indices = @transform_3, window_bounds = array<i64: 16, 128, 32>}, {pipeline_mode = #tpu.pipeline_mode<synchronous>, transform_indices = @transform_4, window_bounds = array<i64: 16, 128, 32>}, {pipeline_mode = #tpu.pipeline_mode<synchronous>, transform_indices = @transform_5, window_bounds = array<i64: 16, 32, 128>}, {pipeline_mode = #tpu.pipeline_mode<synchronous>, transform_indices = @transform_6, window_bounds = array<i64: 4, 128, 256>}, {pipeline_mode = #tpu.pipeline_mode<synchronous>, transform_indices = @transform_7, window_bounds = array<i64: 4, 256, 128>}, {pipeline_mode = #tpu.pipeline_mode<synchronous>, transform_indices = @transform_8, window_bounds = array<i64: 16, 3, 32>}, {pipeline_mode = #tpu.pipeline_mode<synchronous>, transform_indices = @transform_9, window_bounds = array<i64: 4, 1, 256>}, {pipeline_mode = #tpu.pipeline_mode<synchronous>, transform_indices = @transform_10, window_bounds = array<i64: 4, 6, 128>}, {pipeline_mode = #tpu.pipeline_mode<synchronous>, transform_indices = @transform_11, window_bounds = array<i64: 5, 128, 128>}, {pipeline_mode = #tpu.pipeline_mode<synchronous>, transform_indices = @transform_12, window_bounds = array<i64: 6, 128>}, {pipeline_mode = #tpu.pipeline_mode<synchronous>, transform_indices = @transform_13, window_bounds = array<i64: 16, 128>}]} {
    %c0 = arith.constant 0 : index
    %c0_0 = arith.constant 0 : index
    %0 = vector.load %arg1[%c0, %c0_0] : memref<16x128xf32, #tpu.memory_space<vmem>>, vector<16x128xf32>
    %c0_1 = arith.constant 0 : index
    %c0_2 = arith.constant 0 : index
    %1 = vector.load %arg2[%c0_1, %c0_2] : memref<16x16xf32, #tpu.memory_space<vmem>>, vector<16x16xf32>
    %c0_3 = arith.constant 0 : index
    %c0_4 = arith.constant 0 : index
    %2 = vector.load %arg13[%c0_3, %c0_4] : memref<6x128xf32, #tpu.memory_space<vmem>>, vector<6x128xf32>
    %3 = vector.extract_strided_slice %2 {offsets = [0, 0], sizes = [1, 128], strides = [1, 1]} : vector<6x128xf32> to vector<1x128xf32>
    %4 = vector.extract_strided_slice %2 {offsets = [1, 0], sizes = [1, 128], strides = [1, 1]} : vector<6x128xf32> to vector<1x128xf32>
    %cst = arith.constant dense<0.000000e+00> : vector<16xf32>
    %5 = vector.multi_reduction <add>, %0, %cst [1] : vector<16x128xf32> to vector<16xf32>
    %6 = vector.shape_cast %5 : vector<16xf32> to vector<16x1xf32>
    %cst_5 = arith.constant 1.280000e+02 : f32
    %7 = vector.broadcast %cst_5 : f32 to vector<16x1xf32>
    %8 = arith.divf %6, %7 : vector<16x1xf32>
    %9 = vector.broadcast %8 : vector<16x1xf32> to vector<16x128xf32>
    %10 = arith.subf %0, %9 : vector<16x128xf32>
    %11 = arith.mulf %10, %10 : vector<16x128xf32>
    %cst_6 = arith.constant dense<0.000000e+00> : vector<16xf32>
    %12 = vector.multi_reduction <add>, %11, %cst_6 [1] : vector<16x128xf32> to vector<16xf32>
    %13 = vector.shape_cast %12 : vector<16xf32> to vector<16x1xf32>
    %cst_7 = arith.constant 1.280000e+02 : f32
    %14 = vector.broadcast %cst_7 : f32 to vector<16x1xf32>
    %15 = arith.divf %13, %14 : vector<16x1xf32>
    %cst_8 = arith.constant 9.99999974E-6 : f32
    %16 = vector.broadcast %cst_8 : f32 to vector<16x1xf32>
    %17 = arith.addf %15, %16 : vector<16x1xf32>
    %18 = math.rsqrt %17 : vector<16x1xf32>
    %19 = vector.broadcast %18 : vector<16x1xf32> to vector<16x128xf32>
    %20 = arith.mulf %10, %19 : vector<16x128xf32>
    %21 = vector.broadcast %3 : vector<1x128xf32> to vector<16x128xf32>
    %22 = arith.mulf %20, %21 : vector<16x128xf32>
    %23 = vector.broadcast %4 : vector<1x128xf32> to vector<16x128xf32>
    %24 = arith.addf %22, %23 : vector<16x128xf32>
    %c0_9 = arith.constant 0 : index
    %c0_10 = arith.constant 0 : index
    %c0_11 = arith.constant 0 : index
    %25 = vector.load %arg11[%c0_9, %c0_10, %c0_11] : memref<4x6x128xf32, #tpu.memory_space<vmem>>, vector<1x6x128xf32>
    %26 = vector.shape_cast %25 : vector<1x6x128xf32> to vector<6x128xf32>
    %27 = arith.truncf %24 : vector<16x128xf32> to vector<16x128xbf16>
    %c0_12 = arith.constant 0 : index
    %c0_13 = arith.constant 0 : index
    %c0_14 = arith.constant 0 : index
    %28 = vector.load %arg9[%c0_12, %c0_13, %c0_14] : memref<16x3x32xf32, #tpu.memory_space<vmem>>, vector<1x3x32xf32>
    %29 = vector.shape_cast %28 : vector<1x3x32xf32> to vector<3x32xf32>
    %c0_15 = arith.constant 0 : index
    %c0_16 = arith.constant 0 : index
    %c0_17 = arith.constant 0 : index
    %30 = vector.load %arg3[%c0_15, %c0_16, %c0_17] : memref<16x128x32xbf16, #tpu.memory_space<vmem>>, vector<1x128x32xbf16>
    %31 = vector.shape_cast %30 : vector<1x128x32xbf16> to vector<128x32xbf16>
    %cst_18 = arith.constant dense<0.000000e+00> : vector<16x32xf32>
    %32 = tpu.matmul %27, %31, %cst_18 {dimension_numbers = #tpu.dot_dimension_numbers<[1], [0], [0], [1], [0, 0, 1, 1], [], []>} : vector<16x128xbf16>, vector<128x32xbf16>, vector<16x32xf32> -> vector<16x32xf32>
    %33 = vector.extract_strided_slice %29 {offsets = [0, 0], sizes = [1, 32], strides = [1, 1]} : vector<3x32xf32> to vector<1x32xf32>
    %34 = vector.broadcast %33 : vector<1x32xf32> to vector<16x32xf32>
    %35 = arith.addf %32, %34 : vector<16x32xf32>
    %c0_19 = arith.constant 0 : index
    %c0_20 = arith.constant 0 : index
    %c0_21 = arith.constant 0 : index
    %36 = vector.load %arg4[%c0_19, %c0_20, %c0_21] : memref<16x128x32xbf16, #tpu.memory_space<vmem>>, vector<1x128x32xbf16>
    %37 = vector.shape_cast %36 : vector<1x128x32xbf16> to vector<128x32xbf16>
    %cst_22 = arith.constant dense<0.000000e+00> : vector<16x32xf32>
    %38 = tpu.matmul %27, %37, %cst_22 {dimension_numbers = #tpu.dot_dimension_numbers<[1], [0], [0], [1], [0, 0, 1, 1], [], []>} : vector<16x128xbf16>, vector<128x32xbf16>, vector<16x32xf32> -> vector<16x32xf32>
    %39 = vector.extract_strided_slice %29 {offsets = [1, 0], sizes = [1, 32], strides = [1, 1]} : vector<3x32xf32> to vector<1x32xf32>
    %40 = vector.broadcast %39 : vector<1x32xf32> to vector<16x32xf32>
    %41 = arith.addf %38, %40 : vector<16x32xf32>
    %c0_23 = arith.constant 0 : index
    %c0_24 = arith.constant 0 : index
    %c0_25 = arith.constant 0 : index
    %42 = vector.load %arg5[%c0_23, %c0_24, %c0_25] : memref<16x128x32xbf16, #tpu.memory_space<vmem>>, vector<1x128x32xbf16>
    %43 = vector.shape_cast %42 : vector<1x128x32xbf16> to vector<128x32xbf16>
    %cst_26 = arith.constant dense<0.000000e+00> : vector<16x32xf32>
    %44 = tpu.matmul %27, %43, %cst_26 {dimension_numbers = #tpu.dot_dimension_numbers<[1], [0], [0], [1], [0, 0, 1, 1], [], []>} : vector<16x128xbf16>, vector<128x32xbf16>, vector<16x32xf32> -> vector<16x32xf32>
    %45 = vector.extract_strided_slice %29 {offsets = [2, 0], sizes = [1, 32], strides = [1, 1]} : vector<3x32xf32> to vector<1x32xf32>
    %46 = vector.broadcast %45 : vector<1x32xf32> to vector<16x32xf32>
    %47 = arith.addf %44, %46 : vector<16x32xf32>
    %48 = arith.truncf %35 : vector<16x32xf32> to vector<16x32xbf16>
    %49 = arith.truncf %41 : vector<16x32xf32> to vector<16x32xbf16>
    %cst_27 = arith.constant dense<0.000000e+00> : vector<16x16xf32>
    %50 = tpu.matmul %48, %49, %cst_27 {dimension_numbers = #tpu.dot_dimension_numbers<[1], [1], [0], [0], [0, 0, 1, 0], [], []>} : vector<16x32xbf16>, vector<16x32xbf16>, vector<16x16xf32> -> vector<16x16xf32>
    %cst_28 = arith.constant 0.176776692 : f32
    %51 = vector.broadcast %cst_28 : f32 to vector<16x16xf32>
    %52 = arith.mulf %50, %51 : vector<16x16xf32>
    %53 = arith.addf %52, %1 : vector<16x16xf32>
    %cst_29 = arith.constant dense<0xFF800000> : vector<16xf32>
    %54 = vector.multi_reduction <maximumf>, %53, %cst_29 [1] : vector<16x16xf32> to vector<16xf32>
    %55 = vector.shape_cast %54 : vector<16xf32> to vector<16x1xf32>
    %56 = vector.broadcast %55 : vector<16x1xf32> to vector<16x16xf32>
    %57 = arith.subf %53, %56 : vector<16x16xf32>
    %58 = math.exp %57 : vector<16x16xf32>
    %cst_30 = arith.constant dense<0.000000e+00> : vector<16xf32>
    %59 = vector.multi_reduction <add>, %58, %cst_30 [1] : vector<16x16xf32> to vector<16xf32>
    %60 = vector.shape_cast %59 : vector<16xf32> to vector<16x1xf32>
    %61 = tpu.reciprocal %60 {approx = true} : vector<16x1xf32> -> vector<16x1xf32>
    %62 = vector.broadcast %61 : vector<16x1xf32> to vector<16x16xf32>
    %63 = arith.mulf %58, %62 : vector<16x16xf32>
    %64 = arith.truncf %63 : vector<16x16xf32> to vector<16x16xbf16>
    %65 = arith.truncf %47 : vector<16x32xf32> to vector<16x32xbf16>
    %cst_31 = arith.constant dense<0.000000e+00> : vector<16x32xf32>
    %66 = tpu.matmul %64, %65, %cst_31 {dimension_numbers = #tpu.dot_dimension_numbers<[1], [0], [0], [1], [0, 0, 1, 1], [], []>} : vector<16x16xbf16>, vector<16x32xbf16>, vector<16x32xf32> -> vector<16x32xf32>
    %67 = arith.truncf %66 : vector<16x32xf32> to vector<16x32xbf16>
    %c0_32 = arith.constant 0 : index
    %c0_33 = arith.constant 0 : index
    %c0_34 = arith.constant 0 : index
    %68 = vector.load %arg6[%c0_32, %c0_33, %c0_34] : memref<16x32x128xbf16, #tpu.memory_space<vmem>>, vector<1x32x128xbf16>
    %69 = vector.shape_cast %68 : vector<1x32x128xbf16> to vector<32x128xbf16>
    %cst_35 = arith.constant dense<0.000000e+00> : vector<16x128xf32>
    %70 = tpu.matmul %67, %69, %cst_35 {dimension_numbers = #tpu.dot_dimension_numbers<[1], [0], [0], [1], [0, 0, 1, 1], [], []>} : vector<16x32xbf16>, vector<32x128xbf16>, vector<16x128xf32> -> vector<16x128xf32>
    %c1 = arith.constant 1 : index
    %c0_36 = arith.constant 0 : index
    %c0_37 = arith.constant 0 : index
    %71 = vector.load %arg9[%c1, %c0_36, %c0_37] : memref<16x3x32xf32, #tpu.memory_space<vmem>>, vector<1x3x32xf32>
    %72 = vector.shape_cast %71 : vector<1x3x32xf32> to vector<3x32xf32>
    %c1_38 = arith.constant 1 : index
    %c0_39 = arith.constant 0 : index
    %c0_40 = arith.constant 0 : index
    %73 = vector.load %arg3[%c1_38, %c0_39, %c0_40] : memref<16x128x32xbf16, #tpu.memory_space<vmem>>, vector<1x128x32xbf16>
    %74 = vector.shape_cast %73 : vector<1x128x32xbf16> to vector<128x32xbf16>
    %cst_41 = arith.constant dense<0.000000e+00> : vector<16x32xf32>
    %75 = tpu.matmul %27, %74, %cst_41 {dimension_numbers = #tpu.dot_dimension_numbers<[1], [0], [0], [1], [0, 0, 1, 1], [], []>} : vector<16x128xbf16>, vector<128x32xbf16>, vector<16x32xf32> -> vector<16x32xf32>
    %76 = vector.extract_strided_slice %72 {offsets = [0, 0], sizes = [1, 32], strides = [1, 1]} : vector<3x32xf32> to vector<1x32xf32>
    %77 = vector.broadcast %76 : vector<1x32xf32> to vector<16x32xf32>
    %78 = arith.addf %75, %77 : vector<16x32xf32>
    %c1_42 = arith.constant 1 : index
    %c0_43 = arith.constant 0 : index
    %c0_44 = arith.constant 0 : index
    %79 = vector.load %arg4[%c1_42, %c0_43, %c0_44] : memref<16x128x32xbf16, #tpu.memory_space<vmem>>, vector<1x128x32xbf16>
    %80 = vector.shape_cast %79 : vector<1x128x32xbf16> to vector<128x32xbf16>
    %cst_45 = arith.constant dense<0.000000e+00> : vector<16x32xf32>
    %81 = tpu.matmul %27, %80, %cst_45 {dimension_numbers = #tpu.dot_dimension_numbers<[1], [0], [0], [1], [0, 0, 1, 1], [], []>} : vector<16x128xbf16>, vector<128x32xbf16>, vector<16x32xf32> -> vector<16x32xf32>
    %82 = vector.extract_strided_slice %72 {offsets = [1, 0], sizes = [1, 32], strides = [1, 1]} : vector<3x32xf32> to vector<1x32xf32>
    %83 = vector.broadcast %82 : vector<1x32xf32> to vector<16x32xf32>
    %84 = arith.addf %81, %83 : vector<16x32xf32>
    %c1_46 = arith.constant 1 : index
    %c0_47 = arith.constant 0 : index
    %c0_48 = arith.constant 0 : index
    %85 = vector.load %arg5[%c1_46, %c0_47, %c0_48] : memref<16x128x32xbf16, #tpu.memory_space<vmem>>, vector<1x128x32xbf16>
    %86 = vector.shape_cast %85 : vector<1x128x32xbf16> to vector<128x32xbf16>
    %cst_49 = arith.constant dense<0.000000e+00> : vector<16x32xf32>
    %87 = tpu.matmul %27, %86, %cst_49 {dimension_numbers = #tpu.dot_dimension_numbers<[1], [0], [0], [1], [0, 0, 1, 1], [], []>} : vector<16x128xbf16>, vector<128x32xbf16>, vector<16x32xf32> -> vector<16x32xf32>
    %88 = vector.extract_strided_slice %72 {offsets = [2, 0], sizes = [1, 32], strides = [1, 1]} : vector<3x32xf32> to vector<1x32xf32>
    %89 = vector.broadcast %88 : vector<1x32xf32> to vector<16x32xf32>
    %90 = arith.addf %87, %89 : vector<16x32xf32>
    %91 = arith.truncf %78 : vector<16x32xf32> to vector<16x32xbf16>
    %92 = arith.truncf %84 : vector<16x32xf32> to vector<16x32xbf16>
    %cst_50 = arith.constant dense<0.000000e+00> : vector<16x16xf32>
    %93 = tpu.matmul %91, %92, %cst_50 {dimension_numbers = #tpu.dot_dimension_numbers<[1], [1], [0], [0], [0, 0, 1, 0], [], []>} : vector<16x32xbf16>, vector<16x32xbf16>, vector<16x16xf32> -> vector<16x16xf32>
    %cst_51 = arith.constant 0.176776692 : f32
    %94 = vector.broadcast %cst_51 : f32 to vector<16x16xf32>
    %95 = arith.mulf %93, %94 : vector<16x16xf32>
    %96 = arith.addf %95, %1 : vector<16x16xf32>
    %cst_52 = arith.constant dense<0xFF800000> : vector<16xf32>
    %97 = vector.multi_reduction <maximumf>, %96, %cst_52 [1] : vector<16x16xf32> to vector<16xf32>
    %98 = vector.shape_cast %97 : vector<16xf32> to vector<16x1xf32>
    %99 = vector.broadcast %98 : vector<16x1xf32> to vector<16x16xf32>
    %100 = arith.subf %96, %99 : vector<16x16xf32>
    %101 = math.exp %100 : vector<16x16xf32>
    %cst_53 = arith.constant dense<0.000000e+00> : vector<16xf32>
    %102 = vector.multi_reduction <add>, %101, %cst_53 [1] : vector<16x16xf32> to vector<16xf32>
    %103 = vector.shape_cast %102 : vector<16xf32> to vector<16x1xf32>
    %104 = tpu.reciprocal %103 {approx = true} : vector<16x1xf32> -> vector<16x1xf32>
    %105 = vector.broadcast %104 : vector<16x1xf32> to vector<16x16xf32>
    %106 = arith.mulf %101, %105 : vector<16x16xf32>
    %107 = arith.truncf %106 : vector<16x16xf32> to vector<16x16xbf16>
    %108 = arith.truncf %90 : vector<16x32xf32> to vector<16x32xbf16>
    %cst_54 = arith.constant dense<0.000000e+00> : vector<16x32xf32>
    %109 = tpu.matmul %107, %108, %cst_54 {dimension_numbers = #tpu.dot_dimension_numbers<[1], [0], [0], [1], [0, 0, 1, 1], [], []>} : vector<16x16xbf16>, vector<16x32xbf16>, vector<16x32xf32> -> vector<16x32xf32>
    %110 = arith.truncf %109 : vector<16x32xf32> to vector<16x32xbf16>
    %c1_55 = arith.constant 1 : index
    %c0_56 = arith.constant 0 : index
    %c0_57 = arith.constant 0 : index
    %111 = vector.load %arg6[%c1_55, %c0_56, %c0_57] : memref<16x32x128xbf16, #tpu.memory_space<vmem>>, vector<1x32x128xbf16>
    %112 = vector.shape_cast %111 : vector<1x32x128xbf16> to vector<32x128xbf16>
    %cst_58 = arith.constant dense<0.000000e+00> : vector<16x128xf32>
    %113 = tpu.matmul %110, %112, %cst_58 {dimension_numbers = #tpu.dot_dimension_numbers<[1], [0], [0], [1], [0, 0, 1, 1], [], []>} : vector<16x32xbf16>, vector<32x128xbf16>, vector<16x128xf32> -> vector<16x128xf32>
    %114 = arith.addf %70, %113 : vector<16x128xf32>
    %c2 = arith.constant 2 : index
    %c0_59 = arith.constant 0 : index
    %c0_60 = arith.constant 0 : index
    %115 = vector.load %arg9[%c2, %c0_59, %c0_60] : memref<16x3x32xf32, #tpu.memory_space<vmem>>, vector<1x3x32xf32>
    %116 = vector.shape_cast %115 : vector<1x3x32xf32> to vector<3x32xf32>
    %c2_61 = arith.constant 2 : index
    %c0_62 = arith.constant 0 : index
    %c0_63 = arith.constant 0 : index
    %117 = vector.load %arg3[%c2_61, %c0_62, %c0_63] : memref<16x128x32xbf16, #tpu.memory_space<vmem>>, vector<1x128x32xbf16>
    %118 = vector.shape_cast %117 : vector<1x128x32xbf16> to vector<128x32xbf16>
    %cst_64 = arith.constant dense<0.000000e+00> : vector<16x32xf32>
    %119 = tpu.matmul %27, %118, %cst_64 {dimension_numbers = #tpu.dot_dimension_numbers<[1], [0], [0], [1], [0, 0, 1, 1], [], []>} : vector<16x128xbf16>, vector<128x32xbf16>, vector<16x32xf32> -> vector<16x32xf32>
    %120 = vector.extract_strided_slice %116 {offsets = [0, 0], sizes = [1, 32], strides = [1, 1]} : vector<3x32xf32> to vector<1x32xf32>
    %121 = vector.broadcast %120 : vector<1x32xf32> to vector<16x32xf32>
    %122 = arith.addf %119, %121 : vector<16x32xf32>
    %c2_65 = arith.constant 2 : index
    %c0_66 = arith.constant 0 : index
    %c0_67 = arith.constant 0 : index
    %123 = vector.load %arg4[%c2_65, %c0_66, %c0_67] : memref<16x128x32xbf16, #tpu.memory_space<vmem>>, vector<1x128x32xbf16>
    %124 = vector.shape_cast %123 : vector<1x128x32xbf16> to vector<128x32xbf16>
    %cst_68 = arith.constant dense<0.000000e+00> : vector<16x32xf32>
    %125 = tpu.matmul %27, %124, %cst_68 {dimension_numbers = #tpu.dot_dimension_numbers<[1], [0], [0], [1], [0, 0, 1, 1], [], []>} : vector<16x128xbf16>, vector<128x32xbf16>, vector<16x32xf32> -> vector<16x32xf32>
    %126 = vector.extract_strided_slice %116 {offsets = [1, 0], sizes = [1, 32], strides = [1, 1]} : vector<3x32xf32> to vector<1x32xf32>
    %127 = vector.broadcast %126 : vector<1x32xf32> to vector<16x32xf32>
    %128 = arith.addf %125, %127 : vector<16x32xf32>
    %c2_69 = arith.constant 2 : index
    %c0_70 = arith.constant 0 : index
    %c0_71 = arith.constant 0 : index
    %129 = vector.load %arg5[%c2_69, %c0_70, %c0_71] : memref<16x128x32xbf16, #tpu.memory_space<vmem>>, vector<1x128x32xbf16>
    %130 = vector.shape_cast %129 : vector<1x128x32xbf16> to vector<128x32xbf16>
    %cst_72 = arith.constant dense<0.000000e+00> : vector<16x32xf32>
    %131 = tpu.matmul %27, %130, %cst_72 {dimension_numbers = #tpu.dot_dimension_numbers<[1], [0], [0], [1], [0, 0, 1, 1], [], []>} : vector<16x128xbf16>, vector<128x32xbf16>, vector<16x32xf32> -> vector<16x32xf32>
    %132 = vector.extract_strided_slice %116 {offsets = [2, 0], sizes = [1, 32], strides = [1, 1]} : vector<3x32xf32> to vector<1x32xf32>
    %133 = vector.broadcast %132 : vector<1x32xf32> to vector<16x32xf32>
    %134 = arith.addf %131, %133 : vector<16x32xf32>
    %135 = arith.truncf %122 : vector<16x32xf32> to vector<16x32xbf16>
    %136 = arith.truncf %128 : vector<16x32xf32> to vector<16x32xbf16>
    %cst_73 = arith.constant dense<0.000000e+00> : vector<16x16xf32>
    %137 = tpu.matmul %135, %136, %cst_73 {dimension_numbers = #tpu.dot_dimension_numbers<[1], [1], [0], [0], [0, 0, 1, 0], [], []>} : vector<16x32xbf16>, vector<16x32xbf16>, vector<16x16xf32> -> vector<16x16xf32>
    %cst_74 = arith.constant 0.176776692 : f32
    %138 = vector.broadcast %cst_74 : f32 to vector<16x16xf32>
    %139 = arith.mulf %137, %138 : vector<16x16xf32>
    %140 = arith.addf %139, %1 : vector<16x16xf32>
    %cst_75 = arith.constant dense<0xFF800000> : vector<16xf32>
    %141 = vector.multi_reduction <maximumf>, %140, %cst_75 [1] : vector<16x16xf32> to vector<16xf32>
    %142 = vector.shape_cast %141 : vector<16xf32> to vector<16x1xf32>
    %143 = vector.broadcast %142 : vector<16x1xf32> to vector<16x16xf32>
    %144 = arith.subf %140, %143 : vector<16x16xf32>
    %145 = math.exp %144 : vector<16x16xf32>
    %cst_76 = arith.constant dense<0.000000e+00> : vector<16xf32>
    %146 = vector.multi_reduction <add>, %145, %cst_76 [1] : vector<16x16xf32> to vector<16xf32>
    %147 = vector.shape_cast %146 : vector<16xf32> to vector<16x1xf32>
    %148 = tpu.reciprocal %147 {approx = true} : vector<16x1xf32> -> vector<16x1xf32>
    %149 = vector.broadcast %148 : vector<16x1xf32> to vector<16x16xf32>
    %150 = arith.mulf %145, %149 : vector<16x16xf32>
    %151 = arith.truncf %150 : vector<16x16xf32> to vector<16x16xbf16>
    %152 = arith.truncf %134 : vector<16x32xf32> to vector<16x32xbf16>
    %cst_77 = arith.constant dense<0.000000e+00> : vector<16x32xf32>
    %153 = tpu.matmul %151, %152, %cst_77 {dimension_numbers = #tpu.dot_dimension_numbers<[1], [0], [0], [1], [0, 0, 1, 1], [], []>} : vector<16x16xbf16>, vector<16x32xbf16>, vector<16x32xf32> -> vector<16x32xf32>
    %154 = arith.truncf %153 : vector<16x32xf32> to vector<16x32xbf16>
    %c2_78 = arith.constant 2 : index
    %c0_79 = arith.constant 0 : index
    %c0_80 = arith.constant 0 : index
    %155 = vector.load %arg6[%c2_78, %c0_79, %c0_80] : memref<16x32x128xbf16, #tpu.memory_space<vmem>>, vector<1x32x128xbf16>
    %156 = vector.shape_cast %155 : vector<1x32x128xbf16> to vector<32x128xbf16>
    %cst_81 = arith.constant dense<0.000000e+00> : vector<16x128xf32>
    %157 = tpu.matmul %154, %156, %cst_81 {dimension_numbers = #tpu.dot_dimension_numbers<[1], [0], [0], [1], [0, 0, 1, 1], [], []>} : vector<16x32xbf16>, vector<32x128xbf16>, vector<16x128xf32> -> vector<16x128xf32>
    %158 = arith.addf %114, %157 : vector<16x128xf32>
    %c3 = arith.constant 3 : index
    %c0_82 = arith.constant 0 : index
    %c0_83 = arith.constant 0 : index
    %159 = vector.load %arg9[%c3, %c0_82, %c0_83] : memref<16x3x32xf32, #tpu.memory_space<vmem>>, vector<1x3x32xf32>
    %160 = vector.shape_cast %159 : vector<1x3x32xf32> to vector<3x32xf32>
    %c3_84 = arith.constant 3 : index
    %c0_85 = arith.constant 0 : index
    %c0_86 = arith.constant 0 : index
    %161 = vector.load %arg3[%c3_84, %c0_85, %c0_86] : memref<16x128x32xbf16, #tpu.memory_space<vmem>>, vector<1x128x32xbf16>
    %162 = vector.shape_cast %161 : vector<1x128x32xbf16> to vector<128x32xbf16>
    %cst_87 = arith.constant dense<0.000000e+00> : vector<16x32xf32>
    %163 = tpu.matmul %27, %162, %cst_87 {dimension_numbers = #tpu.dot_dimension_numbers<[1], [0], [0], [1], [0, 0, 1, 1], [], []>} : vector<16x128xbf16>, vector<128x32xbf16>, vector<16x32xf32> -> vector<16x32xf32>
    %164 = vector.extract_strided_slice %160 {offsets = [0, 0], sizes = [1, 32], strides = [1, 1]} : vector<3x32xf32> to vector<1x32xf32>
    %165 = vector.broadcast %164 : vector<1x32xf32> to vector<16x32xf32>
    %166 = arith.addf %163, %165 : vector<16x32xf32>
    %c3_88 = arith.constant 3 : index
    %c0_89 = arith.constant 0 : index
    %c0_90 = arith.constant 0 : index
    %167 = vector.load %arg4[%c3_88, %c0_89, %c0_90] : memref<16x128x32xbf16, #tpu.memory_space<vmem>>, vector<1x128x32xbf16>
    %168 = vector.shape_cast %167 : vector<1x128x32xbf16> to vector<128x32xbf16>
    %cst_91 = arith.constant dense<0.000000e+00> : vector<16x32xf32>
    %169 = tpu.matmul %27, %168, %cst_91 {dimension_numbers = #tpu.dot_dimension_numbers<[1], [0], [0], [1], [0, 0, 1, 1], [], []>} : vector<16x128xbf16>, vector<128x32xbf16>, vector<16x32xf32> -> vector<16x32xf32>
    %170 = vector.extract_strided_slice %160 {offsets = [1, 0], sizes = [1, 32], strides = [1, 1]} : vector<3x32xf32> to vector<1x32xf32>
    %171 = vector.broadcast %170 : vector<1x32xf32> to vector<16x32xf32>
    %172 = arith.addf %169, %171 : vector<16x32xf32>
    %c3_92 = arith.constant 3 : index
    %c0_93 = arith.constant 0 : index
    %c0_94 = arith.constant 0 : index
    %173 = vector.load %arg5[%c3_92, %c0_93, %c0_94] : memref<16x128x32xbf16, #tpu.memory_space<vmem>>, vector<1x128x32xbf16>
    %174 = vector.shape_cast %173 : vector<1x128x32xbf16> to vector<128x32xbf16>
    %cst_95 = arith.constant dense<0.000000e+00> : vector<16x32xf32>
    %175 = tpu.matmul %27, %174, %cst_95 {dimension_numbers = #tpu.dot_dimension_numbers<[1], [0], [0], [1], [0, 0, 1, 1], [], []>} : vector<16x128xbf16>, vector<128x32xbf16>, vector<16x32xf32> -> vector<16x32xf32>
    %176 = vector.extract_strided_slice %160 {offsets = [2, 0], sizes = [1, 32], strides = [1, 1]} : vector<3x32xf32> to vector<1x32xf32>
    %177 = vector.broadcast %176 : vector<1x32xf32> to vector<16x32xf32>
    %178 = arith.addf %175, %177 : vector<16x32xf32>
    %179 = arith.truncf %166 : vector<16x32xf32> to vector<16x32xbf16>
    %180 = arith.truncf %172 : vector<16x32xf32> to vector<16x32xbf16>
    %cst_96 = arith.constant dense<0.000000e+00> : vector<16x16xf32>
    %181 = tpu.matmul %179, %180, %cst_96 {dimension_numbers = #tpu.dot_dimension_numbers<[1], [1], [0], [0], [0, 0, 1, 0], [], []>} : vector<16x32xbf16>, vector<16x32xbf16>, vector<16x16xf32> -> vector<16x16xf32>
    %cst_97 = arith.constant 0.176776692 : f32
    %182 = vector.broadcast %cst_97 : f32 to vector<16x16xf32>
    %183 = arith.mulf %181, %182 : vector<16x16xf32>
    %184 = arith.addf %183, %1 : vector<16x16xf32>
    %cst_98 = arith.constant dense<0xFF800000> : vector<16xf32>
    %185 = vector.multi_reduction <maximumf>, %184, %cst_98 [1] : vector<16x16xf32> to vector<16xf32>
    %186 = vector.shape_cast %185 : vector<16xf32> to vector<16x1xf32>
    %187 = vector.broadcast %186 : vector<16x1xf32> to vector<16x16xf32>
    %188 = arith.subf %184, %187 : vector<16x16xf32>
    %189 = math.exp %188 : vector<16x16xf32>
    %cst_99 = arith.constant dense<0.000000e+00> : vector<16xf32>
    %190 = vector.multi_reduction <add>, %189, %cst_99 [1] : vector<16x16xf32> to vector<16xf32>
    %191 = vector.shape_cast %190 : vector<16xf32> to vector<16x1xf32>
    %192 = tpu.reciprocal %191 {approx = true} : vector<16x1xf32> -> vector<16x1xf32>
    %193 = vector.broadcast %192 : vector<16x1xf32> to vector<16x16xf32>
    %194 = arith.mulf %189, %193 : vector<16x16xf32>
    %195 = arith.truncf %194 : vector<16x16xf32> to vector<16x16xbf16>
    %196 = arith.truncf %178 : vector<16x32xf32> to vector<16x32xbf16>
    %cst_100 = arith.constant dense<0.000000e+00> : vector<16x32xf32>
    %197 = tpu.matmul %195, %196, %cst_100 {dimension_numbers = #tpu.dot_dimension_numbers<[1], [0], [0], [1], [0, 0, 1, 1], [], []>} : vector<16x16xbf16>, vector<16x32xbf16>, vector<16x32xf32> -> vector<16x32xf32>
    %198 = arith.truncf %197 : vector<16x32xf32> to vector<16x32xbf16>
    %c3_101 = arith.constant 3 : index
    %c0_102 = arith.constant 0 : index
    %c0_103 = arith.constant 0 : index
    %199 = vector.load %arg6[%c3_101, %c0_102, %c0_103] : memref<16x32x128xbf16, #tpu.memory_space<vmem>>, vector<1x32x128xbf16>
    %200 = vector.shape_cast %199 : vector<1x32x128xbf16> to vector<32x128xbf16>
    %cst_104 = arith.constant dense<0.000000e+00> : vector<16x128xf32>
    %201 = tpu.matmul %198, %200, %cst_104 {dimension_numbers = #tpu.dot_dimension_numbers<[1], [0], [0], [1], [0, 0, 1, 1], [], []>} : vector<16x32xbf16>, vector<32x128xbf16>, vector<16x128xf32> -> vector<16x128xf32>
    %202 = arith.addf %158, %201 : vector<16x128xf32>
    %203 = vector.extract_strided_slice %26 {offsets = [0, 0], sizes = [1, 128], strides = [1, 1]} : vector<6x128xf32> to vector<1x128xf32>
    %204 = vector.broadcast %203 : vector<1x128xf32> to vector<16x128xf32>
    %205 = arith.addf %202, %204 : vector<16x128xf32>
    %206 = arith.addf %205, %24 : vector<16x128xf32>
    %207 = vector.extract_strided_slice %26 {offsets = [1, 0], sizes = [1, 128], strides = [1, 1]} : vector<6x128xf32> to vector<1x128xf32>
    %208 = vector.extract_strided_slice %26 {offsets = [2, 0], sizes = [1, 128], strides = [1, 1]} : vector<6x128xf32> to vector<1x128xf32>
    %cst_105 = arith.constant dense<0.000000e+00> : vector<16xf32>
    %209 = vector.multi_reduction <add>, %206, %cst_105 [1] : vector<16x128xf32> to vector<16xf32>
    %210 = vector.shape_cast %209 : vector<16xf32> to vector<16x1xf32>
    %cst_106 = arith.constant 1.280000e+02 : f32
    %211 = vector.broadcast %cst_106 : f32 to vector<16x1xf32>
    %212 = arith.divf %210, %211 : vector<16x1xf32>
    %213 = vector.broadcast %212 : vector<16x1xf32> to vector<16x128xf32>
    %214 = arith.subf %206, %213 : vector<16x128xf32>
    %215 = arith.mulf %214, %214 : vector<16x128xf32>
    %cst_107 = arith.constant dense<0.000000e+00> : vector<16xf32>
    %216 = vector.multi_reduction <add>, %215, %cst_107 [1] : vector<16x128xf32> to vector<16xf32>
    %217 = vector.shape_cast %216 : vector<16xf32> to vector<16x1xf32>
    %cst_108 = arith.constant 1.280000e+02 : f32
    %218 = vector.broadcast %cst_108 : f32 to vector<16x1xf32>
    %219 = arith.divf %217, %218 : vector<16x1xf32>
    %cst_109 = arith.constant 9.99999974E-6 : f32
    %220 = vector.broadcast %cst_109 : f32 to vector<16x1xf32>
    %221 = arith.addf %219, %220 : vector<16x1xf32>
    %222 = math.rsqrt %221 : vector<16x1xf32>
    %223 = vector.broadcast %222 : vector<16x1xf32> to vector<16x128xf32>
    %224 = arith.mulf %214, %223 : vector<16x128xf32>
    %225 = vector.broadcast %207 : vector<1x128xf32> to vector<16x128xf32>
    %226 = arith.mulf %224, %225 : vector<16x128xf32>
    %227 = vector.broadcast %208 : vector<1x128xf32> to vector<16x128xf32>
    %228 = arith.addf %226, %227 : vector<16x128xf32>
    %229 = arith.truncf %228 : vector<16x128xf32> to vector<16x128xbf16>
    %c0_110 = arith.constant 0 : index
    %c0_111 = arith.constant 0 : index
    %c0_112 = arith.constant 0 : index
    %230 = vector.load %arg12[%c0_110, %c0_111, %c0_112] : memref<5x128x128xbf16, #tpu.memory_space<vmem>>, vector<1x128x128xbf16>
    %231 = vector.shape_cast %230 : vector<1x128x128xbf16> to vector<128x128xbf16>
    %cst_113 = arith.constant dense<0.000000e+00> : vector<16x128xf32>
    %232 = tpu.matmul %229, %231, %cst_113 {dimension_numbers = #tpu.dot_dimension_numbers<[1], [0], [0], [1], [0, 0, 1, 1], [], []>} : vector<16x128xbf16>, vector<128x128xbf16>, vector<16x128xf32> -> vector<16x128xf32>
    %233 = arith.truncf %232 : vector<16x128xf32> to vector<16x128xbf16>
    %c0_114 = arith.constant 0 : index
    %c0_115 = arith.constant 0 : index
    %c0_116 = arith.constant 0 : index
    %234 = vector.load %arg7[%c0_114, %c0_115, %c0_116] : memref<4x128x256xbf16, #tpu.memory_space<vmem>>, vector<1x128x256xbf16>
    %235 = vector.shape_cast %234 : vector<1x128x256xbf16> to vector<128x256xbf16>
    %cst_117 = arith.constant dense<0.000000e+00> : vector<16x256xf32>
    %236 = tpu.matmul %233, %235, %cst_117 {dimension_numbers = #tpu.dot_dimension_numbers<[1], [0], [0], [1], [0, 0, 1, 1], [], []>} : vector<16x128xbf16>, vector<128x256xbf16>, vector<16x256xf32> -> vector<16x256xf32>
    %c0_118 = arith.constant 0 : index
    %c0_119 = arith.constant 0 : index
    %c0_120 = arith.constant 0 : index
    %237 = vector.load %arg10[%c0_118, %c0_119, %c0_120] : memref<4x1x256xf32, #tpu.memory_space<vmem>>, vector<1x1x256xf32>
    %238 = vector.shape_cast %237 : vector<1x1x256xf32> to vector<1x256xf32>
    %239 = vector.broadcast %238 : vector<1x256xf32> to vector<16x256xf32>
    %240 = arith.addf %236, %239 : vector<16x256xf32>
    %cst_121 = arith.constant 5.000000e-01 : f32
    %241 = vector.broadcast %cst_121 : f32 to vector<16x256xf32>
    %242 = arith.mulf %241, %240 : vector<16x256xf32>
    %cst_122 = arith.constant 4.471500e-02 : f32
    %243 = vector.broadcast %cst_122 : f32 to vector<16x256xf32>
    %244 = arith.mulf %243, %240 : vector<16x256xf32>
    %245 = arith.mulf %244, %240 : vector<16x256xf32>
    %246 = arith.mulf %245, %240 : vector<16x256xf32>
    %247 = arith.addf %240, %246 : vector<16x256xf32>
    %cst_123 = arith.constant 0.797884583 : f32
    %248 = vector.broadcast %cst_123 : f32 to vector<16x256xf32>
    %249 = arith.mulf %248, %247 : vector<16x256xf32>
    %250 = math.tanh %249 : vector<16x256xf32>
    %cst_124 = arith.constant 1.000000e+00 : f32
    %251 = vector.broadcast %cst_124 : f32 to vector<16x256xf32>
    %252 = arith.addf %251, %250 : vector<16x256xf32>
    %253 = arith.mulf %242, %252 : vector<16x256xf32>
    %254 = arith.truncf %253 : vector<16x256xf32> to vector<16x256xbf16>
    %c0_125 = arith.constant 0 : index
    %c0_126 = arith.constant 0 : index
    %c0_127 = arith.constant 0 : index
    %255 = vector.load %arg8[%c0_125, %c0_126, %c0_127] : memref<4x256x128xbf16, #tpu.memory_space<vmem>>, vector<1x256x128xbf16>
    %256 = vector.shape_cast %255 : vector<1x256x128xbf16> to vector<256x128xbf16>
    %cst_128 = arith.constant dense<0.000000e+00> : vector<16x128xf32>
    %257 = tpu.matmul %254, %256, %cst_128 {dimension_numbers = #tpu.dot_dimension_numbers<[1], [0], [0], [1], [0, 0, 1, 1], [], []>} : vector<16x256xbf16>, vector<256x128xbf16>, vector<16x128xf32> -> vector<16x128xf32>
    %258 = vector.extract_strided_slice %26 {offsets = [3, 0], sizes = [1, 128], strides = [1, 1]} : vector<6x128xf32> to vector<1x128xf32>
    %259 = vector.broadcast %258 : vector<1x128xf32> to vector<16x128xf32>
    %260 = arith.addf %257, %259 : vector<16x128xf32>
    %261 = arith.addf %260, %232 : vector<16x128xf32>
    %262 = vector.extract_strided_slice %26 {offsets = [4, 0], sizes = [1, 128], strides = [1, 1]} : vector<6x128xf32> to vector<1x128xf32>
    %263 = vector.extract_strided_slice %26 {offsets = [5, 0], sizes = [1, 128], strides = [1, 1]} : vector<6x128xf32> to vector<1x128xf32>
    %cst_129 = arith.constant dense<0.000000e+00> : vector<16xf32>
    %264 = vector.multi_reduction <add>, %261, %cst_129 [1] : vector<16x128xf32> to vector<16xf32>
    %265 = vector.shape_cast %264 : vector<16xf32> to vector<16x1xf32>
    %cst_130 = arith.constant 1.280000e+02 : f32
    %266 = vector.broadcast %cst_130 : f32 to vector<16x1xf32>
    %267 = arith.divf %265, %266 : vector<16x1xf32>
    %268 = vector.broadcast %267 : vector<16x1xf32> to vector<16x128xf32>
    %269 = arith.subf %261, %268 : vector<16x128xf32>
    %270 = arith.mulf %269, %269 : vector<16x128xf32>
    %cst_131 = arith.constant dense<0.000000e+00> : vector<16xf32>
    %271 = vector.multi_reduction <add>, %270, %cst_131 [1] : vector<16x128xf32> to vector<16xf32>
    %272 = vector.shape_cast %271 : vector<16xf32> to vector<16x1xf32>
    %cst_132 = arith.constant 1.280000e+02 : f32
    %273 = vector.broadcast %cst_132 : f32 to vector<16x1xf32>
    %274 = arith.divf %272, %273 : vector<16x1xf32>
    %cst_133 = arith.constant 9.99999974E-6 : f32
    %275 = vector.broadcast %cst_133 : f32 to vector<16x1xf32>
    %276 = arith.addf %274, %275 : vector<16x1xf32>
    %277 = math.rsqrt %276 : vector<16x1xf32>
    %278 = vector.broadcast %277 : vector<16x1xf32> to vector<16x128xf32>
    %279 = arith.mulf %269, %278 : vector<16x128xf32>
    %280 = vector.broadcast %262 : vector<1x128xf32> to vector<16x128xf32>
    %281 = arith.mulf %279, %280 : vector<16x128xf32>
    %282 = vector.broadcast %263 : vector<1x128xf32> to vector<16x128xf32>
    %283 = arith.addf %281, %282 : vector<16x128xf32>
    %c1_134 = arith.constant 1 : index
    %c0_135 = arith.constant 0 : index
    %c0_136 = arith.constant 0 : index
    %284 = vector.load %arg11[%c1_134, %c0_135, %c0_136] : memref<4x6x128xf32, #tpu.memory_space<vmem>>, vector<1x6x128xf32>
    %285 = vector.shape_cast %284 : vector<1x6x128xf32> to vector<6x128xf32>
    %286 = arith.truncf %283 : vector<16x128xf32> to vector<16x128xbf16>
    %c4 = arith.constant 4 : index
    %c0_137 = arith.constant 0 : index
    %c0_138 = arith.constant 0 : index
    %287 = vector.load %arg9[%c4, %c0_137, %c0_138] : memref<16x3x32xf32, #tpu.memory_space<vmem>>, vector<1x3x32xf32>
    %288 = vector.shape_cast %287 : vector<1x3x32xf32> to vector<3x32xf32>
    %c4_139 = arith.constant 4 : index
    %c0_140 = arith.constant 0 : index
    %c0_141 = arith.constant 0 : index
    %289 = vector.load %arg3[%c4_139, %c0_140, %c0_141] : memref<16x128x32xbf16, #tpu.memory_space<vmem>>, vector<1x128x32xbf16>
    %290 = vector.shape_cast %289 : vector<1x128x32xbf16> to vector<128x32xbf16>
    %cst_142 = arith.constant dense<0.000000e+00> : vector<16x32xf32>
    %291 = tpu.matmul %286, %290, %cst_142 {dimension_numbers = #tpu.dot_dimension_numbers<[1], [0], [0], [1], [0, 0, 1, 1], [], []>} : vector<16x128xbf16>, vector<128x32xbf16>, vector<16x32xf32> -> vector<16x32xf32>
    %292 = vector.extract_strided_slice %288 {offsets = [0, 0], sizes = [1, 32], strides = [1, 1]} : vector<3x32xf32> to vector<1x32xf32>
    %293 = vector.broadcast %292 : vector<1x32xf32> to vector<16x32xf32>
    %294 = arith.addf %291, %293 : vector<16x32xf32>
    %c4_143 = arith.constant 4 : index
    %c0_144 = arith.constant 0 : index
    %c0_145 = arith.constant 0 : index
    %295 = vector.load %arg4[%c4_143, %c0_144, %c0_145] : memref<16x128x32xbf16, #tpu.memory_space<vmem>>, vector<1x128x32xbf16>
    %296 = vector.shape_cast %295 : vector<1x128x32xbf16> to vector<128x32xbf16>
    %cst_146 = arith.constant dense<0.000000e+00> : vector<16x32xf32>
    %297 = tpu.matmul %286, %296, %cst_146 {dimension_numbers = #tpu.dot_dimension_numbers<[1], [0], [0], [1], [0, 0, 1, 1], [], []>} : vector<16x128xbf16>, vector<128x32xbf16>, vector<16x32xf32> -> vector<16x32xf32>
    %298 = vector.extract_strided_slice %288 {offsets = [1, 0], sizes = [1, 32], strides = [1, 1]} : vector<3x32xf32> to vector<1x32xf32>
    %299 = vector.broadcast %298 : vector<1x32xf32> to vector<16x32xf32>
    %300 = arith.addf %297, %299 : vector<16x32xf32>
    %c4_147 = arith.constant 4 : index
    %c0_148 = arith.constant 0 : index
    %c0_149 = arith.constant 0 : index
    %301 = vector.load %arg5[%c4_147, %c0_148, %c0_149] : memref<16x128x32xbf16, #tpu.memory_space<vmem>>, vector<1x128x32xbf16>
    %302 = vector.shape_cast %301 : vector<1x128x32xbf16> to vector<128x32xbf16>
    %cst_150 = arith.constant dense<0.000000e+00> : vector<16x32xf32>
    %303 = tpu.matmul %286, %302, %cst_150 {dimension_numbers = #tpu.dot_dimension_numbers<[1], [0], [0], [1], [0, 0, 1, 1], [], []>} : vector<16x128xbf16>, vector<128x32xbf16>, vector<16x32xf32> -> vector<16x32xf32>
    %304 = vector.extract_strided_slice %288 {offsets = [2, 0], sizes = [1, 32], strides = [1, 1]} : vector<3x32xf32> to vector<1x32xf32>
    %305 = vector.broadcast %304 : vector<1x32xf32> to vector<16x32xf32>
    %306 = arith.addf %303, %305 : vector<16x32xf32>
    %307 = arith.truncf %294 : vector<16x32xf32> to vector<16x32xbf16>
    %308 = arith.truncf %300 : vector<16x32xf32> to vector<16x32xbf16>
    %cst_151 = arith.constant dense<0.000000e+00> : vector<16x16xf32>
    %309 = tpu.matmul %307, %308, %cst_151 {dimension_numbers = #tpu.dot_dimension_numbers<[1], [1], [0], [0], [0, 0, 1, 0], [], []>} : vector<16x32xbf16>, vector<16x32xbf16>, vector<16x16xf32> -> vector<16x16xf32>
    %cst_152 = arith.constant 0.176776692 : f32
    %310 = vector.broadcast %cst_152 : f32 to vector<16x16xf32>
    %311 = arith.mulf %309, %310 : vector<16x16xf32>
    %312 = arith.addf %311, %1 : vector<16x16xf32>
    %cst_153 = arith.constant dense<0xFF800000> : vector<16xf32>
    %313 = vector.multi_reduction <maximumf>, %312, %cst_153 [1] : vector<16x16xf32> to vector<16xf32>
    %314 = vector.shape_cast %313 : vector<16xf32> to vector<16x1xf32>
    %315 = vector.broadcast %314 : vector<16x1xf32> to vector<16x16xf32>
    %316 = arith.subf %312, %315 : vector<16x16xf32>
    %317 = math.exp %316 : vector<16x16xf32>
    %cst_154 = arith.constant dense<0.000000e+00> : vector<16xf32>
    %318 = vector.multi_reduction <add>, %317, %cst_154 [1] : vector<16x16xf32> to vector<16xf32>
    %319 = vector.shape_cast %318 : vector<16xf32> to vector<16x1xf32>
    %320 = tpu.reciprocal %319 {approx = true} : vector<16x1xf32> -> vector<16x1xf32>
    %321 = vector.broadcast %320 : vector<16x1xf32> to vector<16x16xf32>
    %322 = arith.mulf %317, %321 : vector<16x16xf32>
    %323 = arith.truncf %322 : vector<16x16xf32> to vector<16x16xbf16>
    %324 = arith.truncf %306 : vector<16x32xf32> to vector<16x32xbf16>
    %cst_155 = arith.constant dense<0.000000e+00> : vector<16x32xf32>
    %325 = tpu.matmul %323, %324, %cst_155 {dimension_numbers = #tpu.dot_dimension_numbers<[1], [0], [0], [1], [0, 0, 1, 1], [], []>} : vector<16x16xbf16>, vector<16x32xbf16>, vector<16x32xf32> -> vector<16x32xf32>
    %326 = arith.truncf %325 : vector<16x32xf32> to vector<16x32xbf16>
    %c4_156 = arith.constant 4 : index
    %c0_157 = arith.constant 0 : index
    %c0_158 = arith.constant 0 : index
    %327 = vector.load %arg6[%c4_156, %c0_157, %c0_158] : memref<16x32x128xbf16, #tpu.memory_space<vmem>>, vector<1x32x128xbf16>
    %328 = vector.shape_cast %327 : vector<1x32x128xbf16> to vector<32x128xbf16>
    %cst_159 = arith.constant dense<0.000000e+00> : vector<16x128xf32>
    %329 = tpu.matmul %326, %328, %cst_159 {dimension_numbers = #tpu.dot_dimension_numbers<[1], [0], [0], [1], [0, 0, 1, 1], [], []>} : vector<16x32xbf16>, vector<32x128xbf16>, vector<16x128xf32> -> vector<16x128xf32>
    %c5 = arith.constant 5 : index
    %c0_160 = arith.constant 0 : index
    %c0_161 = arith.constant 0 : index
    %330 = vector.load %arg9[%c5, %c0_160, %c0_161] : memref<16x3x32xf32, #tpu.memory_space<vmem>>, vector<1x3x32xf32>
    %331 = vector.shape_cast %330 : vector<1x3x32xf32> to vector<3x32xf32>
    %c5_162 = arith.constant 5 : index
    %c0_163 = arith.constant 0 : index
    %c0_164 = arith.constant 0 : index
    %332 = vector.load %arg3[%c5_162, %c0_163, %c0_164] : memref<16x128x32xbf16, #tpu.memory_space<vmem>>, vector<1x128x32xbf16>
    %333 = vector.shape_cast %332 : vector<1x128x32xbf16> to vector<128x32xbf16>
    %cst_165 = arith.constant dense<0.000000e+00> : vector<16x32xf32>
    %334 = tpu.matmul %286, %333, %cst_165 {dimension_numbers = #tpu.dot_dimension_numbers<[1], [0], [0], [1], [0, 0, 1, 1], [], []>} : vector<16x128xbf16>, vector<128x32xbf16>, vector<16x32xf32> -> vector<16x32xf32>
    %335 = vector.extract_strided_slice %331 {offsets = [0, 0], sizes = [1, 32], strides = [1, 1]} : vector<3x32xf32> to vector<1x32xf32>
    %336 = vector.broadcast %335 : vector<1x32xf32> to vector<16x32xf32>
    %337 = arith.addf %334, %336 : vector<16x32xf32>
    %c5_166 = arith.constant 5 : index
    %c0_167 = arith.constant 0 : index
    %c0_168 = arith.constant 0 : index
    %338 = vector.load %arg4[%c5_166, %c0_167, %c0_168] : memref<16x128x32xbf16, #tpu.memory_space<vmem>>, vector<1x128x32xbf16>
    %339 = vector.shape_cast %338 : vector<1x128x32xbf16> to vector<128x32xbf16>
    %cst_169 = arith.constant dense<0.000000e+00> : vector<16x32xf32>
    %340 = tpu.matmul %286, %339, %cst_169 {dimension_numbers = #tpu.dot_dimension_numbers<[1], [0], [0], [1], [0, 0, 1, 1], [], []>} : vector<16x128xbf16>, vector<128x32xbf16>, vector<16x32xf32> -> vector<16x32xf32>
    %341 = vector.extract_strided_slice %331 {offsets = [1, 0], sizes = [1, 32], strides = [1, 1]} : vector<3x32xf32> to vector<1x32xf32>
    %342 = vector.broadcast %341 : vector<1x32xf32> to vector<16x32xf32>
    %343 = arith.addf %340, %342 : vector<16x32xf32>
    %c5_170 = arith.constant 5 : index
    %c0_171 = arith.constant 0 : index
    %c0_172 = arith.constant 0 : index
    %344 = vector.load %arg5[%c5_170, %c0_171, %c0_172] : memref<16x128x32xbf16, #tpu.memory_space<vmem>>, vector<1x128x32xbf16>
    %345 = vector.shape_cast %344 : vector<1x128x32xbf16> to vector<128x32xbf16>
    %cst_173 = arith.constant dense<0.000000e+00> : vector<16x32xf32>
    %346 = tpu.matmul %286, %345, %cst_173 {dimension_numbers = #tpu.dot_dimension_numbers<[1], [0], [0], [1], [0, 0, 1, 1], [], []>} : vector<16x128xbf16>, vector<128x32xbf16>, vector<16x32xf32> -> vector<16x32xf32>
    %347 = vector.extract_strided_slice %331 {offsets = [2, 0], sizes = [1, 32], strides = [1, 1]} : vector<3x32xf32> to vector<1x32xf32>
    %348 = vector.broadcast %347 : vector<1x32xf32> to vector<16x32xf32>
    %349 = arith.addf %346, %348 : vector<16x32xf32>
    %350 = arith.truncf %337 : vector<16x32xf32> to vector<16x32xbf16>
    %351 = arith.truncf %343 : vector<16x32xf32> to vector<16x32xbf16>
    %cst_174 = arith.constant dense<0.000000e+00> : vector<16x16xf32>
    %352 = tpu.matmul %350, %351, %cst_174 {dimension_numbers = #tpu.dot_dimension_numbers<[1], [1], [0], [0], [0, 0, 1, 0], [], []>} : vector<16x32xbf16>, vector<16x32xbf16>, vector<16x16xf32> -> vector<16x16xf32>
    %cst_175 = arith.constant 0.176776692 : f32
    %353 = vector.broadcast %cst_175 : f32 to vector<16x16xf32>
    %354 = arith.mulf %352, %353 : vector<16x16xf32>
    %355 = arith.addf %354, %1 : vector<16x16xf32>
    %cst_176 = arith.constant dense<0xFF800000> : vector<16xf32>
    %356 = vector.multi_reduction <maximumf>, %355, %cst_176 [1] : vector<16x16xf32> to vector<16xf32>
    %357 = vector.shape_cast %356 : vector<16xf32> to vector<16x1xf32>
    %358 = vector.broadcast %357 : vector<16x1xf32> to vector<16x16xf32>
    %359 = arith.subf %355, %358 : vector<16x16xf32>
    %360 = math.exp %359 : vector<16x16xf32>
    %cst_177 = arith.constant dense<0.000000e+00> : vector<16xf32>
    %361 = vector.multi_reduction <add>, %360, %cst_177 [1] : vector<16x16xf32> to vector<16xf32>
    %362 = vector.shape_cast %361 : vector<16xf32> to vector<16x1xf32>
    %363 = tpu.reciprocal %362 {approx = true} : vector<16x1xf32> -> vector<16x1xf32>
    %364 = vector.broadcast %363 : vector<16x1xf32> to vector<16x16xf32>
    %365 = arith.mulf %360, %364 : vector<16x16xf32>
    %366 = arith.truncf %365 : vector<16x16xf32> to vector<16x16xbf16>
    %367 = arith.truncf %349 : vector<16x32xf32> to vector<16x32xbf16>
    %cst_178 = arith.constant dense<0.000000e+00> : vector<16x32xf32>
    %368 = tpu.matmul %366, %367, %cst_178 {dimension_numbers = #tpu.dot_dimension_numbers<[1], [0], [0], [1], [0, 0, 1, 1], [], []>} : vector<16x16xbf16>, vector<16x32xbf16>, vector<16x32xf32> -> vector<16x32xf32>
    %369 = arith.truncf %368 : vector<16x32xf32> to vector<16x32xbf16>
    %c5_179 = arith.constant 5 : index
    %c0_180 = arith.constant 0 : index
    %c0_181 = arith.constant 0 : index
    %370 = vector.load %arg6[%c5_179, %c0_180, %c0_181] : memref<16x32x128xbf16, #tpu.memory_space<vmem>>, vector<1x32x128xbf16>
    %371 = vector.shape_cast %370 : vector<1x32x128xbf16> to vector<32x128xbf16>
    %cst_182 = arith.constant dense<0.000000e+00> : vector<16x128xf32>
    %372 = tpu.matmul %369, %371, %cst_182 {dimension_numbers = #tpu.dot_dimension_numbers<[1], [0], [0], [1], [0, 0, 1, 1], [], []>} : vector<16x32xbf16>, vector<32x128xbf16>, vector<16x128xf32> -> vector<16x128xf32>
    %373 = arith.addf %329, %372 : vector<16x128xf32>
    %c6 = arith.constant 6 : index
    %c0_183 = arith.constant 0 : index
    %c0_184 = arith.constant 0 : index
    %374 = vector.load %arg9[%c6, %c0_183, %c0_184] : memref<16x3x32xf32, #tpu.memory_space<vmem>>, vector<1x3x32xf32>
    %375 = vector.shape_cast %374 : vector<1x3x32xf32> to vector<3x32xf32>
    %c6_185 = arith.constant 6 : index
    %c0_186 = arith.constant 0 : index
    %c0_187 = arith.constant 0 : index
    %376 = vector.load %arg3[%c6_185, %c0_186, %c0_187] : memref<16x128x32xbf16, #tpu.memory_space<vmem>>, vector<1x128x32xbf16>
    %377 = vector.shape_cast %376 : vector<1x128x32xbf16> to vector<128x32xbf16>
    %cst_188 = arith.constant dense<0.000000e+00> : vector<16x32xf32>
    %378 = tpu.matmul %286, %377, %cst_188 {dimension_numbers = #tpu.dot_dimension_numbers<[1], [0], [0], [1], [0, 0, 1, 1], [], []>} : vector<16x128xbf16>, vector<128x32xbf16>, vector<16x32xf32> -> vector<16x32xf32>
    %379 = vector.extract_strided_slice %375 {offsets = [0, 0], sizes = [1, 32], strides = [1, 1]} : vector<3x32xf32> to vector<1x32xf32>
    %380 = vector.broadcast %379 : vector<1x32xf32> to vector<16x32xf32>
    %381 = arith.addf %378, %380 : vector<16x32xf32>
    %c6_189 = arith.constant 6 : index
    %c0_190 = arith.constant 0 : index
    %c0_191 = arith.constant 0 : index
    %382 = vector.load %arg4[%c6_189, %c0_190, %c0_191] : memref<16x128x32xbf16, #tpu.memory_space<vmem>>, vector<1x128x32xbf16>
    %383 = vector.shape_cast %382 : vector<1x128x32xbf16> to vector<128x32xbf16>
    %cst_192 = arith.constant dense<0.000000e+00> : vector<16x32xf32>
    %384 = tpu.matmul %286, %383, %cst_192 {dimension_numbers = #tpu.dot_dimension_numbers<[1], [0], [0], [1], [0, 0, 1, 1], [], []>} : vector<16x128xbf16>, vector<128x32xbf16>, vector<16x32xf32> -> vector<16x32xf32>
    %385 = vector.extract_strided_slice %375 {offsets = [1, 0], sizes = [1, 32], strides = [1, 1]} : vector<3x32xf32> to vector<1x32xf32>
    %386 = vector.broadcast %385 : vector<1x32xf32> to vector<16x32xf32>
    %387 = arith.addf %384, %386 : vector<16x32xf32>
    %c6_193 = arith.constant 6 : index
    %c0_194 = arith.constant 0 : index
    %c0_195 = arith.constant 0 : index
    %388 = vector.load %arg5[%c6_193, %c0_194, %c0_195] : memref<16x128x32xbf16, #tpu.memory_space<vmem>>, vector<1x128x32xbf16>
    %389 = vector.shape_cast %388 : vector<1x128x32xbf16> to vector<128x32xbf16>
    %cst_196 = arith.constant dense<0.000000e+00> : vector<16x32xf32>
    %390 = tpu.matmul %286, %389, %cst_196 {dimension_numbers = #tpu.dot_dimension_numbers<[1], [0], [0], [1], [0, 0, 1, 1], [], []>} : vector<16x128xbf16>, vector<128x32xbf16>, vector<16x32xf32> -> vector<16x32xf32>
    %391 = vector.extract_strided_slice %375 {offsets = [2, 0], sizes = [1, 32], strides = [1, 1]} : vector<3x32xf32> to vector<1x32xf32>
    %392 = vector.broadcast %391 : vector<1x32xf32> to vector<16x32xf32>
    %393 = arith.addf %390, %392 : vector<16x32xf32>
    %394 = arith.truncf %381 : vector<16x32xf32> to vector<16x32xbf16>
    %395 = arith.truncf %387 : vector<16x32xf32> to vector<16x32xbf16>
    %cst_197 = arith.constant dense<0.000000e+00> : vector<16x16xf32>
    %396 = tpu.matmul %394, %395, %cst_197 {dimension_numbers = #tpu.dot_dimension_numbers<[1], [1], [0], [0], [0, 0, 1, 0], [], []>} : vector<16x32xbf16>, vector<16x32xbf16>, vector<16x16xf32> -> vector<16x16xf32>
    %cst_198 = arith.constant 0.176776692 : f32
    %397 = vector.broadcast %cst_198 : f32 to vector<16x16xf32>
    %398 = arith.mulf %396, %397 : vector<16x16xf32>
    %399 = arith.addf %398, %1 : vector<16x16xf32>
    %cst_199 = arith.constant dense<0xFF800000> : vector<16xf32>
    %400 = vector.multi_reduction <maximumf>, %399, %cst_199 [1] : vector<16x16xf32> to vector<16xf32>
    %401 = vector.shape_cast %400 : vector<16xf32> to vector<16x1xf32>
    %402 = vector.broadcast %401 : vector<16x1xf32> to vector<16x16xf32>
    %403 = arith.subf %399, %402 : vector<16x16xf32>
    %404 = math.exp %403 : vector<16x16xf32>
    %cst_200 = arith.constant dense<0.000000e+00> : vector<16xf32>
    %405 = vector.multi_reduction <add>, %404, %cst_200 [1] : vector<16x16xf32> to vector<16xf32>
    %406 = vector.shape_cast %405 : vector<16xf32> to vector<16x1xf32>
    %407 = tpu.reciprocal %406 {approx = true} : vector<16x1xf32> -> vector<16x1xf32>
    %408 = vector.broadcast %407 : vector<16x1xf32> to vector<16x16xf32>
    %409 = arith.mulf %404, %408 : vector<16x16xf32>
    %410 = arith.truncf %409 : vector<16x16xf32> to vector<16x16xbf16>
    %411 = arith.truncf %393 : vector<16x32xf32> to vector<16x32xbf16>
    %cst_201 = arith.constant dense<0.000000e+00> : vector<16x32xf32>
    %412 = tpu.matmul %410, %411, %cst_201 {dimension_numbers = #tpu.dot_dimension_numbers<[1], [0], [0], [1], [0, 0, 1, 1], [], []>} : vector<16x16xbf16>, vector<16x32xbf16>, vector<16x32xf32> -> vector<16x32xf32>
    %413 = arith.truncf %412 : vector<16x32xf32> to vector<16x32xbf16>
    %c6_202 = arith.constant 6 : index
    %c0_203 = arith.constant 0 : index
    %c0_204 = arith.constant 0 : index
    %414 = vector.load %arg6[%c6_202, %c0_203, %c0_204] : memref<16x32x128xbf16, #tpu.memory_space<vmem>>, vector<1x32x128xbf16>
    %415 = vector.shape_cast %414 : vector<1x32x128xbf16> to vector<32x128xbf16>
    %cst_205 = arith.constant dense<0.000000e+00> : vector<16x128xf32>
    %416 = tpu.matmul %413, %415, %cst_205 {dimension_numbers = #tpu.dot_dimension_numbers<[1], [0], [0], [1], [0, 0, 1, 1], [], []>} : vector<16x32xbf16>, vector<32x128xbf16>, vector<16x128xf32> -> vector<16x128xf32>
    %417 = arith.addf %373, %416 : vector<16x128xf32>
    %c7 = arith.constant 7 : index
    %c0_206 = arith.constant 0 : index
    %c0_207 = arith.constant 0 : index
    %418 = vector.load %arg9[%c7, %c0_206, %c0_207] : memref<16x3x32xf32, #tpu.memory_space<vmem>>, vector<1x3x32xf32>
    %419 = vector.shape_cast %418 : vector<1x3x32xf32> to vector<3x32xf32>
    %c7_208 = arith.constant 7 : index
    %c0_209 = arith.constant 0 : index
    %c0_210 = arith.constant 0 : index
    %420 = vector.load %arg3[%c7_208, %c0_209, %c0_210] : memref<16x128x32xbf16, #tpu.memory_space<vmem>>, vector<1x128x32xbf16>
    %421 = vector.shape_cast %420 : vector<1x128x32xbf16> to vector<128x32xbf16>
    %cst_211 = arith.constant dense<0.000000e+00> : vector<16x32xf32>
    %422 = tpu.matmul %286, %421, %cst_211 {dimension_numbers = #tpu.dot_dimension_numbers<[1], [0], [0], [1], [0, 0, 1, 1], [], []>} : vector<16x128xbf16>, vector<128x32xbf16>, vector<16x32xf32> -> vector<16x32xf32>
    %423 = vector.extract_strided_slice %419 {offsets = [0, 0], sizes = [1, 32], strides = [1, 1]} : vector<3x32xf32> to vector<1x32xf32>
    %424 = vector.broadcast %423 : vector<1x32xf32> to vector<16x32xf32>
    %425 = arith.addf %422, %424 : vector<16x32xf32>
    %c7_212 = arith.constant 7 : index
    %c0_213 = arith.constant 0 : index
    %c0_214 = arith.constant 0 : index
    %426 = vector.load %arg4[%c7_212, %c0_213, %c0_214] : memref<16x128x32xbf16, #tpu.memory_space<vmem>>, vector<1x128x32xbf16>
    %427 = vector.shape_cast %426 : vector<1x128x32xbf16> to vector<128x32xbf16>
    %cst_215 = arith.constant dense<0.000000e+00> : vector<16x32xf32>
    %428 = tpu.matmul %286, %427, %cst_215 {dimension_numbers = #tpu.dot_dimension_numbers<[1], [0], [0], [1], [0, 0, 1, 1], [], []>} : vector<16x128xbf16>, vector<128x32xbf16>, vector<16x32xf32> -> vector<16x32xf32>
    %429 = vector.extract_strided_slice %419 {offsets = [1, 0], sizes = [1, 32], strides = [1, 1]} : vector<3x32xf32> to vector<1x32xf32>
    %430 = vector.broadcast %429 : vector<1x32xf32> to vector<16x32xf32>
    %431 = arith.addf %428, %430 : vector<16x32xf32>
    %c7_216 = arith.constant 7 : index
    %c0_217 = arith.constant 0 : index
    %c0_218 = arith.constant 0 : index
    %432 = vector.load %arg5[%c7_216, %c0_217, %c0_218] : memref<16x128x32xbf16, #tpu.memory_space<vmem>>, vector<1x128x32xbf16>
    %433 = vector.shape_cast %432 : vector<1x128x32xbf16> to vector<128x32xbf16>
    %cst_219 = arith.constant dense<0.000000e+00> : vector<16x32xf32>
    %434 = tpu.matmul %286, %433, %cst_219 {dimension_numbers = #tpu.dot_dimension_numbers<[1], [0], [0], [1], [0, 0, 1, 1], [], []>} : vector<16x128xbf16>, vector<128x32xbf16>, vector<16x32xf32> -> vector<16x32xf32>
    %435 = vector.extract_strided_slice %419 {offsets = [2, 0], sizes = [1, 32], strides = [1, 1]} : vector<3x32xf32> to vector<1x32xf32>
    %436 = vector.broadcast %435 : vector<1x32xf32> to vector<16x32xf32>
    %437 = arith.addf %434, %436 : vector<16x32xf32>
    %438 = arith.truncf %425 : vector<16x32xf32> to vector<16x32xbf16>
    %439 = arith.truncf %431 : vector<16x32xf32> to vector<16x32xbf16>
    %cst_220 = arith.constant dense<0.000000e+00> : vector<16x16xf32>
    %440 = tpu.matmul %438, %439, %cst_220 {dimension_numbers = #tpu.dot_dimension_numbers<[1], [1], [0], [0], [0, 0, 1, 0], [], []>} : vector<16x32xbf16>, vector<16x32xbf16>, vector<16x16xf32> -> vector<16x16xf32>
    %cst_221 = arith.constant 0.176776692 : f32
    %441 = vector.broadcast %cst_221 : f32 to vector<16x16xf32>
    %442 = arith.mulf %440, %441 : vector<16x16xf32>
    %443 = arith.addf %442, %1 : vector<16x16xf32>
    %cst_222 = arith.constant dense<0xFF800000> : vector<16xf32>
    %444 = vector.multi_reduction <maximumf>, %443, %cst_222 [1] : vector<16x16xf32> to vector<16xf32>
    %445 = vector.shape_cast %444 : vector<16xf32> to vector<16x1xf32>
    %446 = vector.broadcast %445 : vector<16x1xf32> to vector<16x16xf32>
    %447 = arith.subf %443, %446 : vector<16x16xf32>
    %448 = math.exp %447 : vector<16x16xf32>
    %cst_223 = arith.constant dense<0.000000e+00> : vector<16xf32>
    %449 = vector.multi_reduction <add>, %448, %cst_223 [1] : vector<16x16xf32> to vector<16xf32>
    %450 = vector.shape_cast %449 : vector<16xf32> to vector<16x1xf32>
    %451 = tpu.reciprocal %450 {approx = true} : vector<16x1xf32> -> vector<16x1xf32>
    %452 = vector.broadcast %451 : vector<16x1xf32> to vector<16x16xf32>
    %453 = arith.mulf %448, %452 : vector<16x16xf32>
    %454 = arith.truncf %453 : vector<16x16xf32> to vector<16x16xbf16>
    %455 = arith.truncf %437 : vector<16x32xf32> to vector<16x32xbf16>
    %cst_224 = arith.constant dense<0.000000e+00> : vector<16x32xf32>
    %456 = tpu.matmul %454, %455, %cst_224 {dimension_numbers = #tpu.dot_dimension_numbers<[1], [0], [0], [1], [0, 0, 1, 1], [], []>} : vector<16x16xbf16>, vector<16x32xbf16>, vector<16x32xf32> -> vector<16x32xf32>
    %457 = arith.truncf %456 : vector<16x32xf32> to vector<16x32xbf16>
    %c7_225 = arith.constant 7 : index
    %c0_226 = arith.constant 0 : index
    %c0_227 = arith.constant 0 : index
    %458 = vector.load %arg6[%c7_225, %c0_226, %c0_227] : memref<16x32x128xbf16, #tpu.memory_space<vmem>>, vector<1x32x128xbf16>
    %459 = vector.shape_cast %458 : vector<1x32x128xbf16> to vector<32x128xbf16>
    %cst_228 = arith.constant dense<0.000000e+00> : vector<16x128xf32>
    %460 = tpu.matmul %457, %459, %cst_228 {dimension_numbers = #tpu.dot_dimension_numbers<[1], [0], [0], [1], [0, 0, 1, 1], [], []>} : vector<16x32xbf16>, vector<32x128xbf16>, vector<16x128xf32> -> vector<16x128xf32>
    %461 = arith.addf %417, %460 : vector<16x128xf32>
    %462 = vector.extract_strided_slice %285 {offsets = [0, 0], sizes = [1, 128], strides = [1, 1]} : vector<6x128xf32> to vector<1x128xf32>
    %463 = vector.broadcast %462 : vector<1x128xf32> to vector<16x128xf32>
    %464 = arith.addf %461, %463 : vector<16x128xf32>
    %465 = arith.addf %464, %283 : vector<16x128xf32>
    %466 = vector.extract_strided_slice %285 {offsets = [1, 0], sizes = [1, 128], strides = [1, 1]} : vector<6x128xf32> to vector<1x128xf32>
    %467 = vector.extract_strided_slice %285 {offsets = [2, 0], sizes = [1, 128], strides = [1, 1]} : vector<6x128xf32> to vector<1x128xf32>
    %cst_229 = arith.constant dense<0.000000e+00> : vector<16xf32>
    %468 = vector.multi_reduction <add>, %465, %cst_229 [1] : vector<16x128xf32> to vector<16xf32>
    %469 = vector.shape_cast %468 : vector<16xf32> to vector<16x1xf32>
    %cst_230 = arith.constant 1.280000e+02 : f32
    %470 = vector.broadcast %cst_230 : f32 to vector<16x1xf32>
    %471 = arith.divf %469, %470 : vector<16x1xf32>
    %472 = vector.broadcast %471 : vector<16x1xf32> to vector<16x128xf32>
    %473 = arith.subf %465, %472 : vector<16x128xf32>
    %474 = arith.mulf %473, %473 : vector<16x128xf32>
    %cst_231 = arith.constant dense<0.000000e+00> : vector<16xf32>
    %475 = vector.multi_reduction <add>, %474, %cst_231 [1] : vector<16x128xf32> to vector<16xf32>
    %476 = vector.shape_cast %475 : vector<16xf32> to vector<16x1xf32>
    %cst_232 = arith.constant 1.280000e+02 : f32
    %477 = vector.broadcast %cst_232 : f32 to vector<16x1xf32>
    %478 = arith.divf %476, %477 : vector<16x1xf32>
    %cst_233 = arith.constant 9.99999974E-6 : f32
    %479 = vector.broadcast %cst_233 : f32 to vector<16x1xf32>
    %480 = arith.addf %478, %479 : vector<16x1xf32>
    %481 = math.rsqrt %480 : vector<16x1xf32>
    %482 = vector.broadcast %481 : vector<16x1xf32> to vector<16x128xf32>
    %483 = arith.mulf %473, %482 : vector<16x128xf32>
    %484 = vector.broadcast %466 : vector<1x128xf32> to vector<16x128xf32>
    %485 = arith.mulf %483, %484 : vector<16x128xf32>
    %486 = vector.broadcast %467 : vector<1x128xf32> to vector<16x128xf32>
    %487 = arith.addf %485, %486 : vector<16x128xf32>
    %488 = arith.truncf %487 : vector<16x128xf32> to vector<16x128xbf16>
    %c1_234 = arith.constant 1 : index
    %c0_235 = arith.constant 0 : index
    %c0_236 = arith.constant 0 : index
    %489 = vector.load %arg7[%c1_234, %c0_235, %c0_236] : memref<4x128x256xbf16, #tpu.memory_space<vmem>>, vector<1x128x256xbf16>
    %490 = vector.shape_cast %489 : vector<1x128x256xbf16> to vector<128x256xbf16>
    %cst_237 = arith.constant dense<0.000000e+00> : vector<16x256xf32>
    %491 = tpu.matmul %488, %490, %cst_237 {dimension_numbers = #tpu.dot_dimension_numbers<[1], [0], [0], [1], [0, 0, 1, 1], [], []>} : vector<16x128xbf16>, vector<128x256xbf16>, vector<16x256xf32> -> vector<16x256xf32>
    %c1_238 = arith.constant 1 : index
    %c0_239 = arith.constant 0 : index
    %c0_240 = arith.constant 0 : index
    %492 = vector.load %arg10[%c1_238, %c0_239, %c0_240] : memref<4x1x256xf32, #tpu.memory_space<vmem>>, vector<1x1x256xf32>
    %493 = vector.shape_cast %492 : vector<1x1x256xf32> to vector<1x256xf32>
    %494 = vector.broadcast %493 : vector<1x256xf32> to vector<16x256xf32>
    %495 = arith.addf %491, %494 : vector<16x256xf32>
    %cst_241 = arith.constant 5.000000e-01 : f32
    %496 = vector.broadcast %cst_241 : f32 to vector<16x256xf32>
    %497 = arith.mulf %496, %495 : vector<16x256xf32>
    %cst_242 = arith.constant 4.471500e-02 : f32
    %498 = vector.broadcast %cst_242 : f32 to vector<16x256xf32>
    %499 = arith.mulf %498, %495 : vector<16x256xf32>
    %500 = arith.mulf %499, %495 : vector<16x256xf32>
    %501 = arith.mulf %500, %495 : vector<16x256xf32>
    %502 = arith.addf %495, %501 : vector<16x256xf32>
    %cst_243 = arith.constant 0.797884583 : f32
    %503 = vector.broadcast %cst_243 : f32 to vector<16x256xf32>
    %504 = arith.mulf %503, %502 : vector<16x256xf32>
    %505 = math.tanh %504 : vector<16x256xf32>
    %cst_244 = arith.constant 1.000000e+00 : f32
    %506 = vector.broadcast %cst_244 : f32 to vector<16x256xf32>
    %507 = arith.addf %506, %505 : vector<16x256xf32>
    %508 = arith.mulf %497, %507 : vector<16x256xf32>
    %509 = arith.truncf %508 : vector<16x256xf32> to vector<16x256xbf16>
    %c1_245 = arith.constant 1 : index
    %c0_246 = arith.constant 0 : index
    %c0_247 = arith.constant 0 : index
    %510 = vector.load %arg8[%c1_245, %c0_246, %c0_247] : memref<4x256x128xbf16, #tpu.memory_space<vmem>>, vector<1x256x128xbf16>
    %511 = vector.shape_cast %510 : vector<1x256x128xbf16> to vector<256x128xbf16>
    %cst_248 = arith.constant dense<0.000000e+00> : vector<16x128xf32>
    %512 = tpu.matmul %509, %511, %cst_248 {dimension_numbers = #tpu.dot_dimension_numbers<[1], [0], [0], [1], [0, 0, 1, 1], [], []>} : vector<16x256xbf16>, vector<256x128xbf16>, vector<16x128xf32> -> vector<16x128xf32>
    %513 = vector.extract_strided_slice %285 {offsets = [3, 0], sizes = [1, 128], strides = [1, 1]} : vector<6x128xf32> to vector<1x128xf32>
    %514 = vector.broadcast %513 : vector<1x128xf32> to vector<16x128xf32>
    %515 = arith.addf %512, %514 : vector<16x128xf32>
    %516 = arith.addf %515, %487 : vector<16x128xf32>
    %517 = vector.extract_strided_slice %285 {offsets = [4, 0], sizes = [1, 128], strides = [1, 1]} : vector<6x128xf32> to vector<1x128xf32>
    %518 = vector.extract_strided_slice %285 {offsets = [5, 0], sizes = [1, 128], strides = [1, 1]} : vector<6x128xf32> to vector<1x128xf32>
    %cst_249 = arith.constant dense<0.000000e+00> : vector<16xf32>
    %519 = vector.multi_reduction <add>, %516, %cst_249 [1] : vector<16x128xf32> to vector<16xf32>
    %520 = vector.shape_cast %519 : vector<16xf32> to vector<16x1xf32>
    %cst_250 = arith.constant 1.280000e+02 : f32
    %521 = vector.broadcast %cst_250 : f32 to vector<16x1xf32>
    %522 = arith.divf %520, %521 : vector<16x1xf32>
    %523 = vector.broadcast %522 : vector<16x1xf32> to vector<16x128xf32>
    %524 = arith.subf %516, %523 : vector<16x128xf32>
    %525 = arith.mulf %524, %524 : vector<16x128xf32>
    %cst_251 = arith.constant dense<0.000000e+00> : vector<16xf32>
    %526 = vector.multi_reduction <add>, %525, %cst_251 [1] : vector<16x128xf32> to vector<16xf32>
    %527 = vector.shape_cast %526 : vector<16xf32> to vector<16x1xf32>
    %cst_252 = arith.constant 1.280000e+02 : f32
    %528 = vector.broadcast %cst_252 : f32 to vector<16x1xf32>
    %529 = arith.divf %527, %528 : vector<16x1xf32>
    %cst_253 = arith.constant 9.99999974E-6 : f32
    %530 = vector.broadcast %cst_253 : f32 to vector<16x1xf32>
    %531 = arith.addf %529, %530 : vector<16x1xf32>
    %532 = math.rsqrt %531 : vector<16x1xf32>
    %533 = vector.broadcast %532 : vector<16x1xf32> to vector<16x128xf32>
    %534 = arith.mulf %524, %533 : vector<16x128xf32>
    %535 = vector.broadcast %517 : vector<1x128xf32> to vector<16x128xf32>
    %536 = arith.mulf %534, %535 : vector<16x128xf32>
    %537 = vector.broadcast %518 : vector<1x128xf32> to vector<16x128xf32>
    %538 = arith.addf %536, %537 : vector<16x128xf32>
    %c2_254 = arith.constant 2 : index
    %c0_255 = arith.constant 0 : index
    %c0_256 = arith.constant 0 : index
    %539 = vector.load %arg11[%c2_254, %c0_255, %c0_256] : memref<4x6x128xf32, #tpu.memory_space<vmem>>, vector<1x6x128xf32>
    %540 = vector.shape_cast %539 : vector<1x6x128xf32> to vector<6x128xf32>
    %541 = arith.truncf %538 : vector<16x128xf32> to vector<16x128xbf16>
    %c8 = arith.constant 8 : index
    %c0_257 = arith.constant 0 : index
    %c0_258 = arith.constant 0 : index
    %542 = vector.load %arg9[%c8, %c0_257, %c0_258] : memref<16x3x32xf32, #tpu.memory_space<vmem>>, vector<1x3x32xf32>
    %543 = vector.shape_cast %542 : vector<1x3x32xf32> to vector<3x32xf32>
    %c8_259 = arith.constant 8 : index
    %c0_260 = arith.constant 0 : index
    %c0_261 = arith.constant 0 : index
    %544 = vector.load %arg3[%c8_259, %c0_260, %c0_261] : memref<16x128x32xbf16, #tpu.memory_space<vmem>>, vector<1x128x32xbf16>
    %545 = vector.shape_cast %544 : vector<1x128x32xbf16> to vector<128x32xbf16>
    %cst_262 = arith.constant dense<0.000000e+00> : vector<16x32xf32>
    %546 = tpu.matmul %541, %545, %cst_262 {dimension_numbers = #tpu.dot_dimension_numbers<[1], [0], [0], [1], [0, 0, 1, 1], [], []>} : vector<16x128xbf16>, vector<128x32xbf16>, vector<16x32xf32> -> vector<16x32xf32>
    %547 = vector.extract_strided_slice %543 {offsets = [0, 0], sizes = [1, 32], strides = [1, 1]} : vector<3x32xf32> to vector<1x32xf32>
    %548 = vector.broadcast %547 : vector<1x32xf32> to vector<16x32xf32>
    %549 = arith.addf %546, %548 : vector<16x32xf32>
    %c8_263 = arith.constant 8 : index
    %c0_264 = arith.constant 0 : index
    %c0_265 = arith.constant 0 : index
    %550 = vector.load %arg4[%c8_263, %c0_264, %c0_265] : memref<16x128x32xbf16, #tpu.memory_space<vmem>>, vector<1x128x32xbf16>
    %551 = vector.shape_cast %550 : vector<1x128x32xbf16> to vector<128x32xbf16>
    %cst_266 = arith.constant dense<0.000000e+00> : vector<16x32xf32>
    %552 = tpu.matmul %541, %551, %cst_266 {dimension_numbers = #tpu.dot_dimension_numbers<[1], [0], [0], [1], [0, 0, 1, 1], [], []>} : vector<16x128xbf16>, vector<128x32xbf16>, vector<16x32xf32> -> vector<16x32xf32>
    %553 = vector.extract_strided_slice %543 {offsets = [1, 0], sizes = [1, 32], strides = [1, 1]} : vector<3x32xf32> to vector<1x32xf32>
    %554 = vector.broadcast %553 : vector<1x32xf32> to vector<16x32xf32>
    %555 = arith.addf %552, %554 : vector<16x32xf32>
    %c8_267 = arith.constant 8 : index
    %c0_268 = arith.constant 0 : index
    %c0_269 = arith.constant 0 : index
    %556 = vector.load %arg5[%c8_267, %c0_268, %c0_269] : memref<16x128x32xbf16, #tpu.memory_space<vmem>>, vector<1x128x32xbf16>
    %557 = vector.shape_cast %556 : vector<1x128x32xbf16> to vector<128x32xbf16>
    %cst_270 = arith.constant dense<0.000000e+00> : vector<16x32xf32>
    %558 = tpu.matmul %541, %557, %cst_270 {dimension_numbers = #tpu.dot_dimension_numbers<[1], [0], [0], [1], [0, 0, 1, 1], [], []>} : vector<16x128xbf16>, vector<128x32xbf16>, vector<16x32xf32> -> vector<16x32xf32>
    %559 = vector.extract_strided_slice %543 {offsets = [2, 0], sizes = [1, 32], strides = [1, 1]} : vector<3x32xf32> to vector<1x32xf32>
    %560 = vector.broadcast %559 : vector<1x32xf32> to vector<16x32xf32>
    %561 = arith.addf %558, %560 : vector<16x32xf32>
    %562 = arith.truncf %549 : vector<16x32xf32> to vector<16x32xbf16>
    %563 = arith.truncf %555 : vector<16x32xf32> to vector<16x32xbf16>
    %cst_271 = arith.constant dense<0.000000e+00> : vector<16x16xf32>
    %564 = tpu.matmul %562, %563, %cst_271 {dimension_numbers = #tpu.dot_dimension_numbers<[1], [1], [0], [0], [0, 0, 1, 0], [], []>} : vector<16x32xbf16>, vector<16x32xbf16>, vector<16x16xf32> -> vector<16x16xf32>
    %cst_272 = arith.constant 0.176776692 : f32
    %565 = vector.broadcast %cst_272 : f32 to vector<16x16xf32>
    %566 = arith.mulf %564, %565 : vector<16x16xf32>
    %567 = arith.addf %566, %1 : vector<16x16xf32>
    %cst_273 = arith.constant dense<0xFF800000> : vector<16xf32>
    %568 = vector.multi_reduction <maximumf>, %567, %cst_273 [1] : vector<16x16xf32> to vector<16xf32>
    %569 = vector.shape_cast %568 : vector<16xf32> to vector<16x1xf32>
    %570 = vector.broadcast %569 : vector<16x1xf32> to vector<16x16xf32>
    %571 = arith.subf %567, %570 : vector<16x16xf32>
    %572 = math.exp %571 : vector<16x16xf32>
    %cst_274 = arith.constant dense<0.000000e+00> : vector<16xf32>
    %573 = vector.multi_reduction <add>, %572, %cst_274 [1] : vector<16x16xf32> to vector<16xf32>
    %574 = vector.shape_cast %573 : vector<16xf32> to vector<16x1xf32>
    %575 = tpu.reciprocal %574 {approx = true} : vector<16x1xf32> -> vector<16x1xf32>
    %576 = vector.broadcast %575 : vector<16x1xf32> to vector<16x16xf32>
    %577 = arith.mulf %572, %576 : vector<16x16xf32>
    %578 = arith.truncf %577 : vector<16x16xf32> to vector<16x16xbf16>
    %579 = arith.truncf %561 : vector<16x32xf32> to vector<16x32xbf16>
    %cst_275 = arith.constant dense<0.000000e+00> : vector<16x32xf32>
    %580 = tpu.matmul %578, %579, %cst_275 {dimension_numbers = #tpu.dot_dimension_numbers<[1], [0], [0], [1], [0, 0, 1, 1], [], []>} : vector<16x16xbf16>, vector<16x32xbf16>, vector<16x32xf32> -> vector<16x32xf32>
    %581 = arith.truncf %580 : vector<16x32xf32> to vector<16x32xbf16>
    %c8_276 = arith.constant 8 : index
    %c0_277 = arith.constant 0 : index
    %c0_278 = arith.constant 0 : index
    %582 = vector.load %arg6[%c8_276, %c0_277, %c0_278] : memref<16x32x128xbf16, #tpu.memory_space<vmem>>, vector<1x32x128xbf16>
    %583 = vector.shape_cast %582 : vector<1x32x128xbf16> to vector<32x128xbf16>
    %cst_279 = arith.constant dense<0.000000e+00> : vector<16x128xf32>
    %584 = tpu.matmul %581, %583, %cst_279 {dimension_numbers = #tpu.dot_dimension_numbers<[1], [0], [0], [1], [0, 0, 1, 1], [], []>} : vector<16x32xbf16>, vector<32x128xbf16>, vector<16x128xf32> -> vector<16x128xf32>
    %c9 = arith.constant 9 : index
    %c0_280 = arith.constant 0 : index
    %c0_281 = arith.constant 0 : index
    %585 = vector.load %arg9[%c9, %c0_280, %c0_281] : memref<16x3x32xf32, #tpu.memory_space<vmem>>, vector<1x3x32xf32>
    %586 = vector.shape_cast %585 : vector<1x3x32xf32> to vector<3x32xf32>
    %c9_282 = arith.constant 9 : index
    %c0_283 = arith.constant 0 : index
    %c0_284 = arith.constant 0 : index
    %587 = vector.load %arg3[%c9_282, %c0_283, %c0_284] : memref<16x128x32xbf16, #tpu.memory_space<vmem>>, vector<1x128x32xbf16>
    %588 = vector.shape_cast %587 : vector<1x128x32xbf16> to vector<128x32xbf16>
    %cst_285 = arith.constant dense<0.000000e+00> : vector<16x32xf32>
    %589 = tpu.matmul %541, %588, %cst_285 {dimension_numbers = #tpu.dot_dimension_numbers<[1], [0], [0], [1], [0, 0, 1, 1], [], []>} : vector<16x128xbf16>, vector<128x32xbf16>, vector<16x32xf32> -> vector<16x32xf32>
    %590 = vector.extract_strided_slice %586 {offsets = [0, 0], sizes = [1, 32], strides = [1, 1]} : vector<3x32xf32> to vector<1x32xf32>
    %591 = vector.broadcast %590 : vector<1x32xf32> to vector<16x32xf32>
    %592 = arith.addf %589, %591 : vector<16x32xf32>
    %c9_286 = arith.constant 9 : index
    %c0_287 = arith.constant 0 : index
    %c0_288 = arith.constant 0 : index
    %593 = vector.load %arg4[%c9_286, %c0_287, %c0_288] : memref<16x128x32xbf16, #tpu.memory_space<vmem>>, vector<1x128x32xbf16>
    %594 = vector.shape_cast %593 : vector<1x128x32xbf16> to vector<128x32xbf16>
    %cst_289 = arith.constant dense<0.000000e+00> : vector<16x32xf32>
    %595 = tpu.matmul %541, %594, %cst_289 {dimension_numbers = #tpu.dot_dimension_numbers<[1], [0], [0], [1], [0, 0, 1, 1], [], []>} : vector<16x128xbf16>, vector<128x32xbf16>, vector<16x32xf32> -> vector<16x32xf32>
    %596 = vector.extract_strided_slice %586 {offsets = [1, 0], sizes = [1, 32], strides = [1, 1]} : vector<3x32xf32> to vector<1x32xf32>
    %597 = vector.broadcast %596 : vector<1x32xf32> to vector<16x32xf32>
    %598 = arith.addf %595, %597 : vector<16x32xf32>
    %c9_290 = arith.constant 9 : index
    %c0_291 = arith.constant 0 : index
    %c0_292 = arith.constant 0 : index
    %599 = vector.load %arg5[%c9_290, %c0_291, %c0_292] : memref<16x128x32xbf16, #tpu.memory_space<vmem>>, vector<1x128x32xbf16>
    %600 = vector.shape_cast %599 : vector<1x128x32xbf16> to vector<128x32xbf16>
    %cst_293 = arith.constant dense<0.000000e+00> : vector<16x32xf32>
    %601 = tpu.matmul %541, %600, %cst_293 {dimension_numbers = #tpu.dot_dimension_numbers<[1], [0], [0], [1], [0, 0, 1, 1], [], []>} : vector<16x128xbf16>, vector<128x32xbf16>, vector<16x32xf32> -> vector<16x32xf32>
    %602 = vector.extract_strided_slice %586 {offsets = [2, 0], sizes = [1, 32], strides = [1, 1]} : vector<3x32xf32> to vector<1x32xf32>
    %603 = vector.broadcast %602 : vector<1x32xf32> to vector<16x32xf32>
    %604 = arith.addf %601, %603 : vector<16x32xf32>
    %605 = arith.truncf %592 : vector<16x32xf32> to vector<16x32xbf16>
    %606 = arith.truncf %598 : vector<16x32xf32> to vector<16x32xbf16>
    %cst_294 = arith.constant dense<0.000000e+00> : vector<16x16xf32>
    %607 = tpu.matmul %605, %606, %cst_294 {dimension_numbers = #tpu.dot_dimension_numbers<[1], [1], [0], [0], [0, 0, 1, 0], [], []>} : vector<16x32xbf16>, vector<16x32xbf16>, vector<16x16xf32> -> vector<16x16xf32>
    %cst_295 = arith.constant 0.176776692 : f32
    %608 = vector.broadcast %cst_295 : f32 to vector<16x16xf32>
    %609 = arith.mulf %607, %608 : vector<16x16xf32>
    %610 = arith.addf %609, %1 : vector<16x16xf32>
    %cst_296 = arith.constant dense<0xFF800000> : vector<16xf32>
    %611 = vector.multi_reduction <maximumf>, %610, %cst_296 [1] : vector<16x16xf32> to vector<16xf32>
    %612 = vector.shape_cast %611 : vector<16xf32> to vector<16x1xf32>
    %613 = vector.broadcast %612 : vector<16x1xf32> to vector<16x16xf32>
    %614 = arith.subf %610, %613 : vector<16x16xf32>
    %615 = math.exp %614 : vector<16x16xf32>
    %cst_297 = arith.constant dense<0.000000e+00> : vector<16xf32>
    %616 = vector.multi_reduction <add>, %615, %cst_297 [1] : vector<16x16xf32> to vector<16xf32>
    %617 = vector.shape_cast %616 : vector<16xf32> to vector<16x1xf32>
    %618 = tpu.reciprocal %617 {approx = true} : vector<16x1xf32> -> vector<16x1xf32>
    %619 = vector.broadcast %618 : vector<16x1xf32> to vector<16x16xf32>
    %620 = arith.mulf %615, %619 : vector<16x16xf32>
    %621 = arith.truncf %620 : vector<16x16xf32> to vector<16x16xbf16>
    %622 = arith.truncf %604 : vector<16x32xf32> to vector<16x32xbf16>
    %cst_298 = arith.constant dense<0.000000e+00> : vector<16x32xf32>
    %623 = tpu.matmul %621, %622, %cst_298 {dimension_numbers = #tpu.dot_dimension_numbers<[1], [0], [0], [1], [0, 0, 1, 1], [], []>} : vector<16x16xbf16>, vector<16x32xbf16>, vector<16x32xf32> -> vector<16x32xf32>
    %624 = arith.truncf %623 : vector<16x32xf32> to vector<16x32xbf16>
    %c9_299 = arith.constant 9 : index
    %c0_300 = arith.constant 0 : index
    %c0_301 = arith.constant 0 : index
    %625 = vector.load %arg6[%c9_299, %c0_300, %c0_301] : memref<16x32x128xbf16, #tpu.memory_space<vmem>>, vector<1x32x128xbf16>
    %626 = vector.shape_cast %625 : vector<1x32x128xbf16> to vector<32x128xbf16>
    %cst_302 = arith.constant dense<0.000000e+00> : vector<16x128xf32>
    %627 = tpu.matmul %624, %626, %cst_302 {dimension_numbers = #tpu.dot_dimension_numbers<[1], [0], [0], [1], [0, 0, 1, 1], [], []>} : vector<16x32xbf16>, vector<32x128xbf16>, vector<16x128xf32> -> vector<16x128xf32>
    %628 = arith.addf %584, %627 : vector<16x128xf32>
    %c10 = arith.constant 10 : index
    %c0_303 = arith.constant 0 : index
    %c0_304 = arith.constant 0 : index
    %629 = vector.load %arg9[%c10, %c0_303, %c0_304] : memref<16x3x32xf32, #tpu.memory_space<vmem>>, vector<1x3x32xf32>
    %630 = vector.shape_cast %629 : vector<1x3x32xf32> to vector<3x32xf32>
    %c10_305 = arith.constant 10 : index
    %c0_306 = arith.constant 0 : index
    %c0_307 = arith.constant 0 : index
    %631 = vector.load %arg3[%c10_305, %c0_306, %c0_307] : memref<16x128x32xbf16, #tpu.memory_space<vmem>>, vector<1x128x32xbf16>
    %632 = vector.shape_cast %631 : vector<1x128x32xbf16> to vector<128x32xbf16>
    %cst_308 = arith.constant dense<0.000000e+00> : vector<16x32xf32>
    %633 = tpu.matmul %541, %632, %cst_308 {dimension_numbers = #tpu.dot_dimension_numbers<[1], [0], [0], [1], [0, 0, 1, 1], [], []>} : vector<16x128xbf16>, vector<128x32xbf16>, vector<16x32xf32> -> vector<16x32xf32>
    %634 = vector.extract_strided_slice %630 {offsets = [0, 0], sizes = [1, 32], strides = [1, 1]} : vector<3x32xf32> to vector<1x32xf32>
    %635 = vector.broadcast %634 : vector<1x32xf32> to vector<16x32xf32>
    %636 = arith.addf %633, %635 : vector<16x32xf32>
    %c10_309 = arith.constant 10 : index
    %c0_310 = arith.constant 0 : index
    %c0_311 = arith.constant 0 : index
    %637 = vector.load %arg4[%c10_309, %c0_310, %c0_311] : memref<16x128x32xbf16, #tpu.memory_space<vmem>>, vector<1x128x32xbf16>
    %638 = vector.shape_cast %637 : vector<1x128x32xbf16> to vector<128x32xbf16>
    %cst_312 = arith.constant dense<0.000000e+00> : vector<16x32xf32>
    %639 = tpu.matmul %541, %638, %cst_312 {dimension_numbers = #tpu.dot_dimension_numbers<[1], [0], [0], [1], [0, 0, 1, 1], [], []>} : vector<16x128xbf16>, vector<128x32xbf16>, vector<16x32xf32> -> vector<16x32xf32>
    %640 = vector.extract_strided_slice %630 {offsets = [1, 0], sizes = [1, 32], strides = [1, 1]} : vector<3x32xf32> to vector<1x32xf32>
    %641 = vector.broadcast %640 : vector<1x32xf32> to vector<16x32xf32>
    %642 = arith.addf %639, %641 : vector<16x32xf32>
    %c10_313 = arith.constant 10 : index
    %c0_314 = arith.constant 0 : index
    %c0_315 = arith.constant 0 : index
    %643 = vector.load %arg5[%c10_313, %c0_314, %c0_315] : memref<16x128x32xbf16, #tpu.memory_space<vmem>>, vector<1x128x32xbf16>
    %644 = vector.shape_cast %643 : vector<1x128x32xbf16> to vector<128x32xbf16>
    %cst_316 = arith.constant dense<0.000000e+00> : vector<16x32xf32>
    %645 = tpu.matmul %541, %644, %cst_316 {dimension_numbers = #tpu.dot_dimension_numbers<[1], [0], [0], [1], [0, 0, 1, 1], [], []>} : vector<16x128xbf16>, vector<128x32xbf16>, vector<16x32xf32> -> vector<16x32xf32>
    %646 = vector.extract_strided_slice %630 {offsets = [2, 0], sizes = [1, 32], strides = [1, 1]} : vector<3x32xf32> to vector<1x32xf32>
    %647 = vector.broadcast %646 : vector<1x32xf32> to vector<16x32xf32>
    %648 = arith.addf %645, %647 : vector<16x32xf32>
    %649 = arith.truncf %636 : vector<16x32xf32> to vector<16x32xbf16>
    %650 = arith.truncf %642 : vector<16x32xf32> to vector<16x32xbf16>
    %cst_317 = arith.constant dense<0.000000e+00> : vector<16x16xf32>
    %651 = tpu.matmul %649, %650, %cst_317 {dimension_numbers = #tpu.dot_dimension_numbers<[1], [1], [0], [0], [0, 0, 1, 0], [], []>} : vector<16x32xbf16>, vector<16x32xbf16>, vector<16x16xf32> -> vector<16x16xf32>
    %cst_318 = arith.constant 0.176776692 : f32
    %652 = vector.broadcast %cst_318 : f32 to vector<16x16xf32>
    %653 = arith.mulf %651, %652 : vector<16x16xf32>
    %654 = arith.addf %653, %1 : vector<16x16xf32>
    %cst_319 = arith.constant dense<0xFF800000> : vector<16xf32>
    %655 = vector.multi_reduction <maximumf>, %654, %cst_319 [1] : vector<16x16xf32> to vector<16xf32>
    %656 = vector.shape_cast %655 : vector<16xf32> to vector<16x1xf32>
    %657 = vector.broadcast %656 : vector<16x1xf32> to vector<16x16xf32>
    %658 = arith.subf %654, %657 : vector<16x16xf32>
    %659 = math.exp %658 : vector<16x16xf32>
    %cst_320 = arith.constant dense<0.000000e+00> : vector<16xf32>
    %660 = vector.multi_reduction <add>, %659, %cst_320 [1] : vector<16x16xf32> to vector<16xf32>
    %661 = vector.shape_cast %660 : vector<16xf32> to vector<16x1xf32>
    %662 = tpu.reciprocal %661 {approx = true} : vector<16x1xf32> -> vector<16x1xf32>
    %663 = vector.broadcast %662 : vector<16x1xf32> to vector<16x16xf32>
    %664 = arith.mulf %659, %663 : vector<16x16xf32>
    %665 = arith.truncf %664 : vector<16x16xf32> to vector<16x16xbf16>
    %666 = arith.truncf %648 : vector<16x32xf32> to vector<16x32xbf16>
    %cst_321 = arith.constant dense<0.000000e+00> : vector<16x32xf32>
    %667 = tpu.matmul %665, %666, %cst_321 {dimension_numbers = #tpu.dot_dimension_numbers<[1], [0], [0], [1], [0, 0, 1, 1], [], []>} : vector<16x16xbf16>, vector<16x32xbf16>, vector<16x32xf32> -> vector<16x32xf32>
    %668 = arith.truncf %667 : vector<16x32xf32> to vector<16x32xbf16>
    %c10_322 = arith.constant 10 : index
    %c0_323 = arith.constant 0 : index
    %c0_324 = arith.constant 0 : index
    %669 = vector.load %arg6[%c10_322, %c0_323, %c0_324] : memref<16x32x128xbf16, #tpu.memory_space<vmem>>, vector<1x32x128xbf16>
    %670 = vector.shape_cast %669 : vector<1x32x128xbf16> to vector<32x128xbf16>
    %cst_325 = arith.constant dense<0.000000e+00> : vector<16x128xf32>
    %671 = tpu.matmul %668, %670, %cst_325 {dimension_numbers = #tpu.dot_dimension_numbers<[1], [0], [0], [1], [0, 0, 1, 1], [], []>} : vector<16x32xbf16>, vector<32x128xbf16>, vector<16x128xf32> -> vector<16x128xf32>
    %672 = arith.addf %628, %671 : vector<16x128xf32>
    %c11 = arith.constant 11 : index
    %c0_326 = arith.constant 0 : index
    %c0_327 = arith.constant 0 : index
    %673 = vector.load %arg9[%c11, %c0_326, %c0_327] : memref<16x3x32xf32, #tpu.memory_space<vmem>>, vector<1x3x32xf32>
    %674 = vector.shape_cast %673 : vector<1x3x32xf32> to vector<3x32xf32>
    %c11_328 = arith.constant 11 : index
    %c0_329 = arith.constant 0 : index
    %c0_330 = arith.constant 0 : index
    %675 = vector.load %arg3[%c11_328, %c0_329, %c0_330] : memref<16x128x32xbf16, #tpu.memory_space<vmem>>, vector<1x128x32xbf16>
    %676 = vector.shape_cast %675 : vector<1x128x32xbf16> to vector<128x32xbf16>
    %cst_331 = arith.constant dense<0.000000e+00> : vector<16x32xf32>
    %677 = tpu.matmul %541, %676, %cst_331 {dimension_numbers = #tpu.dot_dimension_numbers<[1], [0], [0], [1], [0, 0, 1, 1], [], []>} : vector<16x128xbf16>, vector<128x32xbf16>, vector<16x32xf32> -> vector<16x32xf32>
    %678 = vector.extract_strided_slice %674 {offsets = [0, 0], sizes = [1, 32], strides = [1, 1]} : vector<3x32xf32> to vector<1x32xf32>
    %679 = vector.broadcast %678 : vector<1x32xf32> to vector<16x32xf32>
    %680 = arith.addf %677, %679 : vector<16x32xf32>
    %c11_332 = arith.constant 11 : index
    %c0_333 = arith.constant 0 : index
    %c0_334 = arith.constant 0 : index
    %681 = vector.load %arg4[%c11_332, %c0_333, %c0_334] : memref<16x128x32xbf16, #tpu.memory_space<vmem>>, vector<1x128x32xbf16>
    %682 = vector.shape_cast %681 : vector<1x128x32xbf16> to vector<128x32xbf16>
    %cst_335 = arith.constant dense<0.000000e+00> : vector<16x32xf32>
    %683 = tpu.matmul %541, %682, %cst_335 {dimension_numbers = #tpu.dot_dimension_numbers<[1], [0], [0], [1], [0, 0, 1, 1], [], []>} : vector<16x128xbf16>, vector<128x32xbf16>, vector<16x32xf32> -> vector<16x32xf32>
    %684 = vector.extract_strided_slice %674 {offsets = [1, 0], sizes = [1, 32], strides = [1, 1]} : vector<3x32xf32> to vector<1x32xf32>
    %685 = vector.broadcast %684 : vector<1x32xf32> to vector<16x32xf32>
    %686 = arith.addf %683, %685 : vector<16x32xf32>
    %c11_336 = arith.constant 11 : index
    %c0_337 = arith.constant 0 : index
    %c0_338 = arith.constant 0 : index
    %687 = vector.load %arg5[%c11_336, %c0_337, %c0_338] : memref<16x128x32xbf16, #tpu.memory_space<vmem>>, vector<1x128x32xbf16>
    %688 = vector.shape_cast %687 : vector<1x128x32xbf16> to vector<128x32xbf16>
    %cst_339 = arith.constant dense<0.000000e+00> : vector<16x32xf32>
    %689 = tpu.matmul %541, %688, %cst_339 {dimension_numbers = #tpu.dot_dimension_numbers<[1], [0], [0], [1], [0, 0, 1, 1], [], []>} : vector<16x128xbf16>, vector<128x32xbf16>, vector<16x32xf32> -> vector<16x32xf32>
    %690 = vector.extract_strided_slice %674 {offsets = [2, 0], sizes = [1, 32], strides = [1, 1]} : vector<3x32xf32> to vector<1x32xf32>
    %691 = vector.broadcast %690 : vector<1x32xf32> to vector<16x32xf32>
    %692 = arith.addf %689, %691 : vector<16x32xf32>
    %693 = arith.truncf %680 : vector<16x32xf32> to vector<16x32xbf16>
    %694 = arith.truncf %686 : vector<16x32xf32> to vector<16x32xbf16>
    %cst_340 = arith.constant dense<0.000000e+00> : vector<16x16xf32>
    %695 = tpu.matmul %693, %694, %cst_340 {dimension_numbers = #tpu.dot_dimension_numbers<[1], [1], [0], [0], [0, 0, 1, 0], [], []>} : vector<16x32xbf16>, vector<16x32xbf16>, vector<16x16xf32> -> vector<16x16xf32>
    %cst_341 = arith.constant 0.176776692 : f32
    %696 = vector.broadcast %cst_341 : f32 to vector<16x16xf32>
    %697 = arith.mulf %695, %696 : vector<16x16xf32>
    %698 = arith.addf %697, %1 : vector<16x16xf32>
    %cst_342 = arith.constant dense<0xFF800000> : vector<16xf32>
    %699 = vector.multi_reduction <maximumf>, %698, %cst_342 [1] : vector<16x16xf32> to vector<16xf32>
    %700 = vector.shape_cast %699 : vector<16xf32> to vector<16x1xf32>
    %701 = vector.broadcast %700 : vector<16x1xf32> to vector<16x16xf32>
    %702 = arith.subf %698, %701 : vector<16x16xf32>
    %703 = math.exp %702 : vector<16x16xf32>
    %cst_343 = arith.constant dense<0.000000e+00> : vector<16xf32>
    %704 = vector.multi_reduction <add>, %703, %cst_343 [1] : vector<16x16xf32> to vector<16xf32>
    %705 = vector.shape_cast %704 : vector<16xf32> to vector<16x1xf32>
    %706 = tpu.reciprocal %705 {approx = true} : vector<16x1xf32> -> vector<16x1xf32>
    %707 = vector.broadcast %706 : vector<16x1xf32> to vector<16x16xf32>
    %708 = arith.mulf %703, %707 : vector<16x16xf32>
    %709 = arith.truncf %708 : vector<16x16xf32> to vector<16x16xbf16>
    %710 = arith.truncf %692 : vector<16x32xf32> to vector<16x32xbf16>
    %cst_344 = arith.constant dense<0.000000e+00> : vector<16x32xf32>
    %711 = tpu.matmul %709, %710, %cst_344 {dimension_numbers = #tpu.dot_dimension_numbers<[1], [0], [0], [1], [0, 0, 1, 1], [], []>} : vector<16x16xbf16>, vector<16x32xbf16>, vector<16x32xf32> -> vector<16x32xf32>
    %712 = arith.truncf %711 : vector<16x32xf32> to vector<16x32xbf16>
    %c11_345 = arith.constant 11 : index
    %c0_346 = arith.constant 0 : index
    %c0_347 = arith.constant 0 : index
    %713 = vector.load %arg6[%c11_345, %c0_346, %c0_347] : memref<16x32x128xbf16, #tpu.memory_space<vmem>>, vector<1x32x128xbf16>
    %714 = vector.shape_cast %713 : vector<1x32x128xbf16> to vector<32x128xbf16>
    %cst_348 = arith.constant dense<0.000000e+00> : vector<16x128xf32>
    %715 = tpu.matmul %712, %714, %cst_348 {dimension_numbers = #tpu.dot_dimension_numbers<[1], [0], [0], [1], [0, 0, 1, 1], [], []>} : vector<16x32xbf16>, vector<32x128xbf16>, vector<16x128xf32> -> vector<16x128xf32>
    %716 = arith.addf %672, %715 : vector<16x128xf32>
    %717 = vector.extract_strided_slice %540 {offsets = [0, 0], sizes = [1, 128], strides = [1, 1]} : vector<6x128xf32> to vector<1x128xf32>
    %718 = vector.broadcast %717 : vector<1x128xf32> to vector<16x128xf32>
    %719 = arith.addf %716, %718 : vector<16x128xf32>
    %720 = arith.addf %719, %538 : vector<16x128xf32>
    %721 = vector.extract_strided_slice %540 {offsets = [1, 0], sizes = [1, 128], strides = [1, 1]} : vector<6x128xf32> to vector<1x128xf32>
    %722 = vector.extract_strided_slice %540 {offsets = [2, 0], sizes = [1, 128], strides = [1, 1]} : vector<6x128xf32> to vector<1x128xf32>
    %cst_349 = arith.constant dense<0.000000e+00> : vector<16xf32>
    %723 = vector.multi_reduction <add>, %720, %cst_349 [1] : vector<16x128xf32> to vector<16xf32>
    %724 = vector.shape_cast %723 : vector<16xf32> to vector<16x1xf32>
    %cst_350 = arith.constant 1.280000e+02 : f32
    %725 = vector.broadcast %cst_350 : f32 to vector<16x1xf32>
    %726 = arith.divf %724, %725 : vector<16x1xf32>
    %727 = vector.broadcast %726 : vector<16x1xf32> to vector<16x128xf32>
    %728 = arith.subf %720, %727 : vector<16x128xf32>
    %729 = arith.mulf %728, %728 : vector<16x128xf32>
    %cst_351 = arith.constant dense<0.000000e+00> : vector<16xf32>
    %730 = vector.multi_reduction <add>, %729, %cst_351 [1] : vector<16x128xf32> to vector<16xf32>
    %731 = vector.shape_cast %730 : vector<16xf32> to vector<16x1xf32>
    %cst_352 = arith.constant 1.280000e+02 : f32
    %732 = vector.broadcast %cst_352 : f32 to vector<16x1xf32>
    %733 = arith.divf %731, %732 : vector<16x1xf32>
    %cst_353 = arith.constant 9.99999974E-6 : f32
    %734 = vector.broadcast %cst_353 : f32 to vector<16x1xf32>
    %735 = arith.addf %733, %734 : vector<16x1xf32>
    %736 = math.rsqrt %735 : vector<16x1xf32>
    %737 = vector.broadcast %736 : vector<16x1xf32> to vector<16x128xf32>
    %738 = arith.mulf %728, %737 : vector<16x128xf32>
    %739 = vector.broadcast %721 : vector<1x128xf32> to vector<16x128xf32>
    %740 = arith.mulf %738, %739 : vector<16x128xf32>
    %741 = vector.broadcast %722 : vector<1x128xf32> to vector<16x128xf32>
    %742 = arith.addf %740, %741 : vector<16x128xf32>
    %743 = arith.truncf %742 : vector<16x128xf32> to vector<16x128xbf16>
    %c2_354 = arith.constant 2 : index
    %c0_355 = arith.constant 0 : index
    %c0_356 = arith.constant 0 : index
    %744 = vector.load %arg7[%c2_354, %c0_355, %c0_356] : memref<4x128x256xbf16, #tpu.memory_space<vmem>>, vector<1x128x256xbf16>
    %745 = vector.shape_cast %744 : vector<1x128x256xbf16> to vector<128x256xbf16>
    %cst_357 = arith.constant dense<0.000000e+00> : vector<16x256xf32>
    %746 = tpu.matmul %743, %745, %cst_357 {dimension_numbers = #tpu.dot_dimension_numbers<[1], [0], [0], [1], [0, 0, 1, 1], [], []>} : vector<16x128xbf16>, vector<128x256xbf16>, vector<16x256xf32> -> vector<16x256xf32>
    %c2_358 = arith.constant 2 : index
    %c0_359 = arith.constant 0 : index
    %c0_360 = arith.constant 0 : index
    %747 = vector.load %arg10[%c2_358, %c0_359, %c0_360] : memref<4x1x256xf32, #tpu.memory_space<vmem>>, vector<1x1x256xf32>
    %748 = vector.shape_cast %747 : vector<1x1x256xf32> to vector<1x256xf32>
    %749 = vector.broadcast %748 : vector<1x256xf32> to vector<16x256xf32>
    %750 = arith.addf %746, %749 : vector<16x256xf32>
    %cst_361 = arith.constant 5.000000e-01 : f32
    %751 = vector.broadcast %cst_361 : f32 to vector<16x256xf32>
    %752 = arith.mulf %751, %750 : vector<16x256xf32>
    %cst_362 = arith.constant 4.471500e-02 : f32
    %753 = vector.broadcast %cst_362 : f32 to vector<16x256xf32>
    %754 = arith.mulf %753, %750 : vector<16x256xf32>
    %755 = arith.mulf %754, %750 : vector<16x256xf32>
    %756 = arith.mulf %755, %750 : vector<16x256xf32>
    %757 = arith.addf %750, %756 : vector<16x256xf32>
    %cst_363 = arith.constant 0.797884583 : f32
    %758 = vector.broadcast %cst_363 : f32 to vector<16x256xf32>
    %759 = arith.mulf %758, %757 : vector<16x256xf32>
    %760 = math.tanh %759 : vector<16x256xf32>
    %cst_364 = arith.constant 1.000000e+00 : f32
    %761 = vector.broadcast %cst_364 : f32 to vector<16x256xf32>
    %762 = arith.addf %761, %760 : vector<16x256xf32>
    %763 = arith.mulf %752, %762 : vector<16x256xf32>
    %764 = arith.truncf %763 : vector<16x256xf32> to vector<16x256xbf16>
    %c2_365 = arith.constant 2 : index
    %c0_366 = arith.constant 0 : index
    %c0_367 = arith.constant 0 : index
    %765 = vector.load %arg8[%c2_365, %c0_366, %c0_367] : memref<4x256x128xbf16, #tpu.memory_space<vmem>>, vector<1x256x128xbf16>
    %766 = vector.shape_cast %765 : vector<1x256x128xbf16> to vector<256x128xbf16>
    %cst_368 = arith.constant dense<0.000000e+00> : vector<16x128xf32>
    %767 = tpu.matmul %764, %766, %cst_368 {dimension_numbers = #tpu.dot_dimension_numbers<[1], [0], [0], [1], [0, 0, 1, 1], [], []>} : vector<16x256xbf16>, vector<256x128xbf16>, vector<16x128xf32> -> vector<16x128xf32>
    %768 = vector.extract_strided_slice %540 {offsets = [3, 0], sizes = [1, 128], strides = [1, 1]} : vector<6x128xf32> to vector<1x128xf32>
    %769 = vector.broadcast %768 : vector<1x128xf32> to vector<16x128xf32>
    %770 = arith.addf %767, %769 : vector<16x128xf32>
    %771 = arith.addf %770, %742 : vector<16x128xf32>
    %772 = vector.extract_strided_slice %540 {offsets = [4, 0], sizes = [1, 128], strides = [1, 1]} : vector<6x128xf32> to vector<1x128xf32>
    %773 = vector.extract_strided_slice %540 {offsets = [5, 0], sizes = [1, 128], strides = [1, 1]} : vector<6x128xf32> to vector<1x128xf32>
    %cst_369 = arith.constant dense<0.000000e+00> : vector<16xf32>
    %774 = vector.multi_reduction <add>, %771, %cst_369 [1] : vector<16x128xf32> to vector<16xf32>
    %775 = vector.shape_cast %774 : vector<16xf32> to vector<16x1xf32>
    %cst_370 = arith.constant 1.280000e+02 : f32
    %776 = vector.broadcast %cst_370 : f32 to vector<16x1xf32>
    %777 = arith.divf %775, %776 : vector<16x1xf32>
    %778 = vector.broadcast %777 : vector<16x1xf32> to vector<16x128xf32>
    %779 = arith.subf %771, %778 : vector<16x128xf32>
    %780 = arith.mulf %779, %779 : vector<16x128xf32>
    %cst_371 = arith.constant dense<0.000000e+00> : vector<16xf32>
    %781 = vector.multi_reduction <add>, %780, %cst_371 [1] : vector<16x128xf32> to vector<16xf32>
    %782 = vector.shape_cast %781 : vector<16xf32> to vector<16x1xf32>
    %cst_372 = arith.constant 1.280000e+02 : f32
    %783 = vector.broadcast %cst_372 : f32 to vector<16x1xf32>
    %784 = arith.divf %782, %783 : vector<16x1xf32>
    %cst_373 = arith.constant 9.99999974E-6 : f32
    %785 = vector.broadcast %cst_373 : f32 to vector<16x1xf32>
    %786 = arith.addf %784, %785 : vector<16x1xf32>
    %787 = math.rsqrt %786 : vector<16x1xf32>
    %788 = vector.broadcast %787 : vector<16x1xf32> to vector<16x128xf32>
    %789 = arith.mulf %779, %788 : vector<16x128xf32>
    %790 = vector.broadcast %772 : vector<1x128xf32> to vector<16x128xf32>
    %791 = arith.mulf %789, %790 : vector<16x128xf32>
    %792 = vector.broadcast %773 : vector<1x128xf32> to vector<16x128xf32>
    %793 = arith.addf %791, %792 : vector<16x128xf32>
    %794 = arith.truncf %793 : vector<16x128xf32> to vector<16x128xbf16>
    %c1_374 = arith.constant 1 : index
    %c0_375 = arith.constant 0 : index
    %c0_376 = arith.constant 0 : index
    %795 = vector.load %arg12[%c1_374, %c0_375, %c0_376] : memref<5x128x128xbf16, #tpu.memory_space<vmem>>, vector<1x128x128xbf16>
    %796 = vector.shape_cast %795 : vector<1x128x128xbf16> to vector<128x128xbf16>
    %cst_377 = arith.constant dense<0.000000e+00> : vector<16x128xf32>
    %797 = tpu.matmul %794, %796, %cst_377 {dimension_numbers = #tpu.dot_dimension_numbers<[1], [0], [0], [1], [0, 0, 1, 1], [], []>} : vector<16x128xbf16>, vector<128x128xbf16>, vector<16x128xf32> -> vector<16x128xf32>
    %798 = vector.extract_strided_slice %2 {offsets = [2, 0], sizes = [1, 128], strides = [1, 1]} : vector<6x128xf32> to vector<1x128xf32>
    %799 = vector.broadcast %798 : vector<1x128xf32> to vector<16x128xf32>
    %800 = arith.addf %797, %799 : vector<16x128xf32>
    %801 = arith.truncf %800 : vector<16x128xf32> to vector<16x128xbf16>
    %c2_378 = arith.constant 2 : index
    %c0_379 = arith.constant 0 : index
    %c0_380 = arith.constant 0 : index
    %802 = vector.load %arg12[%c2_378, %c0_379, %c0_380] : memref<5x128x128xbf16, #tpu.memory_space<vmem>>, vector<1x128x128xbf16>
    %803 = vector.shape_cast %802 : vector<1x128x128xbf16> to vector<128x128xbf16>
    %cst_381 = arith.constant dense<0.000000e+00> : vector<16x128xf32>
    %804 = tpu.matmul %801, %803, %cst_381 {dimension_numbers = #tpu.dot_dimension_numbers<[1], [0], [0], [1], [0, 0, 1, 1], [], []>} : vector<16x128xbf16>, vector<128x128xbf16>, vector<16x128xf32> -> vector<16x128xf32>
    %805 = vector.extract_strided_slice %2 {offsets = [3, 0], sizes = [1, 128], strides = [1, 1]} : vector<6x128xf32> to vector<1x128xf32>
    %806 = vector.broadcast %805 : vector<1x128xf32> to vector<16x128xf32>
    %807 = arith.addf %804, %806 : vector<16x128xf32>
    %c3_382 = arith.constant 3 : index
    %c0_383 = arith.constant 0 : index
    %c0_384 = arith.constant 0 : index
    %808 = vector.load %arg11[%c3_382, %c0_383, %c0_384] : memref<4x6x128xf32, #tpu.memory_space<vmem>>, vector<1x6x128xf32>
    %809 = vector.shape_cast %808 : vector<1x6x128xf32> to vector<6x128xf32>
    %810 = arith.truncf %807 : vector<16x128xf32> to vector<16x128xbf16>
    %c12 = arith.constant 12 : index
    %c0_385 = arith.constant 0 : index
    %c0_386 = arith.constant 0 : index
    %811 = vector.load %arg9[%c12, %c0_385, %c0_386] : memref<16x3x32xf32, #tpu.memory_space<vmem>>, vector<1x3x32xf32>
    %812 = vector.shape_cast %811 : vector<1x3x32xf32> to vector<3x32xf32>
    %c12_387 = arith.constant 12 : index
    %c0_388 = arith.constant 0 : index
    %c0_389 = arith.constant 0 : index
    %813 = vector.load %arg3[%c12_387, %c0_388, %c0_389] : memref<16x128x32xbf16, #tpu.memory_space<vmem>>, vector<1x128x32xbf16>
    %814 = vector.shape_cast %813 : vector<1x128x32xbf16> to vector<128x32xbf16>
    %cst_390 = arith.constant dense<0.000000e+00> : vector<16x32xf32>
    %815 = tpu.matmul %810, %814, %cst_390 {dimension_numbers = #tpu.dot_dimension_numbers<[1], [0], [0], [1], [0, 0, 1, 1], [], []>} : vector<16x128xbf16>, vector<128x32xbf16>, vector<16x32xf32> -> vector<16x32xf32>
    %816 = vector.extract_strided_slice %812 {offsets = [0, 0], sizes = [1, 32], strides = [1, 1]} : vector<3x32xf32> to vector<1x32xf32>
    %817 = vector.broadcast %816 : vector<1x32xf32> to vector<16x32xf32>
    %818 = arith.addf %815, %817 : vector<16x32xf32>
    %c12_391 = arith.constant 12 : index
    %c0_392 = arith.constant 0 : index
    %c0_393 = arith.constant 0 : index
    %819 = vector.load %arg4[%c12_391, %c0_392, %c0_393] : memref<16x128x32xbf16, #tpu.memory_space<vmem>>, vector<1x128x32xbf16>
    %820 = vector.shape_cast %819 : vector<1x128x32xbf16> to vector<128x32xbf16>
    %cst_394 = arith.constant dense<0.000000e+00> : vector<16x32xf32>
    %821 = tpu.matmul %810, %820, %cst_394 {dimension_numbers = #tpu.dot_dimension_numbers<[1], [0], [0], [1], [0, 0, 1, 1], [], []>} : vector<16x128xbf16>, vector<128x32xbf16>, vector<16x32xf32> -> vector<16x32xf32>
    %822 = vector.extract_strided_slice %812 {offsets = [1, 0], sizes = [1, 32], strides = [1, 1]} : vector<3x32xf32> to vector<1x32xf32>
    %823 = vector.broadcast %822 : vector<1x32xf32> to vector<16x32xf32>
    %824 = arith.addf %821, %823 : vector<16x32xf32>
    %c12_395 = arith.constant 12 : index
    %c0_396 = arith.constant 0 : index
    %c0_397 = arith.constant 0 : index
    %825 = vector.load %arg5[%c12_395, %c0_396, %c0_397] : memref<16x128x32xbf16, #tpu.memory_space<vmem>>, vector<1x128x32xbf16>
    %826 = vector.shape_cast %825 : vector<1x128x32xbf16> to vector<128x32xbf16>
    %cst_398 = arith.constant dense<0.000000e+00> : vector<16x32xf32>
    %827 = tpu.matmul %810, %826, %cst_398 {dimension_numbers = #tpu.dot_dimension_numbers<[1], [0], [0], [1], [0, 0, 1, 1], [], []>} : vector<16x128xbf16>, vector<128x32xbf16>, vector<16x32xf32> -> vector<16x32xf32>
    %828 = vector.extract_strided_slice %812 {offsets = [2, 0], sizes = [1, 32], strides = [1, 1]} : vector<3x32xf32> to vector<1x32xf32>
    %829 = vector.broadcast %828 : vector<1x32xf32> to vector<16x32xf32>
    %830 = arith.addf %827, %829 : vector<16x32xf32>
    %831 = arith.truncf %818 : vector<16x32xf32> to vector<16x32xbf16>
    %832 = arith.truncf %824 : vector<16x32xf32> to vector<16x32xbf16>
    %cst_399 = arith.constant dense<0.000000e+00> : vector<16x16xf32>
    %833 = tpu.matmul %831, %832, %cst_399 {dimension_numbers = #tpu.dot_dimension_numbers<[1], [1], [0], [0], [0, 0, 1, 0], [], []>} : vector<16x32xbf16>, vector<16x32xbf16>, vector<16x16xf32> -> vector<16x16xf32>
    %cst_400 = arith.constant 0.176776692 : f32
    %834 = vector.broadcast %cst_400 : f32 to vector<16x16xf32>
    %835 = arith.mulf %833, %834 : vector<16x16xf32>
    %836 = arith.addf %835, %1 : vector<16x16xf32>
    %cst_401 = arith.constant dense<0xFF800000> : vector<16xf32>
    %837 = vector.multi_reduction <maximumf>, %836, %cst_401 [1] : vector<16x16xf32> to vector<16xf32>
    %838 = vector.shape_cast %837 : vector<16xf32> to vector<16x1xf32>
    %839 = vector.broadcast %838 : vector<16x1xf32> to vector<16x16xf32>
    %840 = arith.subf %836, %839 : vector<16x16xf32>
    %841 = math.exp %840 : vector<16x16xf32>
    %cst_402 = arith.constant dense<0.000000e+00> : vector<16xf32>
    %842 = vector.multi_reduction <add>, %841, %cst_402 [1] : vector<16x16xf32> to vector<16xf32>
    %843 = vector.shape_cast %842 : vector<16xf32> to vector<16x1xf32>
    %844 = tpu.reciprocal %843 {approx = true} : vector<16x1xf32> -> vector<16x1xf32>
    %845 = vector.broadcast %844 : vector<16x1xf32> to vector<16x16xf32>
    %846 = arith.mulf %841, %845 : vector<16x16xf32>
    %847 = arith.truncf %846 : vector<16x16xf32> to vector<16x16xbf16>
    %848 = arith.truncf %830 : vector<16x32xf32> to vector<16x32xbf16>
    %cst_403 = arith.constant dense<0.000000e+00> : vector<16x32xf32>
    %849 = tpu.matmul %847, %848, %cst_403 {dimension_numbers = #tpu.dot_dimension_numbers<[1], [0], [0], [1], [0, 0, 1, 1], [], []>} : vector<16x16xbf16>, vector<16x32xbf16>, vector<16x32xf32> -> vector<16x32xf32>
    %850 = arith.truncf %849 : vector<16x32xf32> to vector<16x32xbf16>
    %c12_404 = arith.constant 12 : index
    %c0_405 = arith.constant 0 : index
    %c0_406 = arith.constant 0 : index
    %851 = vector.load %arg6[%c12_404, %c0_405, %c0_406] : memref<16x32x128xbf16, #tpu.memory_space<vmem>>, vector<1x32x128xbf16>
    %852 = vector.shape_cast %851 : vector<1x32x128xbf16> to vector<32x128xbf16>
    %cst_407 = arith.constant dense<0.000000e+00> : vector<16x128xf32>
    %853 = tpu.matmul %850, %852, %cst_407 {dimension_numbers = #tpu.dot_dimension_numbers<[1], [0], [0], [1], [0, 0, 1, 1], [], []>} : vector<16x32xbf16>, vector<32x128xbf16>, vector<16x128xf32> -> vector<16x128xf32>
    %c13 = arith.constant 13 : index
    %c0_408 = arith.constant 0 : index
    %c0_409 = arith.constant 0 : index
    %854 = vector.load %arg9[%c13, %c0_408, %c0_409] : memref<16x3x32xf32, #tpu.memory_space<vmem>>, vector<1x3x32xf32>
    %855 = vector.shape_cast %854 : vector<1x3x32xf32> to vector<3x32xf32>
    %c13_410 = arith.constant 13 : index
    %c0_411 = arith.constant 0 : index
    %c0_412 = arith.constant 0 : index
    %856 = vector.load %arg3[%c13_410, %c0_411, %c0_412] : memref<16x128x32xbf16, #tpu.memory_space<vmem>>, vector<1x128x32xbf16>
    %857 = vector.shape_cast %856 : vector<1x128x32xbf16> to vector<128x32xbf16>
    %cst_413 = arith.constant dense<0.000000e+00> : vector<16x32xf32>
    %858 = tpu.matmul %810, %857, %cst_413 {dimension_numbers = #tpu.dot_dimension_numbers<[1], [0], [0], [1], [0, 0, 1, 1], [], []>} : vector<16x128xbf16>, vector<128x32xbf16>, vector<16x32xf32> -> vector<16x32xf32>
    %859 = vector.extract_strided_slice %855 {offsets = [0, 0], sizes = [1, 32], strides = [1, 1]} : vector<3x32xf32> to vector<1x32xf32>
    %860 = vector.broadcast %859 : vector<1x32xf32> to vector<16x32xf32>
    %861 = arith.addf %858, %860 : vector<16x32xf32>
    %c13_414 = arith.constant 13 : index
    %c0_415 = arith.constant 0 : index
    %c0_416 = arith.constant 0 : index
    %862 = vector.load %arg4[%c13_414, %c0_415, %c0_416] : memref<16x128x32xbf16, #tpu.memory_space<vmem>>, vector<1x128x32xbf16>
    %863 = vector.shape_cast %862 : vector<1x128x32xbf16> to vector<128x32xbf16>
    %cst_417 = arith.constant dense<0.000000e+00> : vector<16x32xf32>
    %864 = tpu.matmul %810, %863, %cst_417 {dimension_numbers = #tpu.dot_dimension_numbers<[1], [0], [0], [1], [0, 0, 1, 1], [], []>} : vector<16x128xbf16>, vector<128x32xbf16>, vector<16x32xf32> -> vector<16x32xf32>
    %865 = vector.extract_strided_slice %855 {offsets = [1, 0], sizes = [1, 32], strides = [1, 1]} : vector<3x32xf32> to vector<1x32xf32>
    %866 = vector.broadcast %865 : vector<1x32xf32> to vector<16x32xf32>
    %867 = arith.addf %864, %866 : vector<16x32xf32>
    %c13_418 = arith.constant 13 : index
    %c0_419 = arith.constant 0 : index
    %c0_420 = arith.constant 0 : index
    %868 = vector.load %arg5[%c13_418, %c0_419, %c0_420] : memref<16x128x32xbf16, #tpu.memory_space<vmem>>, vector<1x128x32xbf16>
    %869 = vector.shape_cast %868 : vector<1x128x32xbf16> to vector<128x32xbf16>
    %cst_421 = arith.constant dense<0.000000e+00> : vector<16x32xf32>
    %870 = tpu.matmul %810, %869, %cst_421 {dimension_numbers = #tpu.dot_dimension_numbers<[1], [0], [0], [1], [0, 0, 1, 1], [], []>} : vector<16x128xbf16>, vector<128x32xbf16>, vector<16x32xf32> -> vector<16x32xf32>
    %871 = vector.extract_strided_slice %855 {offsets = [2, 0], sizes = [1, 32], strides = [1, 1]} : vector<3x32xf32> to vector<1x32xf32>
    %872 = vector.broadcast %871 : vector<1x32xf32> to vector<16x32xf32>
    %873 = arith.addf %870, %872 : vector<16x32xf32>
    %874 = arith.truncf %861 : vector<16x32xf32> to vector<16x32xbf16>
    %875 = arith.truncf %867 : vector<16x32xf32> to vector<16x32xbf16>
    %cst_422 = arith.constant dense<0.000000e+00> : vector<16x16xf32>
    %876 = tpu.matmul %874, %875, %cst_422 {dimension_numbers = #tpu.dot_dimension_numbers<[1], [1], [0], [0], [0, 0, 1, 0], [], []>} : vector<16x32xbf16>, vector<16x32xbf16>, vector<16x16xf32> -> vector<16x16xf32>
    %cst_423 = arith.constant 0.176776692 : f32
    %877 = vector.broadcast %cst_423 : f32 to vector<16x16xf32>
    %878 = arith.mulf %876, %877 : vector<16x16xf32>
    %879 = arith.addf %878, %1 : vector<16x16xf32>
    %cst_424 = arith.constant dense<0xFF800000> : vector<16xf32>
    %880 = vector.multi_reduction <maximumf>, %879, %cst_424 [1] : vector<16x16xf32> to vector<16xf32>
    %881 = vector.shape_cast %880 : vector<16xf32> to vector<16x1xf32>
    %882 = vector.broadcast %881 : vector<16x1xf32> to vector<16x16xf32>
    %883 = arith.subf %879, %882 : vector<16x16xf32>
    %884 = math.exp %883 : vector<16x16xf32>
    %cst_425 = arith.constant dense<0.000000e+00> : vector<16xf32>
    %885 = vector.multi_reduction <add>, %884, %cst_425 [1] : vector<16x16xf32> to vector<16xf32>
    %886 = vector.shape_cast %885 : vector<16xf32> to vector<16x1xf32>
    %887 = tpu.reciprocal %886 {approx = true} : vector<16x1xf32> -> vector<16x1xf32>
    %888 = vector.broadcast %887 : vector<16x1xf32> to vector<16x16xf32>
    %889 = arith.mulf %884, %888 : vector<16x16xf32>
    %890 = arith.truncf %889 : vector<16x16xf32> to vector<16x16xbf16>
    %891 = arith.truncf %873 : vector<16x32xf32> to vector<16x32xbf16>
    %cst_426 = arith.constant dense<0.000000e+00> : vector<16x32xf32>
    %892 = tpu.matmul %890, %891, %cst_426 {dimension_numbers = #tpu.dot_dimension_numbers<[1], [0], [0], [1], [0, 0, 1, 1], [], []>} : vector<16x16xbf16>, vector<16x32xbf16>, vector<16x32xf32> -> vector<16x32xf32>
    %893 = arith.truncf %892 : vector<16x32xf32> to vector<16x32xbf16>
    %c13_427 = arith.constant 13 : index
    %c0_428 = arith.constant 0 : index
    %c0_429 = arith.constant 0 : index
    %894 = vector.load %arg6[%c13_427, %c0_428, %c0_429] : memref<16x32x128xbf16, #tpu.memory_space<vmem>>, vector<1x32x128xbf16>
    %895 = vector.shape_cast %894 : vector<1x32x128xbf16> to vector<32x128xbf16>
    %cst_430 = arith.constant dense<0.000000e+00> : vector<16x128xf32>
    %896 = tpu.matmul %893, %895, %cst_430 {dimension_numbers = #tpu.dot_dimension_numbers<[1], [0], [0], [1], [0, 0, 1, 1], [], []>} : vector<16x32xbf16>, vector<32x128xbf16>, vector<16x128xf32> -> vector<16x128xf32>
    %897 = arith.addf %853, %896 : vector<16x128xf32>
    %c14 = arith.constant 14 : index
    %c0_431 = arith.constant 0 : index
    %c0_432 = arith.constant 0 : index
    %898 = vector.load %arg9[%c14, %c0_431, %c0_432] : memref<16x3x32xf32, #tpu.memory_space<vmem>>, vector<1x3x32xf32>
    %899 = vector.shape_cast %898 : vector<1x3x32xf32> to vector<3x32xf32>
    %c14_433 = arith.constant 14 : index
    %c0_434 = arith.constant 0 : index
    %c0_435 = arith.constant 0 : index
    %900 = vector.load %arg3[%c14_433, %c0_434, %c0_435] : memref<16x128x32xbf16, #tpu.memory_space<vmem>>, vector<1x128x32xbf16>
    %901 = vector.shape_cast %900 : vector<1x128x32xbf16> to vector<128x32xbf16>
    %cst_436 = arith.constant dense<0.000000e+00> : vector<16x32xf32>
    %902 = tpu.matmul %810, %901, %cst_436 {dimension_numbers = #tpu.dot_dimension_numbers<[1], [0], [0], [1], [0, 0, 1, 1], [], []>} : vector<16x128xbf16>, vector<128x32xbf16>, vector<16x32xf32> -> vector<16x32xf32>
    %903 = vector.extract_strided_slice %899 {offsets = [0, 0], sizes = [1, 32], strides = [1, 1]} : vector<3x32xf32> to vector<1x32xf32>
    %904 = vector.broadcast %903 : vector<1x32xf32> to vector<16x32xf32>
    %905 = arith.addf %902, %904 : vector<16x32xf32>
    %c14_437 = arith.constant 14 : index
    %c0_438 = arith.constant 0 : index
    %c0_439 = arith.constant 0 : index
    %906 = vector.load %arg4[%c14_437, %c0_438, %c0_439] : memref<16x128x32xbf16, #tpu.memory_space<vmem>>, vector<1x128x32xbf16>
    %907 = vector.shape_cast %906 : vector<1x128x32xbf16> to vector<128x32xbf16>
    %cst_440 = arith.constant dense<0.000000e+00> : vector<16x32xf32>
    %908 = tpu.matmul %810, %907, %cst_440 {dimension_numbers = #tpu.dot_dimension_numbers<[1], [0], [0], [1], [0, 0, 1, 1], [], []>} : vector<16x128xbf16>, vector<128x32xbf16>, vector<16x32xf32> -> vector<16x32xf32>
    %909 = vector.extract_strided_slice %899 {offsets = [1, 0], sizes = [1, 32], strides = [1, 1]} : vector<3x32xf32> to vector<1x32xf32>
    %910 = vector.broadcast %909 : vector<1x32xf32> to vector<16x32xf32>
    %911 = arith.addf %908, %910 : vector<16x32xf32>
    %c14_441 = arith.constant 14 : index
    %c0_442 = arith.constant 0 : index
    %c0_443 = arith.constant 0 : index
    %912 = vector.load %arg5[%c14_441, %c0_442, %c0_443] : memref<16x128x32xbf16, #tpu.memory_space<vmem>>, vector<1x128x32xbf16>
    %913 = vector.shape_cast %912 : vector<1x128x32xbf16> to vector<128x32xbf16>
    %cst_444 = arith.constant dense<0.000000e+00> : vector<16x32xf32>
    %914 = tpu.matmul %810, %913, %cst_444 {dimension_numbers = #tpu.dot_dimension_numbers<[1], [0], [0], [1], [0, 0, 1, 1], [], []>} : vector<16x128xbf16>, vector<128x32xbf16>, vector<16x32xf32> -> vector<16x32xf32>
    %915 = vector.extract_strided_slice %899 {offsets = [2, 0], sizes = [1, 32], strides = [1, 1]} : vector<3x32xf32> to vector<1x32xf32>
    %916 = vector.broadcast %915 : vector<1x32xf32> to vector<16x32xf32>
    %917 = arith.addf %914, %916 : vector<16x32xf32>
    %918 = arith.truncf %905 : vector<16x32xf32> to vector<16x32xbf16>
    %919 = arith.truncf %911 : vector<16x32xf32> to vector<16x32xbf16>
    %cst_445 = arith.constant dense<0.000000e+00> : vector<16x16xf32>
    %920 = tpu.matmul %918, %919, %cst_445 {dimension_numbers = #tpu.dot_dimension_numbers<[1], [1], [0], [0], [0, 0, 1, 0], [], []>} : vector<16x32xbf16>, vector<16x32xbf16>, vector<16x16xf32> -> vector<16x16xf32>
    %cst_446 = arith.constant 0.176776692 : f32
    %921 = vector.broadcast %cst_446 : f32 to vector<16x16xf32>
    %922 = arith.mulf %920, %921 : vector<16x16xf32>
    %923 = arith.addf %922, %1 : vector<16x16xf32>
    %cst_447 = arith.constant dense<0xFF800000> : vector<16xf32>
    %924 = vector.multi_reduction <maximumf>, %923, %cst_447 [1] : vector<16x16xf32> to vector<16xf32>
    %925 = vector.shape_cast %924 : vector<16xf32> to vector<16x1xf32>
    %926 = vector.broadcast %925 : vector<16x1xf32> to vector<16x16xf32>
    %927 = arith.subf %923, %926 : vector<16x16xf32>
    %928 = math.exp %927 : vector<16x16xf32>
    %cst_448 = arith.constant dense<0.000000e+00> : vector<16xf32>
    %929 = vector.multi_reduction <add>, %928, %cst_448 [1] : vector<16x16xf32> to vector<16xf32>
    %930 = vector.shape_cast %929 : vector<16xf32> to vector<16x1xf32>
    %931 = tpu.reciprocal %930 {approx = true} : vector<16x1xf32> -> vector<16x1xf32>
    %932 = vector.broadcast %931 : vector<16x1xf32> to vector<16x16xf32>
    %933 = arith.mulf %928, %932 : vector<16x16xf32>
    %934 = arith.truncf %933 : vector<16x16xf32> to vector<16x16xbf16>
    %935 = arith.truncf %917 : vector<16x32xf32> to vector<16x32xbf16>
    %cst_449 = arith.constant dense<0.000000e+00> : vector<16x32xf32>
    %936 = tpu.matmul %934, %935, %cst_449 {dimension_numbers = #tpu.dot_dimension_numbers<[1], [0], [0], [1], [0, 0, 1, 1], [], []>} : vector<16x16xbf16>, vector<16x32xbf16>, vector<16x32xf32> -> vector<16x32xf32>
    %937 = arith.truncf %936 : vector<16x32xf32> to vector<16x32xbf16>
    %c14_450 = arith.constant 14 : index
    %c0_451 = arith.constant 0 : index
    %c0_452 = arith.constant 0 : index
    %938 = vector.load %arg6[%c14_450, %c0_451, %c0_452] : memref<16x32x128xbf16, #tpu.memory_space<vmem>>, vector<1x32x128xbf16>
    %939 = vector.shape_cast %938 : vector<1x32x128xbf16> to vector<32x128xbf16>
    %cst_453 = arith.constant dense<0.000000e+00> : vector<16x128xf32>
    %940 = tpu.matmul %937, %939, %cst_453 {dimension_numbers = #tpu.dot_dimension_numbers<[1], [0], [0], [1], [0, 0, 1, 1], [], []>} : vector<16x32xbf16>, vector<32x128xbf16>, vector<16x128xf32> -> vector<16x128xf32>
    %941 = arith.addf %897, %940 : vector<16x128xf32>
    %c15 = arith.constant 15 : index
    %c0_454 = arith.constant 0 : index
    %c0_455 = arith.constant 0 : index
    %942 = vector.load %arg9[%c15, %c0_454, %c0_455] : memref<16x3x32xf32, #tpu.memory_space<vmem>>, vector<1x3x32xf32>
    %943 = vector.shape_cast %942 : vector<1x3x32xf32> to vector<3x32xf32>
    %c15_456 = arith.constant 15 : index
    %c0_457 = arith.constant 0 : index
    %c0_458 = arith.constant 0 : index
    %944 = vector.load %arg3[%c15_456, %c0_457, %c0_458] : memref<16x128x32xbf16, #tpu.memory_space<vmem>>, vector<1x128x32xbf16>
    %945 = vector.shape_cast %944 : vector<1x128x32xbf16> to vector<128x32xbf16>
    %cst_459 = arith.constant dense<0.000000e+00> : vector<16x32xf32>
    %946 = tpu.matmul %810, %945, %cst_459 {dimension_numbers = #tpu.dot_dimension_numbers<[1], [0], [0], [1], [0, 0, 1, 1], [], []>} : vector<16x128xbf16>, vector<128x32xbf16>, vector<16x32xf32> -> vector<16x32xf32>
    %947 = vector.extract_strided_slice %943 {offsets = [0, 0], sizes = [1, 32], strides = [1, 1]} : vector<3x32xf32> to vector<1x32xf32>
    %948 = vector.broadcast %947 : vector<1x32xf32> to vector<16x32xf32>
    %949 = arith.addf %946, %948 : vector<16x32xf32>
    %c15_460 = arith.constant 15 : index
    %c0_461 = arith.constant 0 : index
    %c0_462 = arith.constant 0 : index
    %950 = vector.load %arg4[%c15_460, %c0_461, %c0_462] : memref<16x128x32xbf16, #tpu.memory_space<vmem>>, vector<1x128x32xbf16>
    %951 = vector.shape_cast %950 : vector<1x128x32xbf16> to vector<128x32xbf16>
    %cst_463 = arith.constant dense<0.000000e+00> : vector<16x32xf32>
    %952 = tpu.matmul %810, %951, %cst_463 {dimension_numbers = #tpu.dot_dimension_numbers<[1], [0], [0], [1], [0, 0, 1, 1], [], []>} : vector<16x128xbf16>, vector<128x32xbf16>, vector<16x32xf32> -> vector<16x32xf32>
    %953 = vector.extract_strided_slice %943 {offsets = [1, 0], sizes = [1, 32], strides = [1, 1]} : vector<3x32xf32> to vector<1x32xf32>
    %954 = vector.broadcast %953 : vector<1x32xf32> to vector<16x32xf32>
    %955 = arith.addf %952, %954 : vector<16x32xf32>
    %c15_464 = arith.constant 15 : index
    %c0_465 = arith.constant 0 : index
    %c0_466 = arith.constant 0 : index
    %956 = vector.load %arg5[%c15_464, %c0_465, %c0_466] : memref<16x128x32xbf16, #tpu.memory_space<vmem>>, vector<1x128x32xbf16>
    %957 = vector.shape_cast %956 : vector<1x128x32xbf16> to vector<128x32xbf16>
    %cst_467 = arith.constant dense<0.000000e+00> : vector<16x32xf32>
    %958 = tpu.matmul %810, %957, %cst_467 {dimension_numbers = #tpu.dot_dimension_numbers<[1], [0], [0], [1], [0, 0, 1, 1], [], []>} : vector<16x128xbf16>, vector<128x32xbf16>, vector<16x32xf32> -> vector<16x32xf32>
    %959 = vector.extract_strided_slice %943 {offsets = [2, 0], sizes = [1, 32], strides = [1, 1]} : vector<3x32xf32> to vector<1x32xf32>
    %960 = vector.broadcast %959 : vector<1x32xf32> to vector<16x32xf32>
    %961 = arith.addf %958, %960 : vector<16x32xf32>
    %962 = arith.truncf %949 : vector<16x32xf32> to vector<16x32xbf16>
    %963 = arith.truncf %955 : vector<16x32xf32> to vector<16x32xbf16>
    %cst_468 = arith.constant dense<0.000000e+00> : vector<16x16xf32>
    %964 = tpu.matmul %962, %963, %cst_468 {dimension_numbers = #tpu.dot_dimension_numbers<[1], [1], [0], [0], [0, 0, 1, 0], [], []>} : vector<16x32xbf16>, vector<16x32xbf16>, vector<16x16xf32> -> vector<16x16xf32>
    %cst_469 = arith.constant 0.176776692 : f32
    %965 = vector.broadcast %cst_469 : f32 to vector<16x16xf32>
    %966 = arith.mulf %964, %965 : vector<16x16xf32>
    %967 = arith.addf %966, %1 : vector<16x16xf32>
    %cst_470 = arith.constant dense<0xFF800000> : vector<16xf32>
    %968 = vector.multi_reduction <maximumf>, %967, %cst_470 [1] : vector<16x16xf32> to vector<16xf32>
    %969 = vector.shape_cast %968 : vector<16xf32> to vector<16x1xf32>
    %970 = vector.broadcast %969 : vector<16x1xf32> to vector<16x16xf32>
    %971 = arith.subf %967, %970 : vector<16x16xf32>
    %972 = math.exp %971 : vector<16x16xf32>
    %cst_471 = arith.constant dense<0.000000e+00> : vector<16xf32>
    %973 = vector.multi_reduction <add>, %972, %cst_471 [1] : vector<16x16xf32> to vector<16xf32>
    %974 = vector.shape_cast %973 : vector<16xf32> to vector<16x1xf32>
    %975 = tpu.reciprocal %974 {approx = true} : vector<16x1xf32> -> vector<16x1xf32>
    %976 = vector.broadcast %975 : vector<16x1xf32> to vector<16x16xf32>
    %977 = arith.mulf %972, %976 : vector<16x16xf32>
    %978 = arith.truncf %977 : vector<16x16xf32> to vector<16x16xbf16>
    %979 = arith.truncf %961 : vector<16x32xf32> to vector<16x32xbf16>
    %cst_472 = arith.constant dense<0.000000e+00> : vector<16x32xf32>
    %980 = tpu.matmul %978, %979, %cst_472 {dimension_numbers = #tpu.dot_dimension_numbers<[1], [0], [0], [1], [0, 0, 1, 1], [], []>} : vector<16x16xbf16>, vector<16x32xbf16>, vector<16x32xf32> -> vector<16x32xf32>
    %981 = arith.truncf %980 : vector<16x32xf32> to vector<16x32xbf16>
    %c15_473 = arith.constant 15 : index
    %c0_474 = arith.constant 0 : index
    %c0_475 = arith.constant 0 : index
    %982 = vector.load %arg6[%c15_473, %c0_474, %c0_475] : memref<16x32x128xbf16, #tpu.memory_space<vmem>>, vector<1x32x128xbf16>
    %983 = vector.shape_cast %982 : vector<1x32x128xbf16> to vector<32x128xbf16>
    %cst_476 = arith.constant dense<0.000000e+00> : vector<16x128xf32>
    %984 = tpu.matmul %981, %983, %cst_476 {dimension_numbers = #tpu.dot_dimension_numbers<[1], [0], [0], [1], [0, 0, 1, 1], [], []>} : vector<16x32xbf16>, vector<32x128xbf16>, vector<16x128xf32> -> vector<16x128xf32>
    %985 = arith.addf %941, %984 : vector<16x128xf32>
    %986 = vector.extract_strided_slice %809 {offsets = [0, 0], sizes = [1, 128], strides = [1, 1]} : vector<6x128xf32> to vector<1x128xf32>
    %987 = vector.broadcast %986 : vector<1x128xf32> to vector<16x128xf32>
    %988 = arith.addf %985, %987 : vector<16x128xf32>
    %989 = arith.addf %988, %807 : vector<16x128xf32>
    %990 = vector.extract_strided_slice %809 {offsets = [1, 0], sizes = [1, 128], strides = [1, 1]} : vector<6x128xf32> to vector<1x128xf32>
    %991 = vector.extract_strided_slice %809 {offsets = [2, 0], sizes = [1, 128], strides = [1, 1]} : vector<6x128xf32> to vector<1x128xf32>
    %cst_477 = arith.constant dense<0.000000e+00> : vector<16xf32>
    %992 = vector.multi_reduction <add>, %989, %cst_477 [1] : vector<16x128xf32> to vector<16xf32>
    %993 = vector.shape_cast %992 : vector<16xf32> to vector<16x1xf32>
    %cst_478 = arith.constant 1.280000e+02 : f32
    %994 = vector.broadcast %cst_478 : f32 to vector<16x1xf32>
    %995 = arith.divf %993, %994 : vector<16x1xf32>
    %996 = vector.broadcast %995 : vector<16x1xf32> to vector<16x128xf32>
    %997 = arith.subf %989, %996 : vector<16x128xf32>
    %998 = arith.mulf %997, %997 : vector<16x128xf32>
    %cst_479 = arith.constant dense<0.000000e+00> : vector<16xf32>
    %999 = vector.multi_reduction <add>, %998, %cst_479 [1] : vector<16x128xf32> to vector<16xf32>
    %1000 = vector.shape_cast %999 : vector<16xf32> to vector<16x1xf32>
    %cst_480 = arith.constant 1.280000e+02 : f32
    %1001 = vector.broadcast %cst_480 : f32 to vector<16x1xf32>
    %1002 = arith.divf %1000, %1001 : vector<16x1xf32>
    %cst_481 = arith.constant 9.99999974E-6 : f32
    %1003 = vector.broadcast %cst_481 : f32 to vector<16x1xf32>
    %1004 = arith.addf %1002, %1003 : vector<16x1xf32>
    %1005 = math.rsqrt %1004 : vector<16x1xf32>
    %1006 = vector.broadcast %1005 : vector<16x1xf32> to vector<16x128xf32>
    %1007 = arith.mulf %997, %1006 : vector<16x128xf32>
    %1008 = vector.broadcast %990 : vector<1x128xf32> to vector<16x128xf32>
    %1009 = arith.mulf %1007, %1008 : vector<16x128xf32>
    %1010 = vector.broadcast %991 : vector<1x128xf32> to vector<16x128xf32>
    %1011 = arith.addf %1009, %1010 : vector<16x128xf32>
    %1012 = arith.truncf %1011 : vector<16x128xf32> to vector<16x128xbf16>
    %c3_482 = arith.constant 3 : index
    %c0_483 = arith.constant 0 : index
    %c0_484 = arith.constant 0 : index
    %1013 = vector.load %arg7[%c3_482, %c0_483, %c0_484] : memref<4x128x256xbf16, #tpu.memory_space<vmem>>, vector<1x128x256xbf16>
    %1014 = vector.shape_cast %1013 : vector<1x128x256xbf16> to vector<128x256xbf16>
    %cst_485 = arith.constant dense<0.000000e+00> : vector<16x256xf32>
    %1015 = tpu.matmul %1012, %1014, %cst_485 {dimension_numbers = #tpu.dot_dimension_numbers<[1], [0], [0], [1], [0, 0, 1, 1], [], []>} : vector<16x128xbf16>, vector<128x256xbf16>, vector<16x256xf32> -> vector<16x256xf32>
    %c3_486 = arith.constant 3 : index
    %c0_487 = arith.constant 0 : index
    %c0_488 = arith.constant 0 : index
    %1016 = vector.load %arg10[%c3_486, %c0_487, %c0_488] : memref<4x1x256xf32, #tpu.memory_space<vmem>>, vector<1x1x256xf32>
    %1017 = vector.shape_cast %1016 : vector<1x1x256xf32> to vector<1x256xf32>
    %1018 = vector.broadcast %1017 : vector<1x256xf32> to vector<16x256xf32>
    %1019 = arith.addf %1015, %1018 : vector<16x256xf32>
    %cst_489 = arith.constant 5.000000e-01 : f32
    %1020 = vector.broadcast %cst_489 : f32 to vector<16x256xf32>
    %1021 = arith.mulf %1020, %1019 : vector<16x256xf32>
    %cst_490 = arith.constant 4.471500e-02 : f32
    %1022 = vector.broadcast %cst_490 : f32 to vector<16x256xf32>
    %1023 = arith.mulf %1022, %1019 : vector<16x256xf32>
    %1024 = arith.mulf %1023, %1019 : vector<16x256xf32>
    %1025 = arith.mulf %1024, %1019 : vector<16x256xf32>
    %1026 = arith.addf %1019, %1025 : vector<16x256xf32>
    %cst_491 = arith.constant 0.797884583 : f32
    %1027 = vector.broadcast %cst_491 : f32 to vector<16x256xf32>
    %1028 = arith.mulf %1027, %1026 : vector<16x256xf32>
    %1029 = math.tanh %1028 : vector<16x256xf32>
    %cst_492 = arith.constant 1.000000e+00 : f32
    %1030 = vector.broadcast %cst_492 : f32 to vector<16x256xf32>
    %1031 = arith.addf %1030, %1029 : vector<16x256xf32>
    %1032 = arith.mulf %1021, %1031 : vector<16x256xf32>
    %1033 = arith.truncf %1032 : vector<16x256xf32> to vector<16x256xbf16>
    %c3_493 = arith.constant 3 : index
    %c0_494 = arith.constant 0 : index
    %c0_495 = arith.constant 0 : index
    %1034 = vector.load %arg8[%c3_493, %c0_494, %c0_495] : memref<4x256x128xbf16, #tpu.memory_space<vmem>>, vector<1x256x128xbf16>
    %1035 = vector.shape_cast %1034 : vector<1x256x128xbf16> to vector<256x128xbf16>
    %cst_496 = arith.constant dense<0.000000e+00> : vector<16x128xf32>
    %1036 = tpu.matmul %1033, %1035, %cst_496 {dimension_numbers = #tpu.dot_dimension_numbers<[1], [0], [0], [1], [0, 0, 1, 1], [], []>} : vector<16x256xbf16>, vector<256x128xbf16>, vector<16x128xf32> -> vector<16x128xf32>
    %1037 = vector.extract_strided_slice %809 {offsets = [3, 0], sizes = [1, 128], strides = [1, 1]} : vector<6x128xf32> to vector<1x128xf32>
    %1038 = vector.broadcast %1037 : vector<1x128xf32> to vector<16x128xf32>
    %1039 = arith.addf %1036, %1038 : vector<16x128xf32>
    %1040 = arith.addf %1039, %1011 : vector<16x128xf32>
    %1041 = vector.extract_strided_slice %809 {offsets = [4, 0], sizes = [1, 128], strides = [1, 1]} : vector<6x128xf32> to vector<1x128xf32>
    %1042 = vector.extract_strided_slice %809 {offsets = [5, 0], sizes = [1, 128], strides = [1, 1]} : vector<6x128xf32> to vector<1x128xf32>
    %cst_497 = arith.constant dense<0.000000e+00> : vector<16xf32>
    %1043 = vector.multi_reduction <add>, %1040, %cst_497 [1] : vector<16x128xf32> to vector<16xf32>
    %1044 = vector.shape_cast %1043 : vector<16xf32> to vector<16x1xf32>
    %cst_498 = arith.constant 1.280000e+02 : f32
    %1045 = vector.broadcast %cst_498 : f32 to vector<16x1xf32>
    %1046 = arith.divf %1044, %1045 : vector<16x1xf32>
    %1047 = vector.broadcast %1046 : vector<16x1xf32> to vector<16x128xf32>
    %1048 = arith.subf %1040, %1047 : vector<16x128xf32>
    %1049 = arith.mulf %1048, %1048 : vector<16x128xf32>
    %cst_499 = arith.constant dense<0.000000e+00> : vector<16xf32>
    %1050 = vector.multi_reduction <add>, %1049, %cst_499 [1] : vector<16x128xf32> to vector<16xf32>
    %1051 = vector.shape_cast %1050 : vector<16xf32> to vector<16x1xf32>
    %cst_500 = arith.constant 1.280000e+02 : f32
    %1052 = vector.broadcast %cst_500 : f32 to vector<16x1xf32>
    %1053 = arith.divf %1051, %1052 : vector<16x1xf32>
    %cst_501 = arith.constant 9.99999974E-6 : f32
    %1054 = vector.broadcast %cst_501 : f32 to vector<16x1xf32>
    %1055 = arith.addf %1053, %1054 : vector<16x1xf32>
    %1056 = math.rsqrt %1055 : vector<16x1xf32>
    %1057 = vector.broadcast %1056 : vector<16x1xf32> to vector<16x128xf32>
    %1058 = arith.mulf %1048, %1057 : vector<16x128xf32>
    %1059 = vector.broadcast %1041 : vector<1x128xf32> to vector<16x128xf32>
    %1060 = arith.mulf %1058, %1059 : vector<16x128xf32>
    %1061 = vector.broadcast %1042 : vector<1x128xf32> to vector<16x128xf32>
    %1062 = arith.addf %1060, %1061 : vector<16x128xf32>
    %1063 = arith.truncf %1062 : vector<16x128xf32> to vector<16x128xbf16>
    %c3_502 = arith.constant 3 : index
    %c0_503 = arith.constant 0 : index
    %c0_504 = arith.constant 0 : index
    %1064 = vector.load %arg12[%c3_502, %c0_503, %c0_504] : memref<5x128x128xbf16, #tpu.memory_space<vmem>>, vector<1x128x128xbf16>
    %1065 = vector.shape_cast %1064 : vector<1x128x128xbf16> to vector<128x128xbf16>
    %cst_505 = arith.constant dense<0.000000e+00> : vector<16x128xf32>
    %1066 = tpu.matmul %1063, %1065, %cst_505 {dimension_numbers = #tpu.dot_dimension_numbers<[1], [0], [0], [1], [0, 0, 1, 1], [], []>} : vector<16x128xbf16>, vector<128x128xbf16>, vector<16x128xf32> -> vector<16x128xf32>
    %1067 = vector.extract_strided_slice %2 {offsets = [4, 0], sizes = [1, 128], strides = [1, 1]} : vector<6x128xf32> to vector<1x128xf32>
    %1068 = vector.broadcast %1067 : vector<1x128xf32> to vector<16x128xf32>
    %1069 = arith.addf %1066, %1068 : vector<16x128xf32>
    %1070 = math.tanh %1069 : vector<16x128xf32>
    %1071 = arith.truncf %1070 : vector<16x128xf32> to vector<16x128xbf16>
    %c4_506 = arith.constant 4 : index
    %c0_507 = arith.constant 0 : index
    %c0_508 = arith.constant 0 : index
    %1072 = vector.load %arg12[%c4_506, %c0_507, %c0_508] : memref<5x128x128xbf16, #tpu.memory_space<vmem>>, vector<1x128x128xbf16>
    %1073 = vector.shape_cast %1072 : vector<1x128x128xbf16> to vector<128x128xbf16>
    %cst_509 = arith.constant dense<0.000000e+00> : vector<16x128xf32>
    %1074 = tpu.matmul %1071, %1073, %cst_509 {dimension_numbers = #tpu.dot_dimension_numbers<[1], [0], [0], [1], [0, 0, 1, 1], [], []>} : vector<16x128xbf16>, vector<128x128xbf16>, vector<16x128xf32> -> vector<16x128xf32>
    %1075 = vector.extract_strided_slice %2 {offsets = [5, 0], sizes = [1, 128], strides = [1, 1]} : vector<6x128xf32> to vector<1x128xf32>
    %1076 = vector.broadcast %1075 : vector<1x128xf32> to vector<16x128xf32>
    %1077 = arith.addf %1074, %1076 : vector<16x128xf32>
    %c0_510 = arith.constant 0 : index
    %c0_511 = arith.constant 0 : index
    %1078 = vector.load %arg14[%c0_510, %c0_511] : memref<16x128xf32, #tpu.memory_space<vmem>>, vector<16x128xf32>
    tpu.vector_store %arg14[%c0_510, %c0_511], %1077 {strides = array<i32>} : memref<16x128xf32, #tpu.memory_space<vmem>>, vector<16x128xf32>,
    return
  }
  func.func @transform_0(%arg0: i32) -> (i32, i32) {
    %c0_i32 = arith.constant 0 : i32
    %c0_i32_0 = arith.constant 0 : i32
    %c0_i32_1 = arith.constant 0 : i32
    return %c0_i32, %c0_i32_0 : i32, i32
  }
  func.func @transform_1(%arg0: i32) -> (i32, i32) {
    %c0_i32 = arith.constant 0 : i32
    %c0_i32_0 = arith.constant 0 : i32
    %c0_i32_1 = arith.constant 0 : i32
    return %c0_i32, %c0_i32_0 : i32, i32
  }
  func.func @transform_2(%arg0: i32) -> (i32, i32, i32) {
    %c0_i32 = arith.constant 0 : i32
    %c0_i32_0 = arith.constant 0 : i32
    %c0_i32_1 = arith.constant 0 : i32
    %c0_i32_2 = arith.constant 0 : i32
    return %c0_i32, %c0_i32_0, %c0_i32_1 : i32, i32, i32
  }
  func.func @transform_3(%arg0: i32) -> (i32, i32, i32) {
    %c0_i32 = arith.constant 0 : i32
    %c0_i32_0 = arith.constant 0 : i32
    %c0_i32_1 = arith.constant 0 : i32
    %c0_i32_2 = arith.constant 0 : i32
    return %c0_i32, %c0_i32_0, %c0_i32_1 : i32, i32, i32
  }
  func.func @transform_4(%arg0: i32) -> (i32, i32, i32) {
    %c0_i32 = arith.constant 0 : i32
    %c0_i32_0 = arith.constant 0 : i32
    %c0_i32_1 = arith.constant 0 : i32
    %c0_i32_2 = arith.constant 0 : i32
    return %c0_i32, %c0_i32_0, %c0_i32_1 : i32, i32, i32
  }
  func.func @transform_5(%arg0: i32) -> (i32, i32, i32) {
    %c0_i32 = arith.constant 0 : i32
    %c0_i32_0 = arith.constant 0 : i32
    %c0_i32_1 = arith.constant 0 : i32
    %c0_i32_2 = arith.constant 0 : i32
    return %c0_i32, %c0_i32_0, %c0_i32_1 : i32, i32, i32
  }
  func.func @transform_6(%arg0: i32) -> (i32, i32, i32) {
    %c0_i32 = arith.constant 0 : i32
    %c0_i32_0 = arith.constant 0 : i32
    %c0_i32_1 = arith.constant 0 : i32
    %c0_i32_2 = arith.constant 0 : i32
    return %c0_i32, %c0_i32_0, %c0_i32_1 : i32, i32, i32
  }
  func.func @transform_7(%arg0: i32) -> (i32, i32, i32) {
    %c0_i32 = arith.constant 0 : i32
    %c0_i32_0 = arith.constant 0 : i32
    %c0_i32_1 = arith.constant 0 : i32
    %c0_i32_2 = arith.constant 0 : i32
    return %c0_i32, %c0_i32_0, %c0_i32_1 : i32, i32, i32
  }
  func.func @transform_8(%arg0: i32) -> (i32, i32, i32) {
    %c0_i32 = arith.constant 0 : i32
    %c0_i32_0 = arith.constant 0 : i32
    %c0_i32_1 = arith.constant 0 : i32
    %c0_i32_2 = arith.constant 0 : i32
    return %c0_i32, %c0_i32_0, %c0_i32_1 : i32, i32, i32
  }
  func.func @transform_9(%arg0: i32) -> (i32, i32, i32) {
    %c0_i32 = arith.constant 0 : i32
    %c0_i32_0 = arith.constant 0 : i32
    %c0_i32_1 = arith.constant 0 : i32
    %c0_i32_2 = arith.constant 0 : i32
    return %c0_i32, %c0_i32_0, %c0_i32_1 : i32, i32, i32
  }
  func.func @transform_10(%arg0: i32) -> (i32, i32, i32) {
    %c0_i32 = arith.constant 0 : i32
    %c0_i32_0 = arith.constant 0 : i32
    %c0_i32_1 = arith.constant 0 : i32
    %c0_i32_2 = arith.constant 0 : i32
    return %c0_i32, %c0_i32_0, %c0_i32_1 : i32, i32, i32
  }
  func.func @transform_11(%arg0: i32) -> (i32, i32, i32) {
    %c0_i32 = arith.constant 0 : i32
    %c0_i32_0 = arith.constant 0 : i32
    %c0_i32_1 = arith.constant 0 : i32
    %c0_i32_2 = arith.constant 0 : i32
    return %c0_i32, %c0_i32_0, %c0_i32_1 : i32, i32, i32
  }
  func.func @transform_12(%arg0: i32) -> (i32, i32) {
    %c0_i32 = arith.constant 0 : i32
    %c0_i32_0 = arith.constant 0 : i32
    %c0_i32_1 = arith.constant 0 : i32
    return %c0_i32, %c0_i32_0 : i32, i32
  }
  func.func @transform_13(%arg0: i32) -> (i32, i32) {
    %c0_i32 = arith.constant 0 : i32
    %c0_i32_0 = arith.constant 0 : i32
    %c0_i32_1 = arith.constant 0 : i32
    return %c0_i32, %c0_i32_0 : i32, i32
  }
}

</mosaic_0001>

<bundles_post_ra>
// kernel: robertabase_linear2_forward.1
= control target key start
LH: loop header
LB: loop body
LE: loop exit
PB: predicated region body
PF: predicated region fallthrough
CT: control target
= control target key end

     0   :  { %v15208_v2 = vmov 0.0   ;;  %vm15209_vm0 = vmmov 0   ;;  %v73_v30 = vlaneseq  ;;  %vm417_vm1 = vcmask 261120   ;;  %s18474_s0 = inlined_call_operand.vmem [shape: f32[16,128], index: 0, kind: input, shape index: {}]   ;;  %s18475_s2 = inlined_call_operand.vmem [shape: bf16[16,128,32], index: 2, kind: input, shape index: {}]   ;;  %s18476_s3 = inlined_call_operand.vmem [shape: bf16[16,128,32], index: 3, kind: input, shape index: {}]   ;;  %s18477_s4 = inlined_call_operand.vmem [shape: bf16[16,128,32], index: 4, kind: input, shape index: {}]   ;;  %s18478_s12 = inlined_call_operand.vmem [shape: f32[6,128], index: 12, kind: input, shape index: {}]   ;;  %s18479_s8 = inlined_call_operand.vmem [shape: f32[16,3,32], index: 8, kind: input, shape index: {}]   ;;  %s18480_s1 = inlined_call_operand.vmem [shape: f32[16,16], index: 1, kind: input, shape index: {}]   ;;  %s18481_s5 = inlined_call_operand.vmem [shape: bf16[16,32,128], index: 5, kind: input, shape index: {}]   ;;  %s18482_s10 = inlined_call_operand.vmem [shape: f32[4,6,128], index: 10, kind: input, shape index: {}]   ;;  %s18483_s11 = inlined_call_operand.vmem [shape: bf16[5,128,128], index: 11, kind: input, shape index: {}]   ;;  %s18484_s6 = inlined_call_operand.vmem [shape: bf16[4,128,256], index: 6, kind: input, shape index: {}]   ;;  %s18485_s7 = inlined_call_operand.vmem [shape: bf16[4,256,128], index: 7, kind: input, shape index: {}]   ;;  %s18486_s9 = inlined_call_operand.vmem [shape: f32[4,1,256], index: 9, kind: input, shape index: {}]   ;;  %s18487_s13 = inlined_call_operand.vmem [shape: f32[16,128], index: 13, kind: output, shape index: {}]  }
   0x1   :  { %v45_v0 = vld [vmem:[%s18474_s0] sm:$0xff]  ;;  %v46_v1 = vld [vmem:[%s18474_s0 + $0x8] sm:$0xff]  ;;  %12998 = vmatprep.subr.bf16.mxu0 %v15208_v2  ;;  %13018 = vmatprep.subr.bf16.mxu1 %v15208_v2  ;;  %v14385_v15 = vld [vmem:[%s18475_s2 + $0x10] sm:$0xff]   ;;  %vm469_vm2 = vcmask 130048  }
   0x2   :  { %50 = vadd.xlane.f32.xlu0 %v45_v0  ;;  %v14381_v3 = vld [vmem:[%s18475_s2] sm:$0xff]   ;;  %v14383_v5 = vld [vmem:[%s18475_s2 + $0x8] sm:$0xff]   ;;  %v14386_v16 = vld [vmem:[%s18476_s3 + $0x10] sm:$0xff]   ;;  %13014 = vmatprep.mubr.msk.bf16.mxu0 %vm15209_vm0, %v15208_v2  ;;  %v15365_v34 = vshrl.u32 %v73_v30, 7 }
   0x3   :  { %v14382_v4 = vld [vmem:[%s18476_s3] sm:$0xff]   ;;  %12999 = vmatpush3.bf16.msra.mxu0 %v14381_v3  ;;  %v14384_v14 = vld [vmem:[%s18476_s3 + $0x8] sm:$0xff]   ;;  %v14387_v17 = vld [vmem:[%s18475_s2 + $0x18] sm:$0xff]   ;;  %13034 = vmatprep.mubr.msk.bf16.mxu1 %vm15209_vm0, %v15208_v2 }
   0x4   :  { %13019 = vmatpush3.bf16.msra.mxu1 %v14382_v4  ;;  %13000 = vmatprep.subr.bf16.mxu0 %v15208_v2  ;;  %v14388_v18 = vld [vmem:[%s18476_s3 + $0x18] sm:$0xff]   ;;  %v14389_v19 = vld [vmem:[%s18475_s2 + $0x20] sm:$0xff]   ;;  %v14391_v21 = vld [vmem:[%s18475_s2 + $0x28] sm:$0xff]   ;;  %v15368_v35 = vsub.s32 0, %v15365_v34  ;;  %v15375_v39 = vsub.s32 1, %v15365_v34 }
   0x5   :  { %13020 = vmatprep.subr.bf16.mxu1 %v15208_v2  ;;  %v14390_v20 = vld [vmem:[%s18476_s3 + $0x20] sm:$0xff]   ;;  %v14392_v22 = vld [vmem:[%s18476_s3 + $0x28] sm:$0xff]   ;;  %v14393_v23 = vld [vmem:[%s18475_s2 + $0x30] sm:$0xff]  }
   0x6   :  { %52 = vadd.xlane.f32.xlu0 %v46_v1  ;;  %v14394_v24 = vld [vmem:[%s18476_s3 + $0x30] sm:$0xff]   ;;  %v14395_v25 = vld [vmem:[%s18475_s2 + $0x38] sm:$0xff]   ;;  %v49_v36 = vld [vmem:[%s18478_s12] sm:$0x3f] }
   0x7   :  { %13001 = vmatpush3.bf16.msra.mxu0 %v14383_v5  ;;  %v14396_v26 = vld [vmem:[%s18476_s3 + $0x38] sm:$0xff]   ;;  %v76_v38 = vrot.slane %v49_v36, %v15368_v35  ;;  %v82_v42 = vrot.slane %v49_v36, %v15375_v39  ;;  %v14397_v48 = vld [vmem:[%s18477_s4] sm:$0xff]   ;;  %v14398_v50 = vld [vmem:[%s18477_s4 + $0x8] sm:$0xff]  }
   0x8   :  { %13002 = vmatprep.subr.bf16.mxu0 %v15208_v2  ;;  %13021 = vmatpush3.bf16.msra.mxu1 %v14384_v14  ;;  %v14399_v51 = vld [vmem:[%s18477_s4 + $0x10] sm:$0xff]   ;;  %v14400_v52 = vld [vmem:[%s18477_s4 + $0x18] sm:$0xff]   ;;  %v14401_v53 = vld [vmem:[%s18477_s4 + $0x20] sm:$0xff]  }
   0x9   :  { %13022 = vmatprep.subr.bf16.mxu1 %v15208_v2  ;;  %v14402_v54 = vld [vmem:[%s18477_s4 + $0x28] sm:$0xff]   ;;  %v14403_v55 = vld [vmem:[%s18477_s4 + $0x30] sm:$0xff]   ;;  %v14404_v56 = vld [vmem:[%s18477_s4 + $0x38] sm:$0xff]  }
   0xa   :  { %v14405_v57 = vld [vmem:[%s18476_s3 + $0x40] sm:$0xff]   ;;  %v14406_v58 = vld [vmem:[%s18476_s3 + $0x48] sm:$0xff]   ;;  %v14407_v59 = vld [vmem:[%s18476_s3 + $0x50] sm:$0xff]  }
   0xb   :  { %13003 = vmatpush3.bf16.msra.mxu0 %v14385_v15  ;;  %v14408_v60 = vld [vmem:[%s18476_s3 + $0x58] sm:$0xff]   ;;  %v14409_v61 = vld [vmem:[%s18476_s3 + $0x60] sm:$0xff]   ;;  %v14410_v62 = vld [vmem:[%s18476_s3 + $0x68] sm:$0xff]  }
   0xc   :  { %13023 = vmatpush3.bf16.msra.mxu1 %v14386_v16  ;;  %13004 = vmatprep.subr.bf16.mxu0 %v15208_v2  ;;  %v14411_v63 = vld [vmem:[%s18476_s3 + $0x70] sm:$0xff]  }
   0xd   :  { %13024 = vmatprep.subr.bf16.mxu1 %v15208_v2 }
   0xf   :  { %13005 = vmatpush3.bf16.msra.mxu0 %v14387_v17 }
  0x10   :  { %13025 = vmatpush3.bf16.msra.mxu1 %v14388_v18  ;;  %13006 = vmatprep.subr.bf16.mxu0 %v15208_v2 }
  0x11   :  { %13026 = vmatprep.subr.bf16.mxu1 %v15208_v2 }
  0x13   :  { %13007 = vmatpush3.bf16.msra.mxu0 %v14389_v19 }
  0x14   :  { %13027 = vmatpush3.bf16.msra.mxu1 %v14390_v20  ;;  %13008 = vmatprep.subr.bf16.mxu0 %v15208_v2  ;;  %v15475_v20 = vsub.s32 2, %v15365_v34 }
  0x15   :  { %13028 = vmatprep.subr.bf16.mxu1 %v15208_v2 }
  0x17   :  { %13009 = vmatpush3.bf16.msra.mxu0 %v14391_v21 }
  0x18   :  { %13029 = vmatpush3.bf16.msra.mxu1 %v14392_v22  ;;  %13010 = vmatprep.subr.bf16.mxu0 %v15208_v2 }
  0x19   :  { %13030 = vmatprep.subr.bf16.mxu1 %v15208_v2 }
  0x1b   :  { %13011 = vmatpush3.bf16.msra.mxu0 %v14393_v23 }
  0x1c   :  { %13031 = vmatpush3.bf16.msra.mxu1 %v14394_v24  ;;  %13012 = vmatprep.subr.bf16.mxu0 %v15208_v2 }
  0x1d   :  { %13032 = vmatprep.subr.bf16.mxu1 %v15208_v2 }
  0x1f   :  { %13013 = vmatpush3.bf16.msra.mxu0 %v14395_v25 }
  0x20   :  { %13033 = vmatpush3.bf16.msra.mxu1 %v14396_v26  ;;  %13038 = vmatprep.subr.bf16.mxu0 %v15208_v2 }
  0x21   :  { %13058 = vmatprep.subr.bf16.mxu1 %v15208_v2 }
  0x8f   :  { %v51_v6 = vpop.xlane.xlu0 %50 }
  0x90   :  { %v55_v7 = vmul.f32 0.0078125, %v51_v6 }
  0x92   :  { %v15301_v8 = vsub.f32 %v45_v0, %v55_v7  ;;  %v14412_v0 = vld [vmem:[%s18476_s3 + $0x78] sm:$0xff]  }
  0x93   :  { %v53_v9 = vpop.xlane.xlu0 %52 }
  0x94   :  { %v56_v10 = vmul.f32 0.0078125, %v53_v9  ;;  %v59_v11 = vmul.f32 %v15301_v8, %v15301_v8 }
  0x96   :  { %v15305_v12 = vsub.f32 %v46_v1, %v56_v10  ;;  %61 = vadd.xlane.f32.xlu1 %v59_v11  ;;  %v87_v1 = vld [vmem:[%s18479_s8] sm:$0x7] }
  0x97   :  { %v107_v3 = vrot.slane %v87_v1, %v15368_v35  ;;  %v216_v4 = vrot.slane %v87_v1, %v15375_v39  ;;  %v325_v21 = vrot.slane %v87_v1, %v15475_v20 }
  0x98   :  { %v60_v13 = vmul.f32 %v15305_v12, %v15305_v12 }
  0x9a   :  { %63 = vadd.xlane.f32.xlu1 %v60_v13 }
 0x123   :  { %v62_v27 = vpop.xlane.xlu1 %61 }
 0x124   :  { %v65_v28 = vmul.f32 0.0078125, %v62_v27 }
 0x126   :  { %v67_v29 = vadd.f32 1e-05, %v65_v28 }
 0x127   :  { %v64_v31 = vpop.xlane.xlu1 %63 }
 0x128   :  { %14997 = vrsqrt.f32 %v67_v29  ;;  %v66_v32 = vmul.f32 0.0078125, %v64_v31  ;;  %v15482_v29 = vld [vmem:[%s18479_s8 + $0x4] sm:$0x7] }
 0x129   :  { %v675_v30 = vrot.slane %v15482_v29, %v15375_v39 }
 0x12a   :  { %v68_v33 = vadd.f32 1e-05, %v66_v32 }
 0x12c   :  { %14999 = vrsqrt.f32 %v68_v33 }
 0x132   :  { %v14998_v37 = vpop.eup %14997 }
 0x133   :  { %v71_v40 = vmul.f32 %v14998_v37, %v15301_v8 }
 0x135   :  { %v77_v43 = vmul.f32 %v76_v38, %v71_v40 }
 0x136   :  { %v15000_v41 = vpop.eup %14999 }
 0x137   :  { %v72_v44 = vmul.f32 %v15000_v41, %v15305_v12  ;;  %v15380_v46 = vadd.f32 %v82_v42, %v77_v43  ;;  %v15491_v43 = vld [vmem:[%s18480_s1] sm:$0xff] }
 0x139   :  { %v78_v45 = vmul.f32 %v76_v38, %v72_v44 }
 0x13b   :  { %v15382_v47 = vadd.f32 %v82_v42, %v78_v45 }
 0x13d   :  { %v15389_v49 = vpack.c.bf16 %v15382_v47, %v15380_v46 }
 0x13f   :  { %13015 = vmatmul.mubr.bf16.vlgmr.msra.gmra.mrb[0].mxu0 %v15389_v49  ;;  %13035 = vmatmul.mubr.bf16.vlgmr.msra.gmra.mrb[0].mxu1 %v15389_v49 }
 0x140   :  { %13039 = vmatpush3.bf16.msra.mxu0 %v14397_v48  ;;  %13054 = vmatprep.mubr.msk.bf16.mxu0 %vm15209_vm0, %v15208_v2 }
 0x141   :  { %13040 = vmatprep.subr.bf16.mxu0 %v15208_v2  ;;  %13060 = vmatprep.mubr.msk.bf16.mxu1 %vm15209_vm0, %v15208_v2 }
 0x144   :  { %13041 = vmatpush3.bf16.msra.mxu0 %v14398_v50  ;;  %v15496_v50 = vld [vmem:[%s18480_s1 + $0x8] sm:$0xff] }
 0x145   :  { %13042 = vmatprep.subr.bf16.mxu0 %v15208_v2 }
 0x148   :  { %13043 = vmatpush3.bf16.msra.mxu0 %v14399_v51 }
 0x149   :  { %13044 = vmatprep.subr.bf16.mxu0 %v15208_v2 }
 0x14c   :  { %13045 = vmatpush3.bf16.msra.mxu0 %v14400_v52 }
 0x14d   :  { %13046 = vmatprep.subr.bf16.mxu0 %v15208_v2 }
 0x150   :  { %13047 = vmatpush3.bf16.msra.mxu0 %v14401_v53 }
 0x151   :  { %13048 = vmatprep.subr.bf16.mxu0 %v15208_v2 }
 0x154   :  { %13049 = vmatpush3.bf16.msra.mxu0 %v14402_v54 }
 0x155   :  { %13050 = vmatprep.subr.bf16.mxu0 %v15208_v2 }
 0x158   :  { %13051 = vmatpush3.bf16.msra.mxu0 %v14403_v55 }
 0x159   :  { %13052 = vmatprep.subr.bf16.mxu0 %v15208_v2 }
 0x15c   :  { %13053 = vmatpush3.bf16.msra.mxu0 %v14404_v56 }
 0x15d   :  { %13090 = vmatprep.subr.bf16.mxu0 %v15208_v2 }
 0x15f   :  { %13055 = vmatmul.mubr.bf16.vlgmr.msra.gmra.mrb[4].mxu0 %v15389_v49 }
 0x160   :  { %13091 = vmatpush3.bf16.msra.mxu0 %v14405_v57  ;;  %13106 = vmatprep.mubr.msk.bf16.mxu0 %vm15209_vm0, %v15208_v2 }
 0x161   :  { %13092 = vmatprep.subr.bf16.mxu0 %v15208_v2 }
 0x164   :  { %13093 = vmatpush3.bf16.msra.mxu0 %v14406_v58 }
 0x165   :  { %13094 = vmatprep.subr.bf16.mxu0 %v15208_v2 }
 0x168   :  { %13095 = vmatpush3.bf16.msra.mxu0 %v14407_v59 }
 0x169   :  { %13096 = vmatprep.subr.bf16.mxu0 %v15208_v2 }
 0x16c   :  { %13097 = vmatpush3.bf16.msra.mxu0 %v14408_v60 }
 0x16d   :  { %13098 = vmatprep.subr.bf16.mxu0 %v15208_v2 }
 0x170   :  { %13099 = vmatpush3.bf16.msra.mxu0 %v14409_v61 }
 0x171   :  { %13100 = vmatprep.subr.bf16.mxu0 %v15208_v2 }
 0x174   :  { %13101 = vmatpush3.bf16.msra.mxu0 %v14410_v62 }
 0x175   :  { %13102 = vmatprep.subr.bf16.mxu0 %v15208_v2 }
 0x178   :  { %13103 = vmatpush3.bf16.msra.mxu0 %v14411_v63 }
 0x179   :  { %13104 = vmatprep.subr.bf16.mxu0 %v15208_v2 }
 0x17c   :  { %13105 = vmatpush3.bf16.msra.mxu0 %v14412_v0 }
 0x17d   :  { %13130 = vmatprep.subr.bf16.mxu0 %v15208_v2 }
 0x17f   :  { %13107 = vmatmul.mubr.bf16.vlgmr.msra.gmra.mrb[8].mxu0 %v15389_v49 }
 0x180   :  { %13132 = vmatprep.mubr.msk.bf16.mxu0 %vm15209_vm0, %v15208_v2 }
 0x212   :  { %v190_v5 = vpop.f32.mrb[0].mxu0  ;;  %v299_v6 = vpop.f32.mrb[0].mxu1 }
 0x213   :  { %v13016_v7 = vpop.f32.mrb[1].mxu0  ;;  %v13036_v8 = vpop.f32.mrb[1].mxu1  ;;  %v191_v11 = vadd.f32 %v190_v5, %v107_v3  ;;  %v300_v12 = vadd.f32 %v299_v6, %v216_v4 }
 0x214   :  { %v193_v9 = vpop.f32.mrb[2].mxu0  ;;  %v302_v10 = vpop.f32.mrb[2].mxu1 }
 0x215   :  { %v194_v13 = vadd.f32 %v193_v9, %v107_v3  ;;  %v303_v14 = vadd.f32 %v302_v10, %v216_v4  ;;  %v13017_v15 = vpop.f32.mrb[3].mxu0  ;;  %v13037_v16 = vpop.f32.mrb[3].mxu1  ;;  %v14413_v10 = vld [vmem:[%s18475_s2 + $0x40] sm:$0xff]  }
 0x216   :  { %v14417_v15 = vld [vmem:[%s18475_s2 + $0x60] sm:$0xff]   ;;  %v14418_v16 = vld [vmem:[%s18475_s2 + $0x68] sm:$0xff]  }
 0x217   :  { %v415_v17 = vpack.c.bf16 %v194_v13, %v191_v11  ;;  %v416_v18 = vpack.c.bf16 %v303_v14, %v300_v12  ;;  %v14414_v12 = vld [vmem:[%s18475_s2 + $0x48] sm:$0xff]   ;;  %v14415_v13 = vld [vmem:[%s18475_s2 + $0x50] sm:$0xff]   ;;  %v14416_v14 = vld [vmem:[%s18475_s2 + $0x58] sm:$0xff]  }
 0x219   :  { %v422_v19 = vsel %vm417_vm1, %v416_v18, 0  ;;  %v14420_v18 = vld [vmem:[%s18475_s2 + $0x78] sm:$0xff]  }
 0x21a   :  { %13059 = vmatpush3.bf16.xpose.msra.mxu1 %v422_v19  ;;  %v14421_v19 = vld [vmem:[%s18477_s4 + $0x40] sm:$0xff]  }
 0x21b   :  { %13064 = vmatprep.subr.bf16.mxu1 %v15208_v2 }
 0x221   :  { %13061 = vmatmul.mubr.msk.bf16.vlgmr.msra.gmra.mrb[4].mxu1 %vm417_vm1, %v415_v17  ;;  %v14419_v17 = vld [vmem:[%s18475_s2 + $0x70] sm:$0xff]  }
 0x222   :  { %13066 = vmatprep.mubr.msk.bf16.mxu1 %vm15209_vm0, %v15208_v2 }
 0x232   :  { %v408_v22 = vpop.f32.mrb[4].mxu0 }
 0x233   :  { %v13056_v23 = vpop.f32.mrb[5].mxu0  ;;  %v409_v25 = vadd.f32 %v408_v22, %v325_v21  ;;  %v14423_v22 = vld [vmem:[%s18477_s4 + $0x50] sm:$0xff]  }
 0x234   :  { %v411_v24 = vpop.f32.mrb[6].mxu0  ;;  %v14424_v23 = vld [vmem:[%s18477_s4 + $0x58] sm:$0xff]  }
 0x235   :  { %v412_v26 = vadd.f32 %v411_v24, %v325_v21  ;;  %v13057_v27 = vpop.f32.mrb[7].mxu0  ;;  %v14422_v21 = vld [vmem:[%s18477_s4 + $0x48] sm:$0xff]   ;;  %v14425_v24 = vld [vmem:[%s18477_s4 + $0x60] sm:$0xff]  }
 0x236   :  { %v14428_v27 = vld [vmem:[%s18477_s4 + $0x78] sm:$0xff]  }
 0x237   :  { %v493_v28 = vpack.c.bf16 %v412_v26, %v409_v25  ;;  %v14426_v25 = vld [vmem:[%s18477_s4 + $0x68] sm:$0xff]   ;;  %v14427_v26 = vld [vmem:[%s18477_s4 + $0x70] sm:$0xff]  }
 0x239   :  { %13065 = vmatpush3.bf16.msra.mxu1 %v493_v28  ;;  %v14429_v28 = vld [vmem:[%s18481_s5] sm:$0xff]  }
 0x23a   :  { %13070 = vmatprep.subr.bf16.mxu1 %v15208_v2 }
 0x252   :  { %v758_v31 = vpop.f32.mrb[8].mxu0 }
 0x253   :  { %v13108_v32 = vpop.f32.mrb[9].mxu0  ;;  %v759_v36 = vadd.f32 %v758_v31, %v675_v30 }
 0x254   :  { %v761_v33 = vpop.f32.mrb[10].mxu0 }
 0x255   :  { %v762_v37 = vadd.f32 %v761_v33, %v675_v30  ;;  %v13109_v38 = vpop.f32.mrb[11].mxu0  ;;  %v14430_v30 = vld [vmem:[%s18481_s5 + $0x8] sm:$0xff]  }
 0x257   :  { %v876_v40 = vpack.c.bf16 %v762_v37, %v759_v36  ;;  %v14431_v36 = vld [vmem:[%s18476_s3 + $0x80] sm:$0xff]  }
 0x259   :  { %v881_v41 = vsel %vm417_vm1, %v876_v40, 0  ;;  %v14432_v40 = vld [vmem:[%s18476_s3 + $0x88] sm:$0xff]  }
 0x25a   :  { %13131 = vmatpush3.bf16.xpose.msra.mxu0 %v881_v41  ;;  %v14433_v41 = vld [vmem:[%s18476_s3 + $0x90] sm:$0xff]  }
 0x25b   :  { %13136 = vmatprep.subr.bf16.mxu0 %v15208_v2 }
 0x2f4   :  { %v458_v42 = vpop.f32.mrb[4].mxu1 }
 0x2f5   :  { %v465_v44 = vmul.f32 0.17677669, %v458_v42  ;;  %v13062_v45 = vpop.f32.mrb[5].mxu1  ;;  %v14434_v42 = vld [vmem:[%s18476_s3 + $0x98] sm:$0xff]  }
 0x2f6   :  { %v461_v48 = vpop.f32.mrb[6].mxu1  ;;  %v14436_v45 = vld [vmem:[%s18476_s3 + $0xa8] sm:$0xff]  }
 0x2f7   :  { %v466_v51 = vmul.f32 0.17677669, %v461_v48  ;;  %v13063_v52 = vpop.f32.mrb[7].mxu1  ;;  %v467_v53 = vadd.f32 %v465_v44, %v15491_v43  ;;  %v14435_v44 = vld [vmem:[%s18476_s3 + $0xa0] sm:$0xff]   ;;  %v14437_v48 = vld [vmem:[%s18476_s3 + $0xb0] sm:$0xff]  }
 0x2f8   :  { %v565_v52 = vrot.slane %v15482_v29, %v15368_v35 }
 0x2f9   :  { %v470_v54 = vsel %vm469_vm2, %v467_v53, -inf  ;;  %v468_v55 = vadd.f32 %v466_v51, %v15496_v50  ;;  %v14438_v51 = vld [vmem:[%s18476_s3 + $0xb8] sm:$0xff]  }
 0x2fa   :  { %471 = vmax.xlane.f32.xlu0 %v470_v54 }
 0x2fb   :  { %v473_v56 = vsel %vm469_vm2, %v468_v55, -inf }
 0x2fc   :  { %474 = vmax.xlane.f32.xlu1 %v473_v56 }
 0x387   :  { %v472_v57 = vpop.xlane.xlu0 %471 }
 0x388   :  { %v476_v58 = vsub.f32 %v467_v53, %v472_v57 }
 0x389   :  { %v475_v59 = vpop.xlane.xlu1 %474 }
 0x38a   :  { %v478_v60 = vmul.f32 1.442695, %v476_v58  ;;  %v477_v61 = vsub.f32 %v468_v55, %v475_v59 }
 0x38c   :  { %15001 = vpow2.f32 %v478_v60  ;;  %v480_v62 = vmul.f32 1.442695, %v477_v61  ;;  %v785_v60 = vrot.slane %v15482_v29, %v15475_v20  ;;  %v15638_v29 = vld [vmem:[%s18479_s8 + $0x8] sm:$0x7] }
 0x38e   :  { %15003 = vpow2.f32 %v480_v62 }
 0x396   :  { %v15002_v63 = vpop.eup %15001 }
 0x397   :  { %v482_v0 = vsel %vm469_vm2, %v15002_v63, 0.0 }
 0x398   :  { %v15004_v1 = vpop.eup %15003  ;;  %483 = vadd.xlane.f32.xlu0 %v482_v0 }
 0x399   :  { %v485_v3 = vsel %vm469_vm2, %v15004_v1, 0.0 }
 0x39a   :  { %486 = vadd.xlane.f32.xlu1 %v485_v3 }
 0x425   :  { %v484_v4 = vpop.xlane.xlu0 %483 }
 0x426   :  { %15005 = vrcp.f32 %v484_v4 }
 0x427   :  { %v487_v5 = vpop.xlane.xlu1 %486 }
 0x428   :  { %15007 = vrcp.f32 %v487_v5 }
 0x430   :  { %v15006_v6 = vpop.eup %15005 }
 0x431   :  { %v490_v8 = vmul.f32 %v15006_v6, %v15002_v63 }
 0x432   :  { %v15008_v7 = vpop.eup %15007 }
 0x433   :  { %v491_v9 = vmul.f32 %v15008_v7, %v15004_v1 }
 0x435   :  { %v492_v11 = vpack.c.bf16 %v491_v9, %v490_v8  ;;  %v1246_v9 = vrot.slane %v15638_v29, %v15375_v39 }
 0x437   :  { %13067 = vmatmul.mubr.msk.bf16.vlgmr.msra.gmra.mrb[8].mxu1 %vm469_vm2, %v492_v11 }
 0x438   :  { %13071 = vmatpush3.bf16.msra.mxu1 %v14413_v10  ;;  %13086 = vmatprep.mubr.msk.bf16.mxu1 %vm15209_vm0, %v15208_v2 }
 0x439   :  { %13072 = vmatprep.subr.bf16.mxu1 %v15208_v2 }
 0x43c   :  { %13073 = vmatpush3.bf16.msra.mxu1 %v14414_v12 }
 0x43d   :  { %13074 = vmatprep.subr.bf16.mxu1 %v15208_v2 }
 0x440   :  { %13075 = vmatpush3.bf16.msra.mxu1 %v14415_v13 }
 0x441   :  { %13076 = vmatprep.subr.bf16.mxu1 %v15208_v2 }
 0x444   :  { %13077 = vmatpush3.bf16.msra.mxu1 %v14416_v14 }
 0x445   :  { %13078 = vmatprep.subr.bf16.mxu1 %v15208_v2 }
 0x448   :  { %13079 = vmatpush3.bf16.msra.mxu1 %v14417_v15 }
 0x449   :  { %13080 = vmatprep.subr.bf16.mxu1 %v15208_v2 }
 0x44c   :  { %13081 = vmatpush3.bf16.msra.mxu1 %v14418_v16 }
 0x44d   :  { %13082 = vmatprep.subr.bf16.mxu1 %v15208_v2 }
 0x450   :  { %13083 = vmatpush3.bf16.msra.mxu1 %v14419_v17 }
 0x451   :  { %13084 = vmatprep.subr.bf16.mxu1 %v15208_v2 }
 0x454   :  { %13085 = vmatpush3.bf16.msra.mxu1 %v14420_v18 }
 0x455   :  { %13110 = vmatprep.subr.bf16.mxu1 %v15208_v2 }
 0x457   :  { %13087 = vmatmul.mubr.bf16.vlgmr.msra.gmra.mrb[12].mxu1 %v15389_v49 }
 0x458   :  { %13111 = vmatpush3.bf16.msra.mxu1 %v14421_v19  ;;  %13126 = vmatprep.mubr.msk.bf16.mxu1 %vm15209_vm0, %v15208_v2 }
 0x459   :  { %13112 = vmatprep.subr.bf16.mxu1 %v15208_v2 }
 0x45c   :  { %13113 = vmatpush3.bf16.msra.mxu1 %v14422_v21 }
 0x45d   :  { %13114 = vmatprep.subr.bf16.mxu1 %v15208_v2 }
 0x460   :  { %13115 = vmatpush3.bf16.msra.mxu1 %v14423_v22 }
 0x461   :  { %13116 = vmatprep.subr.bf16.mxu1 %v15208_v2 }
 0x464   :  { %13117 = vmatpush3.bf16.msra.mxu1 %v14424_v23 }
 0x465   :  { %13118 = vmatprep.subr.bf16.mxu1 %v15208_v2 }
 0x468   :  { %13119 = vmatpush3.bf16.msra.mxu1 %v14425_v24 }
 0x469   :  { %13120 = vmatprep.subr.bf16.mxu1 %v15208_v2 }
 0x46c   :  { %13121 = vmatpush3.bf16.msra.mxu1 %v14426_v25 }
 0x46d   :  { %13122 = vmatprep.subr.bf16.mxu1 %v15208_v2 }
 0x470   :  { %13123 = vmatpush3.bf16.msra.mxu1 %v14427_v26 }
 0x471   :  { %13124 = vmatprep.subr.bf16.mxu1 %v15208_v2 }
 0x474   :  { %13125 = vmatpush3.bf16.msra.mxu1 %v14428_v27 }
 0x475   :  { %13150 = vmatprep.subr.bf16.mxu1 %v15208_v2 }
 0x477   :  { %13127 = vmatmul.mubr.bf16.vlgmr.msra.gmra.mrb[16].mxu1 %v15389_v49 }
 0x478   :  { %13151 = vmatpush3.bf16.msra.mxu1 %v14429_v28  ;;  %13154 = vmatprep.mubr.msk.bf16.mxu1 %vm15209_vm0, %v15208_v2 }
 0x479   :  { %13152 = vmatprep.subr.bf16.mxu1 %v15208_v2 }
 0x47c   :  { %13153 = vmatpush3.bf16.msra.mxu1 %v14430_v30 }
 0x47d   :  { %13178 = vmatprep.subr.bf16.mxu1 %v15208_v2 }
 0x50a   :  { %v531_v31 = vpop.f32.mrb[8].mxu1 }
 0x50b   :  { %v13068_v32 = vpop.f32.mrb[9].mxu1 }
 0x50c   :  { %v534_v33 = vpop.f32.mrb[10].mxu1 }
 0x50d   :  { %v538_v37 = vpack.c.bf16 %v534_v33, %v531_v31  ;;  %v13069_v38 = vpop.f32.mrb[11].mxu1 }
 0x50f   :  { %13155 = vmatmul.mubr.msk.bf16.vlgmr.msra.gmra.mrb[20].mxu1 %vm417_vm1, %v538_v37 }
 0x510   :  { %13179 = vmatpush3.bf16.msra.mxu1 %v14431_v36  ;;  %13194 = vmatprep.mubr.msk.bf16.mxu1 %vm15209_vm0, %v15208_v2 }
 0x511   :  { %13180 = vmatprep.subr.bf16.mxu1 %v15208_v2 }
 0x514   :  { %13181 = vmatpush3.bf16.msra.mxu1 %v14432_v40 }
 0x515   :  { %13182 = vmatprep.subr.bf16.mxu1 %v15208_v2 }
 0x518   :  { %13183 = vmatpush3.bf16.msra.mxu1 %v14433_v41 }
 0x519   :  { %13184 = vmatprep.subr.bf16.mxu1 %v15208_v2 }
 0x51c   :  { %13185 = vmatpush3.bf16.msra.mxu1 %v14434_v42 }
 0x51d   :  { %13186 = vmatprep.subr.bf16.mxu1 %v15208_v2 }
 0x520   :  { %13187 = vmatpush3.bf16.msra.mxu1 %v14435_v44 }
 0x521   :  { %13188 = vmatprep.subr.bf16.mxu1 %v15208_v2 }
 0x524   :  { %13189 = vmatpush3.bf16.msra.mxu1 %v14436_v45 }
 0x525   :  { %13190 = vmatprep.subr.bf16.mxu1 %v15208_v2 }
 0x528   :  { %13191 = vmatpush3.bf16.msra.mxu1 %v14437_v48 }
 0x529   :  { %13192 = vmatprep.subr.bf16.mxu1 %v15208_v2 }
 0x52a   :  { %v648_v53 = vpop.f32.mrb[12].mxu1 }
 0x52b   :  { %v13088_v54 = vpop.f32.mrb[13].mxu1  ;;  %v649_v56 = vadd.f32 %v648_v53, %v565_v52 }
 0x52c   :  { %v651_v55 = vpop.f32.mrb[14].mxu1  ;;  %13193 = vmatpush3.bf16.msra.mxu1 %v14438_v51  ;;  %v14439_v54 = vld [vmem:[%s18481_s5 + $0x10] sm:$0xff]  }
 0x52d   :  { %v652_v57 = vadd.f32 %v651_v55, %v565_v52  ;;  %v13089_v58 = vpop.f32.mrb[15].mxu1  ;;  %13218 = vmatprep.subr.bf16.mxu1 %v15208_v2 }
 0x52f   :  { %v875_v59 = vpack.c.bf16 %v652_v57, %v649_v56  ;;  %13195 = vmatmul.mubr.bf16.vlgmr.msra.gmra.mrb[24].mxu1 %v15389_v49  ;;  %v14440_v56 = vld [vmem:[%s18481_s5 + $0x18] sm:$0xff]  }
 0x530   :  { %13220 = vmatprep.mubr.msk.bf16.mxu1 %vm15209_vm0, %v15208_v2 }
 0x531   :  { %13133 = vmatmul.mubr.msk.bf16.vlgmr.msra.gmra.mrb[12].mxu0 %vm417_vm1, %v875_v59 }
 0x532   :  { %13138 = vmatprep.mubr.msk.bf16.mxu0 %vm15209_vm0, %v15208_v2 }
 0x54a   :  { %v868_v61 = vpop.f32.mrb[16].mxu1 }
 0x54b   :  { %v13128_v62 = vpop.f32.mrb[17].mxu1  ;;  %v869_v0 = vadd.f32 %v868_v61, %v785_v60 }
 0x54c   :  { %v871_v63 = vpop.f32.mrb[18].mxu1 }
 0x54d   :  { %v872_v1 = vadd.f32 %v871_v63, %v785_v60  ;;  %v13129_v3 = vpop.f32.mrb[19].mxu1  ;;  %v14441_v60 = vld [vmem:[%s18475_s2 + $0x80] sm:$0xff]   ;;  %v14442_v63 = vld [vmem:[%s18475_s2 + $0x88] sm:$0xff]  }
 0x54e   :  { %v14445_v3 = vld [vmem:[%s18475_s2 + $0xa0] sm:$0xff]  }
 0x54f   :  { %v951_v4 = vpack.c.bf16 %v872_v1, %v869_v0  ;;  %v14443_v0 = vld [vmem:[%s18475_s2 + $0x90] sm:$0xff]   ;;  %v14444_v1 = vld [vmem:[%s18475_s2 + $0x98] sm:$0xff]  }
 0x551   :  { %13137 = vmatpush3.bf16.msra.mxu0 %v951_v4  ;;  %v14446_v4 = vld [vmem:[%s18475_s2 + $0xa8] sm:$0xff]  }
 0x552   :  { %13142 = vmatprep.subr.bf16.mxu0 %v15208_v2 }
 0x5e2   :  { %v15631_v5 = vpop.f32.mrb[20].mxu1 }
 0x5e3   :  { %v13156_v6 = vpop.f32.mrb[21].mxu1 }
 0x5e4   :  { %v15633_v7 = vpop.f32.mrb[22].mxu1  ;;  %v14447_v6 = vld [vmem:[%s18475_s2 + $0xb0] sm:$0xff]  }
 0x5e5   :  { %v13157_v8 = vpop.f32.mrb[23].mxu1 }
 0x5e6   :  { %v14448_v8 = vld [vmem:[%s18475_s2 + $0xb8] sm:$0xff]  }
 0x602   :  { %v1329_v10 = vpop.f32.mrb[24].mxu1 }
 0x603   :  { %v13196_v11 = vpop.f32.mrb[25].mxu1  ;;  %v1330_v14 = vadd.f32 %v1329_v10, %v1246_v9  ;;  %v14450_v10 = vld [vmem:[%s18477_s4 + $0x88] sm:$0xff]  }
 0x604   :  { %v917_v12 = vpop.f32.mrb[12].mxu0  ;;  %v1332_v13 = vpop.f32.mrb[26].mxu1  ;;  %v14451_v11 = vld [vmem:[%s18477_s4 + $0x90] sm:$0xff]  }
 0x605   :  { %v924_v15 = vmul.f32 0.17677669, %v917_v12  ;;  %v1333_v16 = vadd.f32 %v1332_v13, %v1246_v9  ;;  %v13134_v17 = vpop.f32.mrb[13].mxu0  ;;  %v13197_v18 = vpop.f32.mrb[27].mxu1  ;;  %v14449_v9 = vld [vmem:[%s18477_s4 + $0x80] sm:$0xff]   ;;  %v14452_v12 = vld [vmem:[%s18477_s4 + $0x98] sm:$0xff]  }
 0x606   :  { %v920_v19 = vpop.f32.mrb[14].mxu0  ;;  %v14453_v13 = vld [vmem:[%s18477_s4 + $0xa0] sm:$0xff]   ;;  %v14458_v18 = vld [vmem:[%s18476_s3 + $0xc8] sm:$0xff]  }
 0x607   :  { %v1447_v21 = vpack.c.bf16 %v1333_v16, %v1330_v14  ;;  %v925_v22 = vmul.f32 0.17677669, %v920_v19  ;;  %v13135_v23 = vpop.f32.mrb[15].mxu0  ;;  %v926_v24 = vadd.f32 %v924_v15, %v15491_v43  ;;  %v14454_v14 = vld [vmem:[%s18477_s4 + $0xa8] sm:$0xff]   ;;  %v14455_v15 = vld [vmem:[%s18477_s4 + $0xb0] sm:$0xff]   ;;  %v14456_v16 = vld [vmem:[%s18477_s4 + $0xb8] sm:$0xff]  }
 0x608   :  { %v14457_v17 = vld [vmem:[%s18476_s3 + $0xc0] sm:$0xff]   ;;  %v14459_v19 = vld [vmem:[%s18476_s3 + $0xd0] sm:$0xff]   ;;  %v14462_v23 = vld [vmem:[%s18476_s3 + $0xe8] sm:$0xff]  }
 0x609   :  { %v1452_v25 = vsel %vm417_vm1, %v1447_v21, 0  ;;  %v928_v26 = vsel %vm469_vm2, %v926_v24, -inf  ;;  %v927_v27 = vadd.f32 %v925_v22, %v15496_v50  ;;  %v14460_v21 = vld [vmem:[%s18476_s3 + $0xd8] sm:$0xff]   ;;  %v14461_v22 = vld [vmem:[%s18476_s3 + $0xe0] sm:$0xff]  }
 0x60a   :  { %13219 = vmatpush3.bf16.xpose.msra.mxu1 %v1452_v25  ;;  %929 = vmax.xlane.f32.xlu0 %v928_v26  ;;  %v14464_v25 = vld [vmem:[%s18476_s3 + $0xf8] sm:$0xff]  }
 0x60b   :  { %v931_v28 = vsel %vm469_vm2, %v927_v27, -inf  ;;  %13224 = vmatprep.subr.bf16.mxu1 %v15208_v2 }
 0x60c   :  { %932 = vmax.xlane.f32.xlu1 %v931_v28 }
 0x697   :  { %v930_v30 = vpop.xlane.xlu0 %929 }
 0x698   :  { %v934_v31 = vsub.f32 %v926_v24, %v930_v30  ;;  %v14463_v24 = vld [vmem:[%s18476_s3 + $0xf0] sm:$0xff]  }
 0x699   :  { %v933_v32 = vpop.xlane.xlu1 %932 }
 0x69a   :  { %v936_v33 = vmul.f32 1.442695, %v934_v31  ;;  %v935_v36 = vsub.f32 %v927_v27, %v933_v32 }
 0x69c   :  { %15009 = vpow2.f32 %v936_v33  ;;  %v938_v37 = vmul.f32 1.442695, %v935_v36  ;;  %v1136_v33 = vrot.slane %v15638_v29, %v15368_v35 }
 0x69e   :  { %15011 = vpow2.f32 %v938_v37 }
 0x6a6   :  { %v15010_v38 = vpop.eup %15009 }
 0x6a7   :  { %v940_v40 = vsel %vm469_vm2, %v15010_v38, 0.0 }
 0x6a8   :  { %v15012_v41 = vpop.eup %15011  ;;  %941 = vadd.xlane.f32.xlu0 %v940_v40 }
 0x6a9   :  { %v943_v42 = vsel %vm469_vm2, %v15012_v41, 0.0 }
 0x6aa   :  { %944 = vadd.xlane.f32.xlu1 %v943_v42 }
 0x735   :  { %v942_v44 = vpop.xlane.xlu0 %941 }
 0x736   :  { %15013 = vrcp.f32 %v942_v44 }
 0x737   :  { %v945_v45 = vpop.xlane.xlu1 %944 }
 0x738   :  { %15015 = vrcp.f32 %v945_v45 }
 0x740   :  { %v15014_v48 = vpop.eup %15013 }
 0x741   :  { %v948_v52 = vmul.f32 %v15014_v48, %v15010_v38 }
 0x742   :  { %v15016_v51 = vpop.eup %15015 }
 0x743   :  { %v949_v53 = vmul.f32 %v15016_v51, %v15012_v41 }
 0x745   :  { %v950_v55 = vpack.c.bf16 %v949_v53, %v948_v52 }
 0x747   :  { %13139 = vmatmul.mubr.msk.bf16.vlgmr.msra.gmra.mrb[16].mxu0 %vm469_vm2, %v950_v55  ;;  %v15786_v55 = vld [vmem:[%s18479_s8 + $0xc] sm:$0x7] }
 0x748   :  { %13143 = vmatpush3.bf16.msra.mxu0 %v14439_v54  ;;  %13146 = vmatprep.mubr.msk.bf16.mxu0 %vm15209_vm0, %v15208_v2 }
 0x749   :  { %13144 = vmatprep.subr.bf16.mxu0 %v15208_v2 }
 0x74c   :  { %13145 = vmatpush3.bf16.msra.mxu0 %v14440_v56  ;;  %v1763_v56 = vrot.slane %v15786_v55, %v15375_v39 }
 0x74d   :  { %13158 = vmatprep.subr.bf16.mxu0 %v15208_v2 }
 0x81a   :  { %v989_v57 = vpop.f32.mrb[16].mxu0 }
 0x81b   :  { %v13140_v58 = vpop.f32.mrb[17].mxu0 }
 0x81c   :  { %v992_v59 = vpop.f32.mrb[18].mxu0 }
 0x81d   :  { %v996_v61 = vpack.c.bf16 %v992_v59, %v989_v57  ;;  %v13141_v62 = vpop.f32.mrb[19].mxu0 }
 0x81f   :  { %13147 = vmatmul.mubr.msk.bf16.vlgmr.msra.gmra.mrb[20].mxu0 %vm417_vm1, %v996_v61 }
 0x820   :  { %13159 = vmatpush3.bf16.msra.mxu0 %v14441_v60  ;;  %13174 = vmatprep.mubr.msk.bf16.mxu0 %vm15209_vm0, %v15208_v2 }
 0x821   :  { %13160 = vmatprep.subr.bf16.mxu0 %v15208_v2 }
 0x824   :  { %13161 = vmatpush3.bf16.msra.mxu0 %v14442_v63 }
 0x825   :  { %13162 = vmatprep.subr.bf16.mxu0 %v15208_v2 }
 0x828   :  { %13163 = vmatpush3.bf16.msra.mxu0 %v14443_v0 }
 0x829   :  { %13164 = vmatprep.subr.bf16.mxu0 %v15208_v2 }
 0x82c   :  { %13165 = vmatpush3.bf16.msra.mxu0 %v14444_v1 }
 0x82d   :  { %13166 = vmatprep.subr.bf16.mxu0 %v15208_v2 }
 0x830   :  { %13167 = vmatpush3.bf16.msra.mxu0 %v14445_v3 }
 0x831   :  { %13168 = vmatprep.subr.bf16.mxu0 %v15208_v2 }
 0x834   :  { %13169 = vmatpush3.bf16.msra.mxu0 %v14446_v4 }
 0x835   :  { %13170 = vmatprep.subr.bf16.mxu0 %v15208_v2 }
 0x838   :  { %13171 = vmatpush3.bf16.msra.mxu0 %v14447_v6 }
 0x839   :  { %13172 = vmatprep.subr.bf16.mxu0 %v15208_v2 }
 0x83c   :  { %13173 = vmatpush3.bf16.msra.mxu0 %v14448_v8 }
 0x83d   :  { %13198 = vmatprep.subr.bf16.mxu0 %v15208_v2 }
 0x83f   :  { %13175 = vmatmul.mubr.bf16.vlgmr.msra.gmra.mrb[24].mxu0 %v15389_v49 }
 0x840   :  { %13199 = vmatpush3.bf16.msra.mxu0 %v14449_v9  ;;  %13214 = vmatprep.mubr.msk.bf16.mxu0 %vm15209_vm0, %v15208_v2 }
 0x841   :  { %13200 = vmatprep.subr.bf16.mxu0 %v15208_v2 }
 0x844   :  { %13201 = vmatpush3.bf16.msra.mxu0 %v14450_v10 }
 0x845   :  { %13202 = vmatprep.subr.bf16.mxu0 %v15208_v2 }
 0x848   :  { %13203 = vmatpush3.bf16.msra.mxu0 %v14451_v11 }
 0x849   :  { %13204 = vmatprep.subr.bf16.mxu0 %v15208_v2 }
 0x84c   :  { %13205 = vmatpush3.bf16.msra.mxu0 %v14452_v12 }
 0x84d   :  { %13206 = vmatprep.subr.bf16.mxu0 %v15208_v2 }
 0x850   :  { %13207 = vmatpush3.bf16.msra.mxu0 %v14453_v13 }
 0x851   :  { %13208 = vmatprep.subr.bf16.mxu0 %v15208_v2 }
 0x854   :  { %13209 = vmatpush3.bf16.msra.mxu0 %v14454_v14 }
 0x855   :  { %13210 = vmatprep.subr.bf16.mxu0 %v15208_v2 }
 0x858   :  { %13211 = vmatpush3.bf16.msra.mxu0 %v14455_v15 }
 0x859   :  { %13212 = vmatprep.subr.bf16.mxu0 %v15208_v2 }
 0x85c   :  { %13213 = vmatpush3.bf16.msra.mxu0 %v14456_v16 }
 0x85d   :  { %13258 = vmatprep.subr.bf16.mxu0 %v15208_v2 }
 0x85f   :  { %13215 = vmatmul.mubr.bf16.vlgmr.msra.gmra.mrb[28].mxu0 %v15389_v49 }
 0x860   :  { %13259 = vmatpush3.bf16.msra.mxu0 %v14457_v17  ;;  %13274 = vmatprep.mubr.msk.bf16.mxu0 %vm15209_vm0, %v15208_v2 }
 0x861   :  { %13260 = vmatprep.subr.bf16.mxu0 %v15208_v2 }
 0x864   :  { %13261 = vmatpush3.bf16.msra.mxu0 %v14458_v18 }
 0x865   :  { %13262 = vmatprep.subr.bf16.mxu0 %v15208_v2 }
 0x868   :  { %13263 = vmatpush3.bf16.msra.mxu0 %v14459_v19 }
 0x869   :  { %13264 = vmatprep.subr.bf16.mxu0 %v15208_v2 }
 0x86c   :  { %13265 = vmatpush3.bf16.msra.mxu0 %v14460_v21 }
 0x86d   :  { %13266 = vmatprep.subr.bf16.mxu0 %v15208_v2 }
 0x870   :  { %13267 = vmatpush3.bf16.msra.mxu0 %v14461_v22 }
 0x871   :  { %13268 = vmatprep.subr.bf16.mxu0 %v15208_v2 }
 0x874   :  { %13269 = vmatpush3.bf16.msra.mxu0 %v14462_v23 }
 0x875   :  { %13270 = vmatprep.subr.bf16.mxu0 %v15208_v2 }
 0x878   :  { %13271 = vmatpush3.bf16.msra.mxu0 %v14463_v24 }
 0x879   :  { %13272 = vmatprep.subr.bf16.mxu0 %v15208_v2 }
 0x87c   :  { %13273 = vmatpush3.bf16.msra.mxu0 %v14464_v25 }
 0x87d   :  { %13298 = vmatprep.subr.bf16.mxu0 %v15208_v2 }
 0x87f   :  { %13275 = vmatmul.mubr.bf16.vlgmr.msra.gmra.mrb[32].mxu0 %v15389_v49 }
 0x880   :  { %13300 = vmatprep.mubr.msk.bf16.mxu0 %vm15209_vm0, %v15208_v2 }
 0x8f2   :  { %v1051_v26 = vpop.f32.mrb[20].mxu0 }
 0x8f3   :  { %v15770_v27 = vadd.f32 %v15631_v5, %v1051_v26  ;;  %v13148_v28 = vpop.f32.mrb[21].mxu0  ;;  %v1356_v5 = vrot.slane %v15638_v29, %v15475_v20 }
 0x8f4   :  { %v1054_v30 = vpop.f32.mrb[22].mxu0 }
 0x8f5   :  { %v15773_v31 = vadd.f32 %v15633_v7, %v1054_v30  ;;  %v13149_v32 = vpop.f32.mrb[23].mxu0  ;;  %v14465_v30 = vld [vmem:[%s18481_s5 + $0x20] sm:$0xff]  }
 0x912   :  { %v1219_v36 = vpop.f32.mrb[24].mxu0 }
 0x913   :  { %v13176_v37 = vpop.f32.mrb[25].mxu0  ;;  %v1220_v40 = vadd.f32 %v1219_v36, %v1136_v33 }
 0x914   :  { %v1222_v38 = vpop.f32.mrb[26].mxu0 }
 0x915   :  { %v1223_v41 = vadd.f32 %v1222_v38, %v1136_v33  ;;  %v13177_v42 = vpop.f32.mrb[27].mxu0  ;;  %v14466_v33 = vld [vmem:[%s18481_s5 + $0x28] sm:$0xff]  }
 0x917   :  { %v1446_v44 = vpack.c.bf16 %v1223_v41, %v1220_v40  ;;  %v14467_v40 = vld [vmem:[%s18475_s2 + $0xc0] sm:$0xff]  }
 0x919   :  { %13221 = vmatmul.mubr.msk.bf16.vlgmr.msra.gmra.mrb[28].mxu1 %vm417_vm1, %v1446_v44  ;;  %v14468_v44 = vld [vmem:[%s18475_s2 + $0xc8] sm:$0xff]  }
 0x91a   :  { %13226 = vmatprep.mubr.msk.bf16.mxu1 %vm15209_vm0, %v15208_v2 }
 0x932   :  { %v1439_v7 = vpop.f32.mrb[28].mxu0 }
 0x933   :  { %v13216_v45 = vpop.f32.mrb[29].mxu0  ;;  %v1440_v51 = vadd.f32 %v1439_v7, %v1356_v5  ;;  %v14470_v7 = vld [vmem:[%s18475_s2 + $0xd8] sm:$0xff]  }
 0x934   :  { %v1442_v48 = vpop.f32.mrb[30].mxu0  ;;  %v14471_v45 = vld [vmem:[%s18475_s2 + $0xe0] sm:$0xff]  }
 0x935   :  { %v1443_v52 = vadd.f32 %v1442_v48, %v1356_v5  ;;  %v13217_v53 = vpop.f32.mrb[31].mxu0  ;;  %v14469_v5 = vld [vmem:[%s18475_s2 + $0xd0] sm:$0xff]   ;;  %v14472_v48 = vld [vmem:[%s18475_s2 + $0xe8] sm:$0xff]  }
 0x936   :  { %v14475_v53 = vld [vmem:[%s18477_s4 + $0xc0] sm:$0xff]  }
 0x937   :  { %v1522_v54 = vpack.c.bf16 %v1443_v52, %v1440_v51  ;;  %v14473_v51 = vld [vmem:[%s18475_s2 + $0xf0] sm:$0xff]   ;;  %v14474_v52 = vld [vmem:[%s18475_s2 + $0xf8] sm:$0xff]  }
 0x939   :  { %13225 = vmatpush3.bf16.msra.mxu1 %v1522_v54  ;;  %v14476_v54 = vld [vmem:[%s18477_s4 + $0xc8] sm:$0xff]  }
 0x93a   :  { %13230 = vmatprep.subr.bf16.mxu1 %v15208_v2 }
 0x952   :  { %v1846_v57 = vpop.f32.mrb[32].mxu0 }
 0x953   :  { %v13276_v29 = vpop.f32.mrb[33].mxu0  ;;  %v1847_v59 = vadd.f32 %v1846_v57, %v1763_v56  ;;  %v14478_v57 = vld [vmem:[%s18477_s4 + $0xd8] sm:$0xff]  }
 0x954   :  { %v1849_v58 = vpop.f32.mrb[34].mxu0  ;;  %v14479_v29 = vld [vmem:[%s18477_s4 + $0xe0] sm:$0xff]  }
 0x955   :  { %v1850_v60 = vadd.f32 %v1849_v58, %v1763_v56  ;;  %v13277_v61 = vpop.f32.mrb[35].mxu0  ;;  %v14477_v56 = vld [vmem:[%s18477_s4 + $0xd0] sm:$0xff]   ;;  %v14480_v58 = vld [vmem:[%s18477_s4 + $0xe8] sm:$0xff]  }
 0x957   :  { %v1964_v62 = vpack.c.bf16 %v1850_v60, %v1847_v59  ;;  %v14481_v59 = vld [vmem:[%s18477_s4 + $0xf0] sm:$0xff]   ;;  %v14482_v60 = vld [vmem:[%s18477_s4 + $0xf8] sm:$0xff]  }
 0x959   :  { %v1969_v63 = vsel %vm417_vm1, %v1964_v62, 0 }
 0x95a   :  { %13299 = vmatpush3.bf16.xpose.msra.mxu0 %v1969_v63 }
 0x95b   :  { %13304 = vmatprep.subr.bf16.mxu0 %v15208_v2 }
 0x9ec   :  { %v1488_v0 = vpop.f32.mrb[28].mxu1 }
 0x9ed   :  { %v1495_v1 = vmul.f32 0.17677669, %v1488_v0  ;;  %v13222_v3 = vpop.f32.mrb[29].mxu1 }
 0x9ee   :  { %v1491_v4 = vpop.f32.mrb[30].mxu1 }
 0x9ef   :  { %v1496_v6 = vmul.f32 0.17677669, %v1491_v4  ;;  %v13223_v8 = vpop.f32.mrb[31].mxu1  ;;  %v1497_v9 = vadd.f32 %v1495_v1, %v15491_v43  ;;  %v1653_v4 = vrot.slane %v15786_v55, %v15368_v35 }
 0x9f1   :  { %v1499_v10 = vsel %vm469_vm2, %v1497_v9, -inf  ;;  %v1498_v11 = vadd.f32 %v1496_v6, %v15496_v50 }
 0x9f2   :  { %1500 = vmax.xlane.f32.xlu0 %v1499_v10 }
 0x9f3   :  { %v1502_v12 = vsel %vm469_vm2, %v1498_v11, -inf }
 0x9f4   :  { %1503 = vmax.xlane.f32.xlu1 %v1502_v12 }
 0xa7f   :  { %v1501_v13 = vpop.xlane.xlu0 %1500 }
 0xa80   :  { %v1505_v14 = vsub.f32 %v1497_v9, %v1501_v13 }
 0xa81   :  { %v1504_v15 = vpop.xlane.xlu1 %1503 }
 0xa82   :  { %v1507_v16 = vmul.f32 1.442695, %v1505_v14  ;;  %v1506_v17 = vsub.f32 %v1498_v11, %v1504_v15 }
 0xa84   :  { %15017 = vpow2.f32 %v1507_v16  ;;  %v1509_v18 = vmul.f32 1.442695, %v1506_v17 }
 0xa86   :  { %15019 = vpow2.f32 %v1509_v18 }
 0xa8e   :  { %v15018_v19 = vpop.eup %15017 }
 0xa8f   :  { %v1511_v21 = vsel %vm469_vm2, %v15018_v19, 0.0 }
 0xa90   :  { %v15020_v43 = vpop.eup %15019  ;;  %1512 = vadd.xlane.f32.xlu0 %v1511_v21 }
 0xa91   :  { %v1514_v22 = vsel %vm469_vm2, %v15020_v43, 0.0 }
 0xa92   :  { %1515 = vadd.xlane.f32.xlu1 %v1514_v22 }
 0xb1d   :  { %v1513_v50 = vpop.xlane.xlu0 %1512 }
 0xb1e   :  { %15021 = vrcp.f32 %v1513_v50 }
 0xb1f   :  { %v1516_v23 = vpop.xlane.xlu1 %1515 }
 0xb20   :  { %15023 = vrcp.f32 %v1516_v23 }
 0xb28   :  { %v15022_v24 = vpop.eup %15021 }
 0xb29   :  { %v1519_v26 = vmul.f32 %v15022_v24, %v15018_v19 }
 0xb2a   :  { %v15024_v25 = vpop.eup %15023 }
 0xb2b   :  { %v1520_v28 = vmul.f32 %v15024_v25, %v15020_v43 }
 0xb2d   :  { %v1521_v32 = vpack.c.bf16 %v1520_v28, %v1519_v26  ;;  %v15198_v26 = vld [vmem:[%s18480_s1 + $0x8] sm:$0xff] }
 0xb2f   :  { %13227 = vmatmul.mubr.msk.bf16.vlgmr.msra.gmra.mrb[32].mxu1 %vm469_vm2, %v1521_v32 }
 0xb30   :  { %13231 = vmatpush3.bf16.msra.mxu1 %v14465_v30  ;;  %13234 = vmatprep.mubr.msk.bf16.mxu1 %vm15209_vm0, %v15208_v2 }
 0xb31   :  { %13232 = vmatprep.subr.bf16.mxu1 %v15208_v2 }
 0xb34   :  { %13233 = vmatpush3.bf16.msra.mxu1 %v14466_v33 }
 0xb35   :  { %13238 = vmatprep.subr.bf16.mxu1 %v15208_v2 }
 0xc02   :  { %v1560_v36 = vpop.f32.mrb[32].mxu1 }
 0xc03   :  { %v13228_v37 = vpop.f32.mrb[33].mxu1 }
 0xc04   :  { %v1563_v38 = vpop.f32.mrb[34].mxu1 }
 0xc05   :  { %v1567_v41 = vpack.c.bf16 %v1563_v38, %v1560_v36  ;;  %v13229_v42 = vpop.f32.mrb[35].mxu1 }
 0xc07   :  { %13235 = vmatmul.mubr.msk.bf16.vlgmr.msra.gmra.mrb[36].mxu1 %vm417_vm1, %v1567_v41 }
 0xc08   :  { %13239 = vmatpush3.bf16.msra.mxu1 %v14467_v40  ;;  %13254 = vmatprep.mubr.msk.bf16.mxu1 %vm15209_vm0, %v15208_v2 }
 0xc09   :  { %13240 = vmatprep.subr.bf16.mxu1 %v15208_v2 }
 0xc0c   :  { %13241 = vmatpush3.bf16.msra.mxu1 %v14468_v44 }
 0xc0d   :  { %13242 = vmatprep.subr.bf16.mxu1 %v15208_v2 }
 0xc10   :  { %13243 = vmatpush3.bf16.msra.mxu1 %v14469_v5 }
 0xc11   :  { %13244 = vmatprep.subr.bf16.mxu1 %v15208_v2 }
 0xc14   :  { %13245 = vmatpush3.bf16.msra.mxu1 %v14470_v7 }
 0xc15   :  { %13246 = vmatprep.subr.bf16.mxu1 %v15208_v2 }
 0xc18   :  { %13247 = vmatpush3.bf16.msra.mxu1 %v14471_v45 }
 0xc19   :  { %13248 = vmatprep.subr.bf16.mxu1 %v15208_v2 }
 0xc1c   :  { %13249 = vmatpush3.bf16.msra.mxu1 %v14472_v48 }
 0xc1d   :  { %13250 = vmatprep.subr.bf16.mxu1 %v15208_v2 }
 0xc20   :  { %13251 = vmatpush3.bf16.msra.mxu1 %v14473_v51 }
 0xc21   :  { %13252 = vmatprep.subr.bf16.mxu1 %v15208_v2 }
 0xc24   :  { %13253 = vmatpush3.bf16.msra.mxu1 %v14474_v52 }
 0xc25   :  { %13278 = vmatprep.subr.bf16.mxu1 %v15208_v2 }
 0xc27   :  { %13255 = vmatmul.mubr.bf16.vlgmr.msra.gmra.mrb[40].mxu1 %v15389_v49 }
 0xc28   :  { %13279 = vmatpush3.bf16.msra.mxu1 %v14475_v53  ;;  %13294 = vmatprep.mubr.msk.bf16.mxu1 %vm15209_vm0, %v15208_v2 }
 0xc29   :  { %13280 = vmatprep.subr.bf16.mxu1 %v15208_v2 }
 0xc2c   :  { %13281 = vmatpush3.bf16.msra.mxu1 %v14476_v54  ;;  %v14483_v54 = vld [vmem:[%s18481_s5 + $0x30] sm:$0xff]  }
 0xc2d   :  { %13282 = vmatprep.subr.bf16.mxu1 %v15208_v2 }
 0xc30   :  { %13283 = vmatpush3.bf16.msra.mxu1 %v14477_v56 }
 0xc31   :  { %13284 = vmatprep.subr.bf16.mxu1 %v15208_v2 }
 0xc34   :  { %13285 = vmatpush3.bf16.msra.mxu1 %v14478_v57  ;;  %v14484_v57 = vld [vmem:[%s18481_s5 + $0x38] sm:$0xff]  }
 0xc35   :  { %13286 = vmatprep.subr.bf16.mxu1 %v15208_v2 }
 0xc38   :  { %13287 = vmatpush3.bf16.msra.mxu1 %v14479_v29 }
 0xc39   :  { %13288 = vmatprep.subr.bf16.mxu1 %v15208_v2 }
 0xc3c   :  { %13289 = vmatpush3.bf16.msra.mxu1 %v14480_v58 }
 0xc3d   :  { %13290 = vmatprep.subr.bf16.mxu1 %v15208_v2 }
 0xc40   :  { %13291 = vmatpush3.bf16.msra.mxu1 %v14481_v59 }
 0xc41   :  { %13292 = vmatprep.subr.bf16.mxu1 %v15208_v2 }
 0xc44   :  { %13293 = vmatpush3.bf16.msra.mxu1 %v14482_v60 }
 0xc47   :  { %13295 = vmatmul.mubr.bf16.vlgmr.msra.gmra.mrb[44].mxu1 %v15389_v49 }
 0xcda   :  { %v1622_v61 = vpop.f32.mrb[36].mxu1 }
 0xcdb   :  { %v15880_v62 = vadd.f32 %v1622_v61, %v15770_v27  ;;  %v13236_v63 = vpop.f32.mrb[37].mxu1  ;;  %v1873_v27 = vrot.slane %v15786_v55, %v15475_v20  ;;  %v15197_v55 = vld [vmem:[%s18480_s1] sm:$0xff] }
 0xcdc   :  { %v1625_v0 = vpop.f32.mrb[38].mxu1  ;;  %v15920_v63 = vld [vmem:[%s18482_s10] sm:$0x3f] }
 0xcdd   :  { %v15883_v1 = vadd.f32 %v1625_v0, %v15773_v31  ;;  %v13237_v3 = vpop.f32.mrb[39].mxu1  ;;  %v2151_v0 = vrot.slane %v15920_v63, %v15368_v35 }
 0xcfa   :  { %v1736_v6 = vpop.f32.mrb[40].mxu1 }
 0xcfb   :  { %v13256_v8 = vpop.f32.mrb[41].mxu1  ;;  %v1737_v10 = vadd.f32 %v1736_v6, %v1653_v4 }
 0xcfc   :  { %v1739_v9 = vpop.f32.mrb[42].mxu1 }
 0xcfd   :  { %v1740_v11 = vadd.f32 %v1739_v9, %v1653_v4  ;;  %v13257_v12 = vpop.f32.mrb[43].mxu1 }
 0xcff   :  { %v1963_v49 = vpack.c.bf16 %v1740_v11, %v1737_v10 }
 0xd01   :  { %13301 = vmatmul.mubr.msk.bf16.vlgmr.msra.gmra.mrb[36].mxu0 %vm417_vm1, %v1963_v49 }
 0xd02   :  { %13306 = vmatprep.mubr.msk.bf16.mxu0 %vm15209_vm0, %v15208_v2 }
 0xd1a   :  { %v1956_v31 = vpop.f32.mrb[44].mxu1 }
 0xd1b   :  { %v13296_v13 = vpop.f32.mrb[45].mxu1  ;;  %v1957_v15 = vadd.f32 %v1956_v31, %v1873_v27  ;;  %v14485_v31 = vld [vmem:[%s18483_s11] sm:$0xff]  }
 0xd1c   :  { %v1959_v14 = vpop.f32.mrb[46].mxu1 }
 0xd1d   :  { %v1960_v16 = vadd.f32 %v1959_v14, %v1873_v27  ;;  %v13297_v17 = vpop.f32.mrb[47].mxu1 }
 0xd1f   :  { %v2039_v18 = vpack.c.bf16 %v1960_v16, %v1957_v15 }
 0xd21   :  { %13305 = vmatpush3.bf16.msra.mxu0 %v2039_v18  ;;  %v14487_v18 = vld [vmem:[%s18483_s11 + $0x10] sm:$0xff]  }
 0xd22   :  { %13310 = vmatprep.subr.bf16.mxu0 %v15208_v2 }
 0xdd4   :  { %v2005_v19 = vpop.f32.mrb[36].mxu0 }
 0xdd5   :  { %v2012_v21 = vmul.f32 0.17677669, %v2005_v19  ;;  %v13302_v43 = vpop.f32.mrb[37].mxu0  ;;  %v14488_v19 = vld [vmem:[%s18483_s11 + $0x18] sm:$0xff]  }
 0xdd6   :  { %v2008_v22 = vpop.f32.mrb[38].mxu0  ;;  %v14490_v43 = vld [vmem:[%s18483_s11 + $0x28] sm:$0xff]  }
 0xdd7   :  { %v2013_v50 = vmul.f32 0.17677669, %v2008_v22  ;;  %v13303_v23 = vpop.f32.mrb[39].mxu0  ;;  %v2014_v24 = vadd.f32 %v15197_v55, %v2012_v21  ;;  %v14489_v21 = vld [vmem:[%s18483_s11 + $0x20] sm:$0xff]   ;;  %v14491_v22 = vld [vmem:[%s18483_s11 + $0x30] sm:$0xff]  }
 0xdd8   :  { %v14493_v23 = vld [vmem:[%s18484_s6] ss:$8 sps:$4 sm:$0xff]   ;;  %v14495_v55 = vld [vmem:[%s18484_s6 + $0x4] ss:$8 sps:$4 sm:$0xff]  }
 0xdd9   :  { %v2016_v25 = vsel %vm469_vm2, %v2014_v24, -inf  ;;  %v2015_v28 = vadd.f32 %v15198_v26, %v2013_v50  ;;  %v14492_v50 = vld [vmem:[%s18483_s11 + $0x38] sm:$0xff]   ;;  %2405 = vmatprep.subr.bf16.mxu1 %v14495_v55  ;;  %v14501_v26 = vld [vmem:[%s18484_s6 + $0x24] ss:$8 sps:$4 sm:$0xff]  }
 0xdda   :  { %2017 = vmax.xlane.f32.xlu0 %v2016_v25  ;;  %2406 = vmatpush1.bf16.msra.mxu1 %v14493_v23  ;;  %v14496_v25 = vld [vmem:[%s18484_s6 + $0x10] ss:$8 sps:$4 sm:$0xff]  }
 0xddb   :  { %v2019_v30 = vsel %vm469_vm2, %v2015_v28, -inf }
 0xddc   :  { %2020 = vmax.xlane.f32.xlu1 %v2019_v30  ;;  %v14504_v30 = vld [vmem:[%s18484_s6 + $0x34] ss:$8 sps:$4 sm:$0xff]  }
 0xe67   :  { %v2018_v32 = vpop.xlane.xlu0 %2017 }
 0xe68   :  { %v2022_v33 = vsub.f32 %v2014_v24, %v2018_v32  ;;  %v14498_v24 = vld [vmem:[%s18484_s6 + $0x14] ss:$8 sps:$4 sm:$0xff]   ;;  %v14502_v32 = vld [vmem:[%s18484_s6 + $0x30] ss:$8 sps:$4 sm:$0xff]  }
 0xe69   :  { %v2021_v36 = vpop.xlane.xlu1 %2020  ;;  %2407 = vmatprep.subr.bf16.mxu1 %v14498_v24 }
 0xe6a   :  { %v2024_v37 = vmul.f32 1.442695, %v2022_v33  ;;  %v2023_v38 = vsub.f32 %v2015_v28, %v2021_v36  ;;  %2408 = vmatpush1.bf16.msra.mxu1 %v14496_v25  ;;  %v14499_v28 = vld [vmem:[%s18484_s6 + $0x20] ss:$8 sps:$4 sm:$0xff]   ;;  %v14507_v33 = vld [vmem:[%s18484_s6 + $0x44] ss:$8 sps:$4 sm:$0xff]  }
 0xe6b   :  { %2409 = vmatprep.subr.bf16.mxu1 %v14501_v26  ;;  %v14505_v36 = vld [vmem:[%s18484_s6 + $0x40] ss:$8 sps:$4 sm:$0xff]  }
 0xe6c   :  { %15025 = vpow2.f32 %v2024_v37  ;;  %v2026_v40 = vmul.f32 1.442695, %v2023_v38  ;;  %v14510_v37 = vld [vmem:[%s18484_s6 + $0x54] ss:$8 sps:$4 sm:$0xff]   ;;  %v14508_v38 = vld [vmem:[%s18484_s6 + $0x50] ss:$8 sps:$4 sm:$0xff]  }
 0xe6e   :  { %15027 = vpow2.f32 %v2026_v40  ;;  %2410 = vmatpush1.bf16.msra.mxu1 %v14499_v28  ;;  %v14513_v40 = vld [vmem:[%s18484_s6 + $0x64] ss:$8 sps:$4 sm:$0xff]  }
 0xe6f   :  { %2411 = vmatprep.subr.bf16.mxu1 %v14504_v30 }
 0xe72   :  { %2412 = vmatpush1.bf16.msra.mxu1 %v14502_v32 }
 0xe73   :  { %2413 = vmatprep.subr.bf16.mxu1 %v14507_v33 }
 0xe76   :  { %v15026_v41 = vpop.eup %15025  ;;  %2414 = vmatpush1.bf16.msra.mxu1 %v14505_v36 }
 0xe77   :  { %v2028_v42 = vsel %vm469_vm2, %v15026_v41, 0.0  ;;  %2415 = vmatprep.subr.bf16.mxu1 %v14510_v37 }
 0xe78   :  { %v15028_v44 = vpop.eup %15027  ;;  %2029 = vadd.xlane.f32.xlu0 %v2028_v42 }
 0xe79   :  { %v2031_v5 = vsel %vm469_vm2, %v15028_v44, 0.0 }
 0xe7a   :  { %2032 = vadd.xlane.f32.xlu1 %v2031_v5  ;;  %2416 = vmatpush1.bf16.msra.mxu1 %v14508_v38 }
 0xe7b   :  { %2417 = vmatprep.subr.bf16.mxu1 %v14513_v40 }
 0xf05   :  { %v2030_v7 = vpop.xlane.xlu0 %2029 }
 0xf06   :  { %15029 = vrcp.f32 %v2030_v7 }
 0xf07   :  { %v2033_v45 = vpop.xlane.xlu1 %2032 }
 0xf08   :  { %15031 = vrcp.f32 %v2033_v45 }
 0xf10   :  { %v15030_v48 = vpop.eup %15029 }
 0xf11   :  { %v2036_v52 = vmul.f32 %v15030_v48, %v15026_v41  ;;  %v14511_v41 = vld [vmem:[%s18484_s6 + $0x60] ss:$8 sps:$4 sm:$0xff]  }
 0xf12   :  { %v15032_v51 = vpop.eup %15031  ;;  %2418 = vmatpush1.bf16.msra.mxu1 %v14511_v41 }
 0xf13   :  { %v2037_v53 = vmul.f32 %v15032_v51, %v15028_v44  ;;  %v2181_v51 = vrot.slane %v15920_v63, %v15375_v39 }
 0xf15   :  { %v2038_v56 = vpack.c.bf16 %v2037_v53, %v2036_v52 }
 0xf17   :  { %13307 = vmatmul.mubr.msk.bf16.vlgmr.msra.gmra.mrb[40].mxu0 %vm469_vm2, %v2038_v56 }
 0xf18   :  { %13311 = vmatpush3.bf16.msra.mxu0 %v14483_v54  ;;  %13314 = vmatprep.mubr.msk.bf16.mxu0 %vm15209_vm0, %v15208_v2 }
 0xf19   :  { %13312 = vmatprep.subr.bf16.mxu0 %v15208_v2 }
 0xf1c   :  { %13313 = vmatpush3.bf16.msra.mxu0 %v14484_v57 }
 0xf1d   :  { %13318 = vmatprep.subr.bf16.mxu0 %v15208_v2 }
 0xfea   :  { %v2077_v29 = vpop.f32.mrb[40].mxu0 }
 0xfeb   :  { %v13308_v58 = vpop.f32.mrb[41].mxu0 }
 0xfec   :  { %v2080_v59 = vpop.f32.mrb[42].mxu0 }
 0xfed   :  { %v2084_v60 = vpack.c.bf16 %v2080_v59, %v2077_v29  ;;  %v13309_v61 = vpop.f32.mrb[43].mxu0  ;;  %v2187_v29 = vrot.slane %v15920_v63, %v15475_v20 }
 0xfef   :  { %13315 = vmatmul.mubr.msk.bf16.vlgmr.msra.gmra.mrb[44].mxu0 %vm417_vm1, %v2084_v60 }
 0xff0   :  { %13334 = vmatprep.mubr.msk.bf16.mxu0 %vm15209_vm0, %v15208_v2  ;;  %13319 = vmatpush3.bf16.msra.mxu0 %v14485_v31  ;;  %v14520_v31 = vld [vmem:[%s18485_s7 + $0x8] sm:$0xff]  }
 0xff1   :  { %13320 = vmatprep.subr.bf16.mxu0 %v15208_v2 }
0x10c2   :  { %v2139_v3 = vpop.f32.mrb[44].mxu0 }
0x10c3   :  { %v2146_v4 = vadd.f32 %v2139_v3, %v15880_v62  ;;  %v13316_v6 = vpop.f32.mrb[45].mxu0  ;;  %v14486_v62 = vld [vmem:[%s18483_s11 + $0x8] sm:$0xff]   ;;  %v14514_v3 = vld [vmem:[%s18484_s6 + $0x70] ss:$8 sps:$4 sm:$0xff]  }
0x10c4   :  { %v2142_v8 = vpop.f32.mrb[46].mxu0  ;;  %13321 = vmatpush3.bf16.msra.mxu0 %v14486_v62  ;;  %v14521_v62 = vld [vmem:[%s18485_s7 + $0x50] sm:$0xff]  }
0x10c5   :  { %v2152_v9 = vadd.f32 %v2151_v0, %v2146_v4  ;;  %v2147_v10 = vadd.f32 %v2142_v8, %v15883_v1  ;;  %v13317_v11 = vpop.f32.mrb[47].mxu0  ;;  %13322 = vmatprep.subr.bf16.mxu0 %v15208_v2  ;;  %v15210_v4 = vmov 0  }
0x10c6   :  { %2437 = vmatprep.mubr.bf16.mxu1 %v15210_v4 }
0x10c7   :  { %v2153_v12 = vadd.f32 %v2151_v0, %v2147_v10  ;;  %v2154_v49 = vadd.f32 %v2152_v9, %v15380_v46  ;;  %v14516_v0 = vld [vmem:[%s18484_s6 + $0x74] ss:$8 sps:$4 sm:$0xff]  }
0x10c8   :  { %13323 = vmatpush3.bf16.msra.mxu0 %v14487_v18  ;;  %2419 = vmatprep.subr.bf16.mxu1 %v14516_v0  ;;  %v14530_v18 = vld [vmem:[%s18485_s7 + $0x30] sm:$0xff]  }
0x10c9   :  { %2156 = vadd.xlane.f32.xlu0 %v2154_v49  ;;  %v2155_v27 = vadd.f32 %v2153_v12, %v15382_v47  ;;  %13324 = vmatprep.subr.bf16.mxu0 %v15208_v2  ;;  %v14517_v12 = vld [vmem:[%s18485_s7 + $0x40] sm:$0xff]  }
0x10ca   :  { %2420 = vmatpush1.bf16.msra.mxu1 %v14514_v3 }
0x10cb   :  { %2158 = vadd.xlane.f32.xlu1 %v2155_v27  ;;  %13338 = vmatprep.subr.bf16.mxu1 %v15208_v2 }
0x10cc   :  { %13325 = vmatpush3.bf16.msra.mxu0 %v14488_v19  ;;  %v14531_v19 = vld [vmem:[%s18485_s7 + $0x78] sm:$0xff]  }
0x10cd   :  { %13326 = vmatprep.subr.bf16.mxu0 %v15208_v2 }
0x10d0   :  { %13327 = vmatpush3.bf16.msra.mxu0 %v14489_v21  ;;  %v14532_v21 = vld [vmem:[%s18485_s7 + $0x38] sm:$0xff]  }
0x10d1   :  { %13328 = vmatprep.subr.bf16.mxu0 %v15208_v2 }
0x10d4   :  { %13329 = vmatpush3.bf16.msra.mxu0 %v14490_v43  ;;  %v2313_v43 = vld [vmem:[%s18486_s9] sm:$0x3] }
0x10d5   :  { %13330 = vmatprep.subr.bf16.mxu0 %v15208_v2 }
0x10d8   :  { %13331 = vmatpush3.bf16.msra.mxu0 %v14491_v22  ;;  %v2318_v22 = vrot.slane %v2313_v43, %v15368_v35 }
0x10d9   :  { %13332 = vmatprep.subr.bf16.mxu0 %v15208_v2 }
0x10dc   :  { %13333 = vmatpush3.bf16.msra.mxu0 %v14492_v50  ;;  %v2322_v50 = vrot.slane %v2313_v43, %v15375_v39 }
0x10dd   :  { %12466 = vmatprep.subr.bf16.mxu0 %v14517_v12 }
0x1156   :  { %v2157_v1 = vpop.xlane.xlu0 %2156 }
0x1157   :  { %v2160_v46 = vmul.f32 0.0078125, %v2157_v1  ;;  %v14522_v1 = vld [vmem:[%s18485_s7 + $0x10] sm:$0xff]  }
0x1158   :  { %v2159_v13 = vpop.xlane.xlu1 %2158 }
0x1159   :  { %v15936_v14 = vsub.f32 %v2154_v49, %v2160_v46  ;;  %v2161_v47 = vmul.f32 0.0078125, %v2159_v13  ;;  %v14518_v49 = vld [vmem:[%s18485_s7] sm:$0xff]   ;;  %v14523_v46 = vld [vmem:[%s18485_s7 + $0x58] sm:$0xff]  }
0x115a   :  { %v14524_v13 = vld [vmem:[%s18485_s7 + $0x18] sm:$0xff]  }
0x115b   :  { %v15938_v15 = vsub.f32 %v2155_v27, %v2161_v47  ;;  %v2164_v16 = vmul.f32 %v15936_v14, %v15936_v14  ;;  %v14519_v27 = vld [vmem:[%s18485_s7 + $0x48] sm:$0xff]   ;;  %v14526_v47 = vld [vmem:[%s18485_s7 + $0x20] sm:$0xff]  }
0x115d   :  { %2166 = vadd.xlane.f32.xlu0 %v2164_v16  ;;  %v2165_v17 = vmul.f32 %v15938_v15, %v15938_v15  ;;  %v14528_v16 = vld [vmem:[%s18485_s7 + $0x28] sm:$0xff]  }
0x115f   :  { %2168 = vadd.xlane.f32.xlu1 %v2165_v17  ;;  %v14529_v17 = vld [vmem:[%s18485_s7 + $0x70] sm:$0xff]  }
0x11ea   :  { %v2167_v42 = vpop.xlane.xlu0 %2166 }
0x11eb   :  { %v2170_v44 = vmul.f32 0.0078125, %v2167_v42 }
0x11ec   :  { %v2169_v5 = vpop.xlane.xlu1 %2168 }
0x11ed   :  { %v2172_v7 = vadd.f32 1e-05, %v2170_v44  ;;  %v2171_v45 = vmul.f32 0.0078125, %v2169_v5 }
0x11ef   :  { %15033 = vrsqrt.f32 %v2172_v7  ;;  %v2173_v48 = vadd.f32 1e-05, %v2171_v45 }
0x11f1   :  { %15035 = vrsqrt.f32 %v2173_v48 }
0x11f9   :  { %v15034_v52 = vpop.eup %15033 }
0x11fa   :  { %v2176_v53 = vmul.f32 %v15034_v52, %v15936_v14  ;;  %v14525_v14 = vld [vmem:[%s18485_s7 + $0x60] sm:$0xff]  }
0x11fb   :  { %v15036_v54 = vpop.eup %15035 }
0x11fc   :  { %v2177_v56 = vmul.f32 %v15036_v54, %v15938_v15  ;;  %v2182_v57 = vmul.f32 %v2181_v51, %v2176_v53  ;;  %v14527_v15 = vld [vmem:[%s18485_s7 + $0x68] sm:$0xff]  }
0x11fe   :  { %v2183_v58 = vmul.f32 %v2181_v51, %v2177_v56  ;;  %v2188_v59 = vadd.f32 %v2187_v29, %v2182_v57 }
0x1200   :  { %v2189_v60 = vadd.f32 %v2187_v29, %v2183_v58 }
0x1202   :  { %v2190_v61 = vpack.c.bf16 %v2189_v60, %v2188_v59 }
0x1204   :  { %13335 = vmatmul.mubr.bf16.vlgmr.msra.gmra.mrb[48].mxu0 %v2190_v61 }
0x1205   :  { %12467 = vmatpush3.bf16.msra.mxu0 %v14518_v49 }
0x1206   :  { %12468 = vmatprep.subr.bf16.mxu0 %v14519_v27 }
0x1209   :  { %12469 = vmatpush3.bf16.msra.mxu0 %v14520_v31 }
0x120a   :  { %12470 = vmatprep.subr.bf16.mxu0 %v14521_v62 }
0x120d   :  { %12471 = vmatpush3.bf16.msra.mxu0 %v14522_v1 }
0x120e   :  { %12472 = vmatprep.subr.bf16.mxu0 %v14523_v46 }
0x1211   :  { %12473 = vmatpush3.bf16.msra.mxu0 %v14524_v13 }
0x1212   :  { %12474 = vmatprep.subr.bf16.mxu0 %v14525_v14 }
0x1215   :  { %12475 = vmatpush3.bf16.msra.mxu0 %v14526_v47 }
0x1216   :  { %12476 = vmatprep.subr.bf16.mxu0 %v14527_v15  ;;  %v16088_v15 = vsub.s32 3, %v15365_v34 }
0x1219   :  { %12477 = vmatpush3.bf16.msra.mxu0 %v14528_v16 }
0x121a   :  { %12478 = vmatprep.subr.bf16.mxu0 %v14529_v17  ;;  %v2521_v17 = vrot.slane %v15920_v63, %v16088_v15  ;;  %v14534_v63 = vld [vmem:[%s18476_s3 + $0x100] sm:$0xff]  }
0x121d   :  { %12479 = vmatpush3.bf16.msra.mxu0 %v14530_v18 }
0x121e   :  { %12480 = vmatprep.subr.bf16.mxu0 %v14531_v19 }
0x1221   :  { %12481 = vmatpush3.bf16.msra.mxu0 %v14532_v21 }
0x1222   :  { %13358 = vmatprep.subr.bf16.mxu0 %v15208_v2 }
0x12d7   :  { %v16023_v6 = vpop.f32.mrb[48].mxu0 }
0x12d8   :  { %v13336_v8 = vpop.f32.mrb[49].mxu0 }
0x12d9   :  { %v16025_v9 = vpop.f32.mrb[50].mxu0 }
0x12da   :  { %v2296_v10 = vpack.c.bf16 %v16025_v9, %v16023_v6  ;;  %v13337_v11 = vpop.f32.mrb[51].mxu0 }
0x12dc   :  { %2438 = vmatmul.mubr.bf16.vlgmr.msra.gmra.mrb[48].mxu1 %v2296_v10 }
0x12dd   :  { %13354 = vmatprep.mubr.msk.bf16.mxu1 %vm15209_vm0, %v15208_v2 }
0x13af   :  { %v2439_v23 = vpop.f32.mrb[48].mxu1 }
0x13b0   :  { %v2440_v55 = vadd.f32 %v2439_v23, %v2318_v22  ;;  %v2441_v24 = vpop.f32.mrb[49].mxu1 }
0x13b1   :  { %v2442_v25 = vadd.f32 %v2441_v24, %v2322_v50  ;;  %v2443_v26 = vpop.f32.mrb[50].mxu1 }
0x13b2   :  { %v2452_v28 = vmul.f32 0.044715, %v2440_v55  ;;  %v2444_v30 = vadd.f32 %v2443_v26, %v2318_v22  ;;  %v2445_v32 = vpop.f32.mrb[51].mxu1  ;;  %v2448_v10 = vmul.f32 0.5, %v2440_v55  ;;  %v14535_v26 = vld [vmem:[%s18475_s2 + $0x108] sm:$0xff]  }
0x13b3   :  { %v2453_v33 = vmul.f32 0.044715, %v2442_v25  ;;  %v2446_v36 = vadd.f32 %v2445_v32, %v2322_v50  ;;  %v2449_v49 = vmul.f32 0.5, %v2442_v25 }
0x13b4   :  { %v2456_v37 = vmul.f32 %v2452_v28, %v2440_v55  ;;  %v2454_v38 = vmul.f32 0.044715, %v2444_v30  ;;  %v2450_v11 = vmul.f32 0.5, %v2444_v30 }
0x13b5   :  { %v2457_v40 = vmul.f32 %v2453_v33, %v2442_v25  ;;  %v2455_v41 = vmul.f32 0.044715, %v2446_v36  ;;  %v2451_v27 = vmul.f32 0.5, %v2446_v36 }
0x13b6   :  { %v2460_v42 = vmul.f32 %v2456_v37, %v2440_v55  ;;  %v2458_v44 = vmul.f32 %v2454_v38, %v2444_v30 }
0x13b7   :  { %v2461_v5 = vmul.f32 %v2457_v40, %v2442_v25  ;;  %v2459_v7 = vmul.f32 %v2455_v41, %v2446_v36  ;;  %v14537_v40 = vld [vmem:[%s18475_s2 + $0x110] sm:$0xff]  }
0x13b8   :  { %v2464_v45 = vadd.f32 %v2460_v42, %v2440_v55  ;;  %v2462_v48 = vmul.f32 %v2458_v44, %v2444_v30  ;;  %v14538_v41 = vld [vmem:[%s18476_s3 + $0x110] sm:$0xff]   ;;  %v14539_v42 = vld [vmem:[%s18475_s2 + $0x118] sm:$0xff]  }
0x13b9   :  { %v2463_v51 = vmul.f32 %v2459_v7, %v2446_v36  ;;  %v2465_v52 = vadd.f32 %v2461_v5, %v2442_v25  ;;  %v14533_v25 = vld [vmem:[%s18475_s2 + $0x100] sm:$0xff]   ;;  %v14540_v44 = vld [vmem:[%s18476_s3 + $0x118] sm:$0xff]  }
0x13ba   :  { %v2468_v53 = vmul.f32 0.7978846, %v2464_v45  ;;  %v2466_v54 = vadd.f32 %v2462_v48, %v2444_v30  ;;  %13339 = vmatpush3.bf16.msra.mxu1 %v14533_v25  ;;  %v14541_v5 = vld [vmem:[%s18475_s2 + $0x120] sm:$0xff]   ;;  %v14543_v45 = vld [vmem:[%s18475_s2 + $0x128] sm:$0xff]  }
0x13bb   :  { %v2467_v56 = vadd.f32 %v2463_v51, %v2446_v36  ;;  %v2469_v57 = vmul.f32 0.7978846, %v2465_v52  ;;  %13340 = vmatprep.subr.bf16.mxu1 %v15208_v2  ;;  %v14542_v7 = vld [vmem:[%s18476_s3 + $0x120] sm:$0xff]   ;;  %v14544_v48 = vld [vmem:[%s18476_s3 + $0x128] sm:$0xff]   ;;  %v14545_v51 = vld [vmem:[%s18475_s2 + $0x130] sm:$0xff]  }
0x13bc   :  { %15037 = vtanh.f32 %v2468_v53  ;;  %v2470_v29 = vmul.f32 0.7978846, %v2466_v54  ;;  %v14546_v52 = vld [vmem:[%s18476_s3 + $0x130] sm:$0xff]   ;;  %v14547_v53 = vld [vmem:[%s18475_s2 + $0x138] sm:$0xff]  }
0x13bd   :  { %v2471_v58 = vmul.f32 0.7978846, %v2467_v56  ;;  %15039 = vtanh.f32 %v2469_v57  ;;  %v14548_v54 = vld [vmem:[%s18476_s3 + $0x138] sm:$0xff]  }
0x13be   :  { %15041 = vtanh.f32 %v2470_v29  ;;  %13341 = vmatpush3.bf16.msra.mxu1 %v14535_v26 }
0x13bf   :  { %15043 = vtanh.f32 %v2471_v58  ;;  %13342 = vmatprep.subr.bf16.mxu1 %v15208_v2 }
0x13c2   :  { %13343 = vmatpush3.bf16.msra.mxu1 %v14537_v40  ;;  %v14557_v40 = vld [vmem:[%s18475_s2 + $0x140] sm:$0xff]  }
0x13c3   :  { %13344 = vmatprep.subr.bf16.mxu1 %v15208_v2 }
0x13c6   :  { %v15038_v59 = vpop.eup %15037  ;;  %13345 = vmatpush3.bf16.msra.mxu1 %v14539_v42  ;;  %v14559_v42 = vld [vmem:[%s18475_s2 + $0x150] sm:$0xff]  }
0x13c7   :  { %v15040_v60 = vpop.eup %15039  ;;  %v2476_v61 = vadd.f32 1.0, %v15038_v59  ;;  %13346 = vmatprep.subr.bf16.mxu1 %v15208_v2 }
0x13c8   :  { %v15042_v0 = vpop.eup %15041  ;;  %v2477_v3 = vadd.f32 1.0, %v15040_v60 }
0x13c9   :  { %v15044_v8 = vpop.eup %15043  ;;  %v2478_v12 = vadd.f32 1.0, %v15042_v0  ;;  %v2480_v62 = vmul.f32 %v2476_v61, %v2448_v10  ;;  %v16159_v61 = vsub.s32 4, %v15365_v34  ;;  %v15199_v0 = vld [vmem:[%s18482_s10] sm:$0x3f] }
0x13ca   :  { %v2479_v31 = vadd.f32 1.0, %v15044_v8  ;;  %v2481_v46 = vmul.f32 %v2477_v3, %v2449_v49  ;;  %13347 = vmatpush3.bf16.msra.mxu1 %v14541_v5  ;;  %v16166_v8 = vsub.s32 5, %v15365_v34  ;;  %v14561_v5 = vld [vmem:[%s18475_s2 + $0x160] sm:$0xff]  }
0x13cb   :  { %v2482_v1 = vmul.f32 %v2478_v12, %v2450_v11  ;;  %13348 = vmatprep.subr.bf16.mxu1 %v15208_v2  ;;  %v2686_v3 = vrot.slane %v15199_v0, %v16159_v61 }
0x13cc   :  { %v2483_v13 = vmul.f32 %v2479_v31, %v2451_v27  ;;  %v2692_v49 = vrot.slane %v15199_v0, %v16166_v8  ;;  %v14567_v0 = vld [vmem:[%s18477_s4 + $0x150] sm:$0xff]  }
0x13cd   :  { %v2484_v14 = vpack.c.bf16 %v2482_v1, %v2480_v62 }
0x13ce   :  { %v2485_v47 = vpack.c.bf16 %v2483_v13, %v2481_v46  ;;  %13349 = vmatpush3.bf16.msra.mxu1 %v14543_v45  ;;  %v14549_v13 = vld [vmem:[%s18477_s4 + $0x100] sm:$0xff]  }
0x13cf   :  { %13350 = vmatprep.subr.bf16.mxu1 %v15208_v2 }
0x13d0   :  { %2650 = vmatprep.mubr.bf16.mxu0 %v2485_v47  ;;  %v14551_v47 = vld [vmem:[%s18477_s4 + $0x110] sm:$0xff]  }
0x13d1   :  { %2651 = vmatmul.mubr.bf16.vlgmr.msra.gmra.mrb[52].mxu0 %v2484_v14  ;;  %v14550_v14 = vld [vmem:[%s18477_s4 + $0x108] sm:$0xff]  }
0x13d2   :  { %13374 = vmatprep.mubr.msk.bf16.mxu0 %vm15209_vm0, %v15208_v2  ;;  %13359 = vmatpush3.bf16.msra.mxu0 %v14534_v63 }
0x13d3   :  { %13360 = vmatprep.subr.bf16.mxu0 %v15208_v2  ;;  %13351 = vmatpush3.bf16.msra.mxu1 %v14545_v51 }
0x13d4   :  { %13352 = vmatprep.subr.bf16.mxu1 %v15208_v2 }
0x13d7   :  { %13353 = vmatpush3.bf16.msra.mxu1 %v14547_v53 }
0x13d8   :  { %13378 = vmatprep.subr.bf16.mxu1 %v15208_v2 }
0x14a4   :  { %v12482_v16 = vpop.f32.mrb[52].mxu0 }
0x14a5   :  { %v12483_v18 = vpop.f32.mrb[53].mxu0 }
0x14a6   :  { %v12484_v19 = vadd.f32 %v12483_v18, %v12482_v16  ;;  %v12485_v21 = vpop.f32.mrb[54].mxu0  ;;  %v14552_v16 = vld [vmem:[%s18477_s4 + $0x118] sm:$0xff]   ;;  %v14554_v18 = vld [vmem:[%s18477_s4 + $0x128] sm:$0xff]  }
0x14a7   :  { %v12486_v43 = vpop.f32.mrb[55].mxu0 }
0x14a8   :  { %v2653_v22 = vadd.f32 %v12484_v19, %v2521_v17  ;;  %v12487_v50 = vadd.f32 %v12486_v43, %v12485_v21  ;;  %v14555_v19 = vld [vmem:[%s18477_s4 + $0x130] sm:$0xff]   ;;  %v14556_v21 = vld [vmem:[%s18477_s4 + $0x138] sm:$0xff]  }
0x14a9   :  { %v10996_v43 = vld [vmem:[%s18479_s8 + $0x10] sm:$0x7] }
0x14aa   :  { %v2656_v23 = vadd.f32 %v12487_v50, %v2521_v17  ;;  %v2659_v55 = vadd.f32 %v2653_v22, %v16023_v6  ;;  %v14536_v6 = vld [vmem:[%s18476_s3 + $0x108] sm:$0xff]   ;;  %v14553_v17 = vld [vmem:[%s18477_s4 + $0x120] sm:$0xff]   ;;  %v2720_v22 = vrot.slane %v10996_v43, %v15368_v35  ;;  %v2830_v50 = vrot.slane %v10996_v43, %v15375_v39 }
0x14ab   :  { %13361 = vmatpush3.bf16.msra.mxu0 %v14536_v6 }
0x14ac   :  { %2661 = vadd.xlane.f32.xlu0 %v2659_v55  ;;  %v2660_v24 = vadd.f32 %v2656_v23, %v16025_v9  ;;  %13362 = vmatprep.subr.bf16.mxu0 %v15208_v2 }
0x14ae   :  { %2663 = vadd.xlane.f32.xlu1 %v2660_v24 }
0x14af   :  { %13363 = vmatpush3.bf16.msra.mxu0 %v14538_v41  ;;  %v14558_v41 = vld [vmem:[%s18475_s2 + $0x148] sm:$0xff]  }
0x14b0   :  { %13364 = vmatprep.subr.bf16.mxu0 %v15208_v2 }
0x14b3   :  { %13365 = vmatpush3.bf16.msra.mxu0 %v14540_v44  ;;  %v14560_v44 = vld [vmem:[%s18475_s2 + $0x158] sm:$0xff]  }
0x14b4   :  { %13366 = vmatprep.subr.bf16.mxu0 %v15208_v2 }
0x14b7   :  { %13367 = vmatpush3.bf16.msra.mxu0 %v14542_v7  ;;  %v2940_v7 = vrot.slane %v10996_v43, %v15475_v20  ;;  %v14584_v43 = vld [vmem:[%s18477_s4 + $0x198] sm:$0xff]  }
0x14b8   :  { %13368 = vmatprep.subr.bf16.mxu0 %v15208_v2 }
0x14bb   :  { %13369 = vmatpush3.bf16.msra.mxu0 %v14544_v48  ;;  %v14562_v48 = vld [vmem:[%s18475_s2 + $0x168] sm:$0xff]  }
0x14bc   :  { %13370 = vmatprep.subr.bf16.mxu0 %v15208_v2 }
0x14bf   :  { %13371 = vmatpush3.bf16.msra.mxu0 %v14546_v52 }
0x14c0   :  { %13372 = vmatprep.subr.bf16.mxu0 %v15208_v2 }
0x14c3   :  { %13373 = vmatpush3.bf16.msra.mxu0 %v14548_v54 }
0x14c4   :  { %13398 = vmatprep.subr.bf16.mxu0 %v15208_v2 }
0x1539   :  { %v2662_v9 = vpop.xlane.xlu0 %2661 }
0x153a   :  { %v2665_v28 = vmul.f32 0.0078125, %v2662_v9 }
0x153b   :  { %v2664_v30 = vpop.xlane.xlu1 %2663 }
0x153c   :  { %v2667_v32 = vsub.f32 %v2659_v55, %v2665_v28  ;;  %v2666_v33 = vmul.f32 0.0078125, %v2664_v30 }
0x153e   :  { %v2668_v36 = vsub.f32 %v2660_v24, %v2666_v33  ;;  %v2669_v37 = vmul.f32 %v2667_v32, %v2667_v32 }
0x1540   :  { %2671 = vadd.xlane.f32.xlu0 %v2669_v37  ;;  %v2670_v38 = vmul.f32 %v2668_v36, %v2668_v36 }
0x1542   :  { %2673 = vadd.xlane.f32.xlu1 %v2670_v38 }
0x15cd   :  { %v2672_v56 = vpop.xlane.xlu0 %2671 }
0x15ce   :  { %v2675_v57 = vmul.f32 0.0078125, %v2672_v56 }
0x15cf   :  { %v2674_v29 = vpop.xlane.xlu1 %2673 }
0x15d0   :  { %v2677_v58 = vadd.f32 1e-05, %v2675_v57  ;;  %v2676_v59 = vmul.f32 0.0078125, %v2674_v29  ;;  %v14563_v57 = vld [vmem:[%s18475_s2 + $0x170] sm:$0xff]  }
0x15d2   :  { %15045 = vrsqrt.f32 %v2677_v58  ;;  %v2678_v60 = vadd.f32 1e-05, %v2676_v59  ;;  %v14564_v58 = vld [vmem:[%s18475_s2 + $0x178] sm:$0xff]   ;;  %v14565_v59 = vld [vmem:[%s18477_s4 + $0x140] sm:$0xff]  }
0x15d4   :  { %15047 = vrsqrt.f32 %v2678_v60  ;;  %v14566_v60 = vld [vmem:[%s18477_s4 + $0x148] sm:$0xff]  }
0x15dc   :  { %v15046_v10 = vpop.eup %15045 }
0x15dd   :  { %v2681_v11 = vmul.f32 %v15046_v10, %v2667_v32  ;;  %v14569_v10 = vld [vmem:[%s18477_s4 + $0x160] sm:$0xff]  }
0x15de   :  { %v15048_v12 = vpop.eup %15047 }
0x15df   :  { %v2687_v27 = vmul.f32 %v2686_v3, %v2681_v11  ;;  %v2682_v31 = vmul.f32 %v15048_v12, %v2668_v36  ;;  %v14570_v11 = vld [vmem:[%s18477_s4 + $0x168] sm:$0xff]   ;;  %v14571_v12 = vld [vmem:[%s18477_s4 + $0x170] sm:$0xff]  }
0x15e1   :  { %v2688_v62 = vmul.f32 %v2686_v3, %v2682_v31  ;;  %v16169_v1 = vadd.f32 %v2692_v49, %v2687_v27  ;;  %v14568_v3 = vld [vmem:[%s18477_s4 + $0x158] sm:$0xff]   ;;  %v14573_v27 = vld [vmem:[%s18475_s2 + $0x180] sm:$0xff]   ;;  %v14574_v31 = vld [vmem:[%s18475_s2 + $0x188] sm:$0xff]  }
0x15e3   :  { %v16171_v46 = vadd.f32 %v2692_v49, %v2688_v62  ;;  %v14572_v49 = vld [vmem:[%s18477_s4 + $0x178] sm:$0xff]   ;;  %v14575_v62 = vld [vmem:[%s18475_s2 + $0x190] sm:$0xff]  }
0x15e5   :  { %v16178_v34 = vpack.c.bf16 %v16171_v46, %v16169_v1 }
0x15e7   :  { %13355 = vmatmul.mubr.bf16.vlgmr.msra.gmra.mrb[52].mxu1 %v16178_v34  ;;  %13375 = vmatmul.mubr.bf16.vlgmr.msra.gmra.mrb[56].mxu0 %v16178_v34 }
0x15e8   :  { %13379 = vmatpush3.bf16.msra.mxu1 %v14549_v13  ;;  %13394 = vmatprep.mubr.msk.bf16.mxu1 %vm15209_vm0, %v15208_v2  ;;  %v14576_v13 = vld [vmem:[%s18475_s2 + $0x198] sm:$0xff]  }
0x15e9   :  { %13380 = vmatprep.subr.bf16.mxu1 %v15208_v2  ;;  %13400 = vmatprep.mubr.msk.bf16.mxu0 %vm15209_vm0, %v15208_v2 }
0x15ec   :  { %13381 = vmatpush3.bf16.msra.mxu1 %v14550_v14  ;;  %v14577_v14 = vld [vmem:[%s18475_s2 + $0x1a0] sm:$0xff]  }
0x15ed   :  { %13382 = vmatprep.subr.bf16.mxu1 %v15208_v2 }
0x15f0   :  { %13383 = vmatpush3.bf16.msra.mxu1 %v14551_v47  ;;  %v14578_v47 = vld [vmem:[%s18475_s2 + $0x1a8] sm:$0xff]  }
0x15f1   :  { %13384 = vmatprep.subr.bf16.mxu1 %v15208_v2 }
0x15f4   :  { %13385 = vmatpush3.bf16.msra.mxu1 %v14552_v16  ;;  %v14579_v16 = vld [vmem:[%s18475_s2 + $0x1b0] sm:$0xff]  }
0x15f5   :  { %13386 = vmatprep.subr.bf16.mxu1 %v15208_v2 }
0x15f8   :  { %13387 = vmatpush3.bf16.msra.mxu1 %v14553_v17  ;;  %v14580_v17 = vld [vmem:[%s18475_s2 + $0x1b8] sm:$0xff]  }
0x15f9   :  { %13388 = vmatprep.subr.bf16.mxu1 %v15208_v2 }
0x15fc   :  { %13389 = vmatpush3.bf16.msra.mxu1 %v14554_v18  ;;  %v14581_v18 = vld [vmem:[%s18477_s4 + $0x180] sm:$0xff]  }
0x15fd   :  { %13390 = vmatprep.subr.bf16.mxu1 %v15208_v2 }
0x1600   :  { %13391 = vmatpush3.bf16.msra.mxu1 %v14555_v19  ;;  %v14582_v19 = vld [vmem:[%s18477_s4 + $0x188] sm:$0xff]  }
0x1601   :  { %13392 = vmatprep.subr.bf16.mxu1 %v15208_v2 }
0x1604   :  { %13393 = vmatpush3.bf16.msra.mxu1 %v14556_v21  ;;  %v14583_v21 = vld [vmem:[%s18477_s4 + $0x190] sm:$0xff]  }
0x1605   :  { %13404 = vmatprep.subr.bf16.mxu1 %v15208_v2 }
0x1607   :  { %13395 = vmatmul.mubr.bf16.vlgmr.msra.gmra.mrb[56].mxu1 %v16178_v34 }
0x1608   :  { %13406 = vmatprep.mubr.msk.bf16.mxu1 %vm15209_vm0, %v15208_v2 }
0x16ba   :  { %v2803_v23 = vpop.f32.mrb[52].mxu1  ;;  %v2913_v55 = vpop.f32.mrb[56].mxu0 }
0x16bb   :  { %v13356_v24 = vpop.f32.mrb[53].mxu1  ;;  %v13376_v25 = vpop.f32.mrb[57].mxu0  ;;  %v2804_v6 = vadd.f32 %v2803_v23, %v2720_v22  ;;  %v2914_v9 = vadd.f32 %v2913_v55, %v2830_v50  ;;  %v14587_v23 = vld [vmem:[%s18477_s4 + $0x1b0] sm:$0xff]   ;;  %v14588_v55 = vld [vmem:[%s18477_s4 + $0x1b8] sm:$0xff]  }
0x16bc   :  { %v2806_v63 = vpop.f32.mrb[54].mxu1  ;;  %v2916_v26 = vpop.f32.mrb[58].mxu0  ;;  %v14589_v24 = vld [vmem:[%s18476_s3 + $0x1c0] sm:$0xff]   ;;  %v14590_v25 = vld [vmem:[%s18476_s3 + $0x1c8] sm:$0xff]  }
0x16bd   :  { %v2807_v28 = vadd.f32 %v2806_v63, %v2720_v22  ;;  %v2917_v30 = vadd.f32 %v2916_v26, %v2830_v50  ;;  %v13357_v32 = vpop.f32.mrb[55].mxu1  ;;  %v13377_v33 = vpop.f32.mrb[59].mxu0  ;;  %v14585_v22 = vld [vmem:[%s18477_s4 + $0x1a0] sm:$0xff]   ;;  %v14586_v50 = vld [vmem:[%s18477_s4 + $0x1a8] sm:$0xff]   ;;  %v14591_v63 = vld [vmem:[%s18476_s3 + $0x1d0] sm:$0xff]  }
0x16be   :  { %v14592_v26 = vld [vmem:[%s18476_s3 + $0x1d8] sm:$0xff]  }
0x16bf   :  { %v3030_v36 = vpack.c.bf16 %v2807_v28, %v2804_v6  ;;  %v3031_v37 = vpack.c.bf16 %v2917_v30, %v2914_v9  ;;  %v14593_v6 = vld [vmem:[%s18476_s3 + $0x1e0] sm:$0xff]   ;;  %v14594_v9 = vld [vmem:[%s18476_s3 + $0x1e8] sm:$0xff]   ;;  %v14595_v28 = vld [vmem:[%s18476_s3 + $0x1f0] sm:$0xff]  }
0x16c0   :  { %v14596_v30 = vld [vmem:[%s18476_s3 + $0x1f8] sm:$0xff]  }
0x16c1   :  { %v3036_v38 = vsel %vm417_vm1, %v3031_v37, 0 }
0x16c2   :  { %13399 = vmatpush3.bf16.xpose.msra.mxu0 %v3036_v38 }
0x16c3   :  { %13410 = vmatprep.subr.bf16.mxu0 %v15208_v2 }
0x16c9   :  { %13401 = vmatmul.mubr.msk.bf16.vlgmr.msra.gmra.mrb[60].mxu0 %vm417_vm1, %v3030_v36 }
0x16ca   :  { %13411 = vmatpush3.bf16.msra.mxu0 %v14557_v40  ;;  %13426 = vmatprep.mubr.msk.bf16.mxu0 %vm15209_vm0, %v15208_v2 }
0x16cb   :  { %13412 = vmatprep.subr.bf16.mxu0 %v15208_v2 }
0x16ce   :  { %13413 = vmatpush3.bf16.msra.mxu0 %v14558_v41  ;;  %v16408_v41 = vld [vmem:[%s18480_s1] sm:$0xff] }
0x16cf   :  { %13414 = vmatprep.subr.bf16.mxu0 %v15208_v2 }
0x16d2   :  { %13415 = vmatpush3.bf16.msra.mxu0 %v14559_v42 }
0x16d3   :  { %13416 = vmatprep.subr.bf16.mxu0 %v15208_v2 }
0x16d6   :  { %13417 = vmatpush3.bf16.msra.mxu0 %v14560_v44 }
0x16d7   :  { %13418 = vmatprep.subr.bf16.mxu0 %v15208_v2 }
0x16da   :  { %v3023_v45 = vpop.f32.mrb[56].mxu1  ;;  %13419 = vmatpush3.bf16.msra.mxu0 %v14561_v5  ;;  %v16415_v5 = vld [vmem:[%s18480_s1 + $0x8] sm:$0xff] }
0x16db   :  { %v13396_v51 = vpop.f32.mrb[57].mxu1  ;;  %13420 = vmatprep.subr.bf16.mxu0 %v15208_v2  ;;  %v3024_v53 = vadd.f32 %v3023_v45, %v2940_v7 }
0x16dc   :  { %v3026_v52 = vpop.f32.mrb[58].mxu1 }
0x16dd   :  { %v3027_v54 = vadd.f32 %v3026_v52, %v2940_v7  ;;  %v13397_v56 = vpop.f32.mrb[59].mxu1 }
0x16de   :  { %13421 = vmatpush3.bf16.msra.mxu0 %v14562_v48  ;;  %v16422_v48 = vld [vmem:[%s18479_s8 + $0x14] sm:$0x7] }
0x16df   :  { %v3106_v29 = vpack.c.bf16 %v3027_v54, %v3024_v53  ;;  %13422 = vmatprep.subr.bf16.mxu0 %v15208_v2  ;;  %v3179_v51 = vrot.slane %v16422_v48, %v15368_v35 }
0x16e1   :  { %13405 = vmatpush3.bf16.msra.mxu1 %v3106_v29 }
0x16e2   :  { %13423 = vmatpush3.bf16.msra.mxu0 %v14563_v57  ;;  %13430 = vmatprep.subr.bf16.mxu1 %v15208_v2 }
0x16e3   :  { %13424 = vmatprep.subr.bf16.mxu0 %v15208_v2 }
0x16e6   :  { %13425 = vmatpush3.bf16.msra.mxu0 %v14564_v58 }
0x16e7   :  { %13450 = vmatprep.subr.bf16.mxu0 %v15208_v2 }
0x16e9   :  { %13427 = vmatmul.mubr.bf16.vlgmr.msra.gmra.mrb[64].mxu0 %v16178_v34 }
0x16ea   :  { %13451 = vmatpush3.bf16.msra.mxu0 %v14565_v59  ;;  %13466 = vmatprep.mubr.msk.bf16.mxu0 %vm15209_vm0, %v15208_v2  ;;  %v3399_v59 = vrot.slane %v16422_v48, %v15475_v20 }
0x16eb   :  { %13452 = vmatprep.subr.bf16.mxu0 %v15208_v2 }
0x16ee   :  { %13453 = vmatpush3.bf16.msra.mxu0 %v14566_v60 }
0x16ef   :  { %13454 = vmatprep.subr.bf16.mxu0 %v15208_v2 }
0x16f2   :  { %13455 = vmatpush3.bf16.msra.mxu0 %v14567_v0 }
0x16f3   :  { %13456 = vmatprep.subr.bf16.mxu0 %v15208_v2 }
0x16f6   :  { %13457 = vmatpush3.bf16.msra.mxu0 %v14568_v3 }
0x16f7   :  { %13458 = vmatprep.subr.bf16.mxu0 %v15208_v2 }
0x16fa   :  { %13459 = vmatpush3.bf16.msra.mxu0 %v14569_v10 }
0x16fb   :  { %13460 = vmatprep.subr.bf16.mxu0 %v15208_v2 }
0x16fe   :  { %13461 = vmatpush3.bf16.msra.mxu0 %v14570_v11 }
0x16ff   :  { %13462 = vmatprep.subr.bf16.mxu0 %v15208_v2 }
0x1702   :  { %13463 = vmatpush3.bf16.msra.mxu0 %v14571_v12 }
0x1703   :  { %13464 = vmatprep.subr.bf16.mxu0 %v15208_v2 }
0x1706   :  { %13465 = vmatpush3.bf16.msra.mxu0 %v14572_v49 }
0x1707   :  { %13498 = vmatprep.subr.bf16.mxu0 %v15208_v2 }
0x1709   :  { %13467 = vmatmul.mubr.bf16.vlgmr.msra.gmra.mrb[68].mxu0 %v16178_v34 }
0x170a   :  { %13499 = vmatpush3.bf16.msra.mxu0 %v14573_v27  ;;  %13514 = vmatprep.mubr.msk.bf16.mxu0 %vm15209_vm0, %v15208_v2  ;;  %v16443_v27 = vld [vmem:[%s18479_s8 + $0x18] sm:$0x7] }
0x170b   :  { %13500 = vmatprep.subr.bf16.mxu0 %v15208_v2 }
0x170e   :  { %13501 = vmatpush3.bf16.msra.mxu0 %v14574_v31  ;;  %v3750_v31 = vrot.slane %v16443_v27, %v15368_v35 }
0x170f   :  { %13502 = vmatprep.subr.bf16.mxu0 %v15208_v2 }
0x1712   :  { %13503 = vmatpush3.bf16.msra.mxu0 %v14575_v62 }
0x1713   :  { %13504 = vmatprep.subr.bf16.mxu0 %v15208_v2 }
0x1716   :  { %13505 = vmatpush3.bf16.msra.mxu0 %v14576_v13 }
0x1717   :  { %13506 = vmatprep.subr.bf16.mxu0 %v15208_v2 }
0x171a   :  { %13507 = vmatpush3.bf16.msra.mxu0 %v14577_v14 }
0x171b   :  { %13508 = vmatprep.subr.bf16.mxu0 %v15208_v2 }
0x171e   :  { %13509 = vmatpush3.bf16.msra.mxu0 %v14578_v47 }
0x171f   :  { %13510 = vmatprep.subr.bf16.mxu0 %v15208_v2 }
0x1722   :  { %13511 = vmatpush3.bf16.msra.mxu0 %v14579_v16 }
0x1723   :  { %13512 = vmatprep.subr.bf16.mxu0 %v15208_v2 }
0x1726   :  { %13513 = vmatpush3.bf16.msra.mxu0 %v14580_v17 }
0x1727   :  { %13538 = vmatprep.subr.bf16.mxu0 %v15208_v2 }
0x1729   :  { %13515 = vmatmul.mubr.bf16.vlgmr.msra.gmra.mrb[72].mxu0 %v16178_v34 }
0x172a   :  { %13539 = vmatpush3.bf16.msra.mxu0 %v14581_v18  ;;  %13554 = vmatprep.mubr.msk.bf16.mxu0 %vm15209_vm0, %v15208_v2 }
0x172b   :  { %13540 = vmatprep.subr.bf16.mxu0 %v15208_v2 }
0x172e   :  { %13541 = vmatpush3.bf16.msra.mxu0 %v14582_v19  ;;  %v3970_v19 = vrot.slane %v16443_v27, %v15475_v20 }
0x172f   :  { %13542 = vmatprep.subr.bf16.mxu0 %v15208_v2 }
0x1732   :  { %13543 = vmatpush3.bf16.msra.mxu0 %v14583_v21 }
0x1733   :  { %13544 = vmatprep.subr.bf16.mxu0 %v15208_v2 }
0x1736   :  { %13545 = vmatpush3.bf16.msra.mxu0 %v14584_v43 }
0x1737   :  { %13546 = vmatprep.subr.bf16.mxu0 %v15208_v2 }
0x173a   :  { %13547 = vmatpush3.bf16.msra.mxu0 %v14585_v22 }
0x173b   :  { %13548 = vmatprep.subr.bf16.mxu0 %v15208_v2 }
0x173e   :  { %13549 = vmatpush3.bf16.msra.mxu0 %v14586_v50 }
0x173f   :  { %13550 = vmatprep.subr.bf16.mxu0 %v15208_v2 }
0x1742   :  { %13551 = vmatpush3.bf16.msra.mxu0 %v14587_v23 }
0x1743   :  { %13552 = vmatprep.subr.bf16.mxu0 %v15208_v2 }
0x1746   :  { %13553 = vmatpush3.bf16.msra.mxu0 %v14588_v55 }
0x1747   :  { %13598 = vmatprep.subr.bf16.mxu0 %v15208_v2 }
0x1749   :  { %13555 = vmatmul.mubr.bf16.vlgmr.msra.gmra.mrb[76].mxu0 %v16178_v34 }
0x174a   :  { %13599 = vmatpush3.bf16.msra.mxu0 %v14589_v24  ;;  %13614 = vmatprep.mubr.msk.bf16.mxu0 %vm15209_vm0, %v15208_v2 }
0x174b   :  { %13600 = vmatprep.subr.bf16.mxu0 %v15208_v2 }
0x174e   :  { %13601 = vmatpush3.bf16.msra.mxu0 %v14590_v25 }
0x174f   :  { %13602 = vmatprep.subr.bf16.mxu0 %v15208_v2 }
0x1752   :  { %13603 = vmatpush3.bf16.msra.mxu0 %v14591_v63 }
0x1753   :  { %13604 = vmatprep.subr.bf16.mxu0 %v15208_v2 }
0x1756   :  { %13605 = vmatpush3.bf16.msra.mxu0 %v14592_v26 }
0x1757   :  { %13606 = vmatprep.subr.bf16.mxu0 %v15208_v2 }
0x175a   :  { %13607 = vmatpush3.bf16.msra.mxu0 %v14593_v6 }
0x175b   :  { %13608 = vmatprep.subr.bf16.mxu0 %v15208_v2 }
0x175e   :  { %13609 = vmatpush3.bf16.msra.mxu0 %v14594_v9 }
0x175f   :  { %13610 = vmatprep.subr.bf16.mxu0 %v15208_v2 }
0x1762   :  { %13611 = vmatpush3.bf16.msra.mxu0 %v14595_v28 }
0x1763   :  { %13612 = vmatprep.subr.bf16.mxu0 %v15208_v2 }
0x1766   :  { %13613 = vmatpush3.bf16.msra.mxu0 %v14596_v30  ;;  %v16464_v30 = vld [vmem:[%s18479_s8 + $0x1c] sm:$0x7] }
0x1767   :  { %13638 = vmatprep.subr.bf16.mxu0 %v15208_v2 }
0x1769   :  { %13615 = vmatmul.mubr.bf16.vlgmr.msra.gmra.mrb[80].mxu0 %v16178_v34 }
0x176a   :  { %13640 = vmatprep.mubr.msk.bf16.mxu0 %vm15209_vm0, %v15208_v2 }
0x179c   :  { %v3072_v32 = vpop.f32.mrb[60].mxu0 }
0x179d   :  { %v3079_v33 = vmul.f32 0.17677669, %v3072_v32  ;;  %v13402_v36 = vpop.f32.mrb[61].mxu0  ;;  %v4377_v32 = vrot.slane %v16464_v30, %v15375_v39 }
0x179e   :  { %v3075_v37 = vpop.f32.mrb[62].mxu0 }
0x179f   :  { %v3080_v38 = vmul.f32 0.17677669, %v3075_v37  ;;  %v13403_v40 = vpop.f32.mrb[63].mxu0  ;;  %v3081_v42 = vadd.f32 %v16408_v41, %v3079_v33 }
0x17a1   :  { %v3083_v44 = vsel %vm469_vm2, %v3081_v42, -inf  ;;  %v3082_v7 = vadd.f32 %v16415_v5, %v3080_v38 }
0x17a2   :  { %3084 = vmax.xlane.f32.xlu0 %v3083_v44 }
0x17a3   :  { %v3086_v45 = vsel %vm469_vm2, %v3082_v7, -inf }
0x17a4   :  { %3087 = vmax.xlane.f32.xlu1 %v3086_v45 }
0x17bc   :  { %v3262_v52 = vpop.f32.mrb[64].mxu0 }
0x17bd   :  { %v13428_v53 = vpop.f32.mrb[65].mxu0  ;;  %v16426_v56 = vadd.f32 %v3262_v52, %v3179_v51 }
0x17be   :  { %v3265_v54 = vpop.f32.mrb[66].mxu0 }
0x17bf   :  { %v16428_v57 = vadd.f32 %v3265_v54, %v3179_v51  ;;  %v13429_v29 = vpop.f32.mrb[67].mxu0 }
0x17c1   :  { %v3489_v58 = vpack.c.bf16 %v16428_v57, %v16426_v56 }
0x17dc   :  { %v3482_v60 = vpop.f32.mrb[68].mxu0 }
0x17dd   :  { %v13468_v0 = vpop.f32.mrb[69].mxu0  ;;  %v16434_v10 = vadd.f32 %v3482_v60, %v3399_v59 }
0x17de   :  { %v3485_v3 = vpop.f32.mrb[70].mxu0 }
0x17df   :  { %v16436_v11 = vadd.f32 %v3485_v3, %v3399_v59  ;;  %v13469_v12 = vpop.f32.mrb[71].mxu0 }
0x17e0   :  { %v14597_v12 = vld [vmem:[%s18476_s3 + $0x140] sm:$0xff]  }
0x17e1   :  { %v3565_v49 = vpack.c.bf16 %v16436_v11, %v16434_v10 }
0x17fc   :  { %v3833_v62 = vpop.f32.mrb[72].mxu0 }
0x17fd   :  { %v13516_v13 = vpop.f32.mrb[73].mxu0  ;;  %v16447_v47 = vadd.f32 %v3833_v62, %v3750_v31  ;;  %v14598_v62 = vld [vmem:[%s18476_s3 + $0x148] sm:$0xff]  }
0x17fe   :  { %v3836_v14 = vpop.f32.mrb[74].mxu0  ;;  %v14599_v13 = vld [vmem:[%s18476_s3 + $0x150] sm:$0xff]  }
0x17ff   :  { %v16449_v16 = vadd.f32 %v3836_v14, %v3750_v31  ;;  %v13517_v17 = vpop.f32.mrb[75].mxu0  ;;  %v14600_v14 = vld [vmem:[%s18476_s3 + $0x158] sm:$0xff]  }
0x1800   :  { %v14601_v17 = vld [vmem:[%s18476_s3 + $0x160] sm:$0xff]  }
0x1801   :  { %v4060_v18 = vpack.c.bf16 %v16449_v16, %v16447_v47 }
0x181c   :  { %v4053_v21 = vpop.f32.mrb[76].mxu0 }
0x181d   :  { %v13556_v43 = vpop.f32.mrb[77].mxu0  ;;  %v16455_v50 = vadd.f32 %v4053_v21, %v3970_v19  ;;  %v14603_v21 = vld [vmem:[%s18476_s3 + $0x170] sm:$0xff]  }
0x181e   :  { %v4056_v22 = vpop.f32.mrb[78].mxu0  ;;  %v14604_v43 = vld [vmem:[%s18476_s3 + $0x178] sm:$0xff]  }
0x181f   :  { %v16457_v23 = vadd.f32 %v4056_v22, %v3970_v19  ;;  %v13557_v55 = vpop.f32.mrb[79].mxu0  ;;  %v14602_v19 = vld [vmem:[%s18476_s3 + $0x168] sm:$0xff]  }
0x1821   :  { %v4136_v24 = vpack.c.bf16 %v16457_v23, %v16455_v50 }
0x182f   :  { %v3085_v25 = vpop.xlane.xlu0 %3084 }
0x1830   :  { %v3089_v63 = vsub.f32 %v3081_v42, %v3085_v25 }
0x1831   :  { %v3088_v26 = vpop.xlane.xlu1 %3087 }
0x1832   :  { %v3091_v6 = vmul.f32 1.442695, %v3089_v63  ;;  %v3090_v9 = vsub.f32 %v3082_v7, %v3088_v26 }
0x1834   :  { %15049 = vpow2.f32 %v3091_v6  ;;  %v3093_v28 = vmul.f32 1.442695, %v3090_v9  ;;  %v3289_v6 = vrot.slane %v16422_v48, %v15375_v39 }
0x1836   :  { %15051 = vpow2.f32 %v3093_v28 }
0x183c   :  { %v4460_v33 = vpop.f32.mrb[80].mxu0 }
0x183d   :  { %v13616_v36 = vpop.f32.mrb[81].mxu0  ;;  %v4461_v40 = vadd.f32 %v4460_v33, %v4377_v32 }
0x183e   :  { %v15050_v37 = vpop.eup %15049  ;;  %v4463_v38 = vpop.f32.mrb[82].mxu0 }
0x183f   :  { %v4464_v42 = vadd.f32 %v4463_v38, %v4377_v32  ;;  %v13617_v44 = vpop.f32.mrb[83].mxu0  ;;  %v3095_v7 = vsel %vm469_vm2, %v15050_v37, 0.0 }
0x1840   :  { %v15052_v45 = vpop.eup %15051  ;;  %3096 = vadd.xlane.f32.xlu0 %v3095_v7 }
0x1841   :  { %v4578_v51 = vpack.c.bf16 %v4464_v42, %v4461_v40  ;;  %v3098_v52 = vsel %vm469_vm2, %v15052_v45, 0.0 }
0x1842   :  { %3099 = vadd.xlane.f32.xlu1 %v3098_v52 }
0x1843   :  { %v4583_v53 = vsel %vm417_vm1, %v4578_v51, 0 }
0x1844   :  { %13639 = vmatpush3.bf16.xpose.msra.mxu0 %v4583_v53 }
0x1845   :  { %13644 = vmatprep.subr.bf16.mxu0 %v15208_v2 }
0x18cd   :  { %v3097_v54 = vpop.xlane.xlu0 %3096 }
0x18ce   :  { %15053 = vrcp.f32 %v3097_v54 }
0x18cf   :  { %v3100_v29 = vpop.xlane.xlu1 %3099 }
0x18d0   :  { %15055 = vrcp.f32 %v3100_v29 }
0x18d8   :  { %v15054_v59 = vpop.eup %15053 }
0x18d9   :  { %v3103_v0 = vmul.f32 %v15054_v59, %v15050_v37 }
0x18da   :  { %v15056_v60 = vpop.eup %15055 }
0x18db   :  { %v3104_v3 = vmul.f32 %v15056_v60, %v15052_v45 }
0x18dd   :  { %v3105_v31 = vpack.c.bf16 %v3104_v3, %v3103_v0 }
0x18df   :  { %13407 = vmatmul.mubr.msk.bf16.vlgmr.msra.gmra.mrb[60].mxu1 %vm469_vm2, %v3105_v31 }
0x18e0   :  { %13431 = vmatpush3.bf16.msra.mxu1 %v14597_v12  ;;  %13446 = vmatprep.mubr.msk.bf16.mxu1 %vm15209_vm0, %v15208_v2 }
0x18e1   :  { %13432 = vmatprep.subr.bf16.mxu1 %v15208_v2 }
0x18e4   :  { %13433 = vmatpush3.bf16.msra.mxu1 %v14598_v62 }
0x18e5   :  { %13434 = vmatprep.subr.bf16.mxu1 %v15208_v2 }
0x18e8   :  { %13435 = vmatpush3.bf16.msra.mxu1 %v14599_v13 }
0x18e9   :  { %13436 = vmatprep.subr.bf16.mxu1 %v15208_v2 }
0x18ec   :  { %13437 = vmatpush3.bf16.msra.mxu1 %v14600_v14 }
0x18ed   :  { %13438 = vmatprep.subr.bf16.mxu1 %v15208_v2 }
0x18f0   :  { %13439 = vmatpush3.bf16.msra.mxu1 %v14601_v17 }
0x18f1   :  { %13440 = vmatprep.subr.bf16.mxu1 %v15208_v2 }
0x18f4   :  { %13441 = vmatpush3.bf16.msra.mxu1 %v14602_v19  ;;  %v14605_v19 = vld [vmem:[%s18481_s5 + $0x50] sm:$0xff]  }
0x18f5   :  { %13442 = vmatprep.subr.bf16.mxu1 %v15208_v2 }
0x18f8   :  { %13443 = vmatpush3.bf16.msra.mxu1 %v14603_v21 }
0x18f9   :  { %13444 = vmatprep.subr.bf16.mxu1 %v15208_v2 }
0x18fc   :  { %13445 = vmatpush3.bf16.msra.mxu1 %v14604_v43  ;;  %v14606_v43 = vld [vmem:[%s18481_s5 + $0x58] sm:$0xff]  }
0x18fd   :  { %13470 = vmatprep.subr.bf16.mxu1 %v15208_v2 }
0x18ff   :  { %13447 = vmatmul.mubr.bf16.vlgmr.msra.gmra.mrb[64].mxu1 %v16178_v34 }
0x1900   :  { %13472 = vmatprep.mubr.msk.bf16.mxu1 %vm15209_vm0, %v15208_v2 }
0x19b2   :  { %v16510_v22 = vpop.f32.mrb[60].mxu1 }
0x19b3   :  { %v13408_v55 = vpop.f32.mrb[61].mxu1 }
0x19b4   :  { %v16512_v25 = vpop.f32.mrb[62].mxu1 }
0x19b5   :  { %v3151_v63 = vpack.c.bf16 %v16512_v25, %v16510_v22  ;;  %v13409_v26 = vpop.f32.mrb[63].mxu1  ;;  %v14612_v22 = vld [vmem:[%s18476_s3 + $0x198] sm:$0xff]   ;;  %v14613_v25 = vld [vmem:[%s18476_s3 + $0x1a0] sm:$0xff]  }
0x19d2   :  { %v3372_v9 = vpop.f32.mrb[64].mxu1 }
0x19d3   :  { %v13448_v28 = vpop.f32.mrb[65].mxu1  ;;  %v3373_v33 = vadd.f32 %v3372_v9, %v3289_v6  ;;  %v14607_v9 = vld [vmem:[%s18481_s5 + $0x40] sm:$0xff]  }
0x19d4   :  { %v3375_v32 = vpop.f32.mrb[66].mxu1 }
0x19d5   :  { %v3376_v36 = vadd.f32 %v3375_v32, %v3289_v6  ;;  %v13449_v37 = vpop.f32.mrb[67].mxu1 }
0x19d6   :  { %v14610_v37 = vld [vmem:[%s18476_s3 + $0x188] sm:$0xff]  }
0x19d7   :  { %v3490_v38 = vpack.c.bf16 %v3376_v36, %v3373_v33  ;;  %v14608_v33 = vld [vmem:[%s18481_s5 + $0x48] sm:$0xff]   ;;  %v14609_v36 = vld [vmem:[%s18476_s3 + $0x180] sm:$0xff]  }
0x19d9   :  { %v3495_v40 = vsel %vm417_vm1, %v3490_v38, 0  ;;  %v14611_v38 = vld [vmem:[%s18476_s3 + $0x190] sm:$0xff]  }
0x19da   :  { %13471 = vmatpush3.bf16.xpose.msra.mxu1 %v3495_v40  ;;  %v14615_v40 = vld [vmem:[%s18476_s3 + $0x1b0] sm:$0xff]  }
0x19db   :  { %13476 = vmatprep.subr.bf16.mxu1 %v15208_v2 }
0x19e1   :  { %13473 = vmatmul.mubr.msk.bf16.vlgmr.msra.gmra.mrb[68].mxu1 %vm417_vm1, %v3489_v58 }
0x19e2   :  { %13477 = vmatpush3.bf16.msra.mxu1 %v3565_v49  ;;  %13478 = vmatprep.mubr.msk.bf16.mxu1 %vm15209_vm0, %v15208_v2 }
0x19e3   :  { %13482 = vmatprep.subr.bf16.mxu1 %v15208_v2 }
0x1ab4   :  { %v3531_v48 = vpop.f32.mrb[68].mxu1 }
0x1ab5   :  { %v3538_v42 = vmul.f32 0.17677669, %v3531_v48  ;;  %v13474_v44 = vpop.f32.mrb[69].mxu1  ;;  %v14616_v48 = vld [vmem:[%s18476_s3 + $0x1b8] sm:$0xff]  }
0x1ab6   :  { %v3534_v7 = vpop.f32.mrb[70].mxu1 }
0x1ab7   :  { %v3539_v45 = vmul.f32 0.17677669, %v3534_v7  ;;  %v13475_v51 = vpop.f32.mrb[71].mxu1  ;;  %v3540_v52 = vadd.f32 %v16408_v41, %v3538_v42 }
0x1ab9   :  { %v3542_v56 = vsel %vm469_vm2, %v3540_v52, -inf  ;;  %v3541_v57 = vadd.f32 %v16415_v5, %v3539_v45 }
0x1aba   :  { %3543 = vmax.xlane.f32.xlu0 %v3542_v56 }
0x1abb   :  { %v3545_v58 = vsel %vm469_vm2, %v3541_v57, -inf }
0x1abc   :  { %3546 = vmax.xlane.f32.xlu1 %v3545_v58 }
0x1b47   :  { %v3544_v10 = vpop.xlane.xlu0 %3543 }
0x1b48   :  { %v3548_v11 = vsub.f32 %v3540_v52, %v3544_v10 }
0x1b49   :  { %v3547_v49 = vpop.xlane.xlu1 %3546 }
0x1b4a   :  { %v3550_v53 = vmul.f32 1.442695, %v3548_v11  ;;  %v3549_v54 = vsub.f32 %v3541_v57, %v3547_v49  ;;  %v3860_v11 = vrot.slane %v16443_v27, %v15375_v39 }
0x1b4c   :  { %15057 = vpow2.f32 %v3550_v53  ;;  %v3552_v29 = vmul.f32 1.442695, %v3549_v54 }
0x1b4e   :  { %15059 = vpow2.f32 %v3552_v29 }
0x1b56   :  { %v15058_v59 = vpop.eup %15057 }
0x1b57   :  { %v3554_v60 = vsel %vm469_vm2, %v15058_v59, 0.0 }
0x1b58   :  { %v15060_v0 = vpop.eup %15059  ;;  %3555 = vadd.xlane.f32.xlu0 %v3554_v60 }
0x1b59   :  { %v3557_v3 = vsel %vm469_vm2, %v15060_v0, 0.0 }
0x1b5a   :  { %3558 = vadd.xlane.f32.xlu1 %v3557_v3 }
0x1be5   :  { %v3556_v12 = vpop.xlane.xlu0 %3555 }
0x1be6   :  { %15061 = vrcp.f32 %v3556_v12 }
0x1be7   :  { %v3559_v31 = vpop.xlane.xlu1 %3558 }
0x1be8   :  { %15063 = vrcp.f32 %v3559_v31 }
0x1bf0   :  { %v15062_v62 = vpop.eup %15061 }
0x1bf1   :  { %v3562_v14 = vmul.f32 %v15062_v62, %v15058_v59 }
0x1bf2   :  { %v15064_v13 = vpop.eup %15063 }
0x1bf3   :  { %v3563_v17 = vmul.f32 %v15064_v13, %v15060_v0 }
0x1bf5   :  { %v3564_v21 = vpack.c.bf16 %v3563_v17, %v3562_v14 }
0x1bf7   :  { %13479 = vmatmul.mubr.msk.bf16.vlgmr.msra.gmra.mrb[72].mxu1 %vm469_vm2, %v3564_v21 }
0x1bf8   :  { %13483 = vmatpush3.bf16.msra.mxu1 %v14605_v19  ;;  %13486 = vmatprep.mubr.msk.bf16.mxu1 %vm15209_vm0, %v15208_v2 }
0x1bf9   :  { %13484 = vmatprep.subr.bf16.mxu1 %v15208_v2 }
0x1bfc   :  { %13485 = vmatpush3.bf16.msra.mxu1 %v14606_v43 }
0x1bfd   :  { %13490 = vmatprep.subr.bf16.mxu1 %v15208_v2 }
0x1cca   :  { %v3603_v55 = vpop.f32.mrb[72].mxu1 }
0x1ccb   :  { %v13480_v26 = vpop.f32.mrb[73].mxu1 }
0x1ccc   :  { %v3606_v6 = vpop.f32.mrb[74].mxu1 }
0x1ccd   :  { %v3610_v28 = vpack.c.bf16 %v3606_v6, %v3603_v55  ;;  %v13481_v32 = vpop.f32.mrb[75].mxu1 }
0x1ccf   :  { %13487 = vmatmul.mubr.msk.bf16.vlgmr.msra.gmra.mrb[76].mxu1 %vm417_vm1, %v3610_v28 }
0x1cd0   :  { %13491 = vmatpush3.bf16.msra.mxu1 %v14607_v9  ;;  %13494 = vmatprep.mubr.msk.bf16.mxu1 %vm15209_vm0, %v15208_v2 }
0x1cd1   :  { %13492 = vmatprep.subr.bf16.mxu1 %v15208_v2 }
0x1cd4   :  { %13493 = vmatpush3.bf16.msra.mxu1 %v14608_v33 }
0x1cd5   :  { %13518 = vmatprep.subr.bf16.mxu1 %v15208_v2 }
0x1cd7   :  { %13495 = vmatmul.mubr.msk.bf16.vlgmr.msra.gmra.mrb[80].mxu1 %vm417_vm1, %v3151_v63  ;;  %v14614_v63 = vld [vmem:[%s18476_s3 + $0x1a8] sm:$0xff]  }
0x1cd8   :  { %13519 = vmatpush3.bf16.msra.mxu1 %v14609_v36  ;;  %13534 = vmatprep.mubr.msk.bf16.mxu1 %vm15209_vm0, %v15208_v2 }
0x1cd9   :  { %13520 = vmatprep.subr.bf16.mxu1 %v15208_v2 }
0x1cdc   :  { %13521 = vmatpush3.bf16.msra.mxu1 %v14610_v37 }
0x1cdd   :  { %13522 = vmatprep.subr.bf16.mxu1 %v15208_v2 }
0x1ce0   :  { %13523 = vmatpush3.bf16.msra.mxu1 %v14611_v38 }
0x1ce1   :  { %13524 = vmatprep.subr.bf16.mxu1 %v15208_v2 }
0x1ce4   :  { %13525 = vmatpush3.bf16.msra.mxu1 %v14612_v22  ;;  %v14617_v22 = vld [vmem:[%s18481_s5 + $0x60] sm:$0xff]  }
0x1ce5   :  { %13526 = vmatprep.subr.bf16.mxu1 %v15208_v2 }
0x1ce8   :  { %13527 = vmatpush3.bf16.msra.mxu1 %v14613_v25 }
0x1ce9   :  { %13528 = vmatprep.subr.bf16.mxu1 %v15208_v2 }
0x1cec   :  { %13529 = vmatpush3.bf16.msra.mxu1 %v14614_v63  ;;  %v14618_v63 = vld [vmem:[%s18481_s5 + $0x68] sm:$0xff]  }
0x1ced   :  { %13530 = vmatprep.subr.bf16.mxu1 %v15208_v2 }
0x1cf0   :  { %13531 = vmatpush3.bf16.msra.mxu1 %v14615_v40 }
0x1cf1   :  { %13532 = vmatprep.subr.bf16.mxu1 %v15208_v2 }
0x1cf4   :  { %13533 = vmatpush3.bf16.msra.mxu1 %v14616_v48 }
0x1cf5   :  { %13558 = vmatprep.subr.bf16.mxu1 %v15208_v2 }
0x1cf7   :  { %13535 = vmatmul.mubr.bf16.vlgmr.msra.gmra.mrb[84].mxu1 %v16178_v34 }
0x1cf8   :  { %13560 = vmatprep.mubr.msk.bf16.mxu1 %vm15209_vm0, %v15208_v2 }
0x1da2   :  { %v3665_v42 = vpop.f32.mrb[76].mxu1 }
0x1da3   :  { %v13488_v44 = vpop.f32.mrb[77].mxu1 }
0x1da4   :  { %v3668_v7 = vpop.f32.mrb[78].mxu1  ;;  %v14619_v44 = vld [vmem:[%s18475_s2 + $0x1c0] sm:$0xff]  }
0x1da5   :  { %v13489_v45 = vpop.f32.mrb[79].mxu1 }
0x1daa   :  { %v3721_v51 = vpop.f32.mrb[80].mxu1 }
0x1dab   :  { %v16599_v52 = vadd.f32 %v3721_v51, %v3665_v42  ;;  %v13496_v56 = vpop.f32.mrb[81].mxu1  ;;  %v14620_v51 = vld [vmem:[%s18475_s2 + $0x1c8] sm:$0xff]  }
0x1dac   :  { %v3724_v57 = vpop.f32.mrb[82].mxu1  ;;  %v14621_v56 = vld [vmem:[%s18475_s2 + $0x1d0] sm:$0xff]  }
0x1dad   :  { %v16601_v58 = vadd.f32 %v3724_v57, %v3668_v7  ;;  %v13497_v10 = vpop.f32.mrb[83].mxu1  ;;  %v14622_v57 = vld [vmem:[%s18475_s2 + $0x1d8] sm:$0xff]  }
0x1dae   :  { %v14623_v10 = vld [vmem:[%s18475_s2 + $0x1e0] sm:$0xff]  }
0x1dca   :  { %v3943_v49 = vpop.f32.mrb[84].mxu1 }
0x1dcb   :  { %v13536_v53 = vpop.f32.mrb[85].mxu1  ;;  %v3944_v29 = vadd.f32 %v3943_v49, %v3860_v11  ;;  %v14625_v49 = vld [vmem:[%s18475_s2 + $0x1f0] sm:$0xff]  }
0x1dcc   :  { %v3946_v54 = vpop.f32.mrb[86].mxu1  ;;  %v14626_v53 = vld [vmem:[%s18475_s2 + $0x1f8] sm:$0xff]  }
0x1dcd   :  { %v3947_v59 = vadd.f32 %v3946_v54, %v3860_v11  ;;  %v13537_v60 = vpop.f32.mrb[87].mxu1  ;;  %v14624_v11 = vld [vmem:[%s18475_s2 + $0x1e8] sm:$0xff]   ;;  %v14627_v54 = vld [vmem:[%s18477_s4 + $0x1c0] sm:$0xff]  }
0x1dce   :  { %v14630_v60 = vld [vmem:[%s18477_s4 + $0x1d8] sm:$0xff]  }
0x1dcf   :  { %v4061_v0 = vpack.c.bf16 %v3947_v59, %v3944_v29  ;;  %v14628_v29 = vld [vmem:[%s18477_s4 + $0x1c8] sm:$0xff]   ;;  %v14629_v59 = vld [vmem:[%s18477_s4 + $0x1d0] sm:$0xff]  }
0x1dd1   :  { %v4066_v3 = vsel %vm417_vm1, %v4061_v0, 0  ;;  %v14631_v0 = vld [vmem:[%s18477_s4 + $0x1e0] sm:$0xff]  }
0x1dd2   :  { %13559 = vmatpush3.bf16.xpose.msra.mxu1 %v4066_v3  ;;  %v14632_v3 = vld [vmem:[%s18477_s4 + $0x1e8] sm:$0xff]  }
0x1dd3   :  { %13564 = vmatprep.subr.bf16.mxu1 %v15208_v2 }
0x1dd9   :  { %13561 = vmatmul.mubr.msk.bf16.vlgmr.msra.gmra.mrb[88].mxu1 %vm417_vm1, %v4060_v18 }
0x1dda   :  { %13565 = vmatpush3.bf16.msra.mxu1 %v4136_v24  ;;  %13566 = vmatprep.mubr.msk.bf16.mxu1 %vm15209_vm0, %v15208_v2 }
0x1ddb   :  { %13570 = vmatprep.subr.bf16.mxu1 %v15208_v2 }
0x1eac   :  { %v4102_v27 = vpop.f32.mrb[88].mxu1 }
0x1ead   :  { %v4109_v12 = vmul.f32 0.17677669, %v4102_v27  ;;  %v13562_v31 = vpop.f32.mrb[89].mxu1  ;;  %v14633_v27 = vld [vmem:[%s18477_s4 + $0x1f0] sm:$0xff]  }
0x1eae   :  { %v4105_v62 = vpop.f32.mrb[90].mxu1 }
0x1eaf   :  { %v4110_v13 = vmul.f32 0.17677669, %v4105_v62  ;;  %v13563_v14 = vpop.f32.mrb[91].mxu1  ;;  %v4111_v17 = vadd.f32 %v16408_v41, %v4109_v12  ;;  %v14634_v12 = vld [vmem:[%s18477_s4 + $0x1f8] sm:$0xff]  }
0x1eb1   :  { %v4113_v47 = vsel %vm469_vm2, %v4111_v17, -inf  ;;  %v4112_v16 = vadd.f32 %v16415_v5, %v4110_v13 }
0x1eb2   :  { %4114 = vmax.xlane.f32.xlu0 %v4113_v47 }
0x1eb3   :  { %v4116_v18 = vsel %vm469_vm2, %v4112_v16, -inf }
0x1eb4   :  { %4117 = vmax.xlane.f32.xlu1 %v4116_v18 }
0x1f3f   :  { %v4115_v50 = vpop.xlane.xlu0 %4114 }
0x1f40   :  { %v4119_v23 = vsub.f32 %v4111_v17, %v4115_v50 }
0x1f41   :  { %v4118_v24 = vpop.xlane.xlu1 %4117 }
0x1f42   :  { %v4121_v19 = vmul.f32 1.442695, %v4119_v23  ;;  %v4120_v21 = vsub.f32 %v4112_v16, %v4118_v24  ;;  %v4267_v16 = vrot.slane %v16464_v30, %v15368_v35 }
0x1f44   :  { %15065 = vpow2.f32 %v4121_v19  ;;  %v4123_v43 = vmul.f32 1.442695, %v4120_v21 }
0x1f46   :  { %15067 = vpow2.f32 %v4123_v43 }
0x1f4e   :  { %v15066_v55 = vpop.eup %15065 }
0x1f4f   :  { %v4125_v26 = vsel %vm469_vm2, %v15066_v55, 0.0 }
0x1f50   :  { %v15068_v6 = vpop.eup %15067  ;;  %4126 = vadd.xlane.f32.xlu0 %v4125_v26 }
0x1f51   :  { %v4128_v9 = vsel %vm469_vm2, %v15068_v6, 0.0 }
0x1f52   :  { %4129 = vadd.xlane.f32.xlu1 %v4128_v9 }
0x1fdd   :  { %v4127_v28 = vpop.xlane.xlu0 %4126 }
0x1fde   :  { %15069 = vrcp.f32 %v4127_v28 }
0x1fdf   :  { %v4130_v32 = vpop.xlane.xlu1 %4129 }
0x1fe0   :  { %15071 = vrcp.f32 %v4130_v32 }
0x1fe8   :  { %v15070_v33 = vpop.eup %15069 }
0x1fe9   :  { %v4133_v37 = vmul.f32 %v15070_v33, %v15066_v55 }
0x1fea   :  { %v15072_v36 = vpop.eup %15071 }
0x1feb   :  { %v4134_v38 = vmul.f32 %v15072_v36, %v15068_v6 }
0x1fed   :  { %v4135_v25 = vpack.c.bf16 %v4134_v38, %v4133_v37 }
0x1fef   :  { %13567 = vmatmul.mubr.msk.bf16.vlgmr.msra.gmra.mrb[92].mxu1 %vm469_vm2, %v4135_v25 }
0x1ff0   :  { %13571 = vmatpush3.bf16.msra.mxu1 %v14617_v22  ;;  %13574 = vmatprep.mubr.msk.bf16.mxu1 %vm15209_vm0, %v15208_v2 }
0x1ff1   :  { %13572 = vmatprep.subr.bf16.mxu1 %v15208_v2 }
0x1ff4   :  { %13573 = vmatpush3.bf16.msra.mxu1 %v14618_v63 }
0x1ff5   :  { %13578 = vmatprep.subr.bf16.mxu1 %v15208_v2 }
0x20c2   :  { %v4174_v40 = vpop.f32.mrb[92].mxu1 }
0x20c3   :  { %v13568_v48 = vpop.f32.mrb[93].mxu1 }
0x20c4   :  { %v4177_v42 = vpop.f32.mrb[94].mxu1 }
0x20c5   :  { %v4181_v7 = vpack.c.bf16 %v4177_v42, %v4174_v40  ;;  %v13569_v45 = vpop.f32.mrb[95].mxu1 }
0x20c7   :  { %13575 = vmatmul.mubr.msk.bf16.vlgmr.msra.gmra.mrb[96].mxu1 %vm417_vm1, %v4181_v7 }
0x20c8   :  { %13579 = vmatpush3.bf16.msra.mxu1 %v14619_v44  ;;  %13594 = vmatprep.mubr.msk.bf16.mxu1 %vm15209_vm0, %v15208_v2 }
0x20c9   :  { %13580 = vmatprep.subr.bf16.mxu1 %v15208_v2 }
0x20cc   :  { %13581 = vmatpush3.bf16.msra.mxu1 %v14620_v51 }
0x20cd   :  { %13582 = vmatprep.subr.bf16.mxu1 %v15208_v2 }
0x20d0   :  { %13583 = vmatpush3.bf16.msra.mxu1 %v14621_v56 }
0x20d1   :  { %13584 = vmatprep.subr.bf16.mxu1 %v15208_v2 }
0x20d4   :  { %13585 = vmatpush3.bf16.msra.mxu1 %v14622_v57 }
0x20d5   :  { %13586 = vmatprep.subr.bf16.mxu1 %v15208_v2 }
0x20d8   :  { %13587 = vmatpush3.bf16.msra.mxu1 %v14623_v10 }
0x20d9   :  { %13588 = vmatprep.subr.bf16.mxu1 %v15208_v2 }
0x20dc   :  { %13589 = vmatpush3.bf16.msra.mxu1 %v14624_v11 }
0x20dd   :  { %13590 = vmatprep.subr.bf16.mxu1 %v15208_v2 }
0x20e0   :  { %13591 = vmatpush3.bf16.msra.mxu1 %v14625_v49 }
0x20e1   :  { %13592 = vmatprep.subr.bf16.mxu1 %v15208_v2 }
0x20e4   :  { %13593 = vmatpush3.bf16.msra.mxu1 %v14626_v53 }
0x20e5   :  { %13618 = vmatprep.subr.bf16.mxu1 %v15208_v2 }
0x20e7   :  { %13595 = vmatmul.mubr.bf16.vlgmr.msra.gmra.mrb[100].mxu1 %v16178_v34 }
0x20e8   :  { %13619 = vmatpush3.bf16.msra.mxu1 %v14627_v54  ;;  %13634 = vmatprep.mubr.msk.bf16.mxu1 %vm15209_vm0, %v15208_v2 }
0x20e9   :  { %13620 = vmatprep.subr.bf16.mxu1 %v15208_v2 }
0x20ec   :  { %13621 = vmatpush3.bf16.msra.mxu1 %v14628_v29 }
0x20ed   :  { %13622 = vmatprep.subr.bf16.mxu1 %v15208_v2 }
0x20f0   :  { %13623 = vmatpush3.bf16.msra.mxu1 %v14629_v59  ;;  %v14635_v59 = vld [vmem:[%s18481_s5 + $0x70] sm:$0xff]  }
0x20f1   :  { %13624 = vmatprep.subr.bf16.mxu1 %v15208_v2 }
0x20f4   :  { %13625 = vmatpush3.bf16.msra.mxu1 %v14630_v60 }
0x20f5   :  { %13626 = vmatprep.subr.bf16.mxu1 %v15208_v2 }
0x20f8   :  { %13627 = vmatpush3.bf16.msra.mxu1 %v14631_v0  ;;  %v14636_v0 = vld [vmem:[%s18481_s5 + $0x78] sm:$0xff]  }
0x20f9   :  { %13628 = vmatprep.subr.bf16.mxu1 %v15208_v2 }
0x20fc   :  { %13629 = vmatpush3.bf16.msra.mxu1 %v14632_v3 }
0x20fd   :  { %13630 = vmatprep.subr.bf16.mxu1 %v15208_v2 }
0x2100   :  { %13631 = vmatpush3.bf16.msra.mxu1 %v14633_v27 }
0x2101   :  { %13632 = vmatprep.subr.bf16.mxu1 %v15208_v2 }
0x2104   :  { %13633 = vmatpush3.bf16.msra.mxu1 %v14634_v12 }
0x2107   :  { %13635 = vmatmul.mubr.bf16.vlgmr.msra.gmra.mrb[104].mxu1 %v16178_v34 }
0x219a   :  { %v4236_v31 = vpop.f32.mrb[96].mxu1 }
0x219b   :  { %v16705_v62 = vadd.f32 %v4236_v31, %v16599_v52  ;;  %v13576_v13 = vpop.f32.mrb[97].mxu1  ;;  %v4487_v52 = vrot.slane %v16464_v30, %v15475_v20 }
0x219c   :  { %v4239_v14 = vpop.f32.mrb[98].mxu1 }
0x219d   :  { %v16708_v17 = vadd.f32 %v4239_v14, %v16601_v58  ;;  %v13577_v47 = vpop.f32.mrb[99].mxu1  ;;  %v16739_v14 = vld [vmem:[%s18482_s10 + $0x8] sm:$0x3f] }
0x219e   :  { %v4765_v47 = vrot.slane %v16739_v14, %v15368_v35 }
0x21ba   :  { %v4350_v18 = vpop.f32.mrb[100].mxu1 }
0x21bb   :  { %v13596_v50 = vpop.f32.mrb[101].mxu1  ;;  %v4351_v24 = vadd.f32 %v4350_v18, %v4267_v16 }
0x21bc   :  { %v4353_v23 = vpop.f32.mrb[102].mxu1 }
0x21bd   :  { %v4354_v19 = vadd.f32 %v4353_v23, %v4267_v16  ;;  %v13597_v21 = vpop.f32.mrb[103].mxu1 }
0x21bf   :  { %v4577_v34 = vpack.c.bf16 %v4354_v19, %v4351_v24 }
0x21c1   :  { %13641 = vmatmul.mubr.msk.bf16.vlgmr.msra.gmra.mrb[84].mxu0 %vm417_vm1, %v4577_v34 }
0x21c2   :  { %13646 = vmatprep.mubr.msk.bf16.mxu0 %vm15209_vm0, %v15208_v2 }
0x21da   :  { %v4570_v58 = vpop.f32.mrb[104].mxu1 }
0x21db   :  { %v13636_v43 = vpop.f32.mrb[105].mxu1  ;;  %v4571_v26 = vadd.f32 %v4570_v58, %v4487_v52 }
0x21dc   :  { %v4573_v55 = vpop.f32.mrb[106].mxu1  ;;  %v14637_v43 = vld [vmem:[%s18484_s6 + $0x80] ss:$8 sps:$4 sm:$0xff]  }
0x21dd   :  { %v4574_v6 = vadd.f32 %v4573_v55, %v4487_v52  ;;  %v13637_v9 = vpop.f32.mrb[107].mxu1 }
0x21df   :  { %v4653_v28 = vpack.c.bf16 %v4574_v6, %v4571_v26 }
0x21e1   :  { %13645 = vmatpush3.bf16.msra.mxu0 %v4653_v28 }
0x21e2   :  { %13650 = vmatprep.subr.bf16.mxu0 %v15208_v2 }
0x2294   :  { %v4619_v32 = vpop.f32.mrb[84].mxu0 }
0x2295   :  { %v4626_v33 = vmul.f32 0.17677669, %v4619_v32  ;;  %v13642_v36 = vpop.f32.mrb[85].mxu0 }
0x2296   :  { %v4622_v37 = vpop.f32.mrb[86].mxu0  ;;  %v14645_v36 = vld [vmem:[%s18484_s6 + $0xa4] ss:$8 sps:$4 sm:$0xff]  }
0x2297   :  { %v4627_v38 = vmul.f32 0.17677669, %v4622_v37  ;;  %v13643_v22 = vpop.f32.mrb[87].mxu0  ;;  %v4628_v25 = vadd.f32 %v16408_v41, %v4626_v33  ;;  %v14643_v37 = vld [vmem:[%s18484_s6 + $0xa0] ss:$8 sps:$4 sm:$0xff]  }
0x2298   :  { %v14646_v22 = vld [vmem:[%s18484_s6 + $0xb0] ss:$8 sps:$4 sm:$0xff]  }
0x2299   :  { %v4630_v30 = vsel %vm469_vm2, %v4628_v25, -inf  ;;  %v4629_v63 = vadd.f32 %v16415_v5, %v4627_v38  ;;  %v14648_v38 = vld [vmem:[%s18484_s6 + $0xb4] ss:$8 sps:$4 sm:$0xff]  }
0x229a   :  { %4631 = vmax.xlane.f32.xlu0 %v4630_v30  ;;  %v14649_v30 = vld [vmem:[%s18484_s6 + $0xc0] ss:$8 sps:$4 sm:$0xff]  }
0x229b   :  { %v4633_v40 = vsel %vm469_vm2, %v4629_v63, -inf }
0x229c   :  { %4634 = vmax.xlane.f32.xlu1 %v4633_v40  ;;  %v14652_v40 = vld [vmem:[%s18484_s6 + $0xd0] ss:$8 sps:$4 sm:$0xff]  }
0x2327   :  { %v4632_v48 = vpop.xlane.xlu0 %4631 }
0x2328   :  { %v4636_v42 = vsub.f32 %v4628_v25, %v4632_v48  ;;  %v14651_v25 = vld [vmem:[%s18484_s6 + $0xc4] ss:$8 sps:$4 sm:$0xff]  }
0x2329   :  { %v4635_v44 = vpop.xlane.xlu1 %4634  ;;  %v14657_v48 = vld [vmem:[%s18484_s6 + $0xe4] ss:$8 sps:$4 sm:$0xff]  }
0x232a   :  { %v4638_v7 = vmul.f32 1.442695, %v4636_v42  ;;  %v4637_v45 = vsub.f32 %v4629_v63, %v4635_v44  ;;  %v14654_v63 = vld [vmem:[%s18484_s6 + $0xd4] ss:$8 sps:$4 sm:$0xff]   ;;  %v14655_v42 = vld [vmem:[%s18484_s6 + $0xe0] ss:$8 sps:$4 sm:$0xff]  }
0x232b   :  { %v14660_v44 = vld [vmem:[%s18484_s6 + $0xf4] ss:$8 sps:$4 sm:$0xff]  }
0x232c   :  { %15073 = vpow2.f32 %v4638_v7  ;;  %v4640_v51 = vmul.f32 1.442695, %v4637_v45  ;;  %v14658_v7 = vld [vmem:[%s18484_s6 + $0xf0] ss:$8 sps:$4 sm:$0xff]  }
0x232e   :  { %15075 = vpow2.f32 %v4640_v51 }
0x2336   :  { %v15074_v56 = vpop.eup %15073 }
0x2337   :  { %v4642_v57 = vsel %vm469_vm2, %v15074_v56, 0.0 }
0x2338   :  { %v15076_v41 = vpop.eup %15075  ;;  %4643 = vadd.xlane.f32.xlu0 %v4642_v57 }
0x2339   :  { %v4645_v10 = vsel %vm469_vm2, %v15076_v41, 0.0 }
0x233a   :  { %4646 = vadd.xlane.f32.xlu1 %v4645_v10 }
0x23c5   :  { %v4644_v5 = vpop.xlane.xlu0 %4643 }
0x23c6   :  { %15077 = vrcp.f32 %v4644_v5  ;;  %v4795_v5 = vrot.slane %v16739_v14, %v15375_v39 }
0x23c7   :  { %v4647_v11 = vpop.xlane.xlu1 %4646 }
0x23c8   :  { %15079 = vrcp.f32 %v4647_v11 }
0x23d0   :  { %v15078_v49 = vpop.eup %15077 }
0x23d1   :  { %v4650_v54 = vmul.f32 %v15078_v49, %v15074_v56 }
0x23d2   :  { %v15080_v53 = vpop.eup %15079 }
0x23d3   :  { %v4651_v29 = vmul.f32 %v15080_v53, %v15076_v41 }
0x23d5   :  { %v4652_v60 = vpack.c.bf16 %v4651_v29, %v4650_v54 }
0x23d7   :  { %13647 = vmatmul.mubr.msk.bf16.vlgmr.msra.gmra.mrb[88].mxu0 %vm469_vm2, %v4652_v60 }
0x23d8   :  { %13651 = vmatpush3.bf16.msra.mxu0 %v14635_v59  ;;  %13654 = vmatprep.mubr.msk.bf16.mxu0 %vm15209_vm0, %v15208_v2  ;;  %v4801_v59 = vrot.slane %v16739_v14, %v15475_v20 }
0x23d9   :  { %13652 = vmatprep.subr.bf16.mxu0 %v15208_v2 }
0x23dc   :  { %13653 = vmatpush3.bf16.msra.mxu0 %v14636_v0 }
0x24aa   :  { %v4691_v3 = vpop.f32.mrb[88].mxu0 }
0x24ab   :  { %v13648_v27 = vpop.f32.mrb[89].mxu0 }
0x24ac   :  { %v4694_v12 = vpop.f32.mrb[90].mxu0 }
0x24ad   :  { %v4698_v31 = vpack.c.bf16 %v4694_v12, %v4691_v3  ;;  %v13649_v13 = vpop.f32.mrb[91].mxu0  ;;  %v14661_v12 = vld [vmem:[%s18485_s7 + $0xc0] sm:$0xff]  }
0x24ae   :  { %12624 = vmatprep.subr.bf16.mxu1 %v14661_v12  ;;  %v14663_v13 = vld [vmem:[%s18485_s7 + $0xc8] sm:$0xff]  }
0x24af   :  { %13655 = vmatmul.mubr.msk.bf16.vlgmr.msra.gmra.mrb[92].mxu0 %vm417_vm1, %v4698_v31  ;;  %v14662_v31 = vld [vmem:[%s18485_s7 + $0x80] sm:$0xff]  }
0x24b0   :  { %4947 = vmatprep.mubr.bf16.mxu0 %v15210_v4  ;;  %12625 = vmatpush3.bf16.msra.mxu1 %v14662_v31 }
0x24b1   :  { %12626 = vmatprep.subr.bf16.mxu1 %v14663_v13 }
0x2582   :  { %v4753_v16 = vpop.f32.mrb[92].mxu0 }
0x2583   :  { %v4760_v18 = vadd.f32 %v4753_v16, %v16705_v62  ;;  %v13656_v50 = vpop.f32.mrb[93].mxu0  ;;  %v14639_v62 = vld [vmem:[%s18484_s6 + $0x84] ss:$8 sps:$4 sm:$0xff]   ;;  %v14665_v16 = vld [vmem:[%s18485_s7 + $0xd0] sm:$0xff]  }
0x2584   :  { %v4756_v23 = vpop.f32.mrb[94].mxu0  ;;  %4915 = vmatprep.subr.bf16.mxu0 %v14639_v62  ;;  %v14667_v50 = vld [vmem:[%s18485_s7 + $0xd8] sm:$0xff]  }
0x2585   :  { %v4766_v24 = vadd.f32 %v4765_v47, %v4760_v18  ;;  %v4761_v19 = vadd.f32 %v4756_v23, %v16708_v17  ;;  %v13657_v21 = vpop.f32.mrb[95].mxu0  ;;  %v14642_v17 = vld [vmem:[%s18484_s6 + $0x94] ss:$8 sps:$4 sm:$0xff]   ;;  %4916 = vmatpush1.bf16.msra.mxu0 %v14637_v43 }
0x2586   :  { %4917 = vmatprep.subr.bf16.mxu0 %v14642_v17  ;;  %v14666_v18 = vld [vmem:[%s18485_s7 + $0x90] sm:$0xff]   ;;  %v14668_v23 = vld [vmem:[%s18485_s7 + $0x98] sm:$0xff]   ;;  %v14671_v21 = vld [vmem:[%s18485_s7 + $0xe8] sm:$0xff]  }
0x2587   :  { %v4767_v34 = vadd.f32 %v4765_v47, %v4761_v19  ;;  %v4768_v52 = vadd.f32 %v4766_v24, %v16169_v1  ;;  %v14640_v1 = vld [vmem:[%s18484_s6 + $0x90] ss:$8 sps:$4 sm:$0xff]   ;;  %v14664_v47 = vld [vmem:[%s18485_s7 + $0x88] sm:$0xff]   ;;  %v14669_v24 = vld [vmem:[%s18485_s7 + $0xe0] sm:$0xff]  }
0x2588   :  { %12627 = vmatpush3.bf16.msra.mxu1 %v14664_v47  ;;  %v14670_v19 = vld [vmem:[%s18485_s7 + $0xa0] sm:$0xff]   ;;  %v14675_v43 = vld [vmem:[%s18485_s7 + $0xf8] sm:$0xff]  }
0x2589   :  { %4770 = vadd.xlane.f32.xlu0 %v4768_v52  ;;  %v4769_v58 = vadd.f32 %v4767_v34, %v16171_v46  ;;  %4918 = vmatpush1.bf16.msra.mxu0 %v14640_v1  ;;  %v14672_v34 = vld [vmem:[%s18485_s7 + $0xa8] sm:$0xff]   ;;  %v14676_v62 = vld [vmem:[%s18485_s7 + $0xb8] sm:$0xff]   ;;  %v11340_v17 = vld [vmem:[%s18486_s9 + $0x2] sm:$0x3] }
0x258a   :  { %4919 = vmatprep.subr.bf16.mxu0 %v14645_v36  ;;  %12628 = vmatprep.subr.bf16.mxu1 %v14665_v16  ;;  %v4828_v1 = vrot.slane %v11340_v17, %v15368_v35 }
0x258b   :  { %4772 = vadd.xlane.f32.xlu1 %v4769_v58 }
0x258c   :  { %12629 = vmatpush3.bf16.msra.mxu1 %v14666_v18 }
0x258d   :  { %4920 = vmatpush1.bf16.msra.mxu0 %v14643_v37  ;;  %12630 = vmatprep.subr.bf16.mxu1 %v14667_v50 }
0x258e   :  { %4921 = vmatprep.subr.bf16.mxu0 %v14648_v38 }
0x2590   :  { %12631 = vmatpush3.bf16.msra.mxu1 %v14668_v23 }
0x2591   :  { %4922 = vmatpush1.bf16.msra.mxu0 %v14646_v22  ;;  %12632 = vmatprep.subr.bf16.mxu1 %v14669_v24 }
0x2592   :  { %4923 = vmatprep.subr.bf16.mxu0 %v14651_v25 }
0x2594   :  { %12633 = vmatpush3.bf16.msra.mxu1 %v14670_v19 }
0x2595   :  { %4924 = vmatpush1.bf16.msra.mxu0 %v14649_v30  ;;  %12634 = vmatprep.subr.bf16.mxu1 %v14671_v21 }
0x2596   :  { %4925 = vmatprep.subr.bf16.mxu0 %v14654_v63 }
0x2598   :  { %12635 = vmatpush3.bf16.msra.mxu1 %v14672_v34 }
0x2599   :  { %4926 = vmatpush1.bf16.msra.mxu0 %v14652_v40 }
0x259a   :  { %4927 = vmatprep.subr.bf16.mxu0 %v14657_v48 }
0x259d   :  { %4928 = vmatpush1.bf16.msra.mxu0 %v14655_v42 }
0x259e   :  { %4929 = vmatprep.subr.bf16.mxu0 %v14660_v44 }
0x25a1   :  { %4930 = vmatpush1.bf16.msra.mxu0 %v14658_v7 }
0x25a2   :  { %13658 = vmatprep.subr.bf16.mxu0 %v15208_v2 }
0x2616   :  { %v4771_v46 = vpop.xlane.xlu0 %4770 }
0x2617   :  { %v4774_v55 = vmul.f32 0.0078125, %v4771_v46  ;;  %v4832_v46 = vrot.slane %v11340_v17, %v15375_v39 }
0x2618   :  { %v4773_v26 = vpop.xlane.xlu1 %4772 }
0x2619   :  { %v4776_v6 = vsub.f32 %v4768_v52, %v4774_v55  ;;  %v4775_v9 = vmul.f32 0.0078125, %v4773_v26  ;;  %v14673_v52 = vld [vmem:[%s18485_s7 + $0xf0] sm:$0xff]  }
0x261a   :  { %12636 = vmatprep.subr.bf16.mxu1 %v14673_v52 }
0x261b   :  { %v4777_v28 = vsub.f32 %v4769_v58, %v4775_v9  ;;  %v4778_v32 = vmul.f32 %v4776_v6, %v4776_v6  ;;  %v14674_v58 = vld [vmem:[%s18485_s7 + $0xb0] sm:$0xff]  }
0x261c   :  { %12637 = vmatpush3.bf16.msra.mxu1 %v14674_v58  ;;  %v5032_v58 = vrot.slane %v16739_v14, %v16088_v15 }
0x261d   :  { %4780 = vadd.xlane.f32.xlu0 %v4778_v32  ;;  %v4779_v33 = vmul.f32 %v4777_v28, %v4777_v28  ;;  %12638 = vmatprep.subr.bf16.mxu1 %v14675_v43 }
0x261f   :  { %4782 = vadd.xlane.f32.xlu1 %v4779_v33 }
0x2620   :  { %12639 = vmatpush3.bf16.msra.mxu1 %v14676_v62 }
0x2621   :  { %13678 = vmatprep.subr.bf16.mxu1 %v15208_v2 }
0x26aa   :  { %v4781_v45 = vpop.xlane.xlu0 %4780 }
0x26ab   :  { %v4784_v51 = vmul.f32 0.0078125, %v4781_v45 }
0x26ac   :  { %v4783_v56 = vpop.xlane.xlu1 %4782 }
0x26ad   :  { %v4786_v57 = vadd.f32 1e-05, %v4784_v51  ;;  %v4785_v41 = vmul.f32 0.0078125, %v4783_v56 }
0x26af   :  { %15081 = vrsqrt.f32 %v4786_v57  ;;  %v4787_v10 = vadd.f32 1e-05, %v4785_v41 }
0x26b1   :  { %15083 = vrsqrt.f32 %v4787_v10 }
0x26b9   :  { %v15082_v11 = vpop.eup %15081 }
0x26ba   :  { %v4790_v49 = vmul.f32 %v15082_v11, %v4776_v6 }
0x26bb   :  { %v15084_v53 = vpop.eup %15083 }
0x26bc   :  { %v4791_v54 = vmul.f32 %v15084_v53, %v4777_v28  ;;  %v4796_v29 = vmul.f32 %v4795_v5, %v4790_v49 }
0x26be   :  { %v4797_v60 = vmul.f32 %v4795_v5, %v4791_v54  ;;  %v16800_v0 = vadd.f32 %v4801_v59, %v4796_v29 }
0x26c0   :  { %v16802_v3 = vadd.f32 %v4801_v59, %v4797_v60 }
0x26c2   :  { %v4804_v27 = vpack.c.bf16 %v16802_v3, %v16800_v0 }
0x26c4   :  { %4948 = vmatmul.mubr.bf16.vlgmr.msra.gmra.mrb[96].mxu0 %v4804_v27 }
0x26c5   :  { %13674 = vmatprep.mubr.msk.bf16.mxu0 %vm15209_vm0, %v15208_v2 }
0x2797   :  { %v4949_v55 = vpop.f32.mrb[96].mxu0 }
0x2798   :  { %v4950_v26 = vadd.f32 %v4949_v55, %v4828_v1  ;;  %v4951_v6 = vpop.f32.mrb[97].mxu0 }
0x2799   :  { %v4952_v9 = vadd.f32 %v4951_v6, %v4832_v46  ;;  %v4953_v28 = vpop.f32.mrb[98].mxu0 }
0x279a   :  { %v4962_v32 = vmul.f32 0.044715, %v4950_v26  ;;  %v4954_v33 = vadd.f32 %v4953_v28, %v4828_v1  ;;  %v4955_v36 = vpop.f32.mrb[99].mxu0  ;;  %v4958_v12 = vmul.f32 0.5, %v4950_v26  ;;  %v14677_v28 = vld [vmem:[%s18475_s2 + $0x200] sm:$0xff]  }
0x279b   :  { %v4963_v37 = vmul.f32 0.044715, %v4952_v9  ;;  %v4956_v38 = vadd.f32 %v4955_v36, %v4832_v46  ;;  %v4959_v47 = vmul.f32 0.5, %v4952_v9  ;;  %13659 = vmatpush3.bf16.msra.mxu0 %v14677_v28  ;;  %v14708_v28 = vld [vmem:[%s18476_s3 + $0x278] sm:$0xff]  }
0x279c   :  { %v4966_v22 = vmul.f32 %v4962_v32, %v4950_v26  ;;  %v4964_v25 = vmul.f32 0.044715, %v4954_v33  ;;  %v4960_v31 = vmul.f32 0.5, %v4954_v33  ;;  %v14678_v32 = vld [vmem:[%s18476_s3 + $0x200] sm:$0xff]   ;;  %13660 = vmatprep.subr.bf16.mxu0 %v15208_v2 }
0x279d   :  { %v4967_v30 = vmul.f32 %v4963_v37, %v4952_v9  ;;  %v4965_v63 = vmul.f32 0.044715, %v4956_v38  ;;  %v4961_v16 = vmul.f32 0.5, %v4956_v38 }
0x279e   :  { %v4970_v40 = vmul.f32 %v4966_v22, %v4950_v26  ;;  %v4968_v48 = vmul.f32 %v4964_v25, %v4954_v33 }
0x279f   :  { %v4971_v42 = vmul.f32 %v4967_v30, %v4952_v9  ;;  %v4969_v44 = vmul.f32 %v4965_v63, %v4956_v38 }
0x27a0   :  { %v4974_v7 = vadd.f32 %v4970_v40, %v4950_v26  ;;  %v4972_v45 = vmul.f32 %v4968_v48, %v4954_v33  ;;  %v14681_v40 = vld [vmem:[%s18475_s2 + $0x210] sm:$0xff]  }
0x27a1   :  { %v4973_v51 = vmul.f32 %v4969_v44, %v4956_v38  ;;  %v4975_v56 = vadd.f32 %v4971_v42, %v4952_v9  ;;  %v14682_v48 = vld [vmem:[%s18476_s3 + $0x210] sm:$0xff]   ;;  %v14683_v42 = vld [vmem:[%s18475_s2 + $0x218] sm:$0xff]  }
0x27a2   :  { %v4978_v57 = vmul.f32 0.7978846, %v4974_v7  ;;  %v4976_v41 = vadd.f32 %v4972_v45, %v4954_v33  ;;  %v14679_v33 = vld [vmem:[%s18475_s2 + $0x208] sm:$0xff]   ;;  %v14684_v44 = vld [vmem:[%s18476_s3 + $0x218] sm:$0xff]   ;;  %v14685_v7 = vld [vmem:[%s18475_s2 + $0x220] sm:$0xff]  }
0x27a3   :  { %v4977_v10 = vadd.f32 %v4973_v51, %v4956_v38  ;;  %v4979_v5 = vmul.f32 0.7978846, %v4975_v56  ;;  %13661 = vmatpush3.bf16.msra.mxu0 %v14679_v33  ;;  %v14686_v45 = vld [vmem:[%s18476_s3 + $0x220] sm:$0xff]   ;;  %v14687_v51 = vld [vmem:[%s18475_s2 + $0x228] sm:$0xff]  }
0x27a4   :  { %15085 = vtanh.f32 %v4978_v57  ;;  %v4980_v11 = vmul.f32 0.7978846, %v4976_v41  ;;  %13662 = vmatprep.subr.bf16.mxu0 %v15208_v2  ;;  %v14688_v56 = vld [vmem:[%s18476_s3 + $0x228] sm:$0xff]   ;;  %v14689_v57 = vld [vmem:[%s18475_s2 + $0x230] sm:$0xff]  }
0x27a5   :  { %v4981_v49 = vmul.f32 0.7978846, %v4977_v10  ;;  %15087 = vtanh.f32 %v4979_v5  ;;  %v14690_v41 = vld [vmem:[%s18476_s3 + $0x230] sm:$0xff]   ;;  %v14691_v10 = vld [vmem:[%s18475_s2 + $0x238] sm:$0xff]  }
0x27a6   :  { %15089 = vtanh.f32 %v4980_v11  ;;  %v14692_v5 = vld [vmem:[%s18476_s3 + $0x238] sm:$0xff]  }
0x27a7   :  { %15091 = vtanh.f32 %v4981_v49  ;;  %13663 = vmatpush3.bf16.msra.mxu0 %v14681_v40 }
0x27a8   :  { %13664 = vmatprep.subr.bf16.mxu0 %v15208_v2 }
0x27ab   :  { %13665 = vmatpush3.bf16.msra.mxu0 %v14683_v42 }
0x27ac   :  { %13666 = vmatprep.subr.bf16.mxu0 %v15208_v2 }
0x27ae   :  { %v15086_v53 = vpop.eup %15085 }
0x27af   :  { %v15088_v54 = vpop.eup %15087  ;;  %v4986_v29 = vadd.f32 1.0, %v15086_v53  ;;  %13667 = vmatpush3.bf16.msra.mxu0 %v14685_v7 }
0x27b0   :  { %v15090_v59 = vpop.eup %15089  ;;  %v4987_v60 = vadd.f32 1.0, %v15088_v54  ;;  %13668 = vmatprep.subr.bf16.mxu0 %v15208_v2 }
0x27b1   :  { %v15092_v27 = vpop.eup %15091  ;;  %v4988_v13 = vadd.f32 1.0, %v15090_v59  ;;  %v4990_v50 = vmul.f32 %v4986_v29, %v4958_v12 }
0x27b2   :  { %v4989_v18 = vadd.f32 1.0, %v15092_v27  ;;  %v4991_v24 = vmul.f32 %v4987_v60, %v4959_v47  ;;  %v5197_v60 = vrot.slane %v16739_v14, %v16159_v61 }
0x27b3   :  { %v4992_v23 = vmul.f32 %v4988_v13, %v4960_v31  ;;  %13669 = vmatpush3.bf16.msra.mxu0 %v14687_v51  ;;  %v5203_v13 = vrot.slane %v16739_v14, %v16166_v8  ;;  %v14694_v14 = vld [vmem:[%s18477_s4 + $0x208] sm:$0xff]  }
0x27b4   :  { %v4993_v19 = vmul.f32 %v4989_v18, %v4961_v16  ;;  %13670 = vmatprep.subr.bf16.mxu0 %v15208_v2 }
0x27b5   :  { %v4994_v21 = vpack.c.bf16 %v4992_v23, %v4990_v50 }
0x27b6   :  { %v4995_v34 = vpack.c.bf16 %v4993_v19, %v4991_v24  ;;  %v14693_v24 = vld [vmem:[%s18477_s4 + $0x200] sm:$0xff]  }
0x27b7   :  { %13671 = vmatpush3.bf16.msra.mxu0 %v14689_v57 }
0x27b8   :  { %5161 = vmatprep.mubr.bf16.mxu1 %v4995_v34  ;;  %13672 = vmatprep.subr.bf16.mxu0 %v15208_v2  ;;  %v14696_v34 = vld [vmem:[%s18477_s4 + $0x218] sm:$0xff]  }
0x27b9   :  { %5162 = vmatmul.mubr.bf16.vlgmr.msra.gmra.mrb[108].mxu1 %v4994_v21  ;;  %v14695_v21 = vld [vmem:[%s18477_s4 + $0x210] sm:$0xff]  }
0x27ba   :  { %13694 = vmatprep.mubr.msk.bf16.mxu1 %vm15209_vm0, %v15208_v2  ;;  %13679 = vmatpush3.bf16.msra.mxu1 %v14678_v32  ;;  %v11406_v32 = vld [vmem:[%s18479_s8 + $0x20] sm:$0x7] }
0x27bb   :  { %13680 = vmatprep.subr.bf16.mxu1 %v15208_v2  ;;  %13673 = vmatpush3.bf16.msra.mxu0 %v14691_v10  ;;  %v5231_v33 = vrot.slane %v11406_v32, %v15368_v35 }
0x27bc   :  { %13698 = vmatprep.subr.bf16.mxu0 %v15208_v2 }
0x288c   :  { %v12640_v52 = vpop.f32.mrb[108].mxu1 }
0x288d   :  { %v12641_v43 = vpop.f32.mrb[109].mxu1 }
0x288e   :  { %v12642_v62 = vadd.f32 %v12641_v43, %v12640_v52  ;;  %v12643_v17 = vpop.f32.mrb[110].mxu1  ;;  %v14697_v52 = vld [vmem:[%s18477_s4 + $0x220] sm:$0xff]   ;;  %v14699_v43 = vld [vmem:[%s18477_s4 + $0x230] sm:$0xff]  }
0x288f   :  { %v12644_v1 = vpop.f32.mrb[111].mxu1 }
0x2890   :  { %v5164_v46 = vadd.f32 %v12642_v62, %v5032_v58  ;;  %v12645_v55 = vadd.f32 %v12644_v1, %v12643_v17  ;;  %v14700_v62 = vld [vmem:[%s18477_s4 + $0x238] sm:$0xff]   ;;  %v14701_v17 = vld [vmem:[%s18476_s3 + $0x240] sm:$0xff]   ;;  %v14702_v1 = vld [vmem:[%s18476_s3 + $0x248] sm:$0xff]  }
0x2892   :  { %v5167_v26 = vadd.f32 %v12645_v55, %v5032_v58  ;;  %v5170_v6 = vadd.f32 %v5164_v46, %v16800_v0  ;;  %v14680_v0 = vld [vmem:[%s18476_s3 + $0x208] sm:$0xff]   ;;  %v14703_v46 = vld [vmem:[%s18476_s3 + $0x250] sm:$0xff]   ;;  %v14704_v55 = vld [vmem:[%s18476_s3 + $0x258] sm:$0xff]  }
0x2893   :  { %13681 = vmatpush3.bf16.msra.mxu1 %v14680_v0  ;;  %v14698_v58 = vld [vmem:[%s18477_s4 + $0x228] sm:$0xff]   ;;  %v5341_v0 = vrot.slane %v11406_v32, %v15375_v39 }
0x2894   :  { %5172 = vadd.xlane.f32.xlu0 %v5170_v6  ;;  %v5171_v9 = vadd.f32 %v5167_v26, %v16802_v3  ;;  %13682 = vmatprep.subr.bf16.mxu1 %v15208_v2  ;;  %v14705_v26 = vld [vmem:[%s18476_s3 + $0x260] sm:$0xff]  }
0x2896   :  { %5174 = vadd.xlane.f32.xlu1 %v5171_v9 }
0x2897   :  { %13683 = vmatpush3.bf16.msra.mxu1 %v14682_v48 }
0x2898   :  { %13684 = vmatprep.subr.bf16.mxu1 %v15208_v2 }
0x289b   :  { %13685 = vmatpush3.bf16.msra.mxu1 %v14684_v44 }
0x289c   :  { %13686 = vmatprep.subr.bf16.mxu1 %v15208_v2 }
0x289f   :  { %13687 = vmatpush3.bf16.msra.mxu1 %v14686_v45 }
0x28a0   :  { %13688 = vmatprep.subr.bf16.mxu1 %v15208_v2 }
0x28a3   :  { %13689 = vmatpush3.bf16.msra.mxu1 %v14688_v56  ;;  %v5451_v56 = vrot.slane %v11406_v32, %v15475_v20 }
0x28a4   :  { %13690 = vmatprep.subr.bf16.mxu1 %v15208_v2 }
0x28a7   :  { %13691 = vmatpush3.bf16.msra.mxu1 %v14690_v41 }
0x28a8   :  { %13692 = vmatprep.subr.bf16.mxu1 %v15208_v2 }
0x28ab   :  { %13693 = vmatpush3.bf16.msra.mxu1 %v14692_v5 }
0x28ac   :  { %13718 = vmatprep.subr.bf16.mxu1 %v15208_v2 }
0x2921   :  { %v5173_v3 = vpop.xlane.xlu0 %5172 }
0x2922   :  { %v5176_v36 = vmul.f32 0.0078125, %v5173_v3 }
0x2923   :  { %v5175_v37 = vpop.xlane.xlu1 %5174 }
0x2924   :  { %v5178_v38 = vsub.f32 %v5170_v6, %v5176_v36  ;;  %v5177_v22 = vmul.f32 0.0078125, %v5175_v37  ;;  %v14706_v6 = vld [vmem:[%s18476_s3 + $0x268] sm:$0xff]  }
0x2926   :  { %v5179_v25 = vsub.f32 %v5171_v9, %v5177_v22  ;;  %v5180_v30 = vmul.f32 %v5178_v38, %v5178_v38  ;;  %v14707_v9 = vld [vmem:[%s18476_s3 + $0x270] sm:$0xff]  }
0x2928   :  { %5182 = vadd.xlane.f32.xlu0 %v5180_v30  ;;  %v5181_v63 = vmul.f32 %v5179_v25, %v5179_v25 }
0x292a   :  { %5184 = vadd.xlane.f32.xlu1 %v5181_v63 }
0x29b5   :  { %v5183_v11 = vpop.xlane.xlu0 %5182 }
0x29b6   :  { %v5186_v49 = vmul.f32 0.0078125, %v5183_v11 }
0x29b7   :  { %v5185_v53 = vpop.xlane.xlu1 %5184 }
0x29b8   :  { %v5188_v54 = vadd.f32 1e-05, %v5186_v49  ;;  %v5187_v29 = vmul.f32 0.0078125, %v5185_v53 }
0x29ba   :  { %15093 = vrsqrt.f32 %v5188_v54  ;;  %v5189_v59 = vadd.f32 1e-05, %v5187_v29  ;;  %v17035_v54 = vld [vmem:[%s18479_s8 + $0x24] sm:$0x7] }
0x29bb   :  { %v5800_v29 = vrot.slane %v17035_v54, %v15375_v39 }
0x29bc   :  { %15095 = vrsqrt.f32 %v5189_v59 }
0x29c4   :  { %v15094_v27 = vpop.eup %15093 }
0x29c5   :  { %v5192_v12 = vmul.f32 %v15094_v27, %v5178_v38 }
0x29c6   :  { %v15096_v31 = vpop.eup %15095 }
0x29c7   :  { %v5198_v47 = vmul.f32 %v5197_v60, %v5192_v12  ;;  %v5193_v16 = vmul.f32 %v15096_v31, %v5179_v25 }
0x29c9   :  { %v5199_v18 = vmul.f32 %v5197_v60, %v5193_v16  ;;  %v16936_v50 = vadd.f32 %v5203_v13, %v5198_v47 }
0x29cb   :  { %v16938_v23 = vadd.f32 %v5203_v13, %v5199_v18 }
0x29cd   :  { %v16945_v19 = vpack.c.bf16 %v16938_v23, %v16936_v50 }
0x29cf   :  { %13675 = vmatmul.mubr.bf16.vlgmr.msra.gmra.mrb[100].mxu0 %v16945_v19  ;;  %13695 = vmatmul.mubr.bf16.vlgmr.msra.gmra.mrb[112].mxu1 %v16945_v19 }
0x29d0   :  { %13699 = vmatpush3.bf16.msra.mxu0 %v14693_v24  ;;  %13714 = vmatprep.mubr.msk.bf16.mxu0 %vm15209_vm0, %v15208_v2 }
0x29d1   :  { %13700 = vmatprep.subr.bf16.mxu0 %v15208_v2  ;;  %13720 = vmatprep.mubr.msk.bf16.mxu1 %vm15209_vm0, %v15208_v2 }
0x29d4   :  { %13701 = vmatpush3.bf16.msra.mxu0 %v14694_v14 }
0x29d5   :  { %13702 = vmatprep.subr.bf16.mxu0 %v15208_v2 }
0x29d8   :  { %13703 = vmatpush3.bf16.msra.mxu0 %v14695_v21 }
0x29d9   :  { %13704 = vmatprep.subr.bf16.mxu0 %v15208_v2 }
0x29dc   :  { %13705 = vmatpush3.bf16.msra.mxu0 %v14696_v34 }
0x29dd   :  { %13706 = vmatprep.subr.bf16.mxu0 %v15208_v2 }
0x29e0   :  { %13707 = vmatpush3.bf16.msra.mxu0 %v14697_v52 }
0x29e1   :  { %13708 = vmatprep.subr.bf16.mxu0 %v15208_v2 }
0x29e4   :  { %13709 = vmatpush3.bf16.msra.mxu0 %v14698_v58  ;;  %v17044_v58 = vld [vmem:[%s18480_s1] sm:$0xff] }
0x29e5   :  { %13710 = vmatprep.subr.bf16.mxu0 %v15208_v2 }
0x29e8   :  { %13711 = vmatpush3.bf16.msra.mxu0 %v14699_v43 }
0x29e9   :  { %13712 = vmatprep.subr.bf16.mxu0 %v15208_v2 }
0x29ec   :  { %13713 = vmatpush3.bf16.msra.mxu0 %v14700_v62 }
0x29ed   :  { %13750 = vmatprep.subr.bf16.mxu0 %v15208_v2 }
0x29ef   :  { %13715 = vmatmul.mubr.bf16.vlgmr.msra.gmra.mrb[104].mxu0 %v16945_v19 }
0x29f0   :  { %13751 = vmatpush3.bf16.msra.mxu0 %v14701_v17  ;;  %13766 = vmatprep.mubr.msk.bf16.mxu0 %vm15209_vm0, %v15208_v2  ;;  %v17051_v17 = vld [vmem:[%s18480_s1 + $0x8] sm:$0xff] }
0x29f1   :  { %13752 = vmatprep.subr.bf16.mxu0 %v15208_v2 }
0x29f4   :  { %13753 = vmatpush3.bf16.msra.mxu0 %v14702_v1 }
0x29f5   :  { %13754 = vmatprep.subr.bf16.mxu0 %v15208_v2 }
0x29f8   :  { %13755 = vmatpush3.bf16.msra.mxu0 %v14703_v46 }
0x29f9   :  { %13756 = vmatprep.subr.bf16.mxu0 %v15208_v2 }
0x29fc   :  { %13757 = vmatpush3.bf16.msra.mxu0 %v14704_v55 }
0x29fd   :  { %13758 = vmatprep.subr.bf16.mxu0 %v15208_v2 }
0x2a00   :  { %13759 = vmatpush3.bf16.msra.mxu0 %v14705_v26 }
0x2a01   :  { %13760 = vmatprep.subr.bf16.mxu0 %v15208_v2 }
0x2a04   :  { %13761 = vmatpush3.bf16.msra.mxu0 %v14706_v6 }
0x2a05   :  { %13762 = vmatprep.subr.bf16.mxu0 %v15208_v2 }
0x2a08   :  { %13763 = vmatpush3.bf16.msra.mxu0 %v14707_v9 }
0x2a09   :  { %13764 = vmatprep.subr.bf16.mxu0 %v15208_v2 }
0x2a0c   :  { %13765 = vmatpush3.bf16.msra.mxu0 %v14708_v28 }
0x2a0d   :  { %13790 = vmatprep.subr.bf16.mxu0 %v15208_v2 }
0x2a0f   :  { %13767 = vmatmul.mubr.bf16.vlgmr.msra.gmra.mrb[108].mxu0 %v16945_v19 }
0x2a10   :  { %13792 = vmatprep.mubr.msk.bf16.mxu0 %vm15209_vm0, %v15208_v2 }
0x2aa2   :  { %v5314_v3 = vpop.f32.mrb[100].mxu0  ;;  %v5424_v36 = vpop.f32.mrb[112].mxu1 }
0x2aa3   :  { %v13676_v37 = vpop.f32.mrb[101].mxu0  ;;  %v13696_v38 = vpop.f32.mrb[113].mxu1  ;;  %v5315_v30 = vadd.f32 %v5314_v3, %v5231_v33  ;;  %v5425_v63 = vadd.f32 %v5424_v36, %v5341_v0 }
0x2aa4   :  { %v5317_v22 = vpop.f32.mrb[102].mxu0  ;;  %v5427_v25 = vpop.f32.mrb[114].mxu1 }
0x2aa5   :  { %v5318_v40 = vadd.f32 %v5317_v22, %v5231_v33  ;;  %v5428_v48 = vadd.f32 %v5427_v25, %v5341_v0  ;;  %v13677_v42 = vpop.f32.mrb[103].mxu0  ;;  %v13697_v44 = vpop.f32.mrb[115].mxu1 }
0x2aa6   :  { %v14710_v42 = vld [vmem:[%s18475_s2 + $0x248] sm:$0xff]   ;;  %v14711_v44 = vld [vmem:[%s18475_s2 + $0x250] sm:$0xff]  }
0x2aa7   :  { %v5541_v7 = vpack.c.bf16 %v5318_v40, %v5315_v30  ;;  %v5542_v45 = vpack.c.bf16 %v5428_v48, %v5425_v63  ;;  %v14709_v40 = vld [vmem:[%s18475_s2 + $0x240] sm:$0xff]  }
0x2aa9   :  { %v5547_v51 = vsel %vm417_vm1, %v5542_v45, 0  ;;  %v14713_v45 = vld [vmem:[%s18475_s2 + $0x260] sm:$0xff]  }
0x2aaa   :  { %13719 = vmatpush3.bf16.xpose.msra.mxu1 %v5547_v51  ;;  %v14714_v51 = vld [vmem:[%s18475_s2 + $0x268] sm:$0xff]  }
0x2aab   :  { %13724 = vmatprep.subr.bf16.mxu1 %v15208_v2 }
0x2ab1   :  { %13721 = vmatmul.mubr.msk.bf16.vlgmr.msra.gmra.mrb[116].mxu1 %vm417_vm1, %v5541_v7  ;;  %v14712_v7 = vld [vmem:[%s18475_s2 + $0x258] sm:$0xff]  }
0x2ab2   :  { %13726 = vmatprep.mubr.msk.bf16.mxu1 %vm15209_vm0, %v15208_v2 }
0x2ac2   :  { %v5534_v57 = vpop.f32.mrb[104].mxu0 }
0x2ac3   :  { %v13716_v41 = vpop.f32.mrb[105].mxu0  ;;  %v5535_v5 = vadd.f32 %v5534_v57, %v5451_v56  ;;  %v14716_v57 = vld [vmem:[%s18475_s2 + $0x278] sm:$0xff]  }
0x2ac4   :  { %v5537_v10 = vpop.f32.mrb[106].mxu0  ;;  %v14717_v41 = vld [vmem:[%s18477_s4 + $0x240] sm:$0xff]  }
0x2ac5   :  { %v5538_v11 = vadd.f32 %v5537_v10, %v5451_v56  ;;  %v13717_v49 = vpop.f32.mrb[107].mxu0  ;;  %v14715_v56 = vld [vmem:[%s18475_s2 + $0x270] sm:$0xff]   ;;  %v14718_v10 = vld [vmem:[%s18477_s4 + $0x248] sm:$0xff]  }
0x2ac6   :  { %v14721_v49 = vld [vmem:[%s18477_s4 + $0x260] sm:$0xff]  }
0x2ac7   :  { %v5617_v53 = vpack.c.bf16 %v5538_v11, %v5535_v5  ;;  %v14719_v5 = vld [vmem:[%s18477_s4 + $0x250] sm:$0xff]   ;;  %v14720_v11 = vld [vmem:[%s18477_s4 + $0x258] sm:$0xff]  }
0x2ac9   :  { %13725 = vmatpush3.bf16.msra.mxu1 %v5617_v53  ;;  %v14722_v53 = vld [vmem:[%s18477_s4 + $0x268] sm:$0xff]  }
0x2aca   :  { %13730 = vmatprep.subr.bf16.mxu1 %v15208_v2 }
0x2ae2   :  { %v5883_v59 = vpop.f32.mrb[108].mxu0 }
0x2ae3   :  { %v13768_v60 = vpop.f32.mrb[109].mxu0  ;;  %v5884_v12 = vadd.f32 %v5883_v59, %v5800_v29  ;;  %v14724_v59 = vld [vmem:[%s18477_s4 + $0x278] sm:$0xff]  }
0x2ae4   :  { %v5886_v27 = vpop.f32.mrb[110].mxu0  ;;  %v14725_v60 = vld [vmem:[%s18481_s5 + $0x80] sm:$0xff]  }
0x2ae5   :  { %v5887_v31 = vadd.f32 %v5886_v27, %v5800_v29  ;;  %v13769_v13 = vpop.f32.mrb[111].mxu0  ;;  %v14723_v29 = vld [vmem:[%s18477_s4 + $0x270] sm:$0xff]   ;;  %v14726_v27 = vld [vmem:[%s18481_s5 + $0x88] sm:$0xff]  }
0x2ae7   :  { %v6001_v47 = vpack.c.bf16 %v5887_v31, %v5884_v12 }
0x2ae9   :  { %v6006_v16 = vsel %vm417_vm1, %v6001_v47, 0  ;;  %v14727_v47 = vld [vmem:[%s18476_s3 + $0x280] sm:$0xff]  }
0x2aea   :  { %13791 = vmatpush3.bf16.xpose.msra.mxu0 %v6006_v16 }
0x2aeb   :  { %13796 = vmatprep.subr.bf16.mxu0 %v15208_v2 }
0x2b84   :  { %v5583_v18 = vpop.f32.mrb[116].mxu1 }
0x2b85   :  { %v5590_v24 = vmul.f32 0.17677669, %v5583_v18  ;;  %v13722_v14 = vpop.f32.mrb[117].mxu1 }
0x2b86   :  { %v5586_v21 = vpop.f32.mrb[118].mxu1  ;;  %v14729_v14 = vld [vmem:[%s18476_s3 + $0x290] sm:$0xff]  }
0x2b87   :  { %v5591_v34 = vmul.f32 0.17677669, %v5586_v21  ;;  %v13723_v52 = vpop.f32.mrb[119].mxu1  ;;  %v5592_v43 = vadd.f32 %v17044_v58, %v5590_v24  ;;  %v14728_v24 = vld [vmem:[%s18476_s3 + $0x288] sm:$0xff]   ;;  %v14730_v21 = vld [vmem:[%s18476_s3 + $0x298] sm:$0xff]  }
0x2b88   :  { %v14732_v52 = vld [vmem:[%s18476_s3 + $0x2a8] sm:$0xff]  }
0x2b89   :  { %v5594_v62 = vsel %vm469_vm2, %v5592_v43, -inf  ;;  %v5593_v1 = vadd.f32 %v17051_v17, %v5591_v34  ;;  %v14731_v34 = vld [vmem:[%s18476_s3 + $0x2a0] sm:$0xff]  }
0x2b8a   :  { %5595 = vmax.xlane.f32.xlu0 %v5594_v62  ;;  %v14734_v62 = vld [vmem:[%s18476_s3 + $0x2b8] sm:$0xff]  }
0x2b8b   :  { %v5597_v46 = vsel %vm469_vm2, %v5593_v1, -inf }
0x2b8c   :  { %5598 = vmax.xlane.f32.xlu1 %v5597_v46 }
0x2c17   :  { %v5596_v55 = vpop.xlane.xlu0 %5595 }
0x2c18   :  { %v5600_v26 = vsub.f32 %v5592_v43, %v5596_v55  ;;  %v14733_v43 = vld [vmem:[%s18476_s3 + $0x2b0] sm:$0xff]  }
0x2c19   :  { %v5599_v6 = vpop.xlane.xlu1 %5598 }
0x2c1a   :  { %v5602_v9 = vmul.f32 1.442695, %v5600_v26  ;;  %v5601_v28 = vsub.f32 %v5593_v1, %v5599_v6  ;;  %v5690_v1 = vrot.slane %v17035_v54, %v15368_v35 }
0x2c1c   :  { %15097 = vpow2.f32 %v5602_v9  ;;  %v5604_v32 = vmul.f32 1.442695, %v5601_v28 }
0x2c1e   :  { %15099 = vpow2.f32 %v5604_v32 }
0x2c26   :  { %v15098_v33 = vpop.eup %15097 }
0x2c27   :  { %v5606_v0 = vsel %vm469_vm2, %v15098_v33, 0.0 }
0x2c28   :  { %v15100_v3 = vpop.eup %15099  ;;  %5607 = vadd.xlane.f32.xlu0 %v5606_v0 }
0x2c29   :  { %v5609_v36 = vsel %vm469_vm2, %v15100_v3, 0.0 }
0x2c2a   :  { %5610 = vadd.xlane.f32.xlu1 %v5609_v36 }
0x2cb5   :  { %v5608_v37 = vpop.xlane.xlu0 %5607 }
0x2cb6   :  { %15101 = vrcp.f32 %v5608_v37 }
0x2cb7   :  { %v5611_v38 = vpop.xlane.xlu1 %5610 }
0x2cb8   :  { %15103 = vrcp.f32 %v5611_v38 }
0x2cc0   :  { %v15102_v22 = vpop.eup %15101 }
0x2cc1   :  { %v5614_v30 = vmul.f32 %v15102_v22, %v15098_v33  ;;  %v5910_v33 = vrot.slane %v17035_v54, %v15475_v20  ;;  %v17191_v54 = vld [vmem:[%s18479_s8 + $0x28] sm:$0x7] }
0x2cc2   :  { %v15104_v25 = vpop.eup %15103 }
0x2cc3   :  { %v5615_v63 = vmul.f32 %v15104_v25, %v15100_v3 }
0x2cc5   :  { %v5616_v48 = vpack.c.bf16 %v5615_v63, %v5614_v30 }
0x2cc7   :  { %13727 = vmatmul.mubr.msk.bf16.vlgmr.msra.gmra.mrb[120].mxu1 %vm469_vm2, %v5616_v48 }
0x2cc8   :  { %13731 = vmatpush3.bf16.msra.mxu1 %v14709_v40  ;;  %13746 = vmatprep.mubr.msk.bf16.mxu1 %vm15209_vm0, %v15208_v2 }
0x2cc9   :  { %13732 = vmatprep.subr.bf16.mxu1 %v15208_v2 }
0x2ccc   :  { %13733 = vmatpush3.bf16.msra.mxu1 %v14710_v42  ;;  %v6371_v42 = vrot.slane %v17191_v54, %v15375_v39 }
0x2ccd   :  { %13734 = vmatprep.subr.bf16.mxu1 %v15208_v2 }
0x2cd0   :  { %13735 = vmatpush3.bf16.msra.mxu1 %v14711_v44 }
0x2cd1   :  { %13736 = vmatprep.subr.bf16.mxu1 %v15208_v2 }
0x2cd4   :  { %13737 = vmatpush3.bf16.msra.mxu1 %v14712_v7 }
0x2cd5   :  { %13738 = vmatprep.subr.bf16.mxu1 %v15208_v2 }
0x2cd8   :  { %13739 = vmatpush3.bf16.msra.mxu1 %v14713_v45 }
0x2cd9   :  { %13740 = vmatprep.subr.bf16.mxu1 %v15208_v2 }
0x2cdc   :  { %13741 = vmatpush3.bf16.msra.mxu1 %v14714_v51 }
0x2cdd   :  { %13742 = vmatprep.subr.bf16.mxu1 %v15208_v2 }
0x2ce0   :  { %13743 = vmatpush3.bf16.msra.mxu1 %v14715_v56 }
0x2ce1   :  { %13744 = vmatprep.subr.bf16.mxu1 %v15208_v2 }
0x2ce4   :  { %13745 = vmatpush3.bf16.msra.mxu1 %v14716_v57 }
0x2ce5   :  { %13770 = vmatprep.subr.bf16.mxu1 %v15208_v2 }
0x2ce7   :  { %13747 = vmatmul.mubr.bf16.vlgmr.msra.gmra.mrb[124].mxu1 %v16945_v19 }
0x2ce8   :  { %13771 = vmatpush3.bf16.msra.mxu1 %v14717_v41  ;;  %13786 = vmatprep.mubr.msk.bf16.mxu1 %vm15209_vm0, %v15208_v2 }
0x2ce9   :  { %13772 = vmatprep.subr.bf16.mxu1 %v15208_v2 }
0x2cec   :  { %13773 = vmatpush3.bf16.msra.mxu1 %v14718_v10 }
0x2ced   :  { %13774 = vmatprep.subr.bf16.mxu1 %v15208_v2 }
0x2cf0   :  { %13775 = vmatpush3.bf16.msra.mxu1 %v14719_v5 }
0x2cf1   :  { %13776 = vmatprep.subr.bf16.mxu1 %v15208_v2 }
0x2cf4   :  { %13777 = vmatpush3.bf16.msra.mxu1 %v14720_v11 }
0x2cf5   :  { %13778 = vmatprep.subr.bf16.mxu1 %v15208_v2 }
0x2cf8   :  { %13779 = vmatpush3.bf16.msra.mxu1 %v14721_v49 }
0x2cf9   :  { %13780 = vmatprep.subr.bf16.mxu1 %v15208_v2 }
0x2cfc   :  { %13781 = vmatpush3.bf16.msra.mxu1 %v14722_v53 }
0x2cfd   :  { %13782 = vmatprep.subr.bf16.mxu1 %v15208_v2 }
0x2d00   :  { %13783 = vmatpush3.bf16.msra.mxu1 %v14723_v29 }
0x2d01   :  { %13784 = vmatprep.subr.bf16.mxu1 %v15208_v2 }
0x2d04   :  { %13785 = vmatpush3.bf16.msra.mxu1 %v14724_v59 }
0x2d05   :  { %13810 = vmatprep.subr.bf16.mxu1 %v15208_v2 }
0x2d07   :  { %13787 = vmatmul.mubr.bf16.vlgmr.msra.gmra.mrb[128].mxu1 %v16945_v19 }
0x2d08   :  { %13811 = vmatpush3.bf16.msra.mxu1 %v14725_v60  ;;  %13814 = vmatprep.mubr.msk.bf16.mxu1 %vm15209_vm0, %v15208_v2 }
0x2d09   :  { %13812 = vmatprep.subr.bf16.mxu1 %v15208_v2 }
0x2d0c   :  { %13813 = vmatpush3.bf16.msra.mxu1 %v14726_v27 }
0x2d0d   :  { %13838 = vmatprep.subr.bf16.mxu1 %v15208_v2 }
0x2d9a   :  { %v5655_v12 = vpop.f32.mrb[120].mxu1 }
0x2d9b   :  { %v13728_v31 = vpop.f32.mrb[121].mxu1 }
0x2d9c   :  { %v5658_v13 = vpop.f32.mrb[122].mxu1 }
0x2d9d   :  { %v5662_v16 = vpack.c.bf16 %v5658_v13, %v5655_v12  ;;  %v13729_v18 = vpop.f32.mrb[123].mxu1 }
0x2d9f   :  { %13815 = vmatmul.mubr.msk.bf16.vlgmr.msra.gmra.mrb[132].mxu1 %vm417_vm1, %v5662_v16 }
0x2da0   :  { %13839 = vmatpush3.bf16.msra.mxu1 %v14727_v47  ;;  %13854 = vmatprep.mubr.msk.bf16.mxu1 %vm15209_vm0, %v15208_v2 }
0x2da1   :  { %13840 = vmatprep.subr.bf16.mxu1 %v15208_v2 }
0x2da4   :  { %13841 = vmatpush3.bf16.msra.mxu1 %v14728_v24 }
0x2da5   :  { %13842 = vmatprep.subr.bf16.mxu1 %v15208_v2 }
0x2da8   :  { %13843 = vmatpush3.bf16.msra.mxu1 %v14729_v14 }
0x2da9   :  { %13844 = vmatprep.subr.bf16.mxu1 %v15208_v2 }
0x2dac   :  { %13845 = vmatpush3.bf16.msra.mxu1 %v14730_v21 }
0x2dad   :  { %13846 = vmatprep.subr.bf16.mxu1 %v15208_v2 }
0x2db0   :  { %13847 = vmatpush3.bf16.msra.mxu1 %v14731_v34 }
0x2db1   :  { %13848 = vmatprep.subr.bf16.mxu1 %v15208_v2 }
0x2db4   :  { %13849 = vmatpush3.bf16.msra.mxu1 %v14732_v52 }
0x2db5   :  { %13850 = vmatprep.subr.bf16.mxu1 %v15208_v2 }
0x2db8   :  { %13851 = vmatpush3.bf16.msra.mxu1 %v14733_v43 }
0x2db9   :  { %13852 = vmatprep.subr.bf16.mxu1 %v15208_v2 }
0x2dba   :  { %v5773_v46 = vpop.f32.mrb[124].mxu1 }
0x2dbb   :  { %v13748_v55 = vpop.f32.mrb[125].mxu1  ;;  %v5774_v6 = vadd.f32 %v5773_v46, %v5690_v1 }
0x2dbc   :  { %v5776_v26 = vpop.f32.mrb[126].mxu1  ;;  %13853 = vmatpush3.bf16.msra.mxu1 %v14734_v62 }
0x2dbd   :  { %v5777_v9 = vadd.f32 %v5776_v26, %v5690_v1  ;;  %v13749_v28 = vpop.f32.mrb[127].mxu1  ;;  %13878 = vmatprep.subr.bf16.mxu1 %v15208_v2 }
0x2dbf   :  { %v6000_v32 = vpack.c.bf16 %v5777_v9, %v5774_v6  ;;  %13855 = vmatmul.mubr.bf16.vlgmr.msra.gmra.mrb[136].mxu1 %v16945_v19  ;;  %v14735_v9 = vld [vmem:[%s18481_s5 + $0x90] sm:$0xff]  }
0x2dc0   :  { %13880 = vmatprep.mubr.msk.bf16.mxu1 %vm15209_vm0, %v15208_v2 }
0x2dc1   :  { %13793 = vmatmul.mubr.msk.bf16.vlgmr.msra.gmra.mrb[112].mxu0 %vm417_vm1, %v6000_v32  ;;  %v14736_v32 = vld [vmem:[%s18481_s5 + $0x98] sm:$0xff]  }
0x2dc2   :  { %13798 = vmatprep.mubr.msk.bf16.mxu0 %vm15209_vm0, %v15208_v2 }
0x2dda   :  { %v5993_v0 = vpop.f32.mrb[128].mxu1 }
0x2ddb   :  { %v13788_v3 = vpop.f32.mrb[129].mxu1  ;;  %v5994_v37 = vadd.f32 %v5993_v0, %v5910_v33 }
0x2ddc   :  { %v5996_v36 = vpop.f32.mrb[130].mxu1 }
0x2ddd   :  { %v5997_v38 = vadd.f32 %v5996_v36, %v5910_v33  ;;  %v13789_v22 = vpop.f32.mrb[131].mxu1  ;;  %v14737_v36 = vld [vmem:[%s18475_s2 + $0x280] sm:$0xff]  }
0x2dde   :  { %v14738_v22 = vld [vmem:[%s18475_s2 + $0x288] sm:$0xff]  }
0x2ddf   :  { %v6076_v25 = vpack.c.bf16 %v5997_v38, %v5994_v37 }
0x2de1   :  { %13797 = vmatpush3.bf16.msra.mxu0 %v6076_v25  ;;  %v14739_v25 = vld [vmem:[%s18475_s2 + $0x290] sm:$0xff]  }
0x2de2   :  { %13802 = vmatprep.subr.bf16.mxu0 %v15208_v2 }
0x2e72   :  { %v17184_v30 = vpop.f32.mrb[132].mxu1 }
0x2e73   :  { %v13816_v63 = vpop.f32.mrb[133].mxu1 }
0x2e74   :  { %v17186_v40 = vpop.f32.mrb[134].mxu1  ;;  %v14740_v63 = vld [vmem:[%s18475_s2 + $0x298] sm:$0xff]  }
0x2e75   :  { %v13817_v48 = vpop.f32.mrb[135].mxu1 }
0x2e76   :  { %v14741_v48 = vld [vmem:[%s18475_s2 + $0x2a0] sm:$0xff]  }
0x2e92   :  { %v6454_v44 = vpop.f32.mrb[136].mxu1 }
0x2e93   :  { %v13856_v7 = vpop.f32.mrb[137].mxu1  ;;  %v6455_v56 = vadd.f32 %v6454_v44, %v6371_v42  ;;  %v14743_v44 = vld [vmem:[%s18475_s2 + $0x2b0] sm:$0xff]  }
0x2e94   :  { %v6042_v45 = vpop.f32.mrb[112].mxu0  ;;  %v6457_v51 = vpop.f32.mrb[138].mxu1  ;;  %v14744_v7 = vld [vmem:[%s18475_s2 + $0x2b8] sm:$0xff]  }
0x2e95   :  { %v6049_v57 = vmul.f32 0.17677669, %v6042_v45  ;;  %v6458_v41 = vadd.f32 %v6457_v51, %v6371_v42  ;;  %v13794_v10 = vpop.f32.mrb[113].mxu0  ;;  %v13857_v5 = vpop.f32.mrb[139].mxu1  ;;  %v14742_v42 = vld [vmem:[%s18475_s2 + $0x2a8] sm:$0xff]   ;;  %v14745_v45 = vld [vmem:[%s18477_s4 + $0x280] sm:$0xff]  }
0x2e96   :  { %v6045_v11 = vpop.f32.mrb[114].mxu0  ;;  %v14746_v51 = vld [vmem:[%s18477_s4 + $0x288] sm:$0xff]   ;;  %v14751_v5 = vld [vmem:[%s18477_s4 + $0x2b0] sm:$0xff]  }
0x2e97   :  { %v6572_v49 = vpack.c.bf16 %v6458_v41, %v6455_v56  ;;  %v6050_v53 = vmul.f32 0.17677669, %v6045_v11  ;;  %v13795_v29 = vpop.f32.mrb[115].mxu0  ;;  %v6051_v59 = vadd.f32 %v17044_v58, %v6049_v57  ;;  %v14747_v56 = vld [vmem:[%s18477_s4 + $0x290] sm:$0xff]   ;;  %v14748_v57 = vld [vmem:[%s18477_s4 + $0x298] sm:$0xff]   ;;  %v14749_v41 = vld [vmem:[%s18477_s4 + $0x2a0] sm:$0xff]  }
0x2e98   :  { %v14750_v10 = vld [vmem:[%s18477_s4 + $0x2a8] sm:$0xff]   ;;  %v14752_v11 = vld [vmem:[%s18477_s4 + $0x2b8] sm:$0xff]   ;;  %v14755_v29 = vld [vmem:[%s18476_s3 + $0x2d0] sm:$0xff]  }
0x2e99   :  { %v6577_v60 = vsel %vm417_vm1, %v6572_v49, 0  ;;  %v6053_v27 = vsel %vm469_vm2, %v6051_v59, -inf  ;;  %v6052_v12 = vadd.f32 %v17051_v17, %v6050_v53  ;;  %v14753_v49 = vld [vmem:[%s18476_s3 + $0x2c0] sm:$0xff]   ;;  %v14754_v53 = vld [vmem:[%s18476_s3 + $0x2c8] sm:$0xff]  }
0x2e9a   :  { %13879 = vmatpush3.bf16.xpose.msra.mxu1 %v6577_v60  ;;  %6054 = vmax.xlane.f32.xlu0 %v6053_v27  ;;  %v14757_v60 = vld [vmem:[%s18476_s3 + $0x2e0] sm:$0xff]   ;;  %v14758_v27 = vld [vmem:[%s18476_s3 + $0x2e8] sm:$0xff]  }
0x2e9b   :  { %v6056_v31 = vsel %vm469_vm2, %v6052_v12, -inf  ;;  %13884 = vmatprep.subr.bf16.mxu1 %v15208_v2 }
0x2e9c   :  { %6057 = vmax.xlane.f32.xlu1 %v6056_v31  ;;  %v14760_v31 = vld [vmem:[%s18476_s3 + $0x2f8] sm:$0xff]  }
0x2f27   :  { %v6055_v13 = vpop.xlane.xlu0 %6054 }
0x2f28   :  { %v6059_v47 = vsub.f32 %v6051_v59, %v6055_v13  ;;  %v14756_v59 = vld [vmem:[%s18476_s3 + $0x2d8] sm:$0xff]  }
0x2f29   :  { %v6058_v16 = vpop.xlane.xlu1 %6057 }
0x2f2a   :  { %v6061_v18 = vmul.f32 1.442695, %v6059_v47  ;;  %v6060_v24 = vsub.f32 %v6052_v12, %v6058_v16  ;;  %v14759_v12 = vld [vmem:[%s18476_s3 + $0x2f0] sm:$0xff]  }
0x2f2c   :  { %15105 = vpow2.f32 %v6061_v18  ;;  %v6063_v14 = vmul.f32 1.442695, %v6060_v24 }
0x2f2e   :  { %15107 = vpow2.f32 %v6063_v14 }
0x2f36   :  { %v15106_v21 = vpop.eup %15105 }
0x2f37   :  { %v6065_v34 = vsel %vm469_vm2, %v15106_v21, 0.0 }
0x2f38   :  { %v15108_v52 = vpop.eup %15107  ;;  %6066 = vadd.xlane.f32.xlu0 %v6065_v34 }
0x2f39   :  { %v6068_v43 = vsel %vm469_vm2, %v15108_v52, 0.0 }
0x2f3a   :  { %6069 = vadd.xlane.f32.xlu1 %v6068_v43 }
0x2fc5   :  { %v6067_v62 = vpop.xlane.xlu0 %6066 }
0x2fc6   :  { %15109 = vrcp.f32 %v6067_v62 }
0x2fc7   :  { %v6070_v1 = vpop.xlane.xlu1 %6069 }
0x2fc8   :  { %15111 = vrcp.f32 %v6070_v1 }
0x2fd0   :  { %v15110_v46 = vpop.eup %15109 }
0x2fd1   :  { %v6073_v26 = vmul.f32 %v15110_v46, %v15106_v21  ;;  %v6261_v21 = vrot.slane %v17191_v54, %v15368_v35 }
0x2fd2   :  { %v15112_v55 = vpop.eup %15111 }
0x2fd3   :  { %v6074_v6 = vmul.f32 %v15112_v55, %v15108_v52 }
0x2fd5   :  { %v6075_v28 = vpack.c.bf16 %v6074_v6, %v6073_v26 }
0x2fd7   :  { %13799 = vmatmul.mubr.msk.bf16.vlgmr.msra.gmra.mrb[116].mxu0 %vm469_vm2, %v6075_v28 }
0x2fd8   :  { %13803 = vmatpush3.bf16.msra.mxu0 %v14735_v9  ;;  %13806 = vmatprep.mubr.msk.bf16.mxu0 %vm15209_vm0, %v15208_v2 }
0x2fd9   :  { %13804 = vmatprep.subr.bf16.mxu0 %v15208_v2 }
0x2fdc   :  { %13805 = vmatpush3.bf16.msra.mxu0 %v14736_v32 }
0x2fdd   :  { %13818 = vmatprep.subr.bf16.mxu0 %v15208_v2 }
0x30aa   :  { %v6114_v33 = vpop.f32.mrb[116].mxu0 }
0x30ab   :  { %v13800_v0 = vpop.f32.mrb[117].mxu0 }
0x30ac   :  { %v6117_v3 = vpop.f32.mrb[118].mxu0  ;;  %v17339_v0 = vld [vmem:[%s18479_s8 + $0x2c] sm:$0x7] }
0x30ad   :  { %v6121_v37 = vpack.c.bf16 %v6117_v3, %v6114_v33  ;;  %v13801_v38 = vpop.f32.mrb[119].mxu0  ;;  %v6888_v3 = vrot.slane %v17339_v0, %v15375_v39 }
0x30af   :  { %13807 = vmatmul.mubr.msk.bf16.vlgmr.msra.gmra.mrb[120].mxu0 %vm417_vm1, %v6121_v37 }
0x30b0   :  { %13819 = vmatpush3.bf16.msra.mxu0 %v14737_v36  ;;  %13834 = vmatprep.mubr.msk.bf16.mxu0 %vm15209_vm0, %v15208_v2 }
0x30b1   :  { %13820 = vmatprep.subr.bf16.mxu0 %v15208_v2 }
0x30b4   :  { %13821 = vmatpush3.bf16.msra.mxu0 %v14738_v22 }
0x30b5   :  { %13822 = vmatprep.subr.bf16.mxu0 %v15208_v2 }
0x30b8   :  { %13823 = vmatpush3.bf16.msra.mxu0 %v14739_v25 }
0x30b9   :  { %13824 = vmatprep.subr.bf16.mxu0 %v15208_v2 }
0x30bc   :  { %13825 = vmatpush3.bf16.msra.mxu0 %v14740_v63 }
0x30bd   :  { %13826 = vmatprep.subr.bf16.mxu0 %v15208_v2 }
0x30c0   :  { %13827 = vmatpush3.bf16.msra.mxu0 %v14741_v48 }
0x30c1   :  { %13828 = vmatprep.subr.bf16.mxu0 %v15208_v2 }
0x30c4   :  { %13829 = vmatpush3.bf16.msra.mxu0 %v14742_v42 }
0x30c5   :  { %13830 = vmatprep.subr.bf16.mxu0 %v15208_v2 }
0x30c8   :  { %13831 = vmatpush3.bf16.msra.mxu0 %v14743_v44 }
0x30c9   :  { %13832 = vmatprep.subr.bf16.mxu0 %v15208_v2 }
0x30cc   :  { %13833 = vmatpush3.bf16.msra.mxu0 %v14744_v7 }
0x30cd   :  { %13858 = vmatprep.subr.bf16.mxu0 %v15208_v2 }
0x30cf   :  { %13835 = vmatmul.mubr.bf16.vlgmr.msra.gmra.mrb[124].mxu0 %v16945_v19 }
0x30d0   :  { %13859 = vmatpush3.bf16.msra.mxu0 %v14745_v45  ;;  %13874 = vmatprep.mubr.msk.bf16.mxu0 %vm15209_vm0, %v15208_v2 }
0x30d1   :  { %13860 = vmatprep.subr.bf16.mxu0 %v15208_v2 }
0x30d4   :  { %13861 = vmatpush3.bf16.msra.mxu0 %v14746_v51 }
0x30d5   :  { %13862 = vmatprep.subr.bf16.mxu0 %v15208_v2 }
0x30d8   :  { %13863 = vmatpush3.bf16.msra.mxu0 %v14747_v56 }
0x30d9   :  { %13864 = vmatprep.subr.bf16.mxu0 %v15208_v2 }
0x30dc   :  { %13865 = vmatpush3.bf16.msra.mxu0 %v14748_v57 }
0x30dd   :  { %13866 = vmatprep.subr.bf16.mxu0 %v15208_v2 }
0x30e0   :  { %13867 = vmatpush3.bf16.msra.mxu0 %v14749_v41 }
0x30e1   :  { %13868 = vmatprep.subr.bf16.mxu0 %v15208_v2 }
0x30e4   :  { %13869 = vmatpush3.bf16.msra.mxu0 %v14750_v10 }
0x30e5   :  { %13870 = vmatprep.subr.bf16.mxu0 %v15208_v2 }
0x30e8   :  { %13871 = vmatpush3.bf16.msra.mxu0 %v14751_v5 }
0x30e9   :  { %13872 = vmatprep.subr.bf16.mxu0 %v15208_v2 }
0x30ec   :  { %13873 = vmatpush3.bf16.msra.mxu0 %v14752_v11 }
0x30ed   :  { %13918 = vmatprep.subr.bf16.mxu0 %v15208_v2 }
0x30ef   :  { %13875 = vmatmul.mubr.bf16.vlgmr.msra.gmra.mrb[128].mxu0 %v16945_v19 }
0x30f0   :  { %13919 = vmatpush3.bf16.msra.mxu0 %v14753_v49  ;;  %13934 = vmatprep.mubr.msk.bf16.mxu0 %vm15209_vm0, %v15208_v2 }
0x30f1   :  { %13920 = vmatprep.subr.bf16.mxu0 %v15208_v2 }
0x30f4   :  { %13921 = vmatpush3.bf16.msra.mxu0 %v14754_v53 }
0x30f5   :  { %13922 = vmatprep.subr.bf16.mxu0 %v15208_v2 }
0x30f8   :  { %13923 = vmatpush3.bf16.msra.mxu0 %v14755_v29 }
0x30f9   :  { %13924 = vmatprep.subr.bf16.mxu0 %v15208_v2 }
0x30fc   :  { %13925 = vmatpush3.bf16.msra.mxu0 %v14756_v59 }
0x30fd   :  { %13926 = vmatprep.subr.bf16.mxu0 %v15208_v2 }
0x3100   :  { %13927 = vmatpush3.bf16.msra.mxu0 %v14757_v60 }
0x3101   :  { %13928 = vmatprep.subr.bf16.mxu0 %v15208_v2 }
0x3104   :  { %13929 = vmatpush3.bf16.msra.mxu0 %v14758_v27 }
0x3105   :  { %13930 = vmatprep.subr.bf16.mxu0 %v15208_v2 }
0x3108   :  { %13931 = vmatpush3.bf16.msra.mxu0 %v14759_v12 }
0x3109   :  { %13932 = vmatprep.subr.bf16.mxu0 %v15208_v2 }
0x310c   :  { %13933 = vmatpush3.bf16.msra.mxu0 %v14760_v31 }
0x310d   :  { %13958 = vmatprep.subr.bf16.mxu0 %v15208_v2 }
0x310f   :  { %13935 = vmatmul.mubr.bf16.vlgmr.msra.gmra.mrb[132].mxu0 %v16945_v19 }
0x3110   :  { %13960 = vmatprep.mubr.msk.bf16.mxu0 %vm15209_vm0, %v15208_v2 }
0x3182   :  { %v6176_v13 = vpop.f32.mrb[120].mxu0 }
0x3183   :  { %v17323_v47 = vadd.f32 %v17184_v30, %v6176_v13  ;;  %v13808_v16 = vpop.f32.mrb[121].mxu0  ;;  %v6481_v30 = vrot.slane %v17191_v54, %v15475_v20 }
0x3184   :  { %v6179_v18 = vpop.f32.mrb[122].mxu0 }
0x3185   :  { %v17326_v24 = vadd.f32 %v17186_v40, %v6179_v18  ;;  %v13809_v14 = vpop.f32.mrb[123].mxu0 }
0x31a2   :  { %v6344_v34 = vpop.f32.mrb[124].mxu0 }
0x31a3   :  { %v13836_v52 = vpop.f32.mrb[125].mxu0  ;;  %v6345_v62 = vadd.f32 %v6344_v34, %v6261_v21 }
0x31a4   :  { %v6347_v43 = vpop.f32.mrb[126].mxu0 }
0x31a5   :  { %v6348_v1 = vadd.f32 %v6347_v43, %v6261_v21  ;;  %v13837_v46 = vpop.f32.mrb[127].mxu0  ;;  %v14761_v43 = vld [vmem:[%s18481_s5 + $0xa0] sm:$0xff]  }
0x31a7   :  { %v6571_v55 = vpack.c.bf16 %v6348_v1, %v6345_v62  ;;  %v14762_v1 = vld [vmem:[%s18481_s5 + $0xa8] sm:$0xff]  }
0x31a9   :  { %13881 = vmatmul.mubr.msk.bf16.vlgmr.msra.gmra.mrb[140].mxu1 %vm417_vm1, %v6571_v55 }
0x31aa   :  { %13886 = vmatprep.mubr.msk.bf16.mxu1 %vm15209_vm0, %v15208_v2 }
0x31c2   :  { %v6564_v40 = vpop.f32.mrb[128].mxu0 }
0x31c3   :  { %v13876_v26 = vpop.f32.mrb[129].mxu0  ;;  %v6565_v9 = vadd.f32 %v6564_v40, %v6481_v30  ;;  %v14763_v40 = vld [vmem:[%s18475_s2 + $0x2c0] sm:$0xff]  }
0x31c4   :  { %v6567_v6 = vpop.f32.mrb[130].mxu0 }
0x31c5   :  { %v6568_v28 = vadd.f32 %v6567_v6, %v6481_v30  ;;  %v13877_v32 = vpop.f32.mrb[131].mxu0 }
0x31c6   :  { %v14766_v32 = vld [vmem:[%s18475_s2 + $0x2d8] sm:$0xff]  }
0x31c7   :  { %v6647_v33 = vpack.c.bf16 %v6568_v28, %v6565_v9  ;;  %v14764_v9 = vld [vmem:[%s18475_s2 + $0x2c8] sm:$0xff]   ;;  %v14765_v28 = vld [vmem:[%s18475_s2 + $0x2d0] sm:$0xff]  }
0x31c9   :  { %13885 = vmatpush3.bf16.msra.mxu1 %v6647_v33  ;;  %v14767_v33 = vld [vmem:[%s18475_s2 + $0x2e0] sm:$0xff]  }
0x31ca   :  { %13890 = vmatprep.subr.bf16.mxu1 %v15208_v2 }
0x31e2   :  { %v6971_v36 = vpop.f32.mrb[132].mxu0 }
0x31e3   :  { %v13936_v54 = vpop.f32.mrb[133].mxu0  ;;  %v6972_v38 = vadd.f32 %v6971_v36, %v6888_v3  ;;  %v14769_v36 = vld [vmem:[%s18475_s2 + $0x2f0] sm:$0xff]  }
0x31e4   :  { %v6974_v37 = vpop.f32.mrb[134].mxu0  ;;  %v14770_v54 = vld [vmem:[%s18475_s2 + $0x2f8] sm:$0xff]  }
0x31e5   :  { %v6975_v22 = vadd.f32 %v6974_v37, %v6888_v3  ;;  %v13937_v25 = vpop.f32.mrb[135].mxu0  ;;  %v14768_v3 = vld [vmem:[%s18475_s2 + $0x2e8] sm:$0xff]   ;;  %v14771_v37 = vld [vmem:[%s18477_s4 + $0x2c0] sm:$0xff]  }
0x31e6   :  { %v14774_v25 = vld [vmem:[%s18477_s4 + $0x2d8] sm:$0xff]  }
0x31e7   :  { %v7089_v63 = vpack.c.bf16 %v6975_v22, %v6972_v38  ;;  %v14772_v38 = vld [vmem:[%s18477_s4 + $0x2c8] sm:$0xff]   ;;  %v14773_v22 = vld [vmem:[%s18477_s4 + $0x2d0] sm:$0xff]  }
0x31e9   :  { %v7094_v48 = vsel %vm417_vm1, %v7089_v63, 0  ;;  %v14775_v63 = vld [vmem:[%s18477_s4 + $0x2e0] sm:$0xff]  }
0x31ea   :  { %13959 = vmatpush3.bf16.xpose.msra.mxu0 %v7094_v48  ;;  %v14776_v48 = vld [vmem:[%s18477_s4 + $0x2e8] sm:$0xff]  }
0x31eb   :  { %13964 = vmatprep.subr.bf16.mxu0 %v15208_v2 }
0x327c   :  { %v6613_v42 = vpop.f32.mrb[140].mxu1 }
0x327d   :  { %v6620_v44 = vmul.f32 0.17677669, %v6613_v42  ;;  %v13882_v7 = vpop.f32.mrb[141].mxu1  ;;  %v14777_v42 = vld [vmem:[%s18477_s4 + $0x2f0] sm:$0xff]  }
0x327e   :  { %v6616_v45 = vpop.f32.mrb[142].mxu1 }
0x327f   :  { %v6621_v51 = vmul.f32 0.17677669, %v6616_v45  ;;  %v13883_v56 = vpop.f32.mrb[143].mxu1  ;;  %v6622_v57 = vadd.f32 %v17044_v58, %v6620_v44  ;;  %v14778_v44 = vld [vmem:[%s18477_s4 + $0x2f8] sm:$0xff]  }
0x3281   :  { %v6624_v41 = vsel %vm469_vm2, %v6622_v57, -inf  ;;  %v6623_v10 = vadd.f32 %v17051_v17, %v6621_v51 }
0x3282   :  { %6625 = vmax.xlane.f32.xlu0 %v6624_v41 }
0x3283   :  { %v6627_v5 = vsel %vm469_vm2, %v6623_v10, -inf }
0x3284   :  { %6628 = vmax.xlane.f32.xlu1 %v6627_v5 }
0x330f   :  { %v6626_v11 = vpop.xlane.xlu0 %6625 }
0x3310   :  { %v6630_v49 = vsub.f32 %v6622_v57, %v6626_v11 }
0x3311   :  { %v6629_v53 = vpop.xlane.xlu1 %6628 }
0x3312   :  { %v6632_v29 = vmul.f32 1.442695, %v6630_v49  ;;  %v6631_v59 = vsub.f32 %v6623_v10, %v6629_v53  ;;  %v6778_v10 = vrot.slane %v17339_v0, %v15368_v35 }
0x3314   :  { %15113 = vpow2.f32 %v6632_v29  ;;  %v6634_v60 = vmul.f32 1.442695, %v6631_v59 }
0x3316   :  { %15115 = vpow2.f32 %v6634_v60 }
0x331e   :  { %v15114_v27 = vpop.eup %15113 }
0x331f   :  { %v6636_v12 = vsel %vm469_vm2, %v15114_v27, 0.0 }
0x3320   :  { %v15116_v31 = vpop.eup %15115  ;;  %6637 = vadd.xlane.f32.xlu0 %v6636_v12 }
0x3321   :  { %v6639_v13 = vsel %vm469_vm2, %v15116_v31, 0.0 }
0x3322   :  { %6640 = vadd.xlane.f32.xlu1 %v6639_v13 }
0x33ad   :  { %v6638_v16 = vpop.xlane.xlu0 %6637 }
0x33ae   :  { %15117 = vrcp.f32 %v6638_v16 }
0x33af   :  { %v6641_v18 = vpop.xlane.xlu1 %6640 }
0x33b0   :  { %15119 = vrcp.f32 %v6641_v18 }
0x33b8   :  { %v15118_v14 = vpop.eup %15117 }
0x33b9   :  { %v6644_v34 = vmul.f32 %v15118_v14, %v15114_v27 }
0x33ba   :  { %v15120_v21 = vpop.eup %15119 }
0x33bb   :  { %v6645_v52 = vmul.f32 %v15120_v21, %v15116_v31 }
0x33bd   :  { %v6646_v62 = vpack.c.bf16 %v6645_v52, %v6644_v34 }
0x33bf   :  { %13887 = vmatmul.mubr.msk.bf16.vlgmr.msra.gmra.mrb[144].mxu1 %vm469_vm2, %v6646_v62 }
0x33c0   :  { %13891 = vmatpush3.bf16.msra.mxu1 %v14761_v43  ;;  %13894 = vmatprep.mubr.msk.bf16.mxu1 %vm15209_vm0, %v15208_v2 }
0x33c1   :  { %13892 = vmatprep.subr.bf16.mxu1 %v15208_v2 }
0x33c4   :  { %13893 = vmatpush3.bf16.msra.mxu1 %v14762_v1 }
0x33c5   :  { %13898 = vmatprep.subr.bf16.mxu1 %v15208_v2 }
0x3492   :  { %v6685_v46 = vpop.f32.mrb[144].mxu1 }
0x3493   :  { %v13888_v55 = vpop.f32.mrb[145].mxu1 }
0x3494   :  { %v6688_v30 = vpop.f32.mrb[146].mxu1 }
0x3495   :  { %v6692_v26 = vpack.c.bf16 %v6688_v30, %v6685_v46  ;;  %v13889_v6 = vpop.f32.mrb[147].mxu1 }
0x3497   :  { %13895 = vmatmul.mubr.msk.bf16.vlgmr.msra.gmra.mrb[148].mxu1 %vm417_vm1, %v6692_v26 }
0x3498   :  { %13899 = vmatpush3.bf16.msra.mxu1 %v14763_v40  ;;  %13914 = vmatprep.mubr.msk.bf16.mxu1 %vm15209_vm0, %v15208_v2 }
0x3499   :  { %13900 = vmatprep.subr.bf16.mxu1 %v15208_v2 }
0x349c   :  { %13901 = vmatpush3.bf16.msra.mxu1 %v14764_v9 }
0x349d   :  { %13902 = vmatprep.subr.bf16.mxu1 %v15208_v2 }
0x34a0   :  { %13903 = vmatpush3.bf16.msra.mxu1 %v14765_v28 }
0x34a1   :  { %13904 = vmatprep.subr.bf16.mxu1 %v15208_v2 }
0x34a4   :  { %13905 = vmatpush3.bf16.msra.mxu1 %v14766_v32 }
0x34a5   :  { %13906 = vmatprep.subr.bf16.mxu1 %v15208_v2 }
0x34a8   :  { %13907 = vmatpush3.bf16.msra.mxu1 %v14767_v33 }
0x34a9   :  { %13908 = vmatprep.subr.bf16.mxu1 %v15208_v2 }
0x34ac   :  { %13909 = vmatpush3.bf16.msra.mxu1 %v14768_v3 }
0x34ad   :  { %13910 = vmatprep.subr.bf16.mxu1 %v15208_v2 }
0x34b0   :  { %13911 = vmatpush3.bf16.msra.mxu1 %v14769_v36 }
0x34b1   :  { %13912 = vmatprep.subr.bf16.mxu1 %v15208_v2 }
0x34b4   :  { %13913 = vmatpush3.bf16.msra.mxu1 %v14770_v54 }
0x34b5   :  { %13938 = vmatprep.subr.bf16.mxu1 %v15208_v2 }
0x34b7   :  { %13915 = vmatmul.mubr.bf16.vlgmr.msra.gmra.mrb[152].mxu1 %v16945_v19 }
0x34b8   :  { %13939 = vmatpush3.bf16.msra.mxu1 %v14771_v37  ;;  %13954 = vmatprep.mubr.msk.bf16.mxu1 %vm15209_vm0, %v15208_v2 }
0x34b9   :  { %13940 = vmatprep.subr.bf16.mxu1 %v15208_v2 }
0x34bc   :  { %13941 = vmatpush3.bf16.msra.mxu1 %v14772_v38 }
0x34bd   :  { %13942 = vmatprep.subr.bf16.mxu1 %v15208_v2 }
0x34c0   :  { %13943 = vmatpush3.bf16.msra.mxu1 %v14773_v22  ;;  %v14779_v22 = vld [vmem:[%s18481_s5 + $0xb0] sm:$0xff]  }
0x34c1   :  { %13944 = vmatprep.subr.bf16.mxu1 %v15208_v2 }
0x34c4   :  { %13945 = vmatpush3.bf16.msra.mxu1 %v14774_v25 }
0x34c5   :  { %13946 = vmatprep.subr.bf16.mxu1 %v15208_v2 }
0x34c8   :  { %13947 = vmatpush3.bf16.msra.mxu1 %v14775_v63  ;;  %v14780_v63 = vld [vmem:[%s18481_s5 + $0xb8] sm:$0xff]  }
0x34c9   :  { %13948 = vmatprep.subr.bf16.mxu1 %v15208_v2 }
0x34cc   :  { %13949 = vmatpush3.bf16.msra.mxu1 %v14776_v48 }
0x34cd   :  { %13950 = vmatprep.subr.bf16.mxu1 %v15208_v2 }
0x34d0   :  { %13951 = vmatpush3.bf16.msra.mxu1 %v14777_v42 }
0x34d1   :  { %13952 = vmatprep.subr.bf16.mxu1 %v15208_v2 }
0x34d4   :  { %13953 = vmatpush3.bf16.msra.mxu1 %v14778_v44 }
0x34d7   :  { %13955 = vmatmul.mubr.bf16.vlgmr.msra.gmra.mrb[156].mxu1 %v16945_v19 }
0x356a   :  { %v6747_v7 = vpop.f32.mrb[148].mxu1 }
0x356b   :  { %v17433_v45 = vadd.f32 %v6747_v7, %v17323_v47  ;;  %v13896_v51 = vpop.f32.mrb[149].mxu1  ;;  %v6998_v47 = vrot.slane %v17339_v0, %v15475_v20 }
0x356c   :  { %v6750_v56 = vpop.f32.mrb[150].mxu1 }
0x356d   :  { %v17436_v57 = vadd.f32 %v6750_v56, %v17326_v24  ;;  %v13897_v41 = vpop.f32.mrb[151].mxu1  ;;  %v17467_v56 = vld [vmem:[%s18482_s10 + $0x10] sm:$0x3f] }
0x356e   :  { %v7276_v41 = vrot.slane %v17467_v56, %v15368_v35 }
0x358a   :  { %v6861_v5 = vpop.f32.mrb[152].mxu1 }
0x358b   :  { %v13916_v11 = vpop.f32.mrb[153].mxu1  ;;  %v6862_v53 = vadd.f32 %v6861_v5, %v6778_v10 }
0x358c   :  { %v6864_v49 = vpop.f32.mrb[154].mxu1 }
0x358d   :  { %v6865_v29 = vadd.f32 %v6864_v49, %v6778_v10  ;;  %v13917_v59 = vpop.f32.mrb[155].mxu1 }
0x358f   :  { %v7088_v19 = vpack.c.bf16 %v6865_v29, %v6862_v53 }
0x3591   :  { %13961 = vmatmul.mubr.msk.bf16.vlgmr.msra.gmra.mrb[136].mxu0 %vm417_vm1, %v7088_v19 }
0x3592   :  { %13966 = vmatprep.mubr.msk.bf16.mxu0 %vm15209_vm0, %v15208_v2 }
0x35aa   :  { %v7081_v24 = vpop.f32.mrb[156].mxu1 }
0x35ab   :  { %v13956_v60 = vpop.f32.mrb[157].mxu1  ;;  %v7082_v12 = vadd.f32 %v7081_v24, %v6998_v47 }
0x35ac   :  { %v7084_v27 = vpop.f32.mrb[158].mxu1  ;;  %v14781_v60 = vld [vmem:[%s18484_s6 + $0x100] ss:$8 sps:$4 sm:$0xff]  }
0x35ad   :  { %v7085_v31 = vadd.f32 %v7084_v27, %v6998_v47  ;;  %v13957_v13 = vpop.f32.mrb[159].mxu1 }
0x35af   :  { %v7164_v16 = vpack.c.bf16 %v7085_v31, %v7082_v12 }
0x35b1   :  { %13965 = vmatpush3.bf16.msra.mxu0 %v7164_v16 }
0x35b2   :  { %13970 = vmatprep.subr.bf16.mxu0 %v15208_v2 }
0x3664   :  { %v7130_v18 = vpop.f32.mrb[136].mxu0 }
0x3665   :  { %v7137_v14 = vmul.f32 0.17677669, %v7130_v18  ;;  %v13962_v21 = vpop.f32.mrb[137].mxu0 }
0x3666   :  { %v7133_v34 = vpop.f32.mrb[138].mxu0  ;;  %v14789_v21 = vld [vmem:[%s18484_s6 + $0x124] ss:$8 sps:$4 sm:$0xff]  }
0x3667   :  { %v7138_v52 = vmul.f32 0.17677669, %v7133_v34  ;;  %v13963_v43 = vpop.f32.mrb[139].mxu0  ;;  %v7139_v62 = vadd.f32 %v17044_v58, %v7137_v14  ;;  %v14787_v34 = vld [vmem:[%s18484_s6 + $0x120] ss:$8 sps:$4 sm:$0xff]  }
0x3668   :  { %v14790_v43 = vld [vmem:[%s18484_s6 + $0x130] ss:$8 sps:$4 sm:$0xff]  }
0x3669   :  { %v7141_v0 = vsel %vm469_vm2, %v7139_v62, -inf  ;;  %v7140_v1 = vadd.f32 %v17051_v17, %v7138_v52  ;;  %v14792_v52 = vld [vmem:[%s18484_s6 + $0x134] ss:$8 sps:$4 sm:$0xff]  }
0x366a   :  { %7142 = vmax.xlane.f32.xlu0 %v7141_v0  ;;  %v14793_v0 = vld [vmem:[%s18484_s6 + $0x140] ss:$8 sps:$4 sm:$0xff]  }
0x366b   :  { %v7144_v46 = vsel %vm469_vm2, %v7140_v1, -inf }
0x366c   :  { %7145 = vmax.xlane.f32.xlu1 %v7144_v46  ;;  %v14796_v46 = vld [vmem:[%s18484_s6 + $0x150] ss:$8 sps:$4 sm:$0xff]  }
0x36f7   :  { %v7143_v55 = vpop.xlane.xlu0 %7142 }
0x36f8   :  { %v7147_v30 = vsub.f32 %v7139_v62, %v7143_v55  ;;  %v14795_v62 = vld [vmem:[%s18484_s6 + $0x144] ss:$8 sps:$4 sm:$0xff]  }
0x36f9   :  { %v7146_v40 = vpop.xlane.xlu1 %7145  ;;  %v14801_v55 = vld [vmem:[%s18484_s6 + $0x164] ss:$8 sps:$4 sm:$0xff]  }
0x36fa   :  { %v7149_v26 = vmul.f32 1.442695, %v7147_v30  ;;  %v7148_v6 = vsub.f32 %v7140_v1, %v7146_v40  ;;  %v14798_v1 = vld [vmem:[%s18484_s6 + $0x154] ss:$8 sps:$4 sm:$0xff]   ;;  %v14799_v30 = vld [vmem:[%s18484_s6 + $0x160] ss:$8 sps:$4 sm:$0xff]  }
0x36fb   :  { %v14804_v40 = vld [vmem:[%s18484_s6 + $0x174] ss:$8 sps:$4 sm:$0xff]  }
0x36fc   :  { %15121 = vpow2.f32 %v7149_v26  ;;  %v7151_v9 = vmul.f32 1.442695, %v7148_v6  ;;  %v14802_v26 = vld [vmem:[%s18484_s6 + $0x170] ss:$8 sps:$4 sm:$0xff]  }
0x36fe   :  { %15123 = vpow2.f32 %v7151_v9 }
0x3706   :  { %v15122_v28 = vpop.eup %15121 }
0x3707   :  { %v7153_v32 = vsel %vm469_vm2, %v15122_v28, 0.0 }
0x3708   :  { %v15124_v58 = vpop.eup %15123  ;;  %7154 = vadd.xlane.f32.xlu0 %v7153_v32 }
0x3709   :  { %v7156_v33 = vsel %vm469_vm2, %v15124_v58, 0.0 }
0x370a   :  { %7157 = vadd.xlane.f32.xlu1 %v7156_v33 }
0x3795   :  { %v7155_v17 = vpop.xlane.xlu0 %7154 }
0x3796   :  { %15125 = vrcp.f32 %v7155_v17  ;;  %v7306_v17 = vrot.slane %v17467_v56, %v15375_v39 }
0x3797   :  { %v7158_v3 = vpop.xlane.xlu1 %7157 }
0x3798   :  { %15127 = vrcp.f32 %v7158_v3 }
0x37a0   :  { %v15126_v36 = vpop.eup %15125 }
0x37a1   :  { %v7161_v37 = vmul.f32 %v15126_v36, %v15122_v28 }
0x37a2   :  { %v15128_v54 = vpop.eup %15127 }
0x37a3   :  { %v7162_v38 = vmul.f32 %v15128_v54, %v15124_v58 }
0x37a5   :  { %v7163_v25 = vpack.c.bf16 %v7162_v38, %v7161_v37 }
0x37a7   :  { %13967 = vmatmul.mubr.msk.bf16.vlgmr.msra.gmra.mrb[140].mxu0 %vm469_vm2, %v7163_v25 }
0x37a8   :  { %13971 = vmatpush3.bf16.msra.mxu0 %v14779_v22  ;;  %13974 = vmatprep.mubr.msk.bf16.mxu0 %vm15209_vm0, %v15208_v2  ;;  %v7312_v22 = vrot.slane %v17467_v56, %v15475_v20 }
0x37a9   :  { %13972 = vmatprep.subr.bf16.mxu0 %v15208_v2 }
0x37ac   :  { %13973 = vmatpush3.bf16.msra.mxu0 %v14780_v63 }
0x387a   :  { %v7202_v48 = vpop.f32.mrb[140].mxu0 }
0x387b   :  { %v13968_v42 = vpop.f32.mrb[141].mxu0 }
0x387c   :  { %v7205_v44 = vpop.f32.mrb[142].mxu0 }
0x387d   :  { %v7209_v7 = vpack.c.bf16 %v7205_v44, %v7202_v48  ;;  %v13969_v51 = vpop.f32.mrb[143].mxu0  ;;  %v14805_v44 = vld [vmem:[%s18485_s7 + $0x140] sm:$0xff]  }
0x387e   :  { %12782 = vmatprep.subr.bf16.mxu1 %v14805_v44  ;;  %v14807_v51 = vld [vmem:[%s18485_s7 + $0x148] sm:$0xff]  }
0x387f   :  { %13975 = vmatmul.mubr.msk.bf16.vlgmr.msra.gmra.mrb[144].mxu0 %vm417_vm1, %v7209_v7  ;;  %v14806_v7 = vld [vmem:[%s18485_s7 + $0x100] sm:$0xff]  }
0x3880   :  { %7458 = vmatprep.mubr.bf16.mxu0 %v15210_v4  ;;  %12783 = vmatpush3.bf16.msra.mxu1 %v14806_v7 }
0x3881   :  { %12784 = vmatprep.subr.bf16.mxu1 %v14807_v51 }
0x3952   :  { %v7264_v10 = vpop.f32.mrb[144].mxu0 }
0x3953   :  { %v7271_v5 = vadd.f32 %v7264_v10, %v17433_v45  ;;  %v13976_v11 = vpop.f32.mrb[145].mxu0  ;;  %v14783_v45 = vld [vmem:[%s18484_s6 + $0x104] ss:$8 sps:$4 sm:$0xff]   ;;  %v14809_v10 = vld [vmem:[%s18485_s7 + $0x150] sm:$0xff]  }
0x3954   :  { %v7267_v49 = vpop.f32.mrb[146].mxu0  ;;  %7426 = vmatprep.subr.bf16.mxu0 %v14783_v45  ;;  %v14811_v11 = vld [vmem:[%s18485_s7 + $0x158] sm:$0xff]  }
0x3955   :  { %v7277_v53 = vadd.f32 %v7276_v41, %v7271_v5  ;;  %v7272_v29 = vadd.f32 %v7267_v49, %v17436_v57  ;;  %v13977_v59 = vpop.f32.mrb[147].mxu0  ;;  %v14786_v57 = vld [vmem:[%s18484_s6 + $0x114] ss:$8 sps:$4 sm:$0xff]   ;;  %7427 = vmatpush1.bf16.msra.mxu0 %v14781_v60 }
0x3956   :  { %7428 = vmatprep.subr.bf16.mxu0 %v14786_v57  ;;  %v14810_v5 = vld [vmem:[%s18485_s7 + $0x110] sm:$0xff]   ;;  %v14812_v49 = vld [vmem:[%s18485_s7 + $0x118] sm:$0xff]   ;;  %v14815_v59 = vld [vmem:[%s18485_s7 + $0x168] sm:$0xff]  }
0x3957   :  { %v7278_v19 = vadd.f32 %v7276_v41, %v7272_v29  ;;  %v7279_v47 = vadd.f32 %v7277_v53, %v16936_v50  ;;  %v14784_v50 = vld [vmem:[%s18484_s6 + $0x110] ss:$8 sps:$4 sm:$0xff]   ;;  %v14808_v41 = vld [vmem:[%s18485_s7 + $0x108] sm:$0xff]   ;;  %v14813_v53 = vld [vmem:[%s18485_s7 + $0x160] sm:$0xff]  }
0x3958   :  { %12785 = vmatpush3.bf16.msra.mxu1 %v14808_v41  ;;  %v14814_v29 = vld [vmem:[%s18485_s7 + $0x120] sm:$0xff]   ;;  %v14819_v60 = vld [vmem:[%s18485_s7 + $0x178] sm:$0xff]  }
0x3959   :  { %7281 = vadd.xlane.f32.xlu0 %v7279_v47  ;;  %v7280_v24 = vadd.f32 %v7278_v19, %v16938_v23  ;;  %7429 = vmatpush1.bf16.msra.mxu0 %v14784_v50  ;;  %v14816_v19 = vld [vmem:[%s18485_s7 + $0x128] sm:$0xff]   ;;  %v14820_v45 = vld [vmem:[%s18485_s7 + $0x138] sm:$0xff]   ;;  %v11750_v57 = vld [vmem:[%s18486_s9 + $0x4] sm:$0x3] }
0x395a   :  { %7430 = vmatprep.subr.bf16.mxu0 %v14789_v21  ;;  %12786 = vmatprep.subr.bf16.mxu1 %v14809_v10  ;;  %v7339_v50 = vrot.slane %v11750_v57, %v15368_v35 }
0x395b   :  { %7283 = vadd.xlane.f32.xlu1 %v7280_v24 }
0x395c   :  { %12787 = vmatpush3.bf16.msra.mxu1 %v14810_v5 }
0x395d   :  { %7431 = vmatpush1.bf16.msra.mxu0 %v14787_v34  ;;  %12788 = vmatprep.subr.bf16.mxu1 %v14811_v11 }
0x395e   :  { %7432 = vmatprep.subr.bf16.mxu0 %v14792_v52 }
0x3960   :  { %12789 = vmatpush3.bf16.msra.mxu1 %v14812_v49 }
0x3961   :  { %7433 = vmatpush1.bf16.msra.mxu0 %v14790_v43  ;;  %12790 = vmatprep.subr.bf16.mxu1 %v14813_v53 }
0x3962   :  { %7434 = vmatprep.subr.bf16.mxu0 %v14795_v62 }
0x3964   :  { %12791 = vmatpush3.bf16.msra.mxu1 %v14814_v29 }
0x3965   :  { %7435 = vmatpush1.bf16.msra.mxu0 %v14793_v0  ;;  %12792 = vmatprep.subr.bf16.mxu1 %v14815_v59 }
0x3966   :  { %7436 = vmatprep.subr.bf16.mxu0 %v14798_v1 }
0x3968   :  { %12793 = vmatpush3.bf16.msra.mxu1 %v14816_v19 }
0x3969   :  { %7437 = vmatpush1.bf16.msra.mxu0 %v14796_v46 }
0x396a   :  { %7438 = vmatprep.subr.bf16.mxu0 %v14801_v55 }
0x396d   :  { %7439 = vmatpush1.bf16.msra.mxu0 %v14799_v30 }
0x396e   :  { %7440 = vmatprep.subr.bf16.mxu0 %v14804_v40 }
0x3971   :  { %7441 = vmatpush1.bf16.msra.mxu0 %v14802_v26 }
0x3972   :  { %13978 = vmatprep.subr.bf16.mxu0 %v15208_v2 }
0x39e6   :  { %v7282_v23 = vpop.xlane.xlu0 %7281 }
0x39e7   :  { %v7285_v27 = vmul.f32 0.0078125, %v7282_v23  ;;  %v7343_v23 = vrot.slane %v11750_v57, %v15375_v39 }
0x39e8   :  { %v7284_v12 = vpop.xlane.xlu1 %7283 }
0x39e9   :  { %v7287_v31 = vsub.f32 %v7279_v47, %v7285_v27  ;;  %v7286_v13 = vmul.f32 0.0078125, %v7284_v12  ;;  %v14817_v47 = vld [vmem:[%s18485_s7 + $0x170] sm:$0xff]  }
0x39ea   :  { %12794 = vmatprep.subr.bf16.mxu1 %v14817_v47 }
0x39eb   :  { %v7288_v16 = vsub.f32 %v7280_v24, %v7286_v13  ;;  %v7289_v18 = vmul.f32 %v7287_v31, %v7287_v31  ;;  %v14818_v24 = vld [vmem:[%s18485_s7 + $0x130] sm:$0xff]  }
0x39ec   :  { %12795 = vmatpush3.bf16.msra.mxu1 %v14818_v24  ;;  %v7543_v24 = vrot.slane %v17467_v56, %v16088_v15 }
0x39ed   :  { %7291 = vadd.xlane.f32.xlu0 %v7289_v18  ;;  %v7290_v14 = vmul.f32 %v7288_v16, %v7288_v16  ;;  %12796 = vmatprep.subr.bf16.mxu1 %v14819_v60 }
0x39ef   :  { %7293 = vadd.xlane.f32.xlu1 %v7290_v14 }
0x39f0   :  { %12797 = vmatpush3.bf16.msra.mxu1 %v14820_v45 }
0x39f1   :  { %13998 = vmatprep.subr.bf16.mxu1 %v15208_v2 }
0x3a7a   :  { %v7292_v6 = vpop.xlane.xlu0 %7291 }
0x3a7b   :  { %v7295_v9 = vmul.f32 0.0078125, %v7292_v6 }
0x3a7c   :  { %v7294_v28 = vpop.xlane.xlu1 %7293 }
0x3a7d   :  { %v7297_v32 = vadd.f32 1e-05, %v7295_v9  ;;  %v7296_v58 = vmul.f32 0.0078125, %v7294_v28 }
0x3a7f   :  { %15129 = vrsqrt.f32 %v7297_v32  ;;  %v7298_v33 = vadd.f32 1e-05, %v7296_v58 }
0x3a81   :  { %15131 = vrsqrt.f32 %v7298_v33 }
0x3a89   :  { %v15130_v3 = vpop.eup %15129 }
0x3a8a   :  { %v7301_v36 = vmul.f32 %v15130_v3, %v7287_v31 }
0x3a8b   :  { %v15132_v54 = vpop.eup %15131 }
0x3a8c   :  { %v7302_v37 = vmul.f32 %v15132_v54, %v7288_v16  ;;  %v7307_v38 = vmul.f32 %v7306_v17, %v7301_v36 }
0x3a8e   :  { %v7308_v25 = vmul.f32 %v7306_v17, %v7302_v37  ;;  %v17528_v63 = vadd.f32 %v7312_v22, %v7307_v38 }
0x3a90   :  { %v17530_v48 = vadd.f32 %v7312_v22, %v7308_v25 }
0x3a92   :  { %v7315_v42 = vpack.c.bf16 %v17530_v48, %v17528_v63 }
0x3a94   :  { %7459 = vmatmul.mubr.bf16.vlgmr.msra.gmra.mrb[148].mxu0 %v7315_v42 }
0x3a95   :  { %13994 = vmatprep.mubr.msk.bf16.mxu0 %vm15209_vm0, %v15208_v2 }
0x3b67   :  { %v7460_v27 = vpop.f32.mrb[148].mxu0 }
0x3b68   :  { %v7461_v12 = vadd.f32 %v7460_v27, %v7339_v50  ;;  %v7462_v31 = vpop.f32.mrb[149].mxu0 }
0x3b69   :  { %v7463_v13 = vadd.f32 %v7462_v31, %v7343_v23  ;;  %v7464_v16 = vpop.f32.mrb[150].mxu0 }
0x3b6a   :  { %v7473_v18 = vmul.f32 0.044715, %v7461_v12  ;;  %v7465_v14 = vadd.f32 %v7464_v16, %v7339_v50  ;;  %v7466_v21 = vpop.f32.mrb[151].mxu0  ;;  %v7469_v44 = vmul.f32 0.5, %v7461_v12  ;;  %v14821_v16 = vld [vmem:[%s18483_s11 + $0x40] sm:$0xff]  }
0x3b6b   :  { %v7474_v34 = vmul.f32 0.044715, %v7463_v13  ;;  %v7467_v52 = vadd.f32 %v7466_v21, %v7343_v23  ;;  %v7470_v41 = vmul.f32 0.5, %v7463_v13  ;;  %13979 = vmatpush3.bf16.msra.mxu0 %v14821_v16  ;;  %v14838_v16 = vld [vmem:[%s18476_s3 + $0x300] sm:$0xff]  }
0x3b6c   :  { %v7477_v43 = vmul.f32 %v7473_v18, %v7461_v12  ;;  %v7475_v62 = vmul.f32 0.044715, %v7465_v14  ;;  %v7471_v7 = vmul.f32 0.5, %v7465_v14  ;;  %v14822_v18 = vld [vmem:[%s18483_s11 + $0x48] sm:$0xff]   ;;  %13980 = vmatprep.subr.bf16.mxu0 %v15208_v2 }
0x3b6d   :  { %v7478_v0 = vmul.f32 %v7474_v34, %v7463_v13  ;;  %v7476_v1 = vmul.f32 0.044715, %v7467_v52  ;;  %v7472_v10 = vmul.f32 0.5, %v7467_v52 }
0x3b6e   :  { %v7481_v46 = vmul.f32 %v7477_v43, %v7461_v12  ;;  %v7479_v55 = vmul.f32 %v7475_v62, %v7465_v14 }
0x3b6f   :  { %v7482_v30 = vmul.f32 %v7478_v0, %v7463_v13  ;;  %v7480_v40 = vmul.f32 %v7476_v1, %v7467_v52  ;;  %13981 = vmatpush3.bf16.msra.mxu0 %v14822_v18  ;;  %v14823_v0 = vld [vmem:[%s18483_s11 + $0x50] sm:$0xff]   ;;  %v14824_v1 = vld [vmem:[%s18483_s11 + $0x58] sm:$0xff]  }
0x3b70   :  { %v7485_v26 = vadd.f32 %v7481_v46, %v7461_v12  ;;  %v7483_v6 = vmul.f32 %v7479_v55, %v7465_v14  ;;  %13982 = vmatprep.subr.bf16.mxu0 %v15208_v2  ;;  %v14825_v46 = vld [vmem:[%s18483_s11 + $0x60] sm:$0xff]   ;;  %v14826_v55 = vld [vmem:[%s18483_s11 + $0x68] sm:$0xff]  }
0x3b71   :  { %v7484_v9 = vmul.f32 %v7480_v40, %v7467_v52  ;;  %v7486_v28 = vadd.f32 %v7482_v30, %v7463_v13  ;;  %v14827_v30 = vld [vmem:[%s18483_s11 + $0x70] sm:$0xff]   ;;  %v14828_v40 = vld [vmem:[%s18483_s11 + $0x78] sm:$0xff]  }
0x3b72   :  { %v7489_v32 = vmul.f32 0.7978846, %v7485_v26  ;;  %v7487_v58 = vadd.f32 %v7483_v6, %v7465_v14  ;;  %v14829_v26 = vld [vmem:[%s18483_s11 + $0x80] sm:$0xff]   ;;  %v14830_v6 = vld [vmem:[%s18483_s11 + $0x88] sm:$0xff]  }
0x3b73   :  { %v7488_v33 = vadd.f32 %v7484_v9, %v7467_v52  ;;  %v7490_v17 = vmul.f32 0.7978846, %v7486_v28  ;;  %13983 = vmatpush3.bf16.msra.mxu0 %v14823_v0  ;;  %v14831_v9 = vld [vmem:[%s18483_s11 + $0x90] sm:$0xff]   ;;  %v14832_v28 = vld [vmem:[%s18483_s11 + $0x98] sm:$0xff]  }
0x3b74   :  { %15133 = vtanh.f32 %v7489_v32  ;;  %v7491_v3 = vmul.f32 0.7978846, %v7487_v58  ;;  %13984 = vmatprep.subr.bf16.mxu0 %v15208_v2  ;;  %v14833_v32 = vld [vmem:[%s18483_s11 + $0xa0] sm:$0xff]   ;;  %v14834_v58 = vld [vmem:[%s18483_s11 + $0xa8] sm:$0xff]  }
0x3b75   :  { %v7492_v36 = vmul.f32 0.7978846, %v7488_v33  ;;  %15135 = vtanh.f32 %v7490_v17 }
0x3b76   :  { %15137 = vtanh.f32 %v7491_v3 }
0x3b77   :  { %15139 = vtanh.f32 %v7492_v36  ;;  %13985 = vmatpush3.bf16.msra.mxu0 %v14824_v1 }
0x3b78   :  { %13986 = vmatprep.subr.bf16.mxu0 %v15208_v2 }
0x3b7b   :  { %13987 = vmatpush3.bf16.msra.mxu0 %v14825_v46 }
0x3b7c   :  { %13988 = vmatprep.subr.bf16.mxu0 %v15208_v2 }
0x3b7e   :  { %v15134_v54 = vpop.eup %15133 }
0x3b7f   :  { %v15136_v37 = vpop.eup %15135  ;;  %v7497_v38 = vadd.f32 1.0, %v15134_v54  ;;  %13989 = vmatpush3.bf16.msra.mxu0 %v14826_v55 }
0x3b80   :  { %v15138_v22 = vpop.eup %15137  ;;  %v7498_v25 = vadd.f32 1.0, %v15136_v37  ;;  %13990 = vmatprep.subr.bf16.mxu0 %v15208_v2 }
0x3b81   :  { %v15140_v42 = vpop.eup %15139  ;;  %v7499_v51 = vadd.f32 1.0, %v15138_v22  ;;  %v7501_v11 = vmul.f32 %v7497_v38, %v7469_v44  ;;  %v7708_v38 = vrot.slane %v17467_v56, %v16159_v61 }
0x3b82   :  { %v7500_v5 = vadd.f32 1.0, %v15140_v42  ;;  %v7502_v53 = vmul.f32 %v7498_v25, %v7470_v41 }
0x3b83   :  { %v7503_v49 = vmul.f32 %v7499_v51, %v7471_v7  ;;  %13991 = vmatpush3.bf16.msra.mxu0 %v14827_v30  ;;  %v7714_v51 = vrot.slane %v17467_v56, %v16166_v8  ;;  %v14837_v56 = vld [vmem:[%s18475_s2 + $0x300] sm:$0xff]  }
0x3b84   :  { %v7504_v29 = vmul.f32 %v7500_v5, %v7472_v10  ;;  %13992 = vmatprep.subr.bf16.mxu0 %v15208_v2 }
0x3b85   :  { %v7505_v59 = vpack.c.bf16 %v7503_v49, %v7501_v11  ;;  %v14835_v49 = vld [vmem:[%s18483_s11 + $0xb0] sm:$0xff]  }
0x3b86   :  { %v7506_v19 = vpack.c.bf16 %v7504_v29, %v7502_v53  ;;  %v14836_v53 = vld [vmem:[%s18483_s11 + $0xb8] sm:$0xff]   ;;  %v14839_v29 = vld [vmem:[%s18475_s2 + $0x308] sm:$0xff]  }
0x3b87   :  { %13993 = vmatpush3.bf16.msra.mxu0 %v14828_v40 }
0x3b88   :  { %7672 = vmatprep.mubr.bf16.mxu1 %v7506_v19  ;;  %14018 = vmatprep.subr.bf16.mxu0 %v15208_v2  ;;  %v14843_v19 = vld [vmem:[%s18475_s2 + $0x318] sm:$0xff]  }
0x3b89   :  { %7673 = vmatmul.mubr.bf16.vlgmr.msra.gmra.mrb[160].mxu1 %v7505_v59  ;;  %v14841_v59 = vld [vmem:[%s18475_s2 + $0x310] sm:$0xff]  }
0x3b8a   :  { %14014 = vmatprep.mubr.msk.bf16.mxu1 %vm15209_vm0, %v15208_v2  ;;  %13999 = vmatpush3.bf16.msra.mxu1 %v14829_v26 }
0x3b8b   :  { %14000 = vmatprep.subr.bf16.mxu1 %v15208_v2 }
0x3b8e   :  { %14001 = vmatpush3.bf16.msra.mxu1 %v14830_v6  ;;  %v14853_v6 = vld [vmem:[%s18477_s4 + $0x300] sm:$0xff]  }
0x3b8f   :  { %14002 = vmatprep.subr.bf16.mxu1 %v15208_v2 }
0x3b92   :  { %14003 = vmatpush3.bf16.msra.mxu1 %v14831_v9 }
0x3b93   :  { %14004 = vmatprep.subr.bf16.mxu1 %v15208_v2 }
0x3b96   :  { %14005 = vmatpush3.bf16.msra.mxu1 %v14832_v28  ;;  %v14854_v28 = vld [vmem:[%s18477_s4 + $0x308] sm:$0xff]  }
0x3b97   :  { %14006 = vmatprep.subr.bf16.mxu1 %v15208_v2 }
0x3b9a   :  { %14007 = vmatpush3.bf16.msra.mxu1 %v14833_v32  ;;  %v14855_v32 = vld [vmem:[%s18477_s4 + $0x310] sm:$0xff]  }
0x3b9b   :  { %14008 = vmatprep.subr.bf16.mxu1 %v15208_v2 }
0x3b9e   :  { %14009 = vmatpush3.bf16.msra.mxu1 %v14834_v58  ;;  %v14856_v58 = vld [vmem:[%s18477_s4 + $0x318] sm:$0xff]  }
0x3b9f   :  { %14010 = vmatprep.subr.bf16.mxu1 %v15208_v2 }
0x3ba2   :  { %14011 = vmatpush3.bf16.msra.mxu1 %v14835_v49 }
0x3ba3   :  { %14012 = vmatprep.subr.bf16.mxu1 %v15208_v2 }
0x3ba6   :  { %14013 = vmatpush3.bf16.msra.mxu1 %v14836_v53 }
0x3ba7   :  { %14038 = vmatprep.subr.bf16.mxu1 %v15208_v2 }
0x3c5c   :  { %v12798_v47 = vpop.f32.mrb[160].mxu1 }
0x3c5d   :  { %v12799_v60 = vpop.f32.mrb[161].mxu1 }
0x3c5e   :  { %v12800_v45 = vadd.f32 %v12799_v60, %v12798_v47  ;;  %v12801_v57 = vpop.f32.mrb[162].mxu1  ;;  %v14845_v47 = vld [vmem:[%s18475_s2 + $0x320] sm:$0xff]   ;;  %v14849_v60 = vld [vmem:[%s18475_s2 + $0x330] sm:$0xff]  }
0x3c5f   :  { %v12802_v50 = vpop.f32.mrb[163].mxu1 }
0x3c60   :  { %v7675_v23 = vadd.f32 %v12800_v45, %v7543_v24  ;;  %v12803_v27 = vadd.f32 %v12802_v50, %v12801_v57  ;;  %v15204_v45 = vld [vmem:[%s18478_s12] sm:$0x3f] }
0x3c61   :  { %v7738_v57 = vrot.slane %v15204_v45, %v15475_v20  ;;  %v7849_v0 = vrot.slane %v15204_v45, %v16088_v15 }
0x3c62   :  { %v7678_v12 = vadd.f32 %v12803_v27, %v7543_v24  ;;  %v7681_v31 = vadd.f32 %v7675_v23, %v17528_v63  ;;  %v14847_v24 = vld [vmem:[%s18475_s2 + $0x328] sm:$0xff]  }
0x3c64   :  { %7683 = vadd.xlane.f32.xlu0 %v7681_v31  ;;  %v7682_v13 = vadd.f32 %v7678_v12, %v17530_v48 }
0x3c66   :  { %7685 = vadd.xlane.f32.xlu1 %v7682_v13 }
0x3cf1   :  { %v7684_v14 = vpop.xlane.xlu0 %7683 }
0x3cf2   :  { %v7687_v63 = vmul.f32 0.0078125, %v7684_v14  ;;  %v14840_v14 = vld [vmem:[%s18476_s3 + $0x308] sm:$0xff]  }
0x3cf3   :  { %v7686_v21 = vpop.xlane.xlu1 %7685 }
0x3cf4   :  { %v7689_v34 = vsub.f32 %v7681_v31, %v7687_v63  ;;  %v7688_v48 = vmul.f32 0.0078125, %v7686_v21  ;;  %v14842_v63 = vld [vmem:[%s18476_s3 + $0x310] sm:$0xff]   ;;  %v14844_v21 = vld [vmem:[%s18476_s3 + $0x318] sm:$0xff]  }
0x3cf6   :  { %v7690_v52 = vsub.f32 %v7682_v13, %v7688_v48  ;;  %v7691_v43 = vmul.f32 %v7689_v34, %v7689_v34  ;;  %v14848_v48 = vld [vmem:[%s18476_s3 + $0x328] sm:$0xff]  }
0x3cf8   :  { %7693 = vadd.xlane.f32.xlu0 %v7691_v43  ;;  %v7692_v62 = vmul.f32 %v7690_v52, %v7690_v52  ;;  %v14851_v43 = vld [vmem:[%s18475_s2 + $0x338] sm:$0xff]  }
0x3cfa   :  { %7695 = vadd.xlane.f32.xlu1 %v7692_v62  ;;  %v14852_v62 = vld [vmem:[%s18476_s3 + $0x338] sm:$0xff]  }
0x3d85   :  { %v7694_v33 = vpop.xlane.xlu0 %7693 }
0x3d86   :  { %v7697_v17 = vmul.f32 0.0078125, %v7694_v33  ;;  %v14857_v33 = vld [vmem:[%s18477_s4 + $0x320] sm:$0xff]  }
0x3d87   :  { %v7696_v3 = vpop.xlane.xlu1 %7695 }
0x3d88   :  { %v7699_v36 = vadd.f32 1e-05, %v7697_v17  ;;  %v7698_v54 = vmul.f32 0.0078125, %v7696_v3  ;;  %v14858_v17 = vld [vmem:[%s18477_s4 + $0x328] sm:$0xff]   ;;  %v14859_v3 = vld [vmem:[%s18477_s4 + $0x330] sm:$0xff]  }
0x3d8a   :  { %15141 = vrsqrt.f32 %v7699_v36  ;;  %v7700_v37 = vadd.f32 1e-05, %v7698_v54  ;;  %v14860_v36 = vld [vmem:[%s18477_s4 + $0x338] sm:$0xff]   ;;  %v14861_v54 = vld [vmem:[%s18476_s3 + $0x340] sm:$0xff]  }
0x3d8c   :  { %15143 = vrsqrt.f32 %v7700_v37  ;;  %v14862_v37 = vld [vmem:[%s18476_s3 + $0x348] sm:$0xff]  }
0x3d94   :  { %v15142_v22 = vpop.eup %15141 }
0x3d95   :  { %v7703_v25 = vmul.f32 %v15142_v22, %v7689_v34  ;;  %v14846_v34 = vld [vmem:[%s18476_s3 + $0x320] sm:$0xff]   ;;  %v14864_v22 = vld [vmem:[%s18476_s3 + $0x358] sm:$0xff]  }
0x3d96   :  { %v15144_v42 = vpop.eup %15143 }
0x3d97   :  { %v7704_v44 = vmul.f32 %v15144_v42, %v7690_v52  ;;  %v7709_v7 = vmul.f32 %v7708_v38, %v7703_v25  ;;  %v14850_v52 = vld [vmem:[%s18476_s3 + $0x330] sm:$0xff]   ;;  %v14865_v25 = vld [vmem:[%s18476_s3 + $0x360] sm:$0xff]   ;;  %v14866_v42 = vld [vmem:[%s18476_s3 + $0x368] sm:$0xff]  }
0x3d99   :  { %v7710_v41 = vmul.f32 %v7708_v38, %v7704_v44  ;;  %v7715_v10 = vadd.f32 %v7714_v51, %v7709_v7  ;;  %v14863_v38 = vld [vmem:[%s18476_s3 + $0x350] sm:$0xff]   ;;  %v14868_v7 = vld [vmem:[%s18476_s3 + $0x378] sm:$0xff]  }
0x3d9a   :  { %v14867_v44 = vld [vmem:[%s18476_s3 + $0x370] sm:$0xff]  }
0x3d9b   :  { %v7716_v5 = vadd.f32 %v7714_v51, %v7710_v41  ;;  %v11864_v51 = vld [vmem:[%s18479_s8 + $0x30] sm:$0x7] }
0x3d9c   :  { %v7964_v41 = vrot.slane %v11864_v51, %v15368_v35 }
0x3d9d   :  { %v7717_v11 = vpack.c.bf16 %v7716_v5, %v7715_v10  ;;  %v8074_v10 = vrot.slane %v11864_v51, %v15375_v39 }
0x3d9f   :  { %13995 = vmatmul.mubr.bf16.vlgmr.msra.gmra.mrb[152].mxu0 %v7717_v11 }
0x3da0   :  { %14034 = vmatprep.mubr.msk.bf16.mxu0 %vm15209_vm0, %v15208_v2  ;;  %14019 = vmatpush3.bf16.msra.mxu0 %v14837_v56 }
0x3da1   :  { %14020 = vmatprep.subr.bf16.mxu0 %v15208_v2 }
0x3da4   :  { %14021 = vmatpush3.bf16.msra.mxu0 %v14839_v29 }
0x3da5   :  { %14022 = vmatprep.subr.bf16.mxu0 %v15208_v2 }
0x3da8   :  { %14023 = vmatpush3.bf16.msra.mxu0 %v14841_v59 }
0x3da9   :  { %14024 = vmatprep.subr.bf16.mxu0 %v15208_v2 }
0x3dac   :  { %14025 = vmatpush3.bf16.msra.mxu0 %v14843_v19 }
0x3dad   :  { %14026 = vmatprep.subr.bf16.mxu0 %v15208_v2 }
0x3db0   :  { %14027 = vmatpush3.bf16.msra.mxu0 %v14845_v47 }
0x3db1   :  { %14028 = vmatprep.subr.bf16.mxu0 %v15208_v2 }
0x3db4   :  { %14029 = vmatpush3.bf16.msra.mxu0 %v14847_v24 }
0x3db5   :  { %14030 = vmatprep.subr.bf16.mxu0 %v15208_v2 }
0x3db8   :  { %14031 = vmatpush3.bf16.msra.mxu0 %v14849_v60 }
0x3db9   :  { %14032 = vmatprep.subr.bf16.mxu0 %v15208_v2 }
0x3dbc   :  { %14033 = vmatpush3.bf16.msra.mxu0 %v14851_v43 }
0x3dbd   :  { %14058 = vmatprep.subr.bf16.mxu0 %v15208_v2 }
0x3e72   :  { %v7821_v50 = vpop.f32.mrb[152].mxu0 }
0x3e73   :  { %v13996_v23 = vpop.f32.mrb[153].mxu0  ;;  %v7822_v12 = vadd.f32 %v7821_v50, %v7738_v57 }
0x3e74   :  { %v7824_v27 = vpop.f32.mrb[154].mxu0 }
0x3e75   :  { %v7825_v31 = vadd.f32 %v7824_v27, %v7738_v57  ;;  %v13997_v13 = vpop.f32.mrb[155].mxu0  ;;  %v8184_v27 = vrot.slane %v11864_v51, %v15475_v20 }
0x3e77   :  { %v7828_v18 = vpack.c.bf16 %v7825_v31, %v7822_v12 }
0x3e79   :  { %14015 = vmatmul.mubr.bf16.vlgmr.msra.gmra.mrb[164].mxu1 %v7828_v18 }
0x3e7a   :  { %14039 = vmatpush3.bf16.msra.mxu1 %v14838_v16  ;;  %14054 = vmatprep.mubr.msk.bf16.mxu1 %vm15209_vm0, %v15208_v2 }
0x3e7b   :  { %14040 = vmatprep.subr.bf16.mxu1 %v15208_v2 }
0x3e7e   :  { %14041 = vmatpush3.bf16.msra.mxu1 %v14840_v14 }
0x3e7f   :  { %14042 = vmatprep.subr.bf16.mxu1 %v15208_v2 }
0x3e82   :  { %14043 = vmatpush3.bf16.msra.mxu1 %v14842_v63 }
0x3e83   :  { %14044 = vmatprep.subr.bf16.mxu1 %v15208_v2 }
0x3e86   :  { %14045 = vmatpush3.bf16.msra.mxu1 %v14844_v21  ;;  %v17836_v21 = vld [vmem:[%s18479_s8 + $0x34] sm:$0x7] }
0x3e87   :  { %14046 = vmatprep.subr.bf16.mxu1 %v15208_v2 }
0x3e8a   :  { %14047 = vmatpush3.bf16.msra.mxu1 %v14846_v34  ;;  %v8533_v34 = vrot.slane %v17836_v21, %v15375_v39 }
0x3e8b   :  { %14048 = vmatprep.subr.bf16.mxu1 %v15208_v2 }
0x3e8e   :  { %14049 = vmatpush3.bf16.msra.mxu1 %v14848_v48 }
0x3e8f   :  { %14050 = vmatprep.subr.bf16.mxu1 %v15208_v2 }
0x3e92   :  { %14051 = vmatpush3.bf16.msra.mxu1 %v14850_v52 }
0x3e93   :  { %14052 = vmatprep.subr.bf16.mxu1 %v15208_v2 }
0x3e96   :  { %14053 = vmatpush3.bf16.msra.mxu1 %v14852_v62 }
0x3e97   :  { %14078 = vmatprep.subr.bf16.mxu1 %v15208_v2 }
0x3f4c   :  { %v7932_v1 = vpop.f32.mrb[164].mxu1 }
0x3f4d   :  { %v14016_v46 = vpop.f32.mrb[165].mxu1  ;;  %v17737_v30 = vadd.f32 %v7932_v1, %v7849_v0 }
0x3f4e   :  { %v7935_v55 = vpop.f32.mrb[166].mxu1 }
0x3f4f   :  { %v17739_v40 = vadd.f32 %v7935_v55, %v7849_v0  ;;  %v14017_v26 = vpop.f32.mrb[167].mxu1 }
0x3f51   :  { %v17746_v9 = vpack.c.bf16 %v17739_v40, %v17737_v30 }
0x3f53   :  { %14035 = vmatmul.mubr.bf16.vlgmr.msra.gmra.mrb[156].mxu0 %v17746_v9  ;;  %14055 = vmatmul.mubr.bf16.vlgmr.msra.gmra.mrb[168].mxu1 %v17746_v9 }
0x3f54   :  { %14059 = vmatpush3.bf16.msra.mxu0 %v14853_v6  ;;  %14074 = vmatprep.mubr.msk.bf16.mxu0 %vm15209_vm0, %v15208_v2 }
0x3f55   :  { %14060 = vmatprep.subr.bf16.mxu0 %v15208_v2  ;;  %14080 = vmatprep.mubr.msk.bf16.mxu1 %vm15209_vm0, %v15208_v2 }
0x3f58   :  { %14061 = vmatpush3.bf16.msra.mxu0 %v14854_v28 }
0x3f59   :  { %14062 = vmatprep.subr.bf16.mxu0 %v15208_v2 }
0x3f5c   :  { %14063 = vmatpush3.bf16.msra.mxu0 %v14855_v32 }
0x3f5d   :  { %14064 = vmatprep.subr.bf16.mxu0 %v15208_v2 }
0x3f60   :  { %14065 = vmatpush3.bf16.msra.mxu0 %v14856_v58 }
0x3f61   :  { %14066 = vmatprep.subr.bf16.mxu0 %v15208_v2 }
0x3f64   :  { %14067 = vmatpush3.bf16.msra.mxu0 %v14857_v33 }
0x3f65   :  { %14068 = vmatprep.subr.bf16.mxu0 %v15208_v2 }
0x3f68   :  { %14069 = vmatpush3.bf16.msra.mxu0 %v14858_v17  ;;  %v17845_v17 = vld [vmem:[%s18480_s1] sm:$0xff] }
0x3f69   :  { %14070 = vmatprep.subr.bf16.mxu0 %v15208_v2 }
0x3f6c   :  { %14071 = vmatpush3.bf16.msra.mxu0 %v14859_v3 }
0x3f6d   :  { %14072 = vmatprep.subr.bf16.mxu0 %v15208_v2 }
0x3f70   :  { %14073 = vmatpush3.bf16.msra.mxu0 %v14860_v36 }
0x3f71   :  { %14110 = vmatprep.subr.bf16.mxu0 %v15208_v2 }
0x3f73   :  { %14075 = vmatmul.mubr.bf16.vlgmr.msra.gmra.mrb[160].mxu0 %v17746_v9 }
0x3f74   :  { %14111 = vmatpush3.bf16.msra.mxu0 %v14861_v54  ;;  %14126 = vmatprep.mubr.msk.bf16.mxu0 %vm15209_vm0, %v15208_v2  ;;  %v17852_v54 = vld [vmem:[%s18480_s1 + $0x8] sm:$0xff] }
0x3f75   :  { %14112 = vmatprep.subr.bf16.mxu0 %v15208_v2 }
0x3f78   :  { %14113 = vmatpush3.bf16.msra.mxu0 %v14862_v37 }
0x3f79   :  { %14114 = vmatprep.subr.bf16.mxu0 %v15208_v2 }
0x3f7c   :  { %14115 = vmatpush3.bf16.msra.mxu0 %v14863_v38 }
0x3f7d   :  { %14116 = vmatprep.subr.bf16.mxu0 %v15208_v2 }
0x3f80   :  { %14117 = vmatpush3.bf16.msra.mxu0 %v14864_v22 }
0x3f81   :  { %14118 = vmatprep.subr.bf16.mxu0 %v15208_v2 }
0x3f84   :  { %14119 = vmatpush3.bf16.msra.mxu0 %v14865_v25 }
0x3f85   :  { %14120 = vmatprep.subr.bf16.mxu0 %v15208_v2 }
0x3f88   :  { %14121 = vmatpush3.bf16.msra.mxu0 %v14866_v42 }
0x3f89   :  { %14122 = vmatprep.subr.bf16.mxu0 %v15208_v2 }
0x3f8c   :  { %14123 = vmatpush3.bf16.msra.mxu0 %v14867_v44 }
0x3f8d   :  { %14124 = vmatprep.subr.bf16.mxu0 %v15208_v2 }
0x3f90   :  { %14125 = vmatpush3.bf16.msra.mxu0 %v14868_v7 }
0x3f91   :  { %14150 = vmatprep.subr.bf16.mxu0 %v15208_v2 }
0x3f93   :  { %14127 = vmatmul.mubr.bf16.vlgmr.msra.gmra.mrb[164].mxu0 %v17746_v9 }
0x3f94   :  { %14152 = vmatprep.mubr.msk.bf16.mxu0 %vm15209_vm0, %v15208_v2 }
0x4026   :  { %v8047_v5 = vpop.f32.mrb[156].mxu0  ;;  %v8157_v11 = vpop.f32.mrb[168].mxu1 }
0x4027   :  { %v14036_v49 = vpop.f32.mrb[157].mxu0  ;;  %v14056_v53 = vpop.f32.mrb[169].mxu1  ;;  %v8048_v59 = vadd.f32 %v8047_v5, %v7964_v41  ;;  %v8158_v19 = vadd.f32 %v8157_v11, %v8074_v10 }
0x4028   :  { %v8050_v56 = vpop.f32.mrb[158].mxu0  ;;  %v8160_v29 = vpop.f32.mrb[170].mxu1 }
0x4029   :  { %v8051_v47 = vadd.f32 %v8050_v56, %v7964_v41  ;;  %v8161_v24 = vadd.f32 %v8160_v29, %v8074_v10  ;;  %v14037_v60 = vpop.f32.mrb[159].mxu0  ;;  %v14057_v45 = vpop.f32.mrb[171].mxu1 }
0x402a   :  { %v14870_v60 = vld [vmem:[%s18475_s2 + $0x348] sm:$0xff]   ;;  %v14871_v45 = vld [vmem:[%s18475_s2 + $0x350] sm:$0xff]  }
0x402b   :  { %v8274_v57 = vpack.c.bf16 %v8051_v47, %v8048_v59  ;;  %v8275_v50 = vpack.c.bf16 %v8161_v24, %v8158_v19  ;;  %v14869_v47 = vld [vmem:[%s18475_s2 + $0x340] sm:$0xff]  }
0x402d   :  { %v8280_v23 = vsel %vm417_vm1, %v8275_v50, 0  ;;  %v14873_v50 = vld [vmem:[%s18475_s2 + $0x360] sm:$0xff]  }
0x402e   :  { %14079 = vmatpush3.bf16.xpose.msra.mxu1 %v8280_v23  ;;  %v14874_v23 = vld [vmem:[%s18475_s2 + $0x368] sm:$0xff]  }
0x402f   :  { %14084 = vmatprep.subr.bf16.mxu1 %v15208_v2 }
0x4035   :  { %14081 = vmatmul.mubr.msk.bf16.vlgmr.msra.gmra.mrb[172].mxu1 %vm417_vm1, %v8274_v57  ;;  %v14872_v57 = vld [vmem:[%s18475_s2 + $0x358] sm:$0xff]  }
0x4036   :  { %14086 = vmatprep.mubr.msk.bf16.mxu1 %vm15209_vm0, %v15208_v2 }
0x4046   :  { %v8267_v12 = vpop.f32.mrb[160].mxu0 }
0x4047   :  { %v14076_v31 = vpop.f32.mrb[161].mxu0  ;;  %v8268_v16 = vadd.f32 %v8267_v12, %v8184_v27  ;;  %v14876_v12 = vld [vmem:[%s18475_s2 + $0x378] sm:$0xff]  }
0x4048   :  { %v8270_v13 = vpop.f32.mrb[162].mxu0  ;;  %v14877_v31 = vld [vmem:[%s18477_s4 + $0x340] sm:$0xff]  }
0x4049   :  { %v8271_v18 = vadd.f32 %v8270_v13, %v8184_v27  ;;  %v14077_v14 = vpop.f32.mrb[163].mxu0  ;;  %v14875_v27 = vld [vmem:[%s18475_s2 + $0x370] sm:$0xff]   ;;  %v14878_v13 = vld [vmem:[%s18477_s4 + $0x348] sm:$0xff]  }
0x404a   :  { %v14881_v14 = vld [vmem:[%s18477_s4 + $0x360] sm:$0xff]  }
0x404b   :  { %v8350_v63 = vpack.c.bf16 %v8271_v18, %v8268_v16  ;;  %v14879_v16 = vld [vmem:[%s18477_s4 + $0x350] sm:$0xff]   ;;  %v14880_v18 = vld [vmem:[%s18477_s4 + $0x358] sm:$0xff]  }
0x404d   :  { %14085 = vmatpush3.bf16.msra.mxu1 %v8350_v63  ;;  %v14882_v63 = vld [vmem:[%s18477_s4 + $0x368] sm:$0xff]  }
0x404e   :  { %14090 = vmatprep.subr.bf16.mxu1 %v15208_v2 }
0x4066   :  { %v8616_v48 = vpop.f32.mrb[164].mxu0 }
0x4067   :  { %v14128_v52 = vpop.f32.mrb[165].mxu0  ;;  %v8617_v62 = vadd.f32 %v8616_v48, %v8533_v34  ;;  %v14884_v48 = vld [vmem:[%s18477_s4 + $0x378] sm:$0xff]  }
0x4068   :  { %v8619_v43 = vpop.f32.mrb[166].mxu0  ;;  %v14885_v52 = vld [vmem:[%s18481_s5 + $0xc0] sm:$0xff]  }
0x4069   :  { %v8620_v0 = vadd.f32 %v8619_v43, %v8533_v34  ;;  %v14129_v1 = vpop.f32.mrb[167].mxu0  ;;  %v14883_v34 = vld [vmem:[%s18477_s4 + $0x370] sm:$0xff]   ;;  %v14886_v43 = vld [vmem:[%s18481_s5 + $0xc8] sm:$0xff]  }
0x406b   :  { %v8734_v46 = vpack.c.bf16 %v8620_v0, %v8617_v62 }
0x406d   :  { %v8739_v55 = vsel %vm417_vm1, %v8734_v46, 0  ;;  %v14887_v46 = vld [vmem:[%s18476_s3 + $0x380] sm:$0xff]  }
0x406e   :  { %14151 = vmatpush3.bf16.xpose.msra.mxu0 %v8739_v55 }
0x406f   :  { %14156 = vmatprep.subr.bf16.mxu0 %v15208_v2 }
0x4108   :  { %v8316_v26 = vpop.f32.mrb[172].mxu1 }
0x4109   :  { %v8323_v6 = vmul.f32 0.17677669, %v8316_v26  ;;  %v14082_v28 = vpop.f32.mrb[173].mxu1 }
0x410a   :  { %v8319_v32 = vpop.f32.mrb[174].mxu1  ;;  %v14889_v28 = vld [vmem:[%s18476_s3 + $0x390] sm:$0xff]  }
0x410b   :  { %v8324_v58 = vmul.f32 0.17677669, %v8319_v32  ;;  %v14083_v33 = vpop.f32.mrb[175].mxu1  ;;  %v8325_v3 = vadd.f32 %v17845_v17, %v8323_v6  ;;  %v14888_v6 = vld [vmem:[%s18476_s3 + $0x388] sm:$0xff]   ;;  %v14890_v32 = vld [vmem:[%s18476_s3 + $0x398] sm:$0xff]  }
0x410c   :  { %v14892_v33 = vld [vmem:[%s18476_s3 + $0x3a8] sm:$0xff]  }
0x410d   :  { %v8327_v36 = vsel %vm469_vm2, %v8325_v3, -inf  ;;  %v8326_v37 = vadd.f32 %v17852_v54, %v8324_v58  ;;  %v14891_v58 = vld [vmem:[%s18476_s3 + $0x3a0] sm:$0xff]  }
0x410e   :  { %8328 = vmax.xlane.f32.xlu0 %v8327_v36  ;;  %v14894_v36 = vld [vmem:[%s18476_s3 + $0x3b8] sm:$0xff]  }
0x410f   :  { %v8330_v38 = vsel %vm469_vm2, %v8326_v37, -inf }
0x4110   :  { %8331 = vmax.xlane.f32.xlu1 %v8330_v38 }
0x419b   :  { %v8329_v22 = vpop.xlane.xlu0 %8328 }
0x419c   :  { %v8333_v25 = vsub.f32 %v8325_v3, %v8329_v22  ;;  %v14893_v3 = vld [vmem:[%s18476_s3 + $0x3b0] sm:$0xff]  }
0x419d   :  { %v8332_v42 = vpop.xlane.xlu1 %8331 }
0x419e   :  { %v8335_v44 = vmul.f32 1.442695, %v8333_v25  ;;  %v8334_v7 = vsub.f32 %v8326_v37, %v8332_v42  ;;  %v8423_v37 = vrot.slane %v17836_v21, %v15368_v35 }
0x41a0   :  { %15145 = vpow2.f32 %v8335_v44  ;;  %v8337_v51 = vmul.f32 1.442695, %v8334_v7 }
0x41a2   :  { %15147 = vpow2.f32 %v8337_v51 }
0x41aa   :  { %v15146_v41 = vpop.eup %15145 }
0x41ab   :  { %v8339_v10 = vsel %vm469_vm2, %v15146_v41, 0.0 }
0x41ac   :  { %v15148_v5 = vpop.eup %15147  ;;  %8340 = vadd.xlane.f32.xlu0 %v8339_v10 }
0x41ad   :  { %v8342_v11 = vsel %vm469_vm2, %v15148_v5, 0.0 }
0x41ae   :  { %8343 = vadd.xlane.f32.xlu1 %v8342_v11 }
0x4239   :  { %v8341_v49 = vpop.xlane.xlu0 %8340 }
0x423a   :  { %15149 = vrcp.f32 %v8341_v49 }
0x423b   :  { %v8344_v53 = vpop.xlane.xlu1 %8343 }
0x423c   :  { %15151 = vrcp.f32 %v8344_v53 }
0x4244   :  { %v15150_v56 = vpop.eup %15149 }
0x4245   :  { %v8347_v59 = vmul.f32 %v15150_v56, %v15146_v41  ;;  %v8643_v41 = vrot.slane %v17836_v21, %v15475_v20  ;;  %v17992_v21 = vld [vmem:[%s18479_s8 + $0x38] sm:$0x7] }
0x4246   :  { %v15152_v29 = vpop.eup %15151 }
0x4247   :  { %v8348_v19 = vmul.f32 %v15152_v29, %v15148_v5 }
0x4249   :  { %v8349_v24 = vpack.c.bf16 %v8348_v19, %v8347_v59 }
0x424b   :  { %14087 = vmatmul.mubr.msk.bf16.vlgmr.msra.gmra.mrb[176].mxu1 %vm469_vm2, %v8349_v24 }
0x424c   :  { %14091 = vmatpush3.bf16.msra.mxu1 %v14869_v47  ;;  %14106 = vmatprep.mubr.msk.bf16.mxu1 %vm15209_vm0, %v15208_v2 }
0x424d   :  { %14092 = vmatprep.subr.bf16.mxu1 %v15208_v2 }
0x4250   :  { %14093 = vmatpush3.bf16.msra.mxu1 %v14870_v60  ;;  %v9104_v60 = vrot.slane %v17992_v21, %v15375_v39 }
0x4251   :  { %14094 = vmatprep.subr.bf16.mxu1 %v15208_v2 }
0x4254   :  { %14095 = vmatpush3.bf16.msra.mxu1 %v14871_v45 }
0x4255   :  { %14096 = vmatprep.subr.bf16.mxu1 %v15208_v2 }
0x4258   :  { %14097 = vmatpush3.bf16.msra.mxu1 %v14872_v57 }
0x4259   :  { %14098 = vmatprep.subr.bf16.mxu1 %v15208_v2 }
0x425c   :  { %14099 = vmatpush3.bf16.msra.mxu1 %v14873_v50 }
0x425d   :  { %14100 = vmatprep.subr.bf16.mxu1 %v15208_v2 }
0x4260   :  { %14101 = vmatpush3.bf16.msra.mxu1 %v14874_v23 }
0x4261   :  { %14102 = vmatprep.subr.bf16.mxu1 %v15208_v2 }
0x4264   :  { %14103 = vmatpush3.bf16.msra.mxu1 %v14875_v27 }
0x4265   :  { %14104 = vmatprep.subr.bf16.mxu1 %v15208_v2 }
0x4268   :  { %14105 = vmatpush3.bf16.msra.mxu1 %v14876_v12 }
0x4269   :  { %14130 = vmatprep.subr.bf16.mxu1 %v15208_v2 }
0x426b   :  { %14107 = vmatmul.mubr.bf16.vlgmr.msra.gmra.mrb[180].mxu1 %v17746_v9 }
0x426c   :  { %14131 = vmatpush3.bf16.msra.mxu1 %v14877_v31  ;;  %14146 = vmatprep.mubr.msk.bf16.mxu1 %vm15209_vm0, %v15208_v2 }
0x426d   :  { %14132 = vmatprep.subr.bf16.mxu1 %v15208_v2 }
0x4270   :  { %14133 = vmatpush3.bf16.msra.mxu1 %v14878_v13 }
0x4271   :  { %14134 = vmatprep.subr.bf16.mxu1 %v15208_v2 }
0x4274   :  { %14135 = vmatpush3.bf16.msra.mxu1 %v14879_v16 }
0x4275   :  { %14136 = vmatprep.subr.bf16.mxu1 %v15208_v2 }
0x4278   :  { %14137 = vmatpush3.bf16.msra.mxu1 %v14880_v18 }
0x4279   :  { %14138 = vmatprep.subr.bf16.mxu1 %v15208_v2 }
0x427c   :  { %14139 = vmatpush3.bf16.msra.mxu1 %v14881_v14 }
0x427d   :  { %14140 = vmatprep.subr.bf16.mxu1 %v15208_v2 }
0x4280   :  { %14141 = vmatpush3.bf16.msra.mxu1 %v14882_v63 }
0x4281   :  { %14142 = vmatprep.subr.bf16.mxu1 %v15208_v2 }
0x4284   :  { %14143 = vmatpush3.bf16.msra.mxu1 %v14883_v34 }
0x4285   :  { %14144 = vmatprep.subr.bf16.mxu1 %v15208_v2 }
0x4288   :  { %14145 = vmatpush3.bf16.msra.mxu1 %v14884_v48 }
0x4289   :  { %14170 = vmatprep.subr.bf16.mxu1 %v15208_v2 }
0x428b   :  { %14147 = vmatmul.mubr.bf16.vlgmr.msra.gmra.mrb[184].mxu1 %v17746_v9 }
0x428c   :  { %14171 = vmatpush3.bf16.msra.mxu1 %v14885_v52  ;;  %14174 = vmatprep.mubr.msk.bf16.mxu1 %vm15209_vm0, %v15208_v2 }
0x428d   :  { %14172 = vmatprep.subr.bf16.mxu1 %v15208_v2 }
0x4290   :  { %14173 = vmatpush3.bf16.msra.mxu1 %v14886_v43 }
0x4291   :  { %14198 = vmatprep.subr.bf16.mxu1 %v15208_v2 }
0x431e   :  { %v8388_v62 = vpop.f32.mrb[176].mxu1 }
0x431f   :  { %v14088_v0 = vpop.f32.mrb[177].mxu1 }
0x4320   :  { %v8391_v1 = vpop.f32.mrb[178].mxu1 }
0x4321   :  { %v8395_v55 = vpack.c.bf16 %v8391_v1, %v8388_v62  ;;  %v14089_v26 = vpop.f32.mrb[179].mxu1 }
0x4323   :  { %14175 = vmatmul.mubr.msk.bf16.vlgmr.msra.gmra.mrb[188].mxu1 %vm417_vm1, %v8395_v55 }
0x4324   :  { %14199 = vmatpush3.bf16.msra.mxu1 %v14887_v46  ;;  %14214 = vmatprep.mubr.msk.bf16.mxu1 %vm15209_vm0, %v15208_v2 }
0x4325   :  { %14200 = vmatprep.subr.bf16.mxu1 %v15208_v2 }
0x4328   :  { %14201 = vmatpush3.bf16.msra.mxu1 %v14888_v6 }
0x4329   :  { %14202 = vmatprep.subr.bf16.mxu1 %v15208_v2 }
0x432c   :  { %14203 = vmatpush3.bf16.msra.mxu1 %v14889_v28 }
0x432d   :  { %14204 = vmatprep.subr.bf16.mxu1 %v15208_v2 }
0x4330   :  { %14205 = vmatpush3.bf16.msra.mxu1 %v14890_v32 }
0x4331   :  { %14206 = vmatprep.subr.bf16.mxu1 %v15208_v2 }
0x4334   :  { %14207 = vmatpush3.bf16.msra.mxu1 %v14891_v58 }
0x4335   :  { %14208 = vmatprep.subr.bf16.mxu1 %v15208_v2 }
0x4338   :  { %14209 = vmatpush3.bf16.msra.mxu1 %v14892_v33 }
0x4339   :  { %14210 = vmatprep.subr.bf16.mxu1 %v15208_v2 }
0x433c   :  { %14211 = vmatpush3.bf16.msra.mxu1 %v14893_v3 }
0x433d   :  { %14212 = vmatprep.subr.bf16.mxu1 %v15208_v2 }
0x433e   :  { %v8506_v38 = vpop.f32.mrb[180].mxu1 }
0x433f   :  { %v14108_v22 = vpop.f32.mrb[181].mxu1  ;;  %v8507_v42 = vadd.f32 %v8506_v38, %v8423_v37 }
0x4340   :  { %v8509_v25 = vpop.f32.mrb[182].mxu1  ;;  %14213 = vmatpush3.bf16.msra.mxu1 %v14894_v36 }
0x4341   :  { %v8510_v44 = vadd.f32 %v8509_v25, %v8423_v37  ;;  %v14109_v7 = vpop.f32.mrb[183].mxu1  ;;  %14238 = vmatprep.subr.bf16.mxu1 %v15208_v2 }
0x4343   :  { %v8733_v51 = vpack.c.bf16 %v8510_v44, %v8507_v42  ;;  %14215 = vmatmul.mubr.bf16.vlgmr.msra.gmra.mrb[192].mxu1 %v17746_v9  ;;  %v14895_v44 = vld [vmem:[%s18481_s5 + $0xd0] sm:$0xff]  }
0x4344   :  { %14240 = vmatprep.mubr.msk.bf16.mxu1 %vm15209_vm0, %v15208_v2 }
0x4345   :  { %14153 = vmatmul.mubr.msk.bf16.vlgmr.msra.gmra.mrb[168].mxu0 %vm417_vm1, %v8733_v51  ;;  %v14896_v51 = vld [vmem:[%s18481_s5 + $0xd8] sm:$0xff]  }
0x4346   :  { %14158 = vmatprep.mubr.msk.bf16.mxu0 %vm15209_vm0, %v15208_v2 }
0x435e   :  { %v8726_v10 = vpop.f32.mrb[184].mxu1 }
0x435f   :  { %v14148_v5 = vpop.f32.mrb[185].mxu1  ;;  %v8727_v49 = vadd.f32 %v8726_v10, %v8643_v41 }
0x4360   :  { %v8729_v11 = vpop.f32.mrb[186].mxu1 }
0x4361   :  { %v8730_v53 = vadd.f32 %v8729_v11, %v8643_v41  ;;  %v14149_v56 = vpop.f32.mrb[187].mxu1  ;;  %v14897_v11 = vld [vmem:[%s18475_s2 + $0x380] sm:$0xff]  }
0x4362   :  { %v14898_v56 = vld [vmem:[%s18475_s2 + $0x388] sm:$0xff]  }
0x4363   :  { %v8809_v29 = vpack.c.bf16 %v8730_v53, %v8727_v49 }
0x4365   :  { %14157 = vmatpush3.bf16.msra.mxu0 %v8809_v29  ;;  %v14899_v29 = vld [vmem:[%s18475_s2 + $0x390] sm:$0xff]  }
0x4366   :  { %14162 = vmatprep.subr.bf16.mxu0 %v15208_v2 }
0x43f6   :  { %v17985_v59 = vpop.f32.mrb[188].mxu1 }
0x43f7   :  { %v14176_v19 = vpop.f32.mrb[189].mxu1 }
0x43f8   :  { %v17987_v47 = vpop.f32.mrb[190].mxu1  ;;  %v14900_v19 = vld [vmem:[%s18475_s2 + $0x398] sm:$0xff]  }
0x43f9   :  { %v14177_v24 = vpop.f32.mrb[191].mxu1 }
0x43fa   :  { %v14901_v24 = vld [vmem:[%s18475_s2 + $0x3a0] sm:$0xff]  }
0x4416   :  { %v9187_v45 = vpop.f32.mrb[192].mxu1 }
0x4417   :  { %v14216_v57 = vpop.f32.mrb[193].mxu1  ;;  %v9188_v27 = vadd.f32 %v9187_v45, %v9104_v60  ;;  %v14903_v45 = vld [vmem:[%s18475_s2 + $0x3b0] sm:$0xff]  }
0x4418   :  { %v8775_v50 = vpop.f32.mrb[168].mxu0  ;;  %v9190_v23 = vpop.f32.mrb[194].mxu1  ;;  %v14904_v57 = vld [vmem:[%s18475_s2 + $0x3b8] sm:$0xff]  }
0x4419   :  { %v8782_v12 = vmul.f32 0.17677669, %v8775_v50  ;;  %v9191_v31 = vadd.f32 %v9190_v23, %v9104_v60  ;;  %v14154_v13 = vpop.f32.mrb[169].mxu0  ;;  %v14217_v16 = vpop.f32.mrb[195].mxu1  ;;  %v14902_v60 = vld [vmem:[%s18475_s2 + $0x3a8] sm:$0xff]   ;;  %v14905_v50 = vld [vmem:[%s18477_s4 + $0x380] sm:$0xff]  }
0x441a   :  { %v8778_v18 = vpop.f32.mrb[170].mxu0  ;;  %v14906_v23 = vld [vmem:[%s18477_s4 + $0x388] sm:$0xff]   ;;  %v14911_v16 = vld [vmem:[%s18477_s4 + $0x3b0] sm:$0xff]  }
0x441b   :  { %v9305_v14 = vpack.c.bf16 %v9191_v31, %v9188_v27  ;;  %v8783_v63 = vmul.f32 0.17677669, %v8778_v18  ;;  %v14155_v34 = vpop.f32.mrb[171].mxu0  ;;  %v8784_v48 = vadd.f32 %v17845_v17, %v8782_v12  ;;  %v14907_v27 = vld [vmem:[%s18477_s4 + $0x390] sm:$0xff]   ;;  %v14908_v12 = vld [vmem:[%s18477_s4 + $0x398] sm:$0xff]   ;;  %v14909_v31 = vld [vmem:[%s18477_s4 + $0x3a0] sm:$0xff]  }
0x441c   :  { %v14910_v13 = vld [vmem:[%s18477_s4 + $0x3a8] sm:$0xff]   ;;  %v14912_v18 = vld [vmem:[%s18477_s4 + $0x3b8] sm:$0xff]   ;;  %v14915_v34 = vld [vmem:[%s18476_s3 + $0x3d0] sm:$0xff]  }
0x441d   :  { %v9310_v52 = vsel %vm417_vm1, %v9305_v14, 0  ;;  %v8786_v43 = vsel %vm469_vm2, %v8784_v48, -inf  ;;  %v8785_v62 = vadd.f32 %v17852_v54, %v8783_v63  ;;  %v14913_v14 = vld [vmem:[%s18476_s3 + $0x3c0] sm:$0xff]   ;;  %v14914_v63 = vld [vmem:[%s18476_s3 + $0x3c8] sm:$0xff]  }
0x441e   :  { %14239 = vmatpush3.bf16.xpose.msra.mxu1 %v9310_v52  ;;  %8787 = vmax.xlane.f32.xlu0 %v8786_v43  ;;  %v14917_v52 = vld [vmem:[%s18476_s3 + $0x3e0] sm:$0xff]   ;;  %v14918_v43 = vld [vmem:[%s18476_s3 + $0x3e8] sm:$0xff]  }
0x441f   :  { %v8789_v0 = vsel %vm469_vm2, %v8785_v62, -inf  ;;  %14244 = vmatprep.subr.bf16.mxu1 %v15208_v2 }
0x4420   :  { %8790 = vmax.xlane.f32.xlu1 %v8789_v0  ;;  %v14920_v0 = vld [vmem:[%s18476_s3 + $0x3f8] sm:$0xff]  }
0x44ab   :  { %v8788_v1 = vpop.xlane.xlu0 %8787 }
0x44ac   :  { %v8792_v46 = vsub.f32 %v8784_v48, %v8788_v1  ;;  %v14916_v48 = vld [vmem:[%s18476_s3 + $0x3d8] sm:$0xff]  }
0x44ad   :  { %v8791_v55 = vpop.xlane.xlu1 %8790 }
0x44ae   :  { %v8794_v26 = vmul.f32 1.442695, %v8792_v46  ;;  %v8793_v6 = vsub.f32 %v8785_v62, %v8791_v55  ;;  %v14919_v62 = vld [vmem:[%s18476_s3 + $0x3f0] sm:$0xff]  }
0x44b0   :  { %15153 = vpow2.f32 %v8794_v26  ;;  %v8796_v28 = vmul.f32 1.442695, %v8793_v6 }
0x44b2   :  { %15155 = vpow2.f32 %v8796_v28 }
0x44ba   :  { %v15154_v32 = vpop.eup %15153 }
0x44bb   :  { %v8798_v58 = vsel %vm469_vm2, %v15154_v32, 0.0 }
0x44bc   :  { %v15156_v33 = vpop.eup %15155  ;;  %8799 = vadd.xlane.f32.xlu0 %v8798_v58 }
0x44bd   :  { %v8801_v3 = vsel %vm469_vm2, %v15156_v33, 0.0 }
0x44be   :  { %8802 = vadd.xlane.f32.xlu1 %v8801_v3 }
0x4549   :  { %v8800_v36 = vpop.xlane.xlu0 %8799 }
0x454a   :  { %15157 = vrcp.f32 %v8800_v36 }
0x454b   :  { %v8803_v37 = vpop.xlane.xlu1 %8802 }
0x454c   :  { %15159 = vrcp.f32 %v8803_v37 }
0x4554   :  { %v15158_v38 = vpop.eup %15157 }
0x4555   :  { %v8806_v25 = vmul.f32 %v15158_v38, %v15154_v32  ;;  %v8994_v32 = vrot.slane %v17992_v21, %v15368_v35 }
0x4556   :  { %v15160_v22 = vpop.eup %15159 }
0x4557   :  { %v8807_v42 = vmul.f32 %v15160_v22, %v15156_v33 }
0x4559   :  { %v8808_v7 = vpack.c.bf16 %v8807_v42, %v8806_v25 }
0x455b   :  { %14159 = vmatmul.mubr.msk.bf16.vlgmr.msra.gmra.mrb[172].mxu0 %vm469_vm2, %v8808_v7 }
0x455c   :  { %14163 = vmatpush3.bf16.msra.mxu0 %v14895_v44  ;;  %14166 = vmatprep.mubr.msk.bf16.mxu0 %vm15209_vm0, %v15208_v2 }
0x455d   :  { %14164 = vmatprep.subr.bf16.mxu0 %v15208_v2 }
0x4560   :  { %14165 = vmatpush3.bf16.msra.mxu0 %v14896_v51 }
0x4561   :  { %14178 = vmatprep.subr.bf16.mxu0 %v15208_v2 }
0x462e   :  { %v8847_v41 = vpop.f32.mrb[172].mxu0 }
0x462f   :  { %v14160_v10 = vpop.f32.mrb[173].mxu0 }
0x4630   :  { %v8850_v5 = vpop.f32.mrb[174].mxu0  ;;  %v18140_v10 = vld [vmem:[%s18479_s8 + $0x3c] sm:$0x7] }
0x4631   :  { %v8854_v49 = vpack.c.bf16 %v8850_v5, %v8847_v41  ;;  %v14161_v53 = vpop.f32.mrb[175].mxu0  ;;  %v9621_v5 = vrot.slane %v18140_v10, %v15375_v39 }
0x4633   :  { %14167 = vmatmul.mubr.msk.bf16.vlgmr.msra.gmra.mrb[176].mxu0 %vm417_vm1, %v8854_v49 }
0x4634   :  { %14179 = vmatpush3.bf16.msra.mxu0 %v14897_v11  ;;  %14194 = vmatprep.mubr.msk.bf16.mxu0 %vm15209_vm0, %v15208_v2 }
0x4635   :  { %14180 = vmatprep.subr.bf16.mxu0 %v15208_v2 }
0x4638   :  { %14181 = vmatpush3.bf16.msra.mxu0 %v14898_v56 }
0x4639   :  { %14182 = vmatprep.subr.bf16.mxu0 %v15208_v2 }
0x463c   :  { %14183 = vmatpush3.bf16.msra.mxu0 %v14899_v29 }
0x463d   :  { %14184 = vmatprep.subr.bf16.mxu0 %v15208_v2 }
0x4640   :  { %14185 = vmatpush3.bf16.msra.mxu0 %v14900_v19 }
0x4641   :  { %14186 = vmatprep.subr.bf16.mxu0 %v15208_v2 }
0x4644   :  { %14187 = vmatpush3.bf16.msra.mxu0 %v14901_v24 }
0x4645   :  { %14188 = vmatprep.subr.bf16.mxu0 %v15208_v2 }
0x4648   :  { %14189 = vmatpush3.bf16.msra.mxu0 %v14902_v60 }
0x4649   :  { %14190 = vmatprep.subr.bf16.mxu0 %v15208_v2 }
0x464c   :  { %14191 = vmatpush3.bf16.msra.mxu0 %v14903_v45 }
0x464d   :  { %14192 = vmatprep.subr.bf16.mxu0 %v15208_v2 }
0x4650   :  { %14193 = vmatpush3.bf16.msra.mxu0 %v14904_v57 }
0x4651   :  { %14218 = vmatprep.subr.bf16.mxu0 %v15208_v2 }
0x4653   :  { %14195 = vmatmul.mubr.bf16.vlgmr.msra.gmra.mrb[180].mxu0 %v17746_v9 }
0x4654   :  { %14219 = vmatpush3.bf16.msra.mxu0 %v14905_v50  ;;  %14234 = vmatprep.mubr.msk.bf16.mxu0 %vm15209_vm0, %v15208_v2 }
0x4655   :  { %14220 = vmatprep.subr.bf16.mxu0 %v15208_v2 }
0x4658   :  { %14221 = vmatpush3.bf16.msra.mxu0 %v14906_v23 }
0x4659   :  { %14222 = vmatprep.subr.bf16.mxu0 %v15208_v2 }
0x465c   :  { %14223 = vmatpush3.bf16.msra.mxu0 %v14907_v27 }
0x465d   :  { %14224 = vmatprep.subr.bf16.mxu0 %v15208_v2 }
0x4660   :  { %14225 = vmatpush3.bf16.msra.mxu0 %v14908_v12 }
0x4661   :  { %14226 = vmatprep.subr.bf16.mxu0 %v15208_v2 }
0x4664   :  { %14227 = vmatpush3.bf16.msra.mxu0 %v14909_v31 }
0x4665   :  { %14228 = vmatprep.subr.bf16.mxu0 %v15208_v2 }
0x4668   :  { %14229 = vmatpush3.bf16.msra.mxu0 %v14910_v13 }
0x4669   :  { %14230 = vmatprep.subr.bf16.mxu0 %v15208_v2 }
0x466c   :  { %14231 = vmatpush3.bf16.msra.mxu0 %v14911_v16 }
0x466d   :  { %14232 = vmatprep.subr.bf16.mxu0 %v15208_v2 }
0x4670   :  { %14233 = vmatpush3.bf16.msra.mxu0 %v14912_v18 }
0x4671   :  { %14278 = vmatprep.subr.bf16.mxu0 %v15208_v2 }
0x4673   :  { %14235 = vmatmul.mubr.bf16.vlgmr.msra.gmra.mrb[184].mxu0 %v17746_v9 }
0x4674   :  { %14279 = vmatpush3.bf16.msra.mxu0 %v14913_v14  ;;  %14294 = vmatprep.mubr.msk.bf16.mxu0 %vm15209_vm0, %v15208_v2 }
0x4675   :  { %14280 = vmatprep.subr.bf16.mxu0 %v15208_v2 }
0x4678   :  { %14281 = vmatpush3.bf16.msra.mxu0 %v14914_v63 }
0x4679   :  { %14282 = vmatprep.subr.bf16.mxu0 %v15208_v2 }
0x467c   :  { %14283 = vmatpush3.bf16.msra.mxu0 %v14915_v34 }
0x467d   :  { %14284 = vmatprep.subr.bf16.mxu0 %v15208_v2 }
0x4680   :  { %14285 = vmatpush3.bf16.msra.mxu0 %v14916_v48 }
0x4681   :  { %14286 = vmatprep.subr.bf16.mxu0 %v15208_v2 }
0x4684   :  { %14287 = vmatpush3.bf16.msra.mxu0 %v14917_v52 }
0x4685   :  { %14288 = vmatprep.subr.bf16.mxu0 %v15208_v2 }
0x4688   :  { %14289 = vmatpush3.bf16.msra.mxu0 %v14918_v43 }
0x4689   :  { %14290 = vmatprep.subr.bf16.mxu0 %v15208_v2 }
0x468c   :  { %14291 = vmatpush3.bf16.msra.mxu0 %v14919_v62 }
0x468d   :  { %14292 = vmatprep.subr.bf16.mxu0 %v15208_v2 }
0x4690   :  { %14293 = vmatpush3.bf16.msra.mxu0 %v14920_v0 }
0x4691   :  { %14318 = vmatprep.subr.bf16.mxu0 %v15208_v2 }
0x4693   :  { %14295 = vmatmul.mubr.bf16.vlgmr.msra.gmra.mrb[188].mxu0 %v17746_v9 }
0x4694   :  { %14320 = vmatprep.mubr.msk.bf16.mxu0 %vm15209_vm0, %v15208_v2 }
0x4706   :  { %v8909_v1 = vpop.f32.mrb[176].mxu0 }
0x4707   :  { %v18124_v46 = vadd.f32 %v17985_v59, %v8909_v1  ;;  %v14168_v55 = vpop.f32.mrb[177].mxu0  ;;  %v9214_v59 = vrot.slane %v17992_v21, %v15475_v20 }
0x4708   :  { %v8912_v26 = vpop.f32.mrb[178].mxu0 }
0x4709   :  { %v18127_v6 = vadd.f32 %v17987_v47, %v8912_v26  ;;  %v14169_v28 = vpop.f32.mrb[179].mxu0 }
0x4726   :  { %v9077_v58 = vpop.f32.mrb[180].mxu0 }
0x4727   :  { %v14196_v33 = vpop.f32.mrb[181].mxu0  ;;  %v9078_v36 = vadd.f32 %v9077_v58, %v8994_v32 }
0x4728   :  { %v9080_v3 = vpop.f32.mrb[182].mxu0 }
0x4729   :  { %v9081_v37 = vadd.f32 %v9080_v3, %v8994_v32  ;;  %v14197_v38 = vpop.f32.mrb[183].mxu0  ;;  %v14921_v3 = vld [vmem:[%s18481_s5 + $0xe0] sm:$0xff]  }
0x472b   :  { %v9304_v22 = vpack.c.bf16 %v9081_v37, %v9078_v36  ;;  %v14922_v37 = vld [vmem:[%s18481_s5 + $0xe8] sm:$0xff]  }
0x472d   :  { %14241 = vmatmul.mubr.msk.bf16.vlgmr.msra.gmra.mrb[196].mxu1 %vm417_vm1, %v9304_v22 }
0x472e   :  { %14246 = vmatprep.mubr.msk.bf16.mxu1 %vm15209_vm0, %v15208_v2 }
0x4746   :  { %v9297_v47 = vpop.f32.mrb[184].mxu0 }
0x4747   :  { %v14236_v25 = vpop.f32.mrb[185].mxu0  ;;  %v9298_v44 = vadd.f32 %v9297_v47, %v9214_v59  ;;  %v14923_v47 = vld [vmem:[%s18475_s2 + $0x3c0] sm:$0xff]  }
0x4748   :  { %v9300_v42 = vpop.f32.mrb[186].mxu0 }
0x4749   :  { %v9301_v7 = vadd.f32 %v9300_v42, %v9214_v59  ;;  %v14237_v51 = vpop.f32.mrb[187].mxu0 }
0x474a   :  { %v14926_v51 = vld [vmem:[%s18475_s2 + $0x3d8] sm:$0xff]  }
0x474b   :  { %v9380_v41 = vpack.c.bf16 %v9301_v7, %v9298_v44  ;;  %v14924_v44 = vld [vmem:[%s18475_s2 + $0x3c8] sm:$0xff]   ;;  %v14925_v7 = vld [vmem:[%s18475_s2 + $0x3d0] sm:$0xff]  }
0x474d   :  { %14245 = vmatpush3.bf16.msra.mxu1 %v9380_v41  ;;  %v14927_v41 = vld [vmem:[%s18475_s2 + $0x3e0] sm:$0xff]  }
0x474e   :  { %14250 = vmatprep.subr.bf16.mxu1 %v15208_v2 }
0x4766   :  { %v9704_v11 = vpop.f32.mrb[188].mxu0 }
0x4767   :  { %v14296_v21 = vpop.f32.mrb[189].mxu0  ;;  %v9705_v53 = vadd.f32 %v9704_v11, %v9621_v5  ;;  %v14929_v11 = vld [vmem:[%s18475_s2 + $0x3f0] sm:$0xff]  }
0x4768   :  { %v9707_v49 = vpop.f32.mrb[190].mxu0  ;;  %v14930_v21 = vld [vmem:[%s18475_s2 + $0x3f8] sm:$0xff]  }
0x4769   :  { %v9708_v56 = vadd.f32 %v9707_v49, %v9621_v5  ;;  %v14297_v29 = vpop.f32.mrb[191].mxu0  ;;  %v14928_v5 = vld [vmem:[%s18475_s2 + $0x3e8] sm:$0xff]   ;;  %v14931_v49 = vld [vmem:[%s18477_s4 + $0x3c0] sm:$0xff]  }
0x476a   :  { %v14934_v29 = vld [vmem:[%s18477_s4 + $0x3d8] sm:$0xff]  }
0x476b   :  { %v9822_v19 = vpack.c.bf16 %v9708_v56, %v9705_v53  ;;  %v14932_v53 = vld [vmem:[%s18477_s4 + $0x3c8] sm:$0xff]   ;;  %v14933_v56 = vld [vmem:[%s18477_s4 + $0x3d0] sm:$0xff]  }
0x476d   :  { %v9827_v24 = vsel %vm417_vm1, %v9822_v19, 0  ;;  %v14935_v19 = vld [vmem:[%s18477_s4 + $0x3e0] sm:$0xff]  }
0x476e   :  { %14319 = vmatpush3.bf16.xpose.msra.mxu0 %v9827_v24  ;;  %v14936_v24 = vld [vmem:[%s18477_s4 + $0x3e8] sm:$0xff]  }
0x476f   :  { %14324 = vmatprep.subr.bf16.mxu0 %v15208_v2 }
0x4800   :  { %v9346_v60 = vpop.f32.mrb[196].mxu1 }
0x4801   :  { %v9353_v45 = vmul.f32 0.17677669, %v9346_v60  ;;  %v14242_v57 = vpop.f32.mrb[197].mxu1  ;;  %v14937_v60 = vld [vmem:[%s18477_s4 + $0x3f0] sm:$0xff]  }
0x4802   :  { %v9349_v50 = vpop.f32.mrb[198].mxu1 }
0x4803   :  { %v9354_v23 = vmul.f32 0.17677669, %v9349_v50  ;;  %v14243_v27 = vpop.f32.mrb[199].mxu1  ;;  %v9355_v12 = vadd.f32 %v17845_v17, %v9353_v45  ;;  %v14938_v45 = vld [vmem:[%s18477_s4 + $0x3f8] sm:$0xff]  }
0x4805   :  { %v9357_v31 = vsel %vm469_vm2, %v9355_v12, -inf  ;;  %v9356_v13 = vadd.f32 %v17852_v54, %v9354_v23 }
0x4806   :  { %9358 = vmax.xlane.f32.xlu0 %v9357_v31 }
0x4807   :  { %v9360_v16 = vsel %vm469_vm2, %v9356_v13, -inf }
0x4808   :  { %9361 = vmax.xlane.f32.xlu1 %v9360_v16 }
0x4893   :  { %v9359_v18 = vpop.xlane.xlu0 %9358 }
0x4894   :  { %v9363_v14 = vsub.f32 %v9355_v12, %v9359_v18 }
0x4895   :  { %v9362_v63 = vpop.xlane.xlu1 %9361 }
0x4896   :  { %v9365_v34 = vmul.f32 1.442695, %v9363_v14  ;;  %v9364_v48 = vsub.f32 %v9356_v13, %v9362_v63  ;;  %v9511_v13 = vrot.slane %v18140_v10, %v15368_v35 }
0x4898   :  { %15161 = vpow2.f32 %v9365_v34  ;;  %v9367_v52 = vmul.f32 1.442695, %v9364_v48 }
0x489a   :  { %15163 = vpow2.f32 %v9367_v52 }
0x48a2   :  { %v15162_v43 = vpop.eup %15161 }
0x48a3   :  { %v9369_v62 = vsel %vm469_vm2, %v15162_v43, 0.0 }
0x48a4   :  { %v15164_v0 = vpop.eup %15163  ;;  %9370 = vadd.xlane.f32.xlu0 %v9369_v62 }
0x48a5   :  { %v9372_v1 = vsel %vm469_vm2, %v15164_v0, 0.0 }
0x48a6   :  { %9373 = vadd.xlane.f32.xlu1 %v9372_v1 }
0x4931   :  { %v9371_v55 = vpop.xlane.xlu0 %9370 }
0x4932   :  { %15165 = vrcp.f32 %v9371_v55 }
0x4933   :  { %v9374_v26 = vpop.xlane.xlu1 %9373 }
0x4934   :  { %15167 = vrcp.f32 %v9374_v26 }
0x493c   :  { %v15166_v28 = vpop.eup %15165 }
0x493d   :  { %v9377_v58 = vmul.f32 %v15166_v28, %v15162_v43 }
0x493e   :  { %v15168_v32 = vpop.eup %15167 }
0x493f   :  { %v9378_v33 = vmul.f32 %v15168_v32, %v15164_v0 }
0x4941   :  { %v9379_v36 = vpack.c.bf16 %v9378_v33, %v9377_v58 }
0x4943   :  { %14247 = vmatmul.mubr.msk.bf16.vlgmr.msra.gmra.mrb[200].mxu1 %vm469_vm2, %v9379_v36 }
0x4944   :  { %14251 = vmatpush3.bf16.msra.mxu1 %v14921_v3  ;;  %14254 = vmatprep.mubr.msk.bf16.mxu1 %vm15209_vm0, %v15208_v2 }
0x4945   :  { %14252 = vmatprep.subr.bf16.mxu1 %v15208_v2 }
0x4948   :  { %14253 = vmatpush3.bf16.msra.mxu1 %v14922_v37 }
0x4949   :  { %14258 = vmatprep.subr.bf16.mxu1 %v15208_v2 }
0x4a16   :  { %v9418_v38 = vpop.f32.mrb[200].mxu1 }
0x4a17   :  { %v14248_v22 = vpop.f32.mrb[201].mxu1 }
0x4a18   :  { %v9421_v59 = vpop.f32.mrb[202].mxu1 }
0x4a19   :  { %v9425_v25 = vpack.c.bf16 %v9421_v59, %v9418_v38  ;;  %v14249_v42 = vpop.f32.mrb[203].mxu1 }
0x4a1b   :  { %14255 = vmatmul.mubr.msk.bf16.vlgmr.msra.gmra.mrb[204].mxu1 %vm417_vm1, %v9425_v25 }
0x4a1c   :  { %14259 = vmatpush3.bf16.msra.mxu1 %v14923_v47  ;;  %14274 = vmatprep.mubr.msk.bf16.mxu1 %vm15209_vm0, %v15208_v2 }
0x4a1d   :  { %14260 = vmatprep.subr.bf16.mxu1 %v15208_v2 }
0x4a20   :  { %14261 = vmatpush3.bf16.msra.mxu1 %v14924_v44 }
0x4a21   :  { %14262 = vmatprep.subr.bf16.mxu1 %v15208_v2 }
0x4a24   :  { %14263 = vmatpush3.bf16.msra.mxu1 %v14925_v7 }
0x4a25   :  { %14264 = vmatprep.subr.bf16.mxu1 %v15208_v2 }
0x4a28   :  { %14265 = vmatpush3.bf16.msra.mxu1 %v14926_v51 }
0x4a29   :  { %14266 = vmatprep.subr.bf16.mxu1 %v15208_v2 }
0x4a2c   :  { %14267 = vmatpush3.bf16.msra.mxu1 %v14927_v41 }
0x4a2d   :  { %14268 = vmatprep.subr.bf16.mxu1 %v15208_v2 }
0x4a30   :  { %14269 = vmatpush3.bf16.msra.mxu1 %v14928_v5 }
0x4a31   :  { %14270 = vmatprep.subr.bf16.mxu1 %v15208_v2 }
0x4a34   :  { %14271 = vmatpush3.bf16.msra.mxu1 %v14929_v11 }
0x4a35   :  { %14272 = vmatprep.subr.bf16.mxu1 %v15208_v2 }
0x4a38   :  { %14273 = vmatpush3.bf16.msra.mxu1 %v14930_v21 }
0x4a39   :  { %14298 = vmatprep.subr.bf16.mxu1 %v15208_v2 }
0x4a3b   :  { %14275 = vmatmul.mubr.bf16.vlgmr.msra.gmra.mrb[208].mxu1 %v17746_v9 }
0x4a3c   :  { %14299 = vmatpush3.bf16.msra.mxu1 %v14931_v49  ;;  %14314 = vmatprep.mubr.msk.bf16.mxu1 %vm15209_vm0, %v15208_v2 }
0x4a3d   :  { %14300 = vmatprep.subr.bf16.mxu1 %v15208_v2 }
0x4a40   :  { %14301 = vmatpush3.bf16.msra.mxu1 %v14932_v53 }
0x4a41   :  { %14302 = vmatprep.subr.bf16.mxu1 %v15208_v2 }
0x4a44   :  { %14303 = vmatpush3.bf16.msra.mxu1 %v14933_v56  ;;  %v14939_v56 = vld [vmem:[%s18481_s5 + $0xf0] sm:$0xff]  }
0x4a45   :  { %14304 = vmatprep.subr.bf16.mxu1 %v15208_v2 }
0x4a48   :  { %14305 = vmatpush3.bf16.msra.mxu1 %v14934_v29 }
0x4a49   :  { %14306 = vmatprep.subr.bf16.mxu1 %v15208_v2 }
0x4a4c   :  { %14307 = vmatpush3.bf16.msra.mxu1 %v14935_v19  ;;  %v14940_v19 = vld [vmem:[%s18481_s5 + $0xf8] sm:$0xff]  }
0x4a4d   :  { %14308 = vmatprep.subr.bf16.mxu1 %v15208_v2 }
0x4a50   :  { %14309 = vmatpush3.bf16.msra.mxu1 %v14936_v24 }
0x4a51   :  { %14310 = vmatprep.subr.bf16.mxu1 %v15208_v2 }
0x4a54   :  { %14311 = vmatpush3.bf16.msra.mxu1 %v14937_v60 }
0x4a55   :  { %14312 = vmatprep.subr.bf16.mxu1 %v15208_v2 }
0x4a58   :  { %14313 = vmatpush3.bf16.msra.mxu1 %v14938_v45 }
0x4a5b   :  { %14315 = vmatmul.mubr.bf16.vlgmr.msra.gmra.mrb[212].mxu1 %v17746_v9 }
0x4aee   :  { %v9480_v57 = vpop.f32.mrb[204].mxu1 }
0x4aef   :  { %v18234_v50 = vadd.f32 %v9480_v57, %v18124_v46  ;;  %v14256_v23 = vpop.f32.mrb[205].mxu1  ;;  %v9731_v46 = vrot.slane %v18140_v10, %v15475_v20 }
0x4af0   :  { %v9483_v27 = vpop.f32.mrb[206].mxu1 }
0x4af1   :  { %v18237_v12 = vadd.f32 %v9483_v27, %v18127_v6  ;;  %v14257_v31 = vpop.f32.mrb[207].mxu1  ;;  %v18268_v27 = vld [vmem:[%s18482_s10 + $0x18] sm:$0x3f] }
0x4af2   :  { %v10009_v31 = vrot.slane %v18268_v27, %v15368_v35 }
0x4b0e   :  { %v9594_v16 = vpop.f32.mrb[208].mxu1 }
0x4b0f   :  { %v14276_v18 = vpop.f32.mrb[209].mxu1  ;;  %v9595_v63 = vadd.f32 %v9594_v16, %v9511_v13 }
0x4b10   :  { %v9597_v14 = vpop.f32.mrb[210].mxu1 }
0x4b11   :  { %v9598_v34 = vadd.f32 %v9597_v14, %v9511_v13  ;;  %v14277_v48 = vpop.f32.mrb[211].mxu1 }
0x4b13   :  { %v9821_v9 = vpack.c.bf16 %v9598_v34, %v9595_v63 }
0x4b15   :  { %14321 = vmatmul.mubr.msk.bf16.vlgmr.msra.gmra.mrb[192].mxu0 %vm417_vm1, %v9821_v9 }
0x4b16   :  { %14326 = vmatprep.mubr.msk.bf16.mxu0 %vm15209_vm0, %v15208_v2 }
0x4b2e   :  { %v9814_v6 = vpop.f32.mrb[212].mxu1 }
0x4b2f   :  { %v14316_v52 = vpop.f32.mrb[213].mxu1  ;;  %v9815_v62 = vadd.f32 %v9814_v6, %v9731_v46  ;;  %v14941_v6 = vld [vmem:[%s18484_s6 + $0x180] ss:$8 sps:$4 sm:$0xff]  }
0x4b30   :  { %v9817_v43 = vpop.f32.mrb[214].mxu1 }
0x4b31   :  { %v9818_v0 = vadd.f32 %v9817_v43, %v9731_v46  ;;  %v14317_v1 = vpop.f32.mrb[215].mxu1 }
0x4b33   :  { %v9897_v55 = vpack.c.bf16 %v9818_v0, %v9815_v62 }
0x4b35   :  { %14325 = vmatpush3.bf16.msra.mxu0 %v9897_v55 }
0x4b36   :  { %14330 = vmatprep.subr.bf16.mxu0 %v15208_v2 }
0x4be8   :  { %v9863_v26 = vpop.f32.mrb[192].mxu0 }
0x4be9   :  { %v9870_v28 = vmul.f32 0.17677669, %v9863_v26  ;;  %v14322_v32 = vpop.f32.mrb[193].mxu0 }
0x4bea   :  { %v9866_v58 = vpop.f32.mrb[194].mxu0  ;;  %v14947_v32 = vld [vmem:[%s18484_s6 + $0x1a0] ss:$8 sps:$4 sm:$0xff]  }
0x4beb   :  { %v9871_v33 = vmul.f32 0.17677669, %v9866_v58  ;;  %v14323_v3 = vpop.f32.mrb[195].mxu0  ;;  %v9872_v36 = vadd.f32 %v17845_v17, %v9870_v28  ;;  %v14949_v28 = vld [vmem:[%s18484_s6 + $0x1a4] ss:$8 sps:$4 sm:$0xff]  }
0x4bec   :  { %v14952_v58 = vld [vmem:[%s18484_s6 + $0x1b4] ss:$8 sps:$4 sm:$0xff]   ;;  %v14955_v3 = vld [vmem:[%s18484_s6 + $0x1c4] ss:$8 sps:$4 sm:$0xff]  }
0x4bed   :  { %v9874_v10 = vsel %vm469_vm2, %v9872_v36, -inf  ;;  %v9873_v37 = vadd.f32 %v17852_v54, %v9871_v33  ;;  %v14950_v33 = vld [vmem:[%s18484_s6 + $0x1b0] ss:$8 sps:$4 sm:$0xff]  }
0x4bee   :  { %9875 = vmax.xlane.f32.xlu0 %v9874_v10  ;;  %v14958_v10 = vld [vmem:[%s18484_s6 + $0x1d4] ss:$8 sps:$4 sm:$0xff]  }
0x4bef   :  { %v9877_v38 = vsel %vm469_vm2, %v9873_v37, -inf }
0x4bf0   :  { %9878 = vmax.xlane.f32.xlu1 %v9877_v38  ;;  %v14961_v38 = vld [vmem:[%s18484_s6 + $0x1e4] ss:$8 sps:$4 sm:$0xff]  }
0x4c7b   :  { %v9876_v22 = vpop.xlane.xlu0 %9875 }
0x4c7c   :  { %v9880_v59 = vsub.f32 %v9872_v36, %v9876_v22  ;;  %v14953_v36 = vld [vmem:[%s18484_s6 + $0x1c0] ss:$8 sps:$4 sm:$0xff]  }
0x4c7d   :  { %v9879_v47 = vpop.xlane.xlu1 %9878  ;;  %v14959_v22 = vld [vmem:[%s18484_s6 + $0x1e0] ss:$8 sps:$4 sm:$0xff]  }
0x4c7e   :  { %v9882_v25 = vmul.f32 1.442695, %v9880_v59  ;;  %v9881_v42 = vsub.f32 %v9873_v37, %v9879_v47  ;;  %v14956_v37 = vld [vmem:[%s18484_s6 + $0x1d0] ss:$8 sps:$4 sm:$0xff]   ;;  %v14964_v59 = vld [vmem:[%s18484_s6 + $0x1f4] ss:$8 sps:$4 sm:$0xff]  }
0x4c7f   :  { %v14962_v47 = vld [vmem:[%s18484_s6 + $0x1f0] ss:$8 sps:$4 sm:$0xff]  }
0x4c80   :  { %15169 = vpow2.f32 %v9882_v25  ;;  %v9884_v44 = vmul.f32 1.442695, %v9881_v42 }
0x4c82   :  { %15171 = vpow2.f32 %v9884_v44 }
0x4c8a   :  { %v15170_v7 = vpop.eup %15169 }
0x4c8b   :  { %v9886_v51 = vsel %vm469_vm2, %v15170_v7, 0.0 }
0x4c8c   :  { %v15172_v17 = vpop.eup %15171  ;;  %9887 = vadd.xlane.f32.xlu0 %v9886_v51 }
0x4c8d   :  { %v9889_v41 = vsel %vm469_vm2, %v15172_v17, 0.0 }
0x4c8e   :  { %9890 = vadd.xlane.f32.xlu1 %v9889_v41  ;;  %v10039_v41 = vrot.slane %v18268_v27, %v15375_v39 }
0x4d19   :  { %v9888_v54 = vpop.xlane.xlu0 %9887 }
0x4d1a   :  { %15173 = vrcp.f32 %v9888_v54 }
0x4d1b   :  { %v9891_v5 = vpop.xlane.xlu1 %9890 }
0x4d1c   :  { %15175 = vrcp.f32 %v9891_v5 }
0x4d24   :  { %v15174_v11 = vpop.eup %15173 }
0x4d25   :  { %v9894_v49 = vmul.f32 %v15174_v11, %v15170_v7 }
0x4d26   :  { %v15176_v21 = vpop.eup %15175 }
0x4d27   :  { %v9895_v53 = vmul.f32 %v15176_v21, %v15172_v17 }
0x4d29   :  { %v9896_v29 = vpack.c.bf16 %v9895_v53, %v9894_v49  ;;  %v10045_v53 = vrot.slane %v18268_v27, %v15475_v20  ;;  %v14966_v20 = vld [vmem:[%s18485_s7 + $0x180] sm:$0xff]  }
0x4d2b   :  { %14327 = vmatmul.mubr.msk.bf16.vlgmr.msra.gmra.mrb[196].mxu0 %vm469_vm2, %v9896_v29 }
0x4d2c   :  { %14331 = vmatpush3.bf16.msra.mxu0 %v14939_v56  ;;  %14334 = vmatprep.mubr.msk.bf16.mxu0 %vm15209_vm0, %v15208_v2 }
0x4d2d   :  { %14332 = vmatprep.subr.bf16.mxu0 %v15208_v2 }
0x4d30   :  { %14333 = vmatpush3.bf16.msra.mxu0 %v14940_v19 }
0x4dfe   :  { %v9935_v24 = vpop.f32.mrb[196].mxu0 }
0x4dff   :  { %v14328_v60 = vpop.f32.mrb[197].mxu0 }
0x4e00   :  { %v9938_v45 = vpop.f32.mrb[198].mxu0  ;;  %v14965_v60 = vld [vmem:[%s18485_s7 + $0x1c0] sm:$0xff]  }
0x4e01   :  { %v9942_v57 = vpack.c.bf16 %v9938_v45, %v9935_v24  ;;  %v14329_v23 = vpop.f32.mrb[199].mxu0  ;;  %12958 = vmatprep.subr.bf16.mxu1 %v14965_v60  ;;  %v14967_v45 = vld [vmem:[%s18485_s7 + $0x1c8] sm:$0xff]  }
0x4e02   :  { %12959 = vmatpush3.bf16.msra.mxu1 %v14966_v20  ;;  %v14969_v23 = vld [vmem:[%s18485_s7 + $0x1d0] sm:$0xff]  }
0x4e03   :  { %14335 = vmatmul.mubr.msk.bf16.vlgmr.msra.gmra.mrb[200].mxu0 %vm417_vm1, %v9942_v57  ;;  %v14968_v57 = vld [vmem:[%s18485_s7 + $0x188] sm:$0xff]   ;;  %12960 = vmatprep.subr.bf16.mxu1 %v14967_v45 }
0x4e04   :  { %10191 = vmatprep.mubr.bf16.mxu0 %v15210_v4 }
0x4e06   :  { %12961 = vmatpush3.bf16.msra.mxu1 %v14968_v57 }
0x4e07   :  { %12962 = vmatprep.subr.bf16.mxu1 %v14969_v23 }
0x4ed6   :  { %v9997_v13 = vpop.f32.mrb[200].mxu0 }
0x4ed7   :  { %v10004_v16 = vadd.f32 %v9997_v13, %v18234_v50  ;;  %v14336_v18 = vpop.f32.mrb[201].mxu0  ;;  %v14943_v50 = vld [vmem:[%s18484_s6 + $0x184] ss:$8 sps:$4 sm:$0xff]   ;;  %v14971_v13 = vld [vmem:[%s18485_s7 + $0x1d8] sm:$0xff]  }
0x4ed8   :  { %v10000_v14 = vpop.f32.mrb[202].mxu0  ;;  %10159 = vmatprep.subr.bf16.mxu0 %v14943_v50  ;;  %v14973_v18 = vld [vmem:[%s18485_s7 + $0x1e0] sm:$0xff]  }
0x4ed9   :  { %v10010_v63 = vadd.f32 %v10009_v31, %v10004_v16  ;;  %v10005_v34 = vadd.f32 %v10000_v14, %v18237_v12  ;;  %v14337_v48 = vpop.f32.mrb[203].mxu0  ;;  %v14946_v12 = vld [vmem:[%s18484_s6 + $0x194] ss:$8 sps:$4 sm:$0xff]   ;;  %10160 = vmatpush1.bf16.msra.mxu0 %v14941_v6  ;;  %v14974_v14 = vld [vmem:[%s18485_s7 + $0x1a0] sm:$0xff]  }
0x4eda   :  { %10161 = vmatprep.subr.bf16.mxu0 %v14946_v12  ;;  %v14972_v16 = vld [vmem:[%s18485_s7 + $0x198] sm:$0xff]   ;;  %v14977_v48 = vld [vmem:[%s18485_s7 + $0x1f0] sm:$0xff]   ;;  %v12208_v6 = vld [vmem:[%s18486_s9 + $0x6] sm:$0x3] }
0x4edb   :  { %v10011_v9 = vadd.f32 %v10009_v31, %v10005_v34  ;;  %v10012_v4 = vadd.f32 %v10010_v63, %v17737_v30  ;;  %v14944_v30 = vld [vmem:[%s18484_s6 + $0x190] ss:$8 sps:$4 sm:$0xff]   ;;  %v14975_v63 = vld [vmem:[%s18485_s7 + $0x1e8] sm:$0xff]   ;;  %v10072_v50 = vrot.slane %v12208_v6, %v15368_v35  ;;  %v10076_v12 = vrot.slane %v12208_v6, %v15375_v39 }
0x4edc   :  { %v14970_v31 = vld [vmem:[%s18485_s7 + $0x190] sm:$0xff]   ;;  %v14976_v34 = vld [vmem:[%s18485_s7 + $0x1a8] sm:$0xff]  }
0x4edd   :  { %10014 = vadd.xlane.f32.xlu0 %v10012_v4  ;;  %v10013_v46 = vadd.f32 %v10011_v9, %v17739_v40  ;;  %10162 = vmatpush1.bf16.msra.mxu0 %v14944_v30  ;;  %v14978_v9 = vld [vmem:[%s18485_s7 + $0x1b0] sm:$0xff]  }
0x4ede   :  { %10163 = vmatprep.subr.bf16.mxu0 %v14949_v28  ;;  %12963 = vmatpush3.bf16.msra.mxu1 %v14970_v31 }
0x4edf   :  { %10016 = vadd.xlane.f32.xlu1 %v10013_v46  ;;  %12964 = vmatprep.subr.bf16.mxu1 %v14971_v13 }
0x4ee1   :  { %10164 = vmatpush1.bf16.msra.mxu0 %v14947_v32 }
0x4ee2   :  { %10165 = vmatprep.subr.bf16.mxu0 %v14952_v58  ;;  %12965 = vmatpush3.bf16.msra.mxu1 %v14972_v16 }
0x4ee3   :  { %12966 = vmatprep.subr.bf16.mxu1 %v14973_v18 }
0x4ee5   :  { %10166 = vmatpush1.bf16.msra.mxu0 %v14950_v33 }
0x4ee6   :  { %10167 = vmatprep.subr.bf16.mxu0 %v14955_v3  ;;  %12967 = vmatpush3.bf16.msra.mxu1 %v14974_v14  ;;  %v10276_v14 = vrot.slane %v18268_v27, %v16088_v15  ;;  %v14982_v15 = vld [vmem:[%s18483_s11 + $0xc8] sm:$0xff]  }
0x4ee7   :  { %12968 = vmatprep.subr.bf16.mxu1 %v14975_v63 }
0x4ee9   :  { %10168 = vmatpush1.bf16.msra.mxu0 %v14953_v36 }
0x4eea   :  { %10169 = vmatprep.subr.bf16.mxu0 %v14958_v10  ;;  %12969 = vmatpush3.bf16.msra.mxu1 %v14976_v34 }
0x4eeb   :  { %12970 = vmatprep.subr.bf16.mxu1 %v14977_v48 }
0x4eed   :  { %10170 = vmatpush1.bf16.msra.mxu0 %v14956_v37 }
0x4eee   :  { %10171 = vmatprep.subr.bf16.mxu0 %v14961_v38  ;;  %12971 = vmatpush3.bf16.msra.mxu1 %v14978_v9 }
0x4ef1   :  { %10172 = vmatpush1.bf16.msra.mxu0 %v14959_v22 }
0x4ef2   :  { %10173 = vmatprep.subr.bf16.mxu0 %v14964_v59 }
0x4ef5   :  { %10174 = vmatpush1.bf16.msra.mxu0 %v14962_v47 }
0x4ef6   :  { %14338 = vmatprep.subr.bf16.mxu0 %v15208_v2 }
0x4f6a   :  { %v10015_v40 = vpop.xlane.xlu0 %10014 }
0x4f6b   :  { %v10018_v52 = vmul.f32 0.0078125, %v10015_v40 }
0x4f6c   :  { %v10017_v43 = vpop.xlane.xlu1 %10016 }
0x4f6d   :  { %v10020_v62 = vsub.f32 %v10012_v4, %v10018_v52  ;;  %v10019_v0 = vmul.f32 0.0078125, %v10017_v43  ;;  %v14979_v4 = vld [vmem:[%s18485_s7 + $0x1f8] sm:$0xff]  }
0x4f6e   :  { %12972 = vmatprep.subr.bf16.mxu1 %v14979_v4 }
0x4f6f   :  { %v10021_v1 = vsub.f32 %v10013_v46, %v10019_v0  ;;  %v10022_v55 = vmul.f32 %v10020_v62, %v10020_v62  ;;  %v14980_v46 = vld [vmem:[%s18485_s7 + $0x1b8] sm:$0xff]  }
0x4f70   :  { %12973 = vmatpush3.bf16.msra.mxu1 %v14980_v46 }
0x4f71   :  { %10024 = vadd.xlane.f32.xlu0 %v10022_v55  ;;  %v10023_v26 = vmul.f32 %v10021_v1, %v10021_v1  ;;  %14358 = vmatprep.subr.bf16.mxu1 %v15208_v2 }
0x4f73   :  { %10026 = vadd.xlane.f32.xlu1 %v10023_v26 }
0x4ffe   :  { %v10025_v25 = vpop.xlane.xlu0 %10024 }
0x4fff   :  { %v10028_v42 = vmul.f32 0.0078125, %v10025_v25 }
0x5000   :  { %v10027_v44 = vpop.xlane.xlu1 %10026 }
0x5001   :  { %v10030_v7 = vadd.f32 1e-05, %v10028_v42  ;;  %v10029_v51 = vmul.f32 0.0078125, %v10027_v44 }
0x5003   :  { %15177 = vrsqrt.f32 %v10030_v7  ;;  %v10031_v17 = vadd.f32 1e-05, %v10029_v51 }
0x5005   :  { %15179 = vrsqrt.f32 %v10031_v17 }
0x500d   :  { %v15178_v54 = vpop.eup %15177 }
0x500e   :  { %v10034_v5 = vmul.f32 %v15178_v54, %v10020_v62 }
0x500f   :  { %v15180_v11 = vpop.eup %15179 }
0x5010   :  { %v10035_v21 = vmul.f32 %v15180_v11, %v10021_v1  ;;  %v10040_v49 = vmul.f32 %v10039_v41, %v10034_v5 }
0x5012   :  { %v10041_v56 = vmul.f32 %v10039_v41, %v10035_v21  ;;  %v18329_v29 = vadd.f32 %v10045_v53, %v10040_v49 }
0x5014   :  { %v18331_v19 = vadd.f32 %v10045_v53, %v10041_v56 }
0x5016   :  { %v10048_v24 = vpack.c.bf16 %v18331_v19, %v18329_v29 }
0x5018   :  { %10192 = vmatmul.mubr.bf16.vlgmr.msra.gmra.mrb[204].mxu0 %v10048_v24 }
0x5019   :  { %14354 = vmatprep.mubr.msk.bf16.mxu0 %vm15209_vm0, %v15208_v2 }
0x50eb   :  { %v10193_v30 = vpop.f32.mrb[204].mxu0 }
0x50ec   :  { %v10194_v40 = vadd.f32 %v10193_v30, %v10072_v50  ;;  %v10195_v52 = vpop.f32.mrb[205].mxu0  ;;  %v14981_v30 = vld [vmem:[%s18483_s11 + $0xc0] sm:$0xff]  }
0x50ed   :  { %v10196_v43 = vadd.f32 %v10195_v52, %v10076_v12  ;;  %v10197_v62 = vpop.f32.mrb[206].mxu0  ;;  %14339 = vmatpush3.bf16.msra.mxu0 %v14981_v30 }
0x50ee   :  { %v10206_v0 = vmul.f32 0.044715, %v10194_v40  ;;  %v10198_v1 = vadd.f32 %v10197_v62, %v10072_v50  ;;  %v10199_v55 = vpop.f32.mrb[207].mxu0  ;;  %v10202_v49 = vmul.f32 0.5, %v10194_v40  ;;  %14340 = vmatprep.subr.bf16.mxu0 %v15208_v2 }
0x50ef   :  { %v10207_v26 = vmul.f32 0.044715, %v10196_v43  ;;  %v10200_v28 = vadd.f32 %v10199_v55, %v10076_v12  ;;  %v10203_v24 = vmul.f32 0.5, %v10196_v43  ;;  %v14983_v55 = vld [vmem:[%s18483_s11 + $0xd0] sm:$0xff]  }
0x50f0   :  { %v10210_v32 = vmul.f32 %v10206_v0, %v10194_v40  ;;  %v10208_v58 = vmul.f32 0.044715, %v10198_v1  ;;  %v10204_v53 = vmul.f32 0.5, %v10198_v1 }
0x50f1   :  { %v10211_v33 = vmul.f32 %v10207_v26, %v10196_v43  ;;  %v10209_v3 = vmul.f32 0.044715, %v10200_v28  ;;  %v10205_v60 = vmul.f32 0.5, %v10200_v28  ;;  %14341 = vmatpush3.bf16.msra.mxu0 %v14982_v15  ;;  %v14984_v26 = vld [vmem:[%s18483_s11 + $0xd8] sm:$0xff]  }
0x50f2   :  { %v10214_v36 = vmul.f32 %v10210_v32, %v10194_v40  ;;  %v10212_v10 = vmul.f32 %v10208_v58, %v10198_v1  ;;  %14342 = vmatprep.subr.bf16.mxu0 %v15208_v2  ;;  %v14986_v32 = vld [vmem:[%s18483_s11 + $0xe8] sm:$0xff]   ;;  %v14987_v58 = vld [vmem:[%s18483_s11 + $0xf0] sm:$0xff]  }
0x50f3   :  { %v10215_v37 = vmul.f32 %v10211_v33, %v10196_v43  ;;  %v10213_v35 = vmul.f32 %v10209_v3, %v10200_v28  ;;  %v14988_v33 = vld [vmem:[%s18483_s11 + $0xf8] sm:$0xff]   ;;  %v14989_v3 = vld [vmem:[%s18483_s11 + $0x100] sm:$0xff]  }
0x50f4   :  { %v10218_v38 = vadd.f32 %v10214_v36, %v10194_v40  ;;  %v10216_v39 = vmul.f32 %v10212_v10, %v10198_v1  ;;  %v14990_v36 = vld [vmem:[%s18483_s11 + $0x108] sm:$0xff]   ;;  %v14991_v10 = vld [vmem:[%s18483_s11 + $0x110] sm:$0xff]  }
0x50f5   :  { %v10217_v22 = vmul.f32 %v10213_v35, %v10200_v28  ;;  %v10219_v59 = vadd.f32 %v10215_v37, %v10196_v43  ;;  %14343 = vmatpush3.bf16.msra.mxu0 %v14983_v55  ;;  %v14992_v37 = vld [vmem:[%s18483_s11 + $0x118] sm:$0xff]  }
0x50f6   :  { %v10222_v47 = vmul.f32 0.7978846, %v10218_v38  ;;  %v10220_v25 = vadd.f32 %v10216_v39, %v10198_v1  ;;  %14344 = vmatprep.subr.bf16.mxu0 %v15208_v2 }
0x50f7   :  { %v10221_v42 = vadd.f32 %v10217_v22, %v10200_v28  ;;  %v10223_v44 = vmul.f32 0.7978846, %v10219_v59  ;;  %v14985_v28 = vld [vmem:[%s18483_s11 + $0xe0] sm:$0xff]  }
0x50f8   :  { %15181 = vtanh.f32 %v10222_v47  ;;  %v10224_v7 = vmul.f32 0.7978846, %v10220_v25  ;;  %v10441_v25 = vrot.slane %v18268_v27, %v16159_v61 }
0x50f9   :  { %v10225_v51 = vmul.f32 0.7978846, %v10221_v42  ;;  %15183 = vtanh.f32 %v10223_v44  ;;  %14345 = vmatpush3.bf16.msra.mxu0 %v14984_v26 }
0x50fa   :  { %15185 = vtanh.f32 %v10224_v7  ;;  %14346 = vmatprep.subr.bf16.mxu0 %v15208_v2 }
0x50fb   :  { %15187 = vtanh.f32 %v10225_v51 }
0x50fd   :  { %14347 = vmatpush3.bf16.msra.mxu0 %v14985_v28 }
0x50fe   :  { %14348 = vmatprep.subr.bf16.mxu0 %v15208_v2 }
0x5101   :  { %14349 = vmatpush3.bf16.msra.mxu0 %v14986_v32 }
0x5102   :  { %v15182_v17 = vpop.eup %15181  ;;  %14350 = vmatprep.subr.bf16.mxu0 %v15208_v2 }
0x5103   :  { %v15184_v41 = vpop.eup %15183  ;;  %v10230_v54 = vadd.f32 1.0, %v15182_v17 }
0x5104   :  { %v15186_v5 = vpop.eup %15185  ;;  %v10231_v11 = vadd.f32 1.0, %v15184_v41  ;;  %v10447_v41 = vrot.slane %v18268_v27, %v16166_v8  ;;  %v14995_v27 = vld [vmem:[%s18483_s11 + $0x130] sm:$0xff]  }
0x5105   :  { %v15188_v21 = vpop.eup %15187  ;;  %v10232_v56 = vadd.f32 1.0, %v15186_v5  ;;  %v10234_v45 = vmul.f32 %v10230_v54, %v10202_v49  ;;  %14351 = vmatpush3.bf16.msra.mxu0 %v14987_v58  ;;  %v14993_v49 = vld [vmem:[%s18483_s11 + $0x120] sm:$0xff]  }
0x5106   :  { %v10233_v20 = vadd.f32 1.0, %v15188_v21  ;;  %v10235_v23 = vmul.f32 %v10231_v11, %v10203_v24  ;;  %14352 = vmatprep.subr.bf16.mxu0 %v15208_v2  ;;  %v15207_v24 = vld [vmem:[%s18478_s12] sm:$0x3f] }
0x5107   :  { %v10236_v57 = vmul.f32 %v10232_v56, %v10204_v53  ;;  %v14994_v53 = vld [vmem:[%s18483_s11 + $0x128] sm:$0xff]   ;;  %v14996_v56 = vld [vmem:[%s18483_s11 + $0x138] sm:$0xff]  }
0x5108   :  { %v10237_v31 = vmul.f32 %v10233_v20, %v10205_v60  ;;  %v10471_v60 = vrot.slane %v15207_v24, %v16159_v61 }
0x5109   :  { %v10238_v13 = vpack.c.bf16 %v10236_v57, %v10234_v45  ;;  %14353 = vmatpush3.bf16.msra.mxu0 %v14988_v33 }
0x510a   :  { %v10239_v16 = vpack.c.bf16 %v10237_v31, %v10235_v23 }
0x510c   :  { %10405 = vmatprep.mubr.bf16.mxu1 %v10239_v16 }
0x510d   :  { %10406 = vmatmul.mubr.bf16.vlgmr.msra.gmra.mrb[216].mxu1 %v10238_v13 }
0x510e   :  { %14374 = vmatprep.mubr.msk.bf16.mxu1 %vm15209_vm0, %v15208_v2  ;;  %14359 = vmatpush3.bf16.msra.mxu1 %v14989_v3 }
0x510f   :  { %14360 = vmatprep.subr.bf16.mxu1 %v15208_v2 }
0x5112   :  { %14361 = vmatpush3.bf16.msra.mxu1 %v14990_v36 }
0x5113   :  { %14362 = vmatprep.subr.bf16.mxu1 %v15208_v2 }
0x5116   :  { %14363 = vmatpush3.bf16.msra.mxu1 %v14991_v10 }
0x5117   :  { %14364 = vmatprep.subr.bf16.mxu1 %v15208_v2 }
0x511a   :  { %14365 = vmatpush3.bf16.msra.mxu1 %v14992_v37 }
0x511b   :  { %14366 = vmatprep.subr.bf16.mxu1 %v15208_v2 }
0x511e   :  { %14367 = vmatpush3.bf16.msra.mxu1 %v14993_v49 }
0x511f   :  { %14368 = vmatprep.subr.bf16.mxu1 %v15208_v2 }
0x5122   :  { %14369 = vmatpush3.bf16.msra.mxu1 %v14994_v53 }
0x5123   :  { %14370 = vmatprep.subr.bf16.mxu1 %v15208_v2 }
0x5126   :  { %14371 = vmatpush3.bf16.msra.mxu1 %v14995_v27 }
0x5127   :  { %14372 = vmatprep.subr.bf16.mxu1 %v15208_v2  ;;  %v10584_v2 = vrot.slane %v15207_v24, %v16166_v8 }
0x512a   :  { %14373 = vmatpush3.bf16.msra.mxu1 %v14996_v56 }
0x51e0   :  { %v12974_v18 = vpop.f32.mrb[216].mxu1 }
0x51e1   :  { %v12975_v63 = vpop.f32.mrb[217].mxu1 }
0x51e2   :  { %v12976_v34 = vadd.f32 %v12975_v63, %v12974_v18  ;;  %v12977_v48 = vpop.f32.mrb[218].mxu1 }
0x51e3   :  { %v12978_v9 = vpop.f32.mrb[219].mxu1 }
0x51e4   :  { %v10408_v4 = vadd.f32 %v12976_v34, %v10276_v14  ;;  %v12979_v46 = vadd.f32 %v12978_v9, %v12977_v48 }
0x51e6   :  { %v10411_v6 = vadd.f32 %v12979_v46, %v10276_v14  ;;  %v10414_v50 = vadd.f32 %v10408_v4, %v18329_v29 }
0x51e8   :  { %10416 = vadd.xlane.f32.xlu0 %v10414_v50  ;;  %v10415_v12 = vadd.f32 %v10411_v6, %v18331_v19 }
0x51ea   :  { %10418 = vadd.xlane.f32.xlu1 %v10415_v12 }
0x5275   :  { %v10417_v40 = vpop.xlane.xlu0 %10416 }
0x5276   :  { %v10420_v29 = vmul.f32 0.0078125, %v10417_v40 }
0x5277   :  { %v10419_v52 = vpop.xlane.xlu1 %10418 }
0x5278   :  { %v10422_v43 = vsub.f32 %v10414_v50, %v10420_v29  ;;  %v10421_v19 = vmul.f32 0.0078125, %v10419_v52 }
0x527a   :  { %v10423_v62 = vsub.f32 %v10415_v12, %v10421_v19  ;;  %v10424_v0 = vmul.f32 %v10422_v43, %v10422_v43 }
0x527c   :  { %10426 = vadd.xlane.f32.xlu0 %v10424_v0  ;;  %v10425_v1 = vmul.f32 %v10423_v62, %v10423_v62 }
0x527e   :  { %10428 = vadd.xlane.f32.xlu1 %v10425_v1 }
0x5309   :  { %v10427_v35 = vpop.xlane.xlu0 %10426 }
0x530a   :  { %v10430_v38 = vmul.f32 0.0078125, %v10427_v35 }
0x530b   :  { %v10429_v39 = vpop.xlane.xlu1 %10428 }
0x530c   :  { %v10432_v22 = vadd.f32 1e-05, %v10430_v38  ;;  %v10431_v59 = vmul.f32 0.0078125, %v10429_v39 }
0x530e   :  { %15189 = vrsqrt.f32 %v10432_v22  ;;  %v10433_v47 = vadd.f32 1e-05, %v10431_v59 }
0x5310   :  { %15191 = vrsqrt.f32 %v10433_v47 }
0x5318   :  { %v15190_v42 = vpop.eup %15189 }
0x5319   :  { %v10436_v44 = vmul.f32 %v15190_v42, %v10422_v43 }
0x531a   :  { %v15192_v7 = vpop.eup %15191 }
0x531b   :  { %v10437_v51 = vmul.f32 %v15192_v7, %v10423_v62  ;;  %v10442_v17 = vmul.f32 %v10441_v25, %v10436_v44 }
0x531d   :  { %v10443_v54 = vmul.f32 %v10441_v25, %v10437_v51  ;;  %v10448_v5 = vadd.f32 %v10447_v41, %v10442_v17 }
0x531f   :  { %v10449_v11 = vadd.f32 %v10447_v41, %v10443_v54 }
0x5321   :  { %v10450_v21 = vpack.c.bf16 %v10449_v11, %v10448_v5 }
0x5323   :  { %14355 = vmatmul.mubr.bf16.vlgmr.msra.gmra.mrb[208].mxu0 %v10450_v21 }
0x53f6   :  { %v10554_v20 = vpop.f32.mrb[208].mxu0 }
0x53f7   :  { %v10555_v45 = vadd.f32 %v10554_v20, %v10471_v60  ;;  %v14356_v57 = vpop.f32.mrb[209].mxu0 }
0x53f8   :  { %v10557_v23 = vpop.f32.mrb[210].mxu0 }
0x53f9   :  { %v10558_v31 = vadd.f32 %v10557_v23, %v10471_v60  ;;  %v14357_v13 = vpop.f32.mrb[211].mxu0  ;;  %15193 = vtanh.f32 %v10555_v45 }
0x53fb   :  { %15195 = vtanh.f32 %v10558_v31 }
0x5403   :  { %v15194_v16 = vpop.eup %15193 }
0x5405   :  { %v15196_v18 = vpop.eup %15195 }
0x5406   :  { %v10563_v14 = vpack.c.bf16 %v15196_v18, %v15194_v16 }
0x5408   :  { %14375 = vmatmul.mubr.bf16.vlgmr.msra.gmra.mrb[220].mxu1 %v10563_v14 }
0x54db   :  { %v10667_v63 = vpop.f32.mrb[220].mxu1 }
0x54dc   :  { %v10668_v34 = vadd.f32 %v10667_v63, %v10584_v2  ;;  %v14376_v48 = vpop.f32.mrb[221].mxu1 }
0x54dd   :  { %v10670_v9 = vpop.f32.mrb[222].mxu1 }
0x54de   :  { %10674 = vst [vmem:[%s18487_s13] sm:$0xff] %v10668_v34  ;;  %v10671_v61 = vadd.f32 %v10670_v9, %v10584_v2  ;;  %v14377_v4 = vpop.f32.mrb[223].mxu1 }
0x54e0   :  { %10675 = vst [vmem:[%s18487_s13 + $0x8] sm:$0xff] %v10671_v61 }

</bundles_post_ra>
